<compile_context>
chip_gen: v7x
topology: tpu7x:2x2x1
jax: 0.10.0
libtpu: 0.0.40
codegen_flags: <defaults>
</compile_context>

<pallas_src>
import functools
import math

import jax
import jax.numpy as jnp
from jax import lax
from jax.experimental import pallas as pl
from jax.experimental.pallas import tpu as pltpu


# ----------------------------------------------------------------------------
# Fused Pallas kernel: one grid step == one batch element, everything in VMEM.
# ----------------------------------------------------------------------------
def _sa_attn_mem_kernel(h_ref, m_ref, w_all_ref, b_all_ref, bz_ref, wo_ref,
                        bo_ref, h_next_ref, m_next_ref, *, H, W, d_model,
                        input_dim):
    S = H * W
    dm = d_model
    cin = input_dim
    ctot = dm + cin
    bf = jnp.bfloat16

    h = h_ref[0]                                    # (S, Cin) f32
    m = m_ref[0]                                    # (S, Cin) f32

    # ---- merged conv_h/conv_m (1x1 convs) as ONE bf16 matmul, f32 acc ----
    # Columns of w_all: [ q*scale | hk | hv@wz_top | mk | mv@wz_bot ]
    hm = jnp.concatenate([h, m], axis=-1).astype(bf)                  # (S, 2Cin)
    proj = jnp.dot(hm, w_all_ref[...],
                   preferred_element_type=jnp.float32) + b_all_ref[...]  # (S, 5dm)

    q = proj[:, 0:dm]                               # scale already folded in
    hk = proj[:, dm:2 * dm]
    hv = proj[:, 2 * dm:3 * dm]                     # conv_z (top) already folded
    mk = proj[:, 3 * dm:4 * dm]
    mv = proj[:, 4 * dm:5 * dm]                     # conv_z (bottom) already folded

    # ---- dual attention: one score matmul, per-half softmax, one K=2S PV ----
    k_all = jnp.concatenate([hk, mk], axis=0).astype(bf)              # (2S, dm)
    v_all = jnp.concatenate([hv, mv], axis=0).astype(bf)              # (2S, dm)

    dims = (((1,), (1,)), ((), ()))                 # contract last axes: q @ k^T
    s = lax.dot_general(q.astype(bf), k_all, dims,
                        preferred_element_type=jnp.float32)           # (S, 2S)

    def _softmax(x):
        x = x - jnp.max(x, axis=-1, keepdims=True)
        e = jnp.exp(x)
        return e * pl.reciprocal(jnp.sum(e, axis=-1, keepdims=True), approx=True)

    p = jnp.concatenate([_softmax(s[:, 0:S]), _softmax(s[:, S:2 * S])],
                        axis=-1)                                      # (S, 2S)
    z = jnp.dot(p.astype(bf), v_all,
                preferred_element_type=jnp.float32) + bz_ref[...]     # (S, dm)

    # ---- conv_output (3x3, SAME) on cat([Z, h]) via im2col: one K=9*ctot dot ----
    x = jnp.concatenate([z, h], axis=-1)                              # (S, ctot) f32

    # Column-validity masks from an in-kernel iota (no HBM mask input).
    col_ids = lax.broadcasted_iota(jnp.int32, (S, 1), 0) % W
    not_left = col_ids != 0
    not_right = col_ids != (W - 1)

    # +-1 column shifts paid once each; row shifts (+-W) are sublane-aligned.
    zero1 = jnp.zeros((1, ctot), jnp.float32)
    xl = jnp.where(not_left, jnp.concatenate([zero1, x[:S - 1]], axis=0), 0.0)
    xr = jnp.where(not_right, jnp.concatenate([x[1:], zero1], axis=0), 0.0)

    xb = x.astype(bf)
    xlb = xl.astype(bf)
    xrb = xr.astype(bf)
    zW = jnp.zeros((W, ctot), bf)

    def _up(v):    # tap row offset a = -1  (read pixel one row above)
        return jnp.concatenate([zW, v[:S - W]], axis=0)

    def _dn(v):    # tap row offset a = +1  (read pixel one row below)
        return jnp.concatenate([v[W:], zW], axis=0)

    cols = []
    for a in (-1, 0, 1):                            # kernel row (kh = a + 1)
        for b in (-1, 0, 1):                        # kernel col (kw = b + 1)
            vb = (xlb, xb, xrb)[b + 1]
            cols.append(_up(vb) if a == -1 else (_dn(vb) if a == 1 else vb))
    patch = jnp.concatenate(cols, axis=-1)                            # (S, 9*ctot) bf16

    co = jnp.dot(patch, wo_ref[...],
                 preferred_element_type=jnp.float32) + bo_ref[...]    # (S, 3*Cin)

    # ---- gates (i, g, o) fused in the epilogue (EUP slot) ----
    i_g = jax.nn.sigmoid(co[:, 0:cin])
    g_g = jnp.tanh(co[:, cin:2 * cin])
    o_g = jax.nn.sigmoid(co[:, 2 * cin:3 * cin])
    m_next = i_g * g_g + (1.0 - i_g) * m
    m_next_ref[0] = m_next
    h_next_ref[0] = o_g * m_next


# ----------------------------------------------------------------------------
# Channels-last entry point (use this inside the ConvLSTM recurrence).
# ----------------------------------------------------------------------------
def sa_attn_mem_forward_nsc(params, h_nsc, m_nsc, H, W):
    N, S, cin = h_nsc.shape
    dm = params["wz"].shape[1]
    ctot = dm + cin
    bf = jnp.bfloat16
    scale = 1.0 / math.sqrt(dm)

    wh, bh = params["wh"], params["bh"]            # (Cin, 3dm), (3dm,)
    wm, bm = params["wm"], params["bm"]            # (Cin, 2dm), (2dm,)
    wz, bz = params["wz"], params["bz"]            # (2dm, dm),  (dm,)
    wz_h, wz_m = wz[:dm], wz[dm:]

    # Fold softmax scale into Q and conv_z into V (weights and biases), then
    # build one block-diagonal (2*Cin, 5*dm) projection weight.
    wq = wh[:, 0:dm] * scale
    wk_h = wh[:, dm:2 * dm]
    wv_h = wh[:, 2 * dm:] @ wz_h
    wk_m = wm[:, 0:dm]
    wv_m = wm[:, dm:] @ wz_m

    bq = bh[0:dm] * scale
    bk_h = bh[dm:2 * dm]
    bv_h = bh[2 * dm:] @ wz_h
    bk_m = bm[0:dm]
    bv_m = bm[dm:] @ wz_m

    zeros = jnp.zeros((cin, dm), jnp.float32)
    w_top = jnp.concatenate([wq, wk_h, wv_h, zeros, zeros], axis=1)
    w_bot = jnp.concatenate([zeros, zeros, zeros, wk_m, wv_m], axis=1)
    w_all = jnp.concatenate([w_top, w_bot], axis=0).astype(bf)        # (2Cin, 5dm)
    b_all = jnp.concatenate([bq, bk_h, bv_h, bk_m, bv_m]).reshape(1, -1)

    wo = params["wo"].reshape(9 * ctot, 3 * cin).astype(bf)           # HWIO -> (9*ctot, 3Cin)
    bo = params["bo"].reshape(1, -1)
    bz_r = bz.reshape(1, -1)

    kernel = functools.partial(_sa_attn_mem_kernel, H=H, W=W, d_model=dm,
                               input_dim=cin)

    batch_spec = pl.BlockSpec((1, S, cin), lambda n: (n, 0, 0))
    rep2 = lambda r, c: pl.BlockSpec((r, c), lambda n: (0, 0))

    h_next, m_next = pl.pallas_call(
        kernel,
        grid=(N,),
        in_specs=[
            batch_spec, batch_spec,
            rep2(2 * cin, 5 * dm), rep2(1, 5 * dm),
            rep2(1, dm),
            rep2(9 * ctot, 3 * cin), rep2(1, 3 * cin),
        ],
        out_specs=[batch_spec, batch_spec],
        out_shape=[
            jax.ShapeDtypeStruct((N, S, cin), jnp.float32),
            jax.ShapeDtypeStruct((N, S, cin), jnp.float32),
        ],
        compiler_params=pltpu.CompilerParams(dimension_semantics=("parallel",)),
    )(h_nsc, m_nsc, w_all, b_all, bz_r, wo, bo)
    return h_next, m_next


# ----------------------------------------------------------------------------
# NCHW wrapper (matches the PyTorch module interface).  In a real recurrence,
# keep activations channels-last and call sa_attn_mem_forward_nsc directly so
# these transposes are hoisted out of the per-timestep loop.
# ----------------------------------------------------------------------------
def sa_attn_mem_forward(params, h_nchw, m_nchw):
    N, cin, H, W = h_nchw.shape
    S = H * W
    to_nsc = lambda x: jnp.transpose(x, (0, 2, 3, 1)).reshape(N, S, cin)
    h_next, m_next = sa_attn_mem_forward_nsc(params, to_nsc(h_nchw),
                                             to_nsc(m_nchw), H, W)
    to_nchw = lambda x: jnp.transpose(x.reshape(N, H, W, cin), (0, 3, 1, 2))
    return to_nchw(h_next), to_nchw(m_next)


# ----------------------------------------------------------------------------
# Pure-JAX f32 reference (mirrors the PyTorch module exactly)
# ----------------------------------------------------------------------------
def sa_attn_mem_reference(params, h_nchw, m_nchw):
    N, cin, H, W = h_nchw.shape
    S = H * W
    dm = params["wz"].shape[1]
    h = jnp.transpose(h_nchw, (0, 2, 3, 1))
    m = jnp.transpose(m_nchw, (0, 2, 3, 1))
    hf = h.reshape(N, S, cin)
    mf = m.reshape(N, S, cin)

    hqkv = hf @ params["wh"] + params["bh"]
    mkv = mf @ params["wm"] + params["bm"]
    hq, hk, hv = hqkv[..., :dm], hqkv[..., dm:2 * dm], hqkv[..., 2 * dm:]
    mk, mv = mkv[..., :dm], mkv[..., dm:]

    def attn(q, k, v):
        s = jnp.einsum("nsc,ntc->nst", q, k) / math.sqrt(dm)
        a = jax.nn.softmax(s, axis=-1)
        return jnp.einsum("nst,ntc->nsc", a, v)

    zh = attn(hq, hk, hv)
    zm = attn(hq, mk, mv)
    z = jnp.concatenate([zh, zm], axis=-1) @ params["wz"] + params["bz"]
    zin = jnp.concatenate([z.reshape(N, H, W, dm), h], axis=-1)
    co = lax.conv_general_dilated(zin, params["wo"], (1, 1), "SAME",
                                  dimension_numbers=("NHWC", "HWIO", "NHWC"))
    co = co.reshape(N, S, 3 * cin) + params["bo"]
    i = jax.nn.sigmoid(co[..., :cin])
    g = jnp.tanh(co[..., cin:2 * cin])
    o = jax.nn.sigmoid(co[..., 2 * cin:])
    m_next = i * g + (1.0 - i) * mf
    h_next = o * m_next
    to_nchw = lambda x: jnp.transpose(x.reshape(N, H, W, cin), (0, 3, 1, 2))
    return to_nchw(h_next), to_nchw(m_next)


# ----------------------------------------------------------------------------
# Deterministic synthetic parameters (shapes from SAAttnMem.__init__)
# ----------------------------------------------------------------------------
def init_params(key, input_dim, d_model):
    ks = jax.random.split(key, 8)

    def w(k, shape, scale=0.1):
        return scale * jax.random.normal(k, shape, jnp.float32)

    return {
        # conv_h : Conv2d(input_dim, 3*d_model, 1x1)
        "wh": w(ks[0], (input_dim, 3 * d_model)),
        "bh": w(ks[1], (3 * d_model,), 0.01),
        # conv_m : Conv2d(input_dim, 2*d_model, 1x1)
        "wm": w(ks[2], (input_dim, 2 * d_model)),
        "bm": w(ks[3], (2 * d_model,), 0.01),
        # conv_z : Conv2d(2*d_model, d_model, 1x1)
        "wz": w(ks[4], (2 * d_model, d_model)),
        "bz": w(ks[5], (d_model,), 0.01),
        # conv_output : Conv2d(input_dim + d_model, 3*input_dim, 3x3, pad 1), HWIO
        "wo": w(ks[6], (3, 3, d_model + input_dim, 3 * input_dim)),
        "bo": w(ks[7], (3 * input_dim,), 0.01),
    }


if __name__ == "__main__":
    key = jax.random.PRNGKey(0)
    kp, kh, km = jax.random.split(key, 3)

    # Small config: batch=2, hidden (input_dim)=32, d_model=16, 16x16 spatial,
    # kernel_size=(3,3) -- consistent with SAAttnMem inside SA-ConvLSTM.
    N, cin, H, W = 2, 32, 16, 16
    d_model = 16

    params = init_params(kp, input_dim=cin, d_model=d_model)
    h = jax.random.normal(kh, (N, cin, H, W), jnp.float32)
    m = jax.random.normal(km, (N, cin, H, W), jnp.float32)

    fwd = jax.jit(sa_attn_mem_forward)
    h_next, m_next = jax.block_until_ready(fwd(params, h, m))

    assert h_next.shape == (N, cin, H, W), h_next.shape
    assert m_next.shape == (N, cin, H, W), m_next.shape
    assert bool(jnp.all(jnp.isfinite(h_next))) and bool(jnp.all(jnp.isfinite(m_next)))

    # Tolerance check against the f32 reference (bf16 MXU + approx reciprocal
    # introduce small, bounded drift).
    h_exp, m_exp = sa_attn_mem_reference(params, h, m)
    err = max(float(jnp.max(jnp.abs(h_next - h_exp))),
              float(jnp.max(jnp.abs(m_next - m_exp))))
    assert err < 5e-2, f"max abs error vs reference: {err}"
    print("KERNEL_OK")
</pallas_src>

<mosaic_0001>
module attributes {stable_mosaic.version = 11 : i64} {
  func.func @_sa_attn_mem_kernel(%arg0: i32, %arg1: memref<1x256x32xf32, #tpu.memory_space<vmem>>, %arg2: memref<1x256x32xf32, #tpu.memory_space<vmem>>, %arg3: memref<64x80xbf16, #tpu.memory_space<vmem>>, %arg4: memref<1x80xf32, #tpu.memory_space<vmem>>, %arg5: memref<1x16xf32, #tpu.memory_space<vmem>>, %arg6: memref<432x96xbf16, #tpu.memory_space<vmem>>, %arg7: memref<1x96xf32, #tpu.memory_space<vmem>>, %arg8: memref<1x256x32xf32, #tpu.memory_space<vmem>>, %arg9: memref<1x256x32xf32, #tpu.memory_space<vmem>>) attributes {dimension_semantics = [#tpu.dimension_semantics<parallel>], iteration_bounds = array<i64: 2>, scalar_prefetch = 0 : i64, scratch_operands = 0 : i64, tpu.core_type = #tpu.core_type<tc>, window_params = [{transform_indices = @transform_0, window_bounds = array<i64: 1, 256, 32>}, {transform_indices = @transform_1, window_bounds = array<i64: 1, 256, 32>}, {pipeline_mode = #tpu.pipeline_mode<synchronous>, transform_indices = @transform_2, window_bounds = array<i64: 64, 80>}, {pipeline_mode = #tpu.pipeline_mode<synchronous>, transform_indices = @transform_3, window_bounds = array<i64: 1, 80>}, {pipeline_mode = #tpu.pipeline_mode<synchronous>, transform_indices = @transform_4, window_bounds = array<i64: 1, 16>}, {pipeline_mode = #tpu.pipeline_mode<synchronous>, transform_indices = @transform_5, window_bounds = array<i64: 432, 96>}, {pipeline_mode = #tpu.pipeline_mode<synchronous>, transform_indices = @transform_6, window_bounds = array<i64: 1, 96>}, {transform_indices = @transform_7, window_bounds = array<i64: 1, 256, 32>}, {transform_indices = @transform_8, window_bounds = array<i64: 1, 256, 32>}]} {
    %c0 = arith.constant 0 : index
    %c0_0 = arith.constant 0 : index
    %c0_1 = arith.constant 0 : index
    %0 = vector.load %arg1[%c0, %c0_0, %c0_1] : memref<1x256x32xf32, #tpu.memory_space<vmem>>, vector<1x256x32xf32>
    %1 = vector.shape_cast %0 : vector<1x256x32xf32> to vector<256x32xf32>
    %c0_2 = arith.constant 0 : index
    %c0_3 = arith.constant 0 : index
    %c0_4 = arith.constant 0 : index
    %2 = vector.load %arg2[%c0_2, %c0_3, %c0_4] : memref<1x256x32xf32, #tpu.memory_space<vmem>>, vector<1x256x32xf32>
    %3 = vector.shape_cast %2 : vector<1x256x32xf32> to vector<256x32xf32>
    %4 = tpu.concatenate %1, %3 in 1 : vector<256x32xf32>, vector<256x32xf32> -> vector<256x64xf32>
    %5 = arith.truncf %4 : vector<256x64xf32> to vector<256x64xbf16>
    %c0_5 = arith.constant 0 : index
    %c0_6 = arith.constant 0 : index
    %6 = vector.load %arg3[%c0_5, %c0_6] : memref<64x80xbf16, #tpu.memory_space<vmem>>, vector<64x80xbf16>
    %cst = arith.constant dense<0.000000e+00> : vector<256x80xf32>
    %7 = tpu.matmul %5, %6, %cst {dimension_numbers = #tpu.dot_dimension_numbers<[1], [0], [0], [1], [0, 0, 1, 1], [], []>} : vector<256x64xbf16>, vector<64x80xbf16>, vector<256x80xf32> -> vector<256x80xf32>
    %c0_7 = arith.constant 0 : index
    %c0_8 = arith.constant 0 : index
    %8 = vector.load %arg4[%c0_7, %c0_8] : memref<1x80xf32, #tpu.memory_space<vmem>>, vector<1x80xf32>
    %9 = vector.broadcast %8 : vector<1x80xf32> to vector<256x80xf32>
    %10 = arith.addf %7, %9 : vector<256x80xf32>
    %11 = vector.extract_strided_slice %10 {offsets = [0, 0], sizes = [256, 16], strides = [1, 1]} : vector<256x80xf32> to vector<256x16xf32>
    %12 = vector.extract_strided_slice %10 {offsets = [0, 16], sizes = [256, 16], strides = [1, 1]} : vector<256x80xf32> to vector<256x16xf32>
    %13 = vector.extract_strided_slice %10 {offsets = [0, 32], sizes = [256, 16], strides = [1, 1]} : vector<256x80xf32> to vector<256x16xf32>
    %14 = vector.extract_strided_slice %10 {offsets = [0, 48], sizes = [256, 16], strides = [1, 1]} : vector<256x80xf32> to vector<256x16xf32>
    %15 = vector.extract_strided_slice %10 {offsets = [0, 64], sizes = [256, 16], strides = [1, 1]} : vector<256x80xf32> to vector<256x16xf32>
    %16 = tpu.concatenate %12, %14 in 0 : vector<256x16xf32>, vector<256x16xf32> -> vector<512x16xf32>
    %17 = arith.truncf %16 : vector<512x16xf32> to vector<512x16xbf16>
    %18 = tpu.concatenate %13, %15 in 0 : vector<256x16xf32>, vector<256x16xf32> -> vector<512x16xf32>
    %19 = arith.truncf %18 : vector<512x16xf32> to vector<512x16xbf16>
    %20 = arith.truncf %11 : vector<256x16xf32> to vector<256x16xbf16>
    %cst_9 = arith.constant dense<0.000000e+00> : vector<256x512xf32>
    %21 = tpu.matmul %20, %17, %cst_9 {dimension_numbers = #tpu.dot_dimension_numbers<[1], [1], [0], [0], [0, 0, 1, 0], [], []>} : vector<256x16xbf16>, vector<512x16xbf16>, vector<256x512xf32> -> vector<256x512xf32>
    %22 = vector.extract_strided_slice %21 {offsets = [0, 0], sizes = [256, 256], strides = [1, 1]} : vector<256x512xf32> to vector<256x256xf32>
    %cst_10 = arith.constant dense<0xFF800000> : vector<256xf32>
    %23 = vector.multi_reduction <maximumf>, %22, %cst_10 [1] : vector<256x256xf32> to vector<256xf32>
    %24 = vector.shape_cast %23 : vector<256xf32> to vector<256x1xf32>
    %25 = vector.broadcast %24 : vector<256x1xf32> to vector<256x256xf32>
    %26 = arith.subf %22, %25 : vector<256x256xf32>
    %27 = math.exp %26 : vector<256x256xf32>
    %cst_11 = arith.constant dense<0.000000e+00> : vector<256xf32>
    %28 = vector.multi_reduction <add>, %27, %cst_11 [1] : vector<256x256xf32> to vector<256xf32>
    %29 = vector.shape_cast %28 : vector<256xf32> to vector<256x1xf32>
    %30 = tpu.reciprocal %29 {approx = true} : vector<256x1xf32> -> vector<256x1xf32>
    %31 = vector.broadcast %30 : vector<256x1xf32> to vector<256x256xf32>
    %32 = arith.mulf %27, %31 : vector<256x256xf32>
    %33 = vector.extract_strided_slice %21 {offsets = [0, 256], sizes = [256, 256], strides = [1, 1]} : vector<256x512xf32> to vector<256x256xf32>
    %cst_12 = arith.constant dense<0xFF800000> : vector<256xf32>
    %34 = vector.multi_reduction <maximumf>, %33, %cst_12 [1] : vector<256x256xf32> to vector<256xf32>
    %35 = vector.shape_cast %34 : vector<256xf32> to vector<256x1xf32>
    %36 = vector.broadcast %35 : vector<256x1xf32> to vector<256x256xf32>
    %37 = arith.subf %33, %36 : vector<256x256xf32>
    %38 = math.exp %37 : vector<256x256xf32>
    %cst_13 = arith.constant dense<0.000000e+00> : vector<256xf32>
    %39 = vector.multi_reduction <add>, %38, %cst_13 [1] : vector<256x256xf32> to vector<256xf32>
    %40 = vector.shape_cast %39 : vector<256xf32> to vector<256x1xf32>
    %41 = tpu.reciprocal %40 {approx = true} : vector<256x1xf32> -> vector<256x1xf32>
    %42 = vector.broadcast %41 : vector<256x1xf32> to vector<256x256xf32>
    %43 = arith.mulf %38, %42 : vector<256x256xf32>
    %44 = tpu.concatenate %32, %43 in 1 : vector<256x256xf32>, vector<256x256xf32> -> vector<256x512xf32>
    %45 = arith.truncf %44 : vector<256x512xf32> to vector<256x512xbf16>
    %cst_14 = arith.constant dense<0.000000e+00> : vector<256x16xf32>
    %46 = tpu.matmul %45, %19, %cst_14 {dimension_numbers = #tpu.dot_dimension_numbers<[1], [0], [0], [1], [0, 0, 1, 1], [], []>} : vector<256x512xbf16>, vector<512x16xbf16>, vector<256x16xf32> -> vector<256x16xf32>
    %c0_15 = arith.constant 0 : index
    %c0_16 = arith.constant 0 : index
    %47 = vector.load %arg5[%c0_15, %c0_16] : memref<1x16xf32, #tpu.memory_space<vmem>>, vector<1x16xf32>
    %48 = vector.broadcast %47 : vector<1x16xf32> to vector<256x16xf32>
    %49 = arith.addf %46, %48 : vector<256x16xf32>
    %50 = tpu.concatenate %49, %1 in 1 : vector<256x16xf32>, vector<256x32xf32> -> vector<256x48xf32>
    %51 = tpu.iota {dimensions = array<i32: 0>} : vector<256x1xi32>
    %c16_i32 = arith.constant 16 : i32
    %c0_i32 = arith.constant 0 : i32
    %52 = arith.cmpi eq, %c16_i32, %c0_i32 : i32
    %c1_i32 = arith.constant 1 : i32
    %53 = arith.select %52, %c1_i32, %c16_i32 : i32
    %54 = vector.broadcast %53 : i32 to vector<256x1xi32>
    %55 = arith.remsi %51, %54 : vector<256x1xi32>
    %c0_i32_17 = arith.constant 0 : i32
    %56 = vector.broadcast %c0_i32_17 : i32 to vector<256x1xi32>
    %57 = arith.cmpi ne, %55, %56 : vector<256x1xi32>
    %c0_i32_18 = arith.constant 0 : i32
    %58 = vector.broadcast %c0_i32_18 : i32 to vector<256x1xi32>
    %59 = arith.cmpi slt, %55, %58 : vector<256x1xi32>
    %c0_i32_19 = arith.constant 0 : i32
    %60 = arith.cmpi slt, %53, %c0_i32_19 : i32
    %61 = vector.broadcast %60 : i1 to vector<256x1xi1>
    %62 = vector.broadcast %61 : vector<256x1xi1> to vector<256x1xi1>
    %63 = arith.xori %59, %62 : vector<256x1xi1>
    %64 = arith.andi %63, %57 : vector<256x1xi1>
    %65 = vector.broadcast %53 : i32 to vector<256x1xi32>
    %66 = arith.addi %55, %65 : vector<256x1xi32>
    %67 = arith.select %64, %66, %55 : vector<256x1xi1>, vector<256x1xi32>
    %c0_i32_20 = arith.constant 0 : i32
    %68 = vector.broadcast %c0_i32_20 : i32 to vector<256x1xi32>
    %69 = arith.cmpi ne, %67, %68 : vector<256x1xi32>
    %c15_i32 = arith.constant 15 : i32
    %70 = vector.broadcast %c15_i32 : i32 to vector<256x1xi32>
    %71 = arith.cmpi ne, %67, %70 : vector<256x1xi32>
    %cst_21 = arith.constant 0.000000e+00 : f32
    %72 = vector.broadcast %cst_21 : f32 to vector<1x48xf32>
    %73 = vector.extract_strided_slice %50 {offsets = [0, 0], sizes = [255, 48], strides = [1, 1]} : vector<256x48xf32> to vector<255x48xf32>
    %74 = tpu.concatenate %72, %73 in 0 : vector<1x48xf32>, vector<255x48xf32> -> vector<256x48xf32>
    %cst_22 = arith.constant 0.000000e+00 : f32
    %75 = vector.shape_cast %69 : vector<256x1xi1> to vector<256x1xi1>
    %76 = vector.broadcast %75 : vector<256x1xi1> to vector<256x48xi1>
    %77 = vector.broadcast %cst_22 : f32 to vector<256x48xf32>
    %78 = arith.select %76, %74, %77 : vector<256x48xi1>, vector<256x48xf32>
    %79 = vector.extract_strided_slice %50 {offsets = [1, 0], sizes = [255, 48], strides = [1, 1]} : vector<256x48xf32> to vector<255x48xf32>
    %80 = tpu.concatenate %79, %72 in 0 : vector<255x48xf32>, vector<1x48xf32> -> vector<256x48xf32>
    %cst_23 = arith.constant 0.000000e+00 : f32
    %81 = vector.shape_cast %71 : vector<256x1xi1> to vector<256x1xi1>
    %82 = vector.broadcast %81 : vector<256x1xi1> to vector<256x48xi1>
    %83 = vector.broadcast %cst_23 : f32 to vector<256x48xf32>
    %84 = arith.select %82, %80, %83 : vector<256x48xi1>, vector<256x48xf32>
    %85 = arith.truncf %50 : vector<256x48xf32> to vector<256x48xbf16>
    %86 = arith.truncf %78 : vector<256x48xf32> to vector<256x48xbf16>
    %87 = arith.truncf %84 : vector<256x48xf32> to vector<256x48xbf16>
    %cst_24 = arith.constant 0.000000e+00 : bf16
    %88 = vector.broadcast %cst_24 : bf16 to vector<16x48xbf16>
    %89 = vector.extract_strided_slice %86 {offsets = [0, 0], sizes = [240, 48], strides = [1, 1]} : vector<256x48xbf16> to vector<240x48xbf16>
    %90 = tpu.concatenate %88, %89 in 0 : vector<16x48xbf16>, vector<240x48xbf16> -> vector<256x48xbf16>
    %91 = vector.extract_strided_slice %85 {offsets = [0, 0], sizes = [240, 48], strides = [1, 1]} : vector<256x48xbf16> to vector<240x48xbf16>
    %92 = tpu.concatenate %88, %91 in 0 : vector<16x48xbf16>, vector<240x48xbf16> -> vector<256x48xbf16>
    %93 = vector.extract_strided_slice %87 {offsets = [0, 0], sizes = [240, 48], strides = [1, 1]} : vector<256x48xbf16> to vector<240x48xbf16>
    %94 = tpu.concatenate %88, %93 in 0 : vector<16x48xbf16>, vector<240x48xbf16> -> vector<256x48xbf16>
    %95 = vector.extract_strided_slice %86 {offsets = [16, 0], sizes = [240, 48], strides = [1, 1]} : vector<256x48xbf16> to vector<240x48xbf16>
    %96 = tpu.concatenate %95, %88 in 0 : vector<240x48xbf16>, vector<16x48xbf16> -> vector<256x48xbf16>
    %97 = vector.extract_strided_slice %85 {offsets = [16, 0], sizes = [240, 48], strides = [1, 1]} : vector<256x48xbf16> to vector<240x48xbf16>
    %98 = tpu.concatenate %97, %88 in 0 : vector<240x48xbf16>, vector<16x48xbf16> -> vector<256x48xbf16>
    %99 = vector.extract_strided_slice %87 {offsets = [16, 0], sizes = [240, 48], strides = [1, 1]} : vector<256x48xbf16> to vector<240x48xbf16>
    %100 = tpu.concatenate %99, %88 in 0 : vector<240x48xbf16>, vector<16x48xbf16> -> vector<256x48xbf16>
    %101 = tpu.concatenate %90, %92, %94, %86, %85, %87, %96, %98, %100 in 1 : vector<256x48xbf16>, vector<256x48xbf16>, vector<256x48xbf16>, vector<256x48xbf16>, vector<256x48xbf16>, vector<256x48xbf16>, vector<256x48xbf16>, vector<256x48xbf16>, vector<256x48xbf16> -> vector<256x432xbf16>
    %c0_25 = arith.constant 0 : index
    %c0_26 = arith.constant 0 : index
    %102 = vector.load %arg6[%c0_25, %c0_26] : memref<432x96xbf16, #tpu.memory_space<vmem>>, vector<432x96xbf16>
    %cst_27 = arith.constant dense<0.000000e+00> : vector<256x96xf32>
    %103 = tpu.matmul %101, %102, %cst_27 {dimension_numbers = #tpu.dot_dimension_numbers<[1], [0], [0], [1], [0, 0, 1, 1], [], []>} : vector<256x432xbf16>, vector<432x96xbf16>, vector<256x96xf32> -> vector<256x96xf32>
    %c0_28 = arith.constant 0 : index
    %c0_29 = arith.constant 0 : index
    %104 = vector.load %arg7[%c0_28, %c0_29] : memref<1x96xf32, #tpu.memory_space<vmem>>, vector<1x96xf32>
    %105 = vector.broadcast %104 : vector<1x96xf32> to vector<256x96xf32>
    %106 = arith.addf %103, %105 : vector<256x96xf32>
    %107 = vector.extract_strided_slice %106 {offsets = [0, 0], sizes = [256, 32], strides = [1, 1]} : vector<256x96xf32> to vector<256x32xf32>
    %108 = arith.negf %107 : vector<256x32xf32>
    %109 = math.exp %108 : vector<256x32xf32>
    %cst_30 = arith.constant 1.000000e+00 : f32
    %110 = vector.broadcast %cst_30 : f32 to vector<256x32xf32>
    %111 = arith.addf %110, %109 : vector<256x32xf32>
    %112 = arith.divf %110, %111 : vector<256x32xf32>
    %113 = vector.extract_strided_slice %106 {offsets = [0, 32], sizes = [256, 32], strides = [1, 1]} : vector<256x96xf32> to vector<256x32xf32>
    %114 = math.tanh %113 : vector<256x32xf32>
    %115 = vector.extract_strided_slice %106 {offsets = [0, 64], sizes = [256, 32], strides = [1, 1]} : vector<256x96xf32> to vector<256x32xf32>
    %116 = arith.negf %115 : vector<256x32xf32>
    %117 = math.exp %116 : vector<256x32xf32>
    %cst_31 = arith.constant 1.000000e+00 : f32
    %118 = vector.broadcast %cst_31 : f32 to vector<256x32xf32>
    %119 = arith.addf %118, %117 : vector<256x32xf32>
    %120 = arith.divf %118, %119 : vector<256x32xf32>
    %121 = arith.mulf %112, %114 : vector<256x32xf32>
    %cst_32 = arith.constant 1.000000e+00 : f32
    %122 = vector.broadcast %cst_32 : f32 to vector<256x32xf32>
    %123 = arith.subf %122, %112 : vector<256x32xf32>
    %124 = arith.mulf %123, %3 : vector<256x32xf32>
    %125 = arith.addf %121, %124 : vector<256x32xf32>
    %c0_33 = arith.constant 0 : index
    %c0_34 = arith.constant 0 : index
    %c0_35 = arith.constant 0 : index
    %126 = vector.load %arg9[%c0_33, %c0_34, %c0_35] : memref<1x256x32xf32, #tpu.memory_space<vmem>>, vector<1x256x32xf32>
    %127 = vector.shape_cast %126 : vector<1x256x32xf32> to vector<256x32xf32>
    %128 = vector.shape_cast %125 : vector<256x32xf32> to vector<1x256x32xf32>
    tpu.vector_store %arg9[%c0_33, %c0_34, %c0_35], %128 {strides = array<i32>} : memref<1x256x32xf32, #tpu.memory_space<vmem>>, vector<1x256x32xf32>,
    %129 = arith.mulf %120, %125 : vector<256x32xf32>
    %c0_36 = arith.constant 0 : index
    %c0_37 = arith.constant 0 : index
    %c0_38 = arith.constant 0 : index
    %130 = vector.load %arg8[%c0_36, %c0_37, %c0_38] : memref<1x256x32xf32, #tpu.memory_space<vmem>>, vector<1x256x32xf32>
    %131 = vector.shape_cast %130 : vector<1x256x32xf32> to vector<256x32xf32>
    %132 = vector.shape_cast %129 : vector<256x32xf32> to vector<1x256x32xf32>
    tpu.vector_store %arg8[%c0_36, %c0_37, %c0_38], %132 {strides = array<i32>} : memref<1x256x32xf32, #tpu.memory_space<vmem>>, vector<1x256x32xf32>,
    return
  }
  func.func @transform_0(%arg0: i32) -> (i32, i32, i32) {
    %c0_i32 = arith.constant 0 : i32
    %c0_i32_0 = arith.constant 0 : i32
    %c0_i32_1 = arith.constant 0 : i32
    return %arg0, %c0_i32, %c0_i32_0 : i32, i32, i32
  }
  func.func @transform_1(%arg0: i32) -> (i32, i32, i32) {
    %c0_i32 = arith.constant 0 : i32
    %c0_i32_0 = arith.constant 0 : i32
    %c0_i32_1 = arith.constant 0 : i32
    return %arg0, %c0_i32, %c0_i32_0 : i32, i32, i32
  }
  func.func @transform_2(%arg0: i32) -> (i32, i32) {
    %c0_i32 = arith.constant 0 : i32
    %c0_i32_0 = arith.constant 0 : i32
    %c0_i32_1 = arith.constant 0 : i32
    return %c0_i32, %c0_i32_0 : i32, i32
  }
  func.func @transform_3(%arg0: i32) -> (i32, i32) {
    %c0_i32 = arith.constant 0 : i32
    %c0_i32_0 = arith.constant 0 : i32
    %c0_i32_1 = arith.constant 0 : i32
    return %c0_i32, %c0_i32_0 : i32, i32
  }
  func.func @transform_4(%arg0: i32) -> (i32, i32) {
    %c0_i32 = arith.constant 0 : i32
    %c0_i32_0 = arith.constant 0 : i32
    %c0_i32_1 = arith.constant 0 : i32
    return %c0_i32, %c0_i32_0 : i32, i32
  }
  func.func @transform_5(%arg0: i32) -> (i32, i32) {
    %c0_i32 = arith.constant 0 : i32
    %c0_i32_0 = arith.constant 0 : i32
    %c0_i32_1 = arith.constant 0 : i32
    return %c0_i32, %c0_i32_0 : i32, i32
  }
  func.func @transform_6(%arg0: i32) -> (i32, i32) {
    %c0_i32 = arith.constant 0 : i32
    %c0_i32_0 = arith.constant 0 : i32
    %c0_i32_1 = arith.constant 0 : i32
    return %c0_i32, %c0_i32_0 : i32, i32
  }
  func.func @transform_7(%arg0: i32) -> (i32, i32, i32) {
    %c0_i32 = arith.constant 0 : i32
    %c0_i32_0 = arith.constant 0 : i32
    %c0_i32_1 = arith.constant 0 : i32
    return %arg0, %c0_i32, %c0_i32_0 : i32, i32, i32
  }
  func.func @transform_8(%arg0: i32) -> (i32, i32, i32) {
    %c0_i32 = arith.constant 0 : i32
    %c0_i32_0 = arith.constant 0 : i32
    %c0_i32_1 = arith.constant 0 : i32
    return %arg0, %c0_i32, %c0_i32_0 : i32, i32, i32
  }
}

</mosaic_0001>

<bundles_post_ra>
// kernel: sa_attn_mem_forward.1
= control target key start
LH: loop header
LB: loop body
LE: loop exit
PB: predicated region body
PF: predicated region fallthrough
CT: control target
= control target key end

     0   :  { %14 = vsyncpa [#allocation3], 0  ;;  %s11963_s0 = inlined_call_operand.vmem [shape: f32[2,256,32], index: 0, kind: input, shape index: {}]   ;;  %s11964_s1 = inlined_call_operand.vmem [shape: f32[2,256,32], index: 1, kind: input, shape index: {}]   ;;  %s11965_s2 = inlined_call_operand.vmem [shape: bf16[64,80], index: 2, kind: input, shape index: {}]   ;;  %s11966_s3 = inlined_call_operand.vmem [shape: f32[1,80], index: 3, kind: input, shape index: {}]   ;;  %s11967_s4 = inlined_call_operand.vmem [shape: f32[1,16], index: 4, kind: input, shape index: {}]   ;;  %s11968_s5 = inlined_call_operand.vmem [shape: bf16[432,96], index: 5, kind: input, shape index: {}]   ;;  %s11969_s6 = inlined_call_operand.vmem [shape: f32[1,96], index: 6, kind: input, shape index: {}]   ;;  %s11970_s7 = inlined_call_operand.hbm [shape: f32[2,256,32], index: 7, kind: output, shape index: {0}]   ;;  %s11971_s8 = inlined_call_operand.hbm [shape: f32[2,256,32], index: 8, kind: output, shape index: {1}]  }
   0x1   :  { %16 = vsyncpa [#allocation3 + $0x1], 0 }
   0x2   :  { %17 = vsyncpa [#allocation5], 0 }
   0x3   :  { %19 = vsyncpa [#allocation5 + $0x1], 0  ;;  %s8110_s27 = smov 0   ;;  %s8112_s28 = smov 0  }
   0x4   :  { %s8114_s29 = smov 0   ;;  %s8116_s30 = smov 0  }
   0x5 LB: > { %s8131_s9 = sadd.s32 4294967295, %s8051_s30   ;;  %s6299_s10 = sadd.s32 4294967294, %s8051_s30   ;;  %s8051_s30 = sphi %s8116_s30, %s12658_s30   ;;  %s8047_s29 = sphi %s8114_s29, %s12657_s29   ;;  %s8043_s28 = sphi %s8112_s28, %s12656_s28   ;;  %s8039_s27 = sphi %s8110_s27, %s12655_s27  }
   0x6   : > { %s8135_s11 = sadd.s32 1, %s8051_s30   ;;  %s189_s12 = sadd.s32 1, %s8047_s29 }
   0x7   : > { %s186_s13 = ssub.s32 %s8051_s30, %s8135_s11  ;;  %p199_p0 = scmp.ne.s32.totalorder %s8047_s29, %s8043_s28 }
   0x8   : > { %p187_p1 = scmp.eq.s32.totalorder %s186_s13, 0  ;;  %p200_p2 = scmp.eq.s32.totalorder %s8131_s9, 1 }
   0x9   : > { %p205_p3 = scmp.ne.s32.totalorder %s8043_s28, %s8039_s27  ;;  %p206_p4 = scmp.eq.s32.totalorder %s6299_s10, 1 }
   0xa   : > { %s8146_s14 = scalar_select %p187_p1, %s8047_s29, %s189_s12  }
   0xb   : > { %p8148_p5 = por %p200_p2, %p199_p0  ;;  %p8152_p6 = por %p206_p4, %p205_p3 }
   0xc   : > { %p6302_p7 = scmp.ge.s32.totalorder %s8051_s30, 1  ;;  %p281_p8 = scmp.lt.s32.totalorder %s8051_s30, 3 }
   0xe   : > { %p282_p9 = pnand %p6302_p7, %p281_p8 }
  0x10   : > { %285 = sbr.rel (%p282_p9) target bundleno = 2573 (0xa0d), region = 48 }
  0x17   : > { %p325_p10 = scmp.lt.s32.totalorder %s8131_s9, 1  ;;  %v7274_v0 = vld [vmem:[%s11965_s2] sm:$0xff]   ;;  %v7275_v1 = vld [vmem:[%s11965_s2 + $0x8] sm:$0xff]   ;;  %v7276_v2 = vld [vmem:[%s11965_s2 + $0x10] sm:$0xff]   ;;  %s8053_s12 = smov 32   ;;  %vm528_vm0 = vcmask 261120  }
  0x18   : > { %6902 = vmatprep.subr.bf16.mxu0 %v7274_v0  ;;  %v7277_v14 = vld [vmem:[%s11965_s2 + $0x18] sm:$0xff]   ;;  %vm616_vm1 = vcmask 523264   ;;  %vm1082_vm2 = vcmask 130048   ;;  %s8054_s23 = smov 96   ;;  %s12171_s24 = smov 112   ;;  %vm3735_vm4 = vcmask 1040384  }
  0x19   : > { %s8163_s19 = scalar_select %p325_p10, %s8131_s9, 1  ;;  %6903 = vmatpush3.bf16.msra.mxu0 %v7274_v0  ;;  %vm3928_vm5 = vcmask 1046528   ;;  %vm4442_vm10 = vcmask 392192  }
  0x1a   : > { %6904 = vmatprep.subr.bf16.mxu0 %v7275_v1  ;;  %s8057_s25 = smov 16   ;;  %s8058_s26 = smov 48  }
  0x1b   : > { %s6446_s22 = sshll.u32 %s8163_s19, 8  ;;  %s12585_s20 = smov 112  }
  0x1c   : > { %s8177_s10 = scalar_lea.vmem %s11964_s1, %s6446_s22  ;;  %s8235_s21 = scalar_lea.vmem %s11963_s0, %s6446_s22 }
  0x1d   : > { %v368_v3 = vld [vmem:[%s8177_s10] sm:$0xff]  ;;  %v369_v4 = vld [vmem:[%s8177_s10 + $0x8] sm:$0xff]  ;;  %v370_v5 = vld [vmem:[%s8177_s10 + $0x10] sm:$0xff]  ;;  %6905 = vmatpush3.bf16.msra.mxu0 %v7275_v1 }
  0x1e   : > { %v7034_v6 = vpack.i.bf16 %v369_v4, %v368_v3  ;;  %v371_v7 = vld [vmem:[%s8177_s10 + $0x18] sm:$0xff]  ;;  %v372_v8 = vld [vmem:[%s8177_s10 + $0x20] sm:$0xff]  ;;  %v373_v9 = vld [vmem:[%s8177_s10 + $0x28] sm:$0xff]  ;;  %6906 = vmatprep.subr.bf16.mxu0 %v7276_v2 }
  0x1f   : > { %v7044_v10 = vpack.i.bf16 %v373_v9, %v372_v8  ;;  %v374_v11 = vld [vmem:[%s8177_s10 + $0x30] sm:$0xff]  ;;  %v375_v12 = vld [vmem:[%s8177_s10 + $0x38] sm:$0xff]  ;;  %v7039_v13 = vpack.i.bf16 %v371_v7, %v370_v5  ;;  %v376_v16 = vld [vmem:[%s8177_s10 + $0x40] sm:$0xff] }
  0x20   : > { %7035 = vrot.lane.b32.xlu0 %v7034_v6, %s8053_s12  ;;  %v7049_v15 = vpack.i.bf16 %v375_v12, %v374_v11  ;;  %v377_v17 = vld [vmem:[%s8177_s10 + $0x48] sm:$0xff]  ;;  %v378_v18 = vld [vmem:[%s8177_s10 + $0x50] sm:$0xff]  ;;  %v379_v19 = vld [vmem:[%s8177_s10 + $0x58] sm:$0xff] }
  0x21   : > { %7045 = vrot.lane.b32.xlu1 %v7044_v10, %s8053_s12  ;;  %6907 = vmatpush3.bf16.msra.mxu0 %v7276_v2  ;;  %v7054_v20 = vpack.i.bf16 %v377_v17, %v376_v16  ;;  %v7059_v21 = vpack.i.bf16 %v379_v19, %v378_v18  ;;  %v380_v22 = vld [vmem:[%s8177_s10 + $0x60] sm:$0xff]  ;;  %v381_v23 = vld [vmem:[%s8177_s10 + $0x68] sm:$0xff]  ;;  %v382_v24 = vld [vmem:[%s8177_s10 + $0x70] sm:$0xff] }
  0x22   : > { %6908 = vmatprep.subr.bf16.mxu0 %v7277_v14  ;;  %v383_v25 = vld [vmem:[%s8177_s10 + $0x78] sm:$0xff]  ;;  %v7064_v26 = vpack.i.bf16 %v381_v23, %v380_v22  ;;  %v384_v28 = vld [vmem:[%s8177_s10 + $0x80] sm:$0xff]  ;;  %v385_v29 = vld [vmem:[%s8177_s10 + $0x88] sm:$0xff] }
  0x23   : > { %v7069_v27 = vpack.i.bf16 %v383_v25, %v382_v24  ;;  %v386_v30 = vld [vmem:[%s8177_s10 + $0x90] sm:$0xff]  ;;  %v387_v31 = vld [vmem:[%s8177_s10 + $0x98] sm:$0xff]  ;;  %v7074_v32 = vpack.i.bf16 %v385_v29, %v384_v28  ;;  %v388_v33 = vld [vmem:[%s8177_s10 + $0xa0] sm:$0xff] }
  0x24   : > { %7040 = vrot.lane.b32.xlu0 %v7039_v13, %s8053_s12  ;;  %v389_v34 = vld [vmem:[%s8177_s10 + $0xa8] sm:$0xff]  ;;  %v390_v35 = vld [vmem:[%s8177_s10 + $0xb0] sm:$0xff]  ;;  %v7079_v36 = vpack.i.bf16 %v387_v31, %v386_v30  ;;  %v391_v37 = vld [vmem:[%s8177_s10 + $0xb8] sm:$0xff] }
  0x25   : > { %7050 = vrot.lane.b32.xlu1 %v7049_v15, %s8053_s12  ;;  %6909 = vmatpush3.bf16.msra.mxu0 %v7277_v14  ;;  %v392_v38 = vld [vmem:[%s8177_s10 + $0xc0] sm:$0xff]  ;;  %v393_v39 = vld [vmem:[%s8177_s10 + $0xc8] sm:$0xff]  ;;  %v7084_v40 = vpack.i.bf16 %v389_v34, %v388_v33  ;;  %v394_v41 = vld [vmem:[%s8177_s10 + $0xd0] sm:$0xff]  ;;  %v7089_v43 = vpack.i.bf16 %v391_v37, %v390_v35 }
  0x26   : > { %v395_v42 = vld [vmem:[%s8177_s10 + $0xd8] sm:$0xff]  ;;  %v7094_v44 = vpack.i.bf16 %v393_v39, %v392_v38  ;;  %v396_v45 = vld [vmem:[%s8177_s10 + $0xe0] sm:$0xff]  ;;  %v397_v46 = vld [vmem:[%s8177_s10 + $0xe8] sm:$0xff] }
  0x27   : > { %v398_v47 = vld [vmem:[%s8177_s10 + $0xf0] sm:$0xff]  ;;  %v7099_v48 = vpack.i.bf16 %v395_v42, %v394_v41  ;;  %v399_v49 = vld [vmem:[%s8177_s10 + $0xf8] sm:$0xff]  ;;  %v7104_v50 = vpack.i.bf16 %v397_v46, %v396_v45  ;;  %v336_v53 = vld [vmem:[%s8235_s21] sm:$0xff] }
  0x28   : > { %7055 = vrot.lane.b32.xlu0 %v7054_v20, %s8053_s12  ;;  %v7109_v51 = vpack.i.bf16 %v399_v49, %v398_v47  ;;  %v337_v54 = vld [vmem:[%s8235_s21 + $0x8] sm:$0xff]  ;;  %v340_v58 = vld [vmem:[%s8235_s21 + $0x20] sm:$0xff]  ;;  %v338_v1 = vld [vmem:[%s8235_s21 + $0x10] sm:$0xff] }
  0x29   : > { %7060 = vrot.lane.b32.xlu1 %v7059_v21, %s8053_s12  ;;  %v341_v59 = vld [vmem:[%s8235_s21 + $0x28] sm:$0xff]  ;;  %v339_v2 = vld [vmem:[%s8235_s21 + $0x18] sm:$0xff]  ;;  %v342_v15 = vld [vmem:[%s8235_s21 + $0x30] sm:$0xff] }
  0x2a   : > { %v343_v16 = vld [vmem:[%s8235_s21 + $0x38] sm:$0xff]  ;;  %v344_v20 = vld [vmem:[%s8235_s21 + $0x40] sm:$0xff]  ;;  %v345_v21 = vld [vmem:[%s8235_s21 + $0x48] sm:$0xff] }
  0x2b   : > { %v347_v33 = vld [vmem:[%s8235_s21 + $0x58] sm:$0xff]  ;;  %v349_v37 = vld [vmem:[%s8235_s21 + $0x68] sm:$0xff] }
  0x2c   : > { %7065 = vrot.lane.b32.xlu0 %v7064_v26, %s8053_s12  ;;  %v351_v49 = vld [vmem:[%s8235_s21 + $0x78] sm:$0xff] }
  0x2d   : > { %7070 = vrot.lane.b32.xlu1 %v7069_v27, %s8053_s12 }
  0x30   : > { %7075 = vrot.lane.b32.xlu0 %v7074_v32, %s8053_s12  ;;  %v346_v32 = vld [vmem:[%s8235_s21 + $0x50] sm:$0xff] }
  0x31   : > { %7080 = vrot.lane.b32.xlu1 %v7079_v36, %s8053_s12  ;;  %v348_v36 = vld [vmem:[%s8235_s21 + $0x60] sm:$0xff] }
  0x34   : > { %7085 = vrot.lane.b32.xlu0 %v7084_v40, %s8053_s12 }
  0x35   : > { %7090 = vrot.lane.b32.xlu1 %v7089_v43, %s8053_s12 }
  0x38   : > { %7095 = vrot.lane.b32.xlu0 %v7094_v44, %s8053_s12 }
  0x39   : > { %7100 = vrot.lane.b32.xlu1 %v7099_v48, %s8053_s12  ;;  %v350_v48 = vld [vmem:[%s8235_s21 + $0x70] sm:$0xff] }
  0x3c   : > { %7105 = vrot.lane.b32.xlu0 %v7104_v50, %s8053_s12 }
  0x3d   : > { %7110 = vrot.lane.b32.xlu1 %v7109_v51, %s8053_s12 }
  0x92   : > { %v7036_v52 = vpop.permute.xlu0 %7035 }
  0x93   : > { %v7038_v55 = vunpack.i.h.bf16 %v7036_v52  ;;  %v7037_v56 = vunpack.i.l.bf16 %v7036_v52  ;;  %v7046_v57 = vpop.permute.xlu1 %7045  ;;  %v352_v52 = vld [vmem:[%s8235_s21 + $0x80] sm:$0xff] }
  0x94   : > { %v7048_v60 = vunpack.i.h.bf16 %v7046_v57  ;;  %v7047_v61 = vunpack.i.l.bf16 %v7046_v57 }
  0x95   : > { %v530_v62 = vsel %vm528_vm0, %v337_v54, %v7038_v55  ;;  %v529_v63 = vsel %vm528_vm0, %v336_v53, %v7037_v56  ;;  %v353_v53 = vld [vmem:[%s8235_s21 + $0x88] sm:$0xff] }
  0x96   : > { %v7041_v0 = vpop.permute.xlu0 %7040  ;;  %v561_v3 = vpack.c.bf16 %v530_v62, %v529_v63  ;;  %v533_v4 = vsel %vm528_vm0, %v340_v58, %v7047_v61  ;;  %v534_v5 = vsel %vm528_vm0, %v341_v59, %v7048_v60 }
  0x97   : > { %v7043_v6 = vunpack.i.h.bf16 %v7041_v0  ;;  %v7042_v7 = vunpack.i.l.bf16 %v7041_v0  ;;  %v7051_v8 = vpop.permute.xlu1 %7050  ;;  %v563_v9 = vpack.c.bf16 %v534_v5, %v533_v4  ;;  %v354_v0 = vld [vmem:[%s8235_s21 + $0x90] sm:$0xff]  ;;  %v356_v4 = vld [vmem:[%s8235_s21 + $0xa0] sm:$0xff]  ;;  %v357_v5 = vld [vmem:[%s8235_s21 + $0xa8] sm:$0xff] }
  0x98   : > { %6910 = vmatprep.mubr.msk.bf16.mxu0 %vm616_vm1, %v561_v3  ;;  %v7053_v12 = vunpack.i.h.bf16 %v7051_v8  ;;  %v7052_v13 = vunpack.i.l.bf16 %v7051_v8 }
  0x99   : > { %v531_v10 = vsel %vm528_vm0, %v338_v1, %v7042_v7  ;;  %v532_v11 = vsel %vm528_vm0, %v339_v2, %v7043_v6  ;;  %v355_v1 = vld [vmem:[%s8235_s21 + $0x98] sm:$0xff] }
  0x9a   : > { %v562_v14 = vpack.c.bf16 %v532_v11, %v531_v10  ;;  %v7056_v17 = vpop.permute.xlu0 %7055  ;;  %v535_v22 = vsel %vm528_vm0, %v342_v15, %v7052_v13  ;;  %v536_v23 = vsel %vm528_vm0, %v343_v16, %v7053_v12  ;;  %v358_v16 = vld [vmem:[%s8235_s21 + $0xb0] sm:$0xff] }
  0x9b   : > { %v7058_v18 = vunpack.i.h.bf16 %v7056_v17  ;;  %v7057_v19 = vunpack.i.l.bf16 %v7056_v17  ;;  %v7061_v26 = vpop.permute.xlu1 %7060  ;;  %v564_v28 = vpack.c.bf16 %v536_v23, %v535_v22  ;;  %v359_v17 = vld [vmem:[%s8235_s21 + $0xb8] sm:$0xff] }
  0x9c   : > { %6911 = vmatmul.mubr.msk.bf16.vlgmr.msra.gmra.mrb[0].mxu0 %vm616_vm1, %v562_v14  ;;  %v7063_v29 = vunpack.i.h.bf16 %v7061_v26  ;;  %v7062_v30 = vunpack.i.l.bf16 %v7061_v26 }
  0x9d   : > { %6914 = vmatprep.mubr.msk.bf16.mxu0 %vm616_vm1, %v563_v9  ;;  %v537_v24 = vsel %vm528_vm0, %v344_v20, %v7057_v19  ;;  %v538_v25 = vsel %vm528_vm0, %v345_v21, %v7058_v18  ;;  %v360_v20 = vld [vmem:[%s8235_s21 + $0xc0] sm:$0xff]  ;;  %v361_v21 = vld [vmem:[%s8235_s21 + $0xc8] sm:$0xff] }
  0x9e   : > { %v7066_v27 = vpop.permute.xlu0 %7065  ;;  %v565_v31 = vpack.c.bf16 %v538_v25, %v537_v24  ;;  %v539_v38 = vsel %vm528_vm0, %v346_v32, %v7062_v30  ;;  %v540_v39 = vsel %vm528_vm0, %v347_v33, %v7063_v29  ;;  %v362_v32 = vld [vmem:[%s8235_s21 + $0xd0] sm:$0xff]  ;;  %v363_v33 = vld [vmem:[%s8235_s21 + $0xd8] sm:$0xff] }
  0x9f   : > { %v7068_v34 = vunpack.i.h.bf16 %v7066_v27  ;;  %v7067_v35 = vunpack.i.l.bf16 %v7066_v27  ;;  %v7071_v42 = vpop.permute.xlu1 %7070  ;;  %v566_v44 = vpack.c.bf16 %v540_v39, %v539_v38 }
  0xa0   : > { %v7073_v45 = vunpack.i.h.bf16 %v7071_v42  ;;  %v7072_v46 = vunpack.i.l.bf16 %v7071_v42 }
  0xa1   : > { %v541_v40 = vsel %vm528_vm0, %v348_v36, %v7067_v35  ;;  %v542_v41 = vsel %vm528_vm0, %v349_v37, %v7068_v34  ;;  %v364_v36 = vld [vmem:[%s8235_s21 + $0xe0] sm:$0xff]  ;;  %v365_v37 = vld [vmem:[%s8235_s21 + $0xe8] sm:$0xff] }
  0xa2   : > { %v7076_v43 = vpop.permute.xlu0 %7075  ;;  %v567_v47 = vpack.c.bf16 %v542_v41, %v541_v40  ;;  %v543_v54 = vsel %vm528_vm0, %v350_v48, %v7072_v46  ;;  %v544_v55 = vsel %vm528_vm0, %v351_v49, %v7073_v45  ;;  %v367_v48 = vld [vmem:[%s8235_s21 + $0xf8] sm:$0xff] }
  0xa3   : > { %v7078_v50 = vunpack.i.h.bf16 %v7076_v43  ;;  %v7077_v51 = vunpack.i.l.bf16 %v7076_v43  ;;  %v7081_v58 = vpop.permute.xlu1 %7080  ;;  %v568_v60 = vpack.c.bf16 %v544_v55, %v543_v54 }
  0xa4   : > { %6915 = vmatmul.mubr.msk.bf16.gmra.mrb[4].mxu0 %vm616_vm1, %v564_v28  ;;  %v7083_v61 = vunpack.i.h.bf16 %v7081_v58  ;;  %v7082_v62 = vunpack.i.l.bf16 %v7081_v58 }
  0xa5   : > { %6918 = vmatprep.mubr.msk.bf16.mxu0 %vm616_vm1, %v565_v31  ;;  %v545_v56 = vsel %vm528_vm0, %v352_v52, %v7077_v51  ;;  %v546_v57 = vsel %vm528_vm0, %v353_v53, %v7078_v50  ;;  %v8320_v53 = vld [vmem:[%s11966_s3] ss:$0 sm:$0xff] }
  0xa6   : > { %v7086_v59 = vpop.permute.xlu0 %7085  ;;  %v569_v63 = vpack.c.bf16 %v546_v57, %v545_v56  ;;  %v547_v6 = vsel %vm528_vm0, %v354_v0, %v7082_v62  ;;  %v548_v7 = vsel %vm528_vm0, %v355_v1, %v7083_v61 }
  0xa7   : > { %v7088_v2 = vunpack.i.h.bf16 %v7086_v59  ;;  %v7087_v3 = vunpack.i.l.bf16 %v7086_v59  ;;  %v7091_v10 = vpop.permute.xlu1 %7090  ;;  %v570_v12 = vpack.c.bf16 %v548_v7, %v547_v6 }
  0xa8   : > { %v7093_v13 = vunpack.i.h.bf16 %v7091_v10  ;;  %v7092_v14 = vunpack.i.l.bf16 %v7091_v10 }
  0xa9   : > { %v549_v8 = vsel %vm528_vm0, %v356_v4, %v7087_v3  ;;  %v550_v9 = vsel %vm528_vm0, %v357_v5, %v7088_v2 }
  0xaa   : > { %v7096_v11 = vpop.permute.xlu0 %7095  ;;  %v571_v15 = vpack.c.bf16 %v550_v9, %v549_v8  ;;  %v551_v22 = vsel %vm528_vm0, %v358_v16, %v7092_v14  ;;  %v552_v23 = vsel %vm528_vm0, %v359_v17, %v7093_v13 }
  0xab   : > { %v7098_v18 = vunpack.i.h.bf16 %v7096_v11  ;;  %v7097_v19 = vunpack.i.l.bf16 %v7096_v11  ;;  %v7101_v26 = vpop.permute.xlu1 %7100  ;;  %v572_v28 = vpack.c.bf16 %v552_v23, %v551_v22 }
  0xac   : > { %6919 = vmatmul.mubr.msk.bf16.gmra.mrb[8].mxu0 %vm616_vm1, %v566_v44  ;;  %v7103_v29 = vunpack.i.h.bf16 %v7101_v26  ;;  %v7102_v30 = vunpack.i.l.bf16 %v7101_v26 }
  0xad   : > { %6922 = vmatprep.mubr.msk.bf16.mxu0 %vm616_vm1, %v567_v47  ;;  %v553_v24 = vsel %vm528_vm0, %v360_v20, %v7097_v19  ;;  %v554_v25 = vsel %vm528_vm0, %v361_v21, %v7098_v18  ;;  %v366_v47 = vld [vmem:[%s8235_s21 + $0xf0] sm:$0xff] }
  0xae   : > { %v7106_v27 = vpop.permute.xlu0 %7105  ;;  %v573_v31 = vpack.c.bf16 %v554_v25, %v553_v24  ;;  %v555_v38 = vsel %vm528_vm0, %v362_v32, %v7102_v30  ;;  %v556_v39 = vsel %vm528_vm0, %v363_v33, %v7103_v29 }
  0xaf   : > { %v7108_v34 = vunpack.i.h.bf16 %v7106_v27  ;;  %v7107_v35 = vunpack.i.l.bf16 %v7106_v27  ;;  %v7111_v42 = vpop.permute.xlu1 %7110  ;;  %v574_v43 = vpack.c.bf16 %v556_v39, %v555_v38 }
  0xb0   : > { %v7113_v44 = vunpack.i.h.bf16 %v7111_v42  ;;  %v7112_v45 = vunpack.i.l.bf16 %v7111_v42 }
  0xb1   : > { %v557_v40 = vsel %vm528_vm0, %v364_v36, %v7107_v35  ;;  %v558_v41 = vsel %vm528_vm0, %v365_v37, %v7108_v34 }
  0xb2   : > { %v575_v46 = vpack.c.bf16 %v558_v41, %v557_v40  ;;  %v559_v49 = vsel %vm528_vm0, %v366_v47, %v7112_v45  ;;  %v560_v50 = vsel %vm528_vm0, %v367_v48, %v7113_v44 }
  0xb3   : > { %v576_v51 = vpack.c.bf16 %v560_v50, %v559_v49 }
  0xb4   : > { %6923 = vmatmul.mubr.msk.bf16.gmra.mrb[12].mxu0 %vm616_vm1, %v568_v60 }
  0xb5   : > { %6926 = vmatprep.mubr.msk.bf16.mxu0 %vm616_vm1, %v569_v63 }
  0xbc   : > { %6927 = vmatmul.mubr.msk.bf16.gmra.mrb[16].mxu0 %vm616_vm1, %v570_v12 }
  0xbd   : > { %6930 = vmatprep.mubr.msk.bf16.mxu0 %vm616_vm1, %v571_v15 }
  0xc4   : > { %6931 = vmatmul.mubr.msk.bf16.gmra.mrb[20].mxu0 %vm616_vm1, %v572_v28 }
  0xc5   : > { %6934 = vmatprep.mubr.msk.bf16.mxu0 %vm616_vm1, %v573_v31 }
  0xcc   : > { %6935 = vmatmul.mubr.msk.bf16.gmra.mrb[24].mxu0 %vm616_vm1, %v574_v43 }
  0xcd   : > { %6938 = vmatprep.mubr.msk.bf16.mxu0 %vm616_vm1, %v575_v46 }
  0xd4   : > { %6939 = vmatmul.mubr.msk.bf16.gmra.mrb[28].mxu0 %vm616_vm1, %v576_v51 }
 0x16f   : > { %v6912_v52 = vpop.f32.mrb[0].mxu0 }
 0x170   : > { %v699_v54 = vpop.f32.mrb[1].mxu0  ;;  %v708_v56 = vadd.f32 %v6912_v52, %v8320_v53 }
 0x171   : > { %v6913_v55 = vpop.f32.mrb[2].mxu0  ;;  %v700_v59 = vadd.f32 %v8320_v53, %v699_v54 }
 0x172   : > { %v711_v57 = vadd.f32 %v6913_v55, %v8320_v53  ;;  %v702_v58 = vpop.f32.mrb[3].mxu0 }
 0x173   : > { %v703_v60 = vadd.f32 %v8320_v53, %v702_v58 }
 0x174   : > { %v7124_v61 = vpack.i.bf16 %v711_v57, %v708_v56  ;;  %v8326_v62 = vpack.c.bf16 %v711_v57, %v708_v56 }
 0x175   : > { %v7114_v63 = vpack.i.bf16 %v703_v60, %v700_v59  ;;  %v8328_v0 = vpack.c.bf16 %v703_v60, %v700_v59 }
 0x177   : > { %v6916_v1 = vpop.f32.mrb[4].mxu0  ;;  %7115 = vrot.lane.b32.xlu0 %v7114_v63, %s8054_s23  ;;  %6486 = vmatprep.mubr.msk.bf16.mxu1 %vm1082_vm2, %v8328_v0 }
 0x178   : > { %6534 = vmatprep.mubr.msk.bf16.mxu0 %vm1082_vm2, %v8328_v0  ;;  %v715_v2 = vpop.f32.mrb[5].mxu0  ;;  %v724_v4 = vadd.f32 %v6916_v1, %v8320_v53 }
 0x179   : > { %v6917_v3 = vpop.f32.mrb[6].mxu0  ;;  %v716_v7 = vadd.f32 %v8320_v53, %v715_v2 }
 0x17a   : > { %v727_v5 = vadd.f32 %v6917_v3, %v8320_v53  ;;  %v718_v6 = vpop.f32.mrb[7].mxu0 }
 0x17b   : > { %v719_v8 = vadd.f32 %v8320_v53, %v718_v6  ;;  %7125 = vrot.lane.b32.xlu0 %v7124_v61, %s8054_s23 }
 0x17c   : > { %v7144_v9 = vpack.i.bf16 %v727_v5, %v724_v4  ;;  %v8340_v10 = vpack.c.bf16 %v727_v5, %v724_v4 }
 0x17d   : > { %v7134_v11 = vpack.i.bf16 %v719_v8, %v716_v7  ;;  %v8342_v12 = vpack.c.bf16 %v719_v8, %v716_v7 }
 0x17f   : > { %v6920_v13 = vpop.f32.mrb[8].mxu0  ;;  %7135 = vrot.lane.b32.xlu0 %v7134_v11, %s8054_s23 }
 0x180   : > { %v731_v14 = vpop.f32.mrb[9].mxu0  ;;  %v740_v16 = vadd.f32 %v6920_v13, %v8320_v53 }
 0x181   : > { %v6921_v15 = vpop.f32.mrb[10].mxu0  ;;  %v732_v19 = vadd.f32 %v8320_v53, %v731_v14 }
 0x182   : > { %v743_v17 = vadd.f32 %v6921_v15, %v8320_v53  ;;  %v734_v18 = vpop.f32.mrb[11].mxu0 }
 0x183   : > { %v735_v20 = vadd.f32 %v8320_v53, %v734_v18  ;;  %7145 = vrot.lane.b32.xlu0 %v7144_v9, %s8054_s23 }
 0x184   : > { %v7164_v21 = vpack.i.bf16 %v743_v17, %v740_v16  ;;  %v8350_v22 = vpack.c.bf16 %v743_v17, %v740_v16 }
 0x185   : > { %v7154_v23 = vpack.i.bf16 %v735_v20, %v732_v19  ;;  %v8352_v24 = vpack.c.bf16 %v735_v20, %v732_v19 }
 0x187   : > { %v6924_v25 = vpop.f32.mrb[12].mxu0  ;;  %7155 = vrot.lane.b32.xlu0 %v7154_v23, %s8054_s23 }
 0x188   : > { %v747_v26 = vpop.f32.mrb[13].mxu0  ;;  %v756_v28 = vadd.f32 %v6924_v25, %v8320_v53 }
 0x189   : > { %v6925_v27 = vpop.f32.mrb[14].mxu0  ;;  %v748_v31 = vadd.f32 %v8320_v53, %v747_v26 }
 0x18a   : > { %v759_v29 = vadd.f32 %v6925_v27, %v8320_v53  ;;  %v750_v30 = vpop.f32.mrb[15].mxu0 }
 0x18b   : > { %v751_v32 = vadd.f32 %v8320_v53, %v750_v30  ;;  %7165 = vrot.lane.b32.xlu0 %v7164_v21, %s8054_s23 }
 0x18c   : > { %v7179_v33 = vpack.i.bf16 %v759_v29, %v756_v28  ;;  %v8360_v34 = vpack.c.bf16 %v759_v29, %v756_v28 }
 0x18d   : > { %v7174_v35 = vpack.i.bf16 %v751_v32, %v748_v31  ;;  %v8362_v36 = vpack.c.bf16 %v751_v32, %v748_v31 }
 0x18f   : > { %v6928_v37 = vpop.f32.mrb[16].mxu0  ;;  %7175 = vrot.lane.b32.xlu0 %v7174_v35, %s8054_s23 }
 0x190   : > { %v763_v38 = vpop.f32.mrb[17].mxu0  ;;  %v772_v40 = vadd.f32 %v6928_v37, %v8320_v53 }
 0x191   : > { %v6929_v39 = vpop.f32.mrb[18].mxu0  ;;  %v764_v43 = vadd.f32 %v8320_v53, %v763_v38 }
 0x192   : > { %v775_v41 = vadd.f32 %v6929_v39, %v8320_v53  ;;  %v766_v42 = vpop.f32.mrb[19].mxu0 }
 0x193   : > { %v767_v44 = vadd.f32 %v8320_v53, %v766_v42  ;;  %7180 = vrot.lane.b32.xlu0 %v7179_v33, %s8054_s23 }
 0x194   : > { %v7129_v45 = vpack.i.bf16 %v775_v41, %v772_v40  ;;  %v8370_v46 = vpack.c.bf16 %v775_v41, %v772_v40 }
 0x195   : > { %v7119_v47 = vpack.i.bf16 %v767_v44, %v764_v43  ;;  %v8372_v48 = vpack.c.bf16 %v767_v44, %v764_v43 }
 0x197   : > { %v6932_v49 = vpop.f32.mrb[20].mxu0  ;;  %7120 = vrot.lane.b32.xlu1 %v7119_v47, %s8054_s23  ;;  %1018 = vrot.lane.b32.xlu0 %v8328_v0, %s12171_s24 }
 0x198   : > { %v788_v50 = vadd.f32 %v6932_v49, %v8320_v53  ;;  %v779_v51 = vpop.f32.mrb[21].mxu0 }
 0x199   : > { %v780_v52 = vadd.f32 %v8320_v53, %v779_v51  ;;  %v6933_v54 = vpop.f32.mrb[22].mxu0 }
 0x19a   : > { %v791_v55 = vadd.f32 %v6933_v54, %v8320_v53  ;;  %v782_v56 = vpop.f32.mrb[23].mxu0 }
 0x19b   : > { %v783_v57 = vadd.f32 %v8320_v53, %v782_v56  ;;  %7130 = vrot.lane.b32.xlu1 %v7129_v45, %s8054_s23 }
 0x19c   : > { %v7149_v58 = vpack.i.bf16 %v791_v55, %v788_v50  ;;  %v8382_v59 = vpack.c.bf16 %v791_v55, %v788_v50 }
 0x19d   : > { %v7139_v60 = vpack.i.bf16 %v783_v57, %v780_v52  ;;  %v8384_v61 = vpack.c.bf16 %v783_v57, %v780_v52 }
 0x19f   : > { %v6936_v63 = vpop.f32.mrb[24].mxu0  ;;  %7140 = vrot.lane.b32.xlu1 %v7139_v60, %s8054_s23 }
 0x1a0   : > { %v804_v1 = vadd.f32 %v6936_v63, %v8320_v53  ;;  %v795_v2 = vpop.f32.mrb[25].mxu0 }
 0x1a1   : > { %v796_v3 = vadd.f32 %v8320_v53, %v795_v2  ;;  %v6937_v4 = vpop.f32.mrb[26].mxu0 }
 0x1a2   : > { %v807_v5 = vadd.f32 %v6937_v4, %v8320_v53  ;;  %v798_v6 = vpop.f32.mrb[27].mxu0 }
 0x1a3   : > { %v799_v7 = vadd.f32 %v8320_v53, %v798_v6  ;;  %7150 = vrot.lane.b32.xlu1 %v7149_v58, %s8054_s23 }
 0x1a4   : > { %v7169_v8 = vpack.i.bf16 %v807_v5, %v804_v1  ;;  %v8392_v9 = vpack.c.bf16 %v807_v5, %v804_v1 }
 0x1a5   : > { %v7159_v11 = vpack.i.bf16 %v799_v7, %v796_v3  ;;  %v8394_v13 = vpack.c.bf16 %v799_v7, %v796_v3 }
 0x1a7   : > { %v6940_v14 = vpop.f32.mrb[28].mxu0  ;;  %7160 = vrot.lane.b32.xlu1 %v7159_v11, %s8054_s23 }
 0x1a8   : > { %v820_v15 = vadd.f32 %v6940_v14, %v8320_v53  ;;  %v811_v16 = vpop.f32.mrb[29].mxu0 }
 0x1a9   : > { %v812_v17 = vadd.f32 %v8320_v53, %v811_v16  ;;  %v6941_v18 = vpop.f32.mrb[30].mxu0 }
 0x1aa   : > { %v823_v19 = vadd.f32 %v6941_v18, %v8320_v53  ;;  %v814_v20 = vpop.f32.mrb[31].mxu0 }
 0x1ab   : > { %v815_v21 = vadd.f32 %v8320_v53, %v814_v20  ;;  %7170 = vrot.lane.b32.xlu1 %v7169_v8, %s8054_s23 }
 0x1ac   : > { %v7189_v23 = vpack.i.bf16 %v823_v19, %v820_v15  ;;  %v8402_v25 = vpack.c.bf16 %v823_v19, %v820_v15 }
 0x1ad   : > { %v7184_v26 = vpack.i.bf16 %v815_v21, %v812_v17  ;;  %v8404_v27 = vpack.c.bf16 %v815_v21, %v812_v17 }
 0x1af   : > { %7185 = vrot.lane.b32.xlu1 %v7184_v26, %s8054_s23 }
 0x1b3   : > { %7190 = vrot.lane.b32.xlu1 %v7189_v23, %s8054_s23 }
 0x1b7   : > { %1034 = vrot.lane.b32.xlu1 %v8372_v48, %s12171_s24 }
 0x1e9   : > { %v7116_v28 = vpop.permute.xlu0 %7115 }
 0x1ea   : > { %v7118_v29 = vunpack.i.h.bf16 %v7116_v28  ;;  %v7117_v30 = vunpack.i.l.bf16 %v7116_v28 }
 0x1ec   : > { %v8410_v31 = vpack.c.bf16 %v7118_v29, %v7117_v30 }
 0x1ed   : > { %v7126_v53 = vpop.permute.xlu0 %7125 }
 0x1ee   : > { %1050 = vrot.lane.b32.xlu0 %v8410_v31, %s12171_s24  ;;  %v7128_v32 = vunpack.i.h.bf16 %v7126_v53  ;;  %v7127_v33 = vunpack.i.l.bf16 %v7126_v53 }
 0x1f0   : > { %v8416_v35 = vpack.c.bf16 %v7128_v32, %v7127_v33 }
 0x1f1   : > { %v7136_v37 = vpop.permute.xlu0 %7135 }
 0x1f2   : > { %1020 = vrot.lane.b32.xlu0 %v8326_v62, %s12171_s24  ;;  %v7138_v38 = vunpack.i.h.bf16 %v7136_v37  ;;  %v7137_v39 = vunpack.i.l.bf16 %v7136_v37 }
 0x1f4   : > { %v8422_v40 = vpack.c.bf16 %v7138_v38, %v7137_v39 }
 0x1f5   : > { %v7146_v41 = vpop.permute.xlu0 %7145 }
 0x1f6   : > { %1052 = vrot.lane.b32.xlu0 %v8416_v35, %s12171_s24  ;;  %v7148_v42 = vunpack.i.h.bf16 %v7146_v41  ;;  %v7147_v43 = vunpack.i.l.bf16 %v7146_v41 }
 0x1f8   : > { %v8428_v44 = vpack.c.bf16 %v7148_v42, %v7147_v43 }
 0x1f9   : > { %v7156_v45 = vpop.permute.xlu0 %7155 }
 0x1fa   : > { %1022 = vrot.lane.b32.xlu0 %v8342_v12, %s12171_s24  ;;  %v7158_v47 = vunpack.i.h.bf16 %v7156_v45  ;;  %v7157_v49 = vunpack.i.l.bf16 %v7156_v45 }
 0x1fc   : > { %v8436_v55 = vpack.c.bf16 %v7158_v47, %v7157_v49 }
 0x1fd   : > { %v7166_v56 = vpop.permute.xlu0 %7165 }
 0x1fe   : > { %1054 = vrot.lane.b32.xlu0 %v8422_v40, %s12171_s24  ;;  %v7168_v58 = vunpack.i.h.bf16 %v7166_v56  ;;  %v7167_v60 = vunpack.i.l.bf16 %v7166_v56 }
 0x200   : > { %v8446_v4 = vpack.c.bf16 %v7168_v58, %v7167_v60 }
 0x201   : > { %v7176_v5 = vpop.permute.xlu0 %7175 }
 0x202   : > { %1024 = vrot.lane.b32.xlu0 %v8340_v10, %s12171_s24  ;;  %v7178_v7 = vunpack.i.h.bf16 %v7176_v5  ;;  %v7177_v8 = vunpack.i.l.bf16 %v7176_v5 }
 0x204   : > { %v8455_v17 = vpack.c.bf16 %v7178_v7, %v7177_v8 }
 0x205   : > { %v7181_v18 = vpop.permute.xlu0 %7180 }
 0x206   : > { %1056 = vrot.lane.b32.xlu0 %v8428_v44, %s12171_s24  ;;  %v7183_v20 = vunpack.i.h.bf16 %v7181_v18  ;;  %v7182_v21 = vunpack.i.l.bf16 %v7181_v18 }
 0x208   : > { %v8464_v30 = vpack.c.bf16 %v7183_v20, %v7182_v21 }
 0x209   : > { %v7121_v50 = vpop.permute.xlu1 %7120  ;;  %v1019_v32 = vpop.permute.xlu0 %1018 }
 0x20a   : > { %v7123_v51 = vunpack.i.h.bf16 %v7121_v50  ;;  %v7122_v52 = vunpack.i.l.bf16 %v7121_v50  ;;  %1026 = vrot.lane.b32.xlu0 %v8352_v24, %s12171_s24  ;;  %12185 = vst [vmem:[#allocation8_spill] sm:$0xff] %v8464_v30  ;;  %v1132_v39 = vsel %vm1082_vm2, %v1019_v32, 0 }
 0x20c   : > { %v8434_v54 = vpack.c.bf16 %v7123_v51, %v7122_v52 }
 0x20d   : > { %v7131_v57 = vpop.permute.xlu1 %7130 }
 0x20e   : > { %1066 = vrot.lane.b32.xlu1 %v8434_v54, %s12171_s24  ;;  %1058 = vrot.lane.b32.xlu0 %v8436_v55, %s12171_s24  ;;  %v7133_v63 = vunpack.i.h.bf16 %v7131_v57  ;;  %v7132_v1 = vunpack.i.l.bf16 %v7131_v57 }
 0x210   : > { %v979_v3 = vpack.c.bf16 %v7133_v63, %v7132_v1 }
 0x211   : > { %v7141_v2 = vpop.permute.xlu1 %7140 }
 0x212   : > { %1036 = vrot.lane.b32.xlu1 %v8370_v46, %s12171_s24  ;;  %1028 = vrot.lane.b32.xlu0 %v8350_v22, %s12171_s24  ;;  %v7143_v11 = vunpack.i.h.bf16 %v7141_v2  ;;  %v7142_v14 = vunpack.i.l.bf16 %v7141_v2 }
 0x214   : > { %v980_v16 = vpack.c.bf16 %v7143_v11, %v7142_v14 }
 0x215   : > { %v7151_v6 = vpop.permute.xlu1 %7150 }
 0x216   : > { %1068 = vrot.lane.b32.xlu1 %v979_v3, %s12171_s24  ;;  %1060 = vrot.lane.b32.xlu0 %v8446_v4, %s12171_s24  ;;  %v7153_v23 = vunpack.i.h.bf16 %v7151_v6  ;;  %v7152_v26 = vunpack.i.l.bf16 %v7151_v6 }
 0x218   : > { %v981_v29 = vpack.c.bf16 %v7153_v23, %v7152_v26 }
 0x219   : > { %v7161_v15 = vpop.permute.xlu1 %7160 }
 0x21a   : > { %1038 = vrot.lane.b32.xlu1 %v8384_v61, %s12171_s24  ;;  %1030 = vrot.lane.b32.xlu0 %v8362_v36, %s12171_s24  ;;  %v7163_v33 = vunpack.i.h.bf16 %v7161_v15  ;;  %v7162_v37 = vunpack.i.l.bf16 %v7161_v15 }
 0x21c   : > { %v982_v41 = vpack.c.bf16 %v7163_v33, %v7162_v37 }
 0x21d   : > { %v7171_v19 = vpop.permute.xlu1 %7170 }
 0x21e   : > { %1070 = vrot.lane.b32.xlu1 %v980_v16, %s12171_s24  ;;  %1062 = vrot.lane.b32.xlu0 %v8455_v17, %s12171_s24  ;;  %v7173_v42 = vunpack.i.h.bf16 %v7171_v19  ;;  %v7172_v43 = vunpack.i.l.bf16 %v7171_v19 }
 0x220   : > { %v983_v45 = vpack.c.bf16 %v7173_v42, %v7172_v43 }
 0x221   : > { %v7186_v28 = vpop.permute.xlu1 %7185 }
 0x222   : > { %1040 = vrot.lane.b32.xlu1 %v8382_v59, %s12171_s24  ;;  %1032 = vrot.lane.b32.xlu0 %v8360_v34, %s12171_s24  ;;  %v7188_v47 = vunpack.i.h.bf16 %v7186_v28  ;;  %v7187_v49 = vunpack.i.l.bf16 %v7186_v28 }
 0x224   : > { %v984_v50 = vpack.c.bf16 %v7188_v47, %v7187_v49 }
 0x225   : > { %v7191_v53 = vpop.permute.xlu1 %7190 }
 0x226   : > { %1072 = vrot.lane.b32.xlu1 %v981_v29, %s12171_s24  ;;  %1064 = vrot.lane.b32.xlu0 %v8464_v30, %s12171_s24  ;;  %v7193_v51 = vunpack.i.h.bf16 %v7191_v53  ;;  %v7192_v52 = vunpack.i.l.bf16 %v7191_v53 }
 0x228   : > { %v8494_v56 = vpack.c.bf16 %v7193_v51, %v7192_v52 }
 0x229   : > { %v1035_v38 = vpop.permute.xlu1 %1034 }
 0x22a   : > { %1042 = vrot.lane.b32.xlu1 %v8394_v13, %s12171_s24  ;;  %6964 = vmatprep.subr.msk.bf16.mxu1 %vm1082_vm2, %v1035_v38 }
 0x22b   : > { %2644 = vrot.lane.b32.xlu0 %v8328_v0, %s8054_s23  ;;  %6471 = vmatpush3.bf16.xpose.msra.mxu1 %v1132_v39 }
 0x22e   : > { %1074 = vrot.lane.b32.xlu1 %v982_v41, %s12171_s24 }
 0x22f   : > { %2662 = vrot.lane.b32.xlu0 %v8370_v46, %s8054_s23 }
 0x232   : > { %1044 = vrot.lane.b32.xlu1 %v8392_v9, %s12171_s24 }
 0x233   : > { %2646 = vrot.lane.b32.xlu0 %v8326_v62, %s8054_s23 }
 0x236   : > { %1076 = vrot.lane.b32.xlu1 %v983_v45, %s12171_s24 }
 0x237   : > { %2694 = vrot.lane.b32.xlu0 %v979_v3, %s8054_s23 }
 0x23a   : > { %1046 = vrot.lane.b32.xlu1 %v8404_v27, %s12171_s24 }
 0x23b   : > { %2678 = vrot.lane.b32.xlu0 %v8416_v35, %s8054_s23 }
 0x23e   : > { %1078 = vrot.lane.b32.xlu1 %v984_v50, %s12171_s24 }
 0x23f   : > { %2664 = vrot.lane.b32.xlu0 %v8384_v61, %s8054_s23 }
 0x242   : > { %1048 = vrot.lane.b32.xlu1 %v8402_v25, %s12171_s24 }
 0x243   : > { %2696 = vrot.lane.b32.xlu0 %v980_v16, %s8054_s23 }
 0x246   : > { %1080 = vrot.lane.b32.xlu1 %v8494_v56, %s12171_s24  ;;  %s8060_s24 = smov 80  }
 0x247   : > { %2666 = vrot.lane.b32.xlu0 %v8382_v59, %s8054_s23 }
 0x24a   : > { %2660 = vrot.lane.b32.xlu1 %v8372_v48, %s8054_s23 }
 0x24b   : > { %2698 = vrot.lane.b32.xlu0 %v981_v29, %s8054_s23 }
 0x24e   : > { %2692 = vrot.lane.b32.xlu1 %v8434_v54, %s8054_s23 }
 0x24f   : > { %2682 = vrot.lane.b32.xlu0 %v8428_v44, %s8054_s23 }
 0x252   : > { %2676 = vrot.lane.b32.xlu1 %v8410_v31, %s8054_s23 }
 0x253   : > { %2668 = vrot.lane.b32.xlu0 %v8394_v13, %s8054_s23 }
 0x256   : > { %2648 = vrot.lane.b32.xlu1 %v8342_v12, %s8054_s23 }
 0x257   : > { %2652 = vrot.lane.b32.xlu0 %v8352_v24, %s8054_s23 }
 0x25a   : > { %2680 = vrot.lane.b32.xlu1 %v8422_v40, %s8054_s23 }
 0x25b   : > { %2684 = vrot.lane.b32.xlu0 %v8436_v55, %s8054_s23 }
 0x25e   : > { %2650 = vrot.lane.b32.xlu1 %v8340_v10, %s8054_s23 }
 0x25f   : > { %2670 = vrot.lane.b32.xlu0 %v8392_v9, %s8054_s23 }
 0x260   : > { %v1051_v31 = vpop.permute.xlu0 %1050 }
 0x261   : > { %v1180_v1 = vsel %vm1082_vm2, %v1051_v31, 0 }
 0x262   : > { %2700 = vrot.lane.b32.xlu1 %v982_v41, %s8054_s23 }
 0x263   : > { %2702 = vrot.lane.b32.xlu0 %v983_v45, %s8054_s23 }
 0x264   : > { %v1021_v35 = vpop.permute.xlu0 %1020 }
 0x266   : > { %2654 = vrot.lane.b32.xlu1 %v8350_v22, %s8054_s23 }
 0x267   : > { %2686 = vrot.lane.b32.xlu0 %v8446_v4, %s8054_s23  ;;  %v1135_v4 = vsel %vm1082_vm2, %v1021_v35, 0 }
 0x268   : > { %v1053_v40 = vpop.permute.xlu0 %1052 }
 0x269   : > { %v1183_v7 = vsel %vm1082_vm2, %v1053_v40, 0 }
 0x26a   : > { %2704 = vrot.lane.b32.xlu1 %v984_v50, %s8054_s23 }
 0x26b   : > { %2672 = vrot.lane.b32.xlu0 %v8404_v27, %s8054_s23 }
 0x26c   : > { %v1023_v44 = vpop.permute.xlu0 %1022 }
 0x26d   : > { %v1138_v14 = vsel %vm1082_vm2, %v1023_v44, 0 }
 0x26f   : > { %2656 = vrot.lane.b32.xlu0 %v8362_v36, %s8054_s23 }
 0x270   : > { %v1055_v54 = vpop.permute.xlu0 %1054 }
 0x273   : > { %2688 = vrot.lane.b32.xlu0 %v8455_v17, %s8054_s23  ;;  %v1186_v17 = vsel %vm1082_vm2, %v1055_v54, 0 }
 0x274   : > { %v1025_v55 = vpop.permute.xlu0 %1024 }
 0x275   : > { %v1141_v20 = vsel %vm1082_vm2, %v1025_v55, 0 }
 0x277   : > { %2674 = vrot.lane.b32.xlu0 %v8402_v25, %s8054_s23 }
 0x278   : > { %v1057_v57 = vpop.permute.xlu0 %1056 }
 0x279   : > { %v1189_v26 = vsel %vm1082_vm2, %v1057_v57, 0 }
 0x27c   : > { %v1027_v58 = vpop.permute.xlu0 %1026 }
 0x27d   : > { %v1144_v53 = vsel %vm1082_vm2, %v1027_v58, 0 }
 0x280   : > { %v1067_v60 = vpop.permute.xlu1 %1066  ;;  %v1059_v63 = vpop.permute.xlu0 %1058 }
 0x281   : > { %6972 = vmatprep.subr.msk.bf16.mxu0 %vm1082_vm2, %v1067_v60  ;;  %v1192_v33 = vsel %vm1082_vm2, %v1059_v63, 0 }
 0x282   : > { %6519 = vmatpush3.bf16.xpose.msra.mxu0 %v1180_v1 }
 0x284   : > { %v1037_v2 = vpop.permute.xlu1 %1036  ;;  %v1029_v3 = vpop.permute.xlu0 %1028 }
 0x285   : > { %6965 = vmatprep.subr.msk.bf16.mxu1 %vm1082_vm2, %v1037_v2  ;;  %v1147_v41 = vsel %vm1082_vm2, %v1029_v3, 0 }
 0x286   : > { %6473 = vmatpush3.bf16.xpose.msra.mxu1 %v1135_v4 }
 0x288   : > { %v1069_v5 = vpop.permute.xlu1 %1068  ;;  %v1061_v6 = vpop.permute.xlu0 %1060 }
 0x289   : > { %6973 = vmatprep.subr.msk.bf16.mxu0 %vm1082_vm2, %v1069_v5  ;;  %v1195_v43 = vsel %vm1082_vm2, %v1061_v6, 0 }
 0x28a   : > { %6521 = vmatpush3.bf16.xpose.msra.mxu0 %v1183_v7 }
 0x28c   : > { %v1039_v8 = vpop.permute.xlu1 %1038  ;;  %v1031_v11 = vpop.permute.xlu0 %1030 }
 0x28d   : > { %6966 = vmatprep.subr.msk.bf16.mxu1 %vm1082_vm2, %v1039_v8  ;;  %v1150_v50 = vsel %vm1082_vm2, %v1031_v11, 0 }
 0x28e   : > { %6475 = vmatpush3.bf16.xpose.msra.mxu1 %v1138_v14 }
 0x290   : > { %v1071_v15 = vpop.permute.xlu1 %1070  ;;  %v1063_v16 = vpop.permute.xlu0 %1062 }
 0x291   : > { %6974 = vmatprep.subr.msk.bf16.mxu0 %vm1082_vm2, %v1071_v15  ;;  %v1198_v52 = vsel %vm1082_vm2, %v1063_v16, 0 }
 0x292   : > { %6523 = vmatpush3.bf16.xpose.msra.mxu0 %v1186_v17 }
 0x294   : > { %v1041_v18 = vpop.permute.xlu1 %1040  ;;  %v1033_v19 = vpop.permute.xlu0 %1032 }
 0x295   : > { %6967 = vmatprep.subr.msk.bf16.mxu1 %vm1082_vm2, %v1041_v18  ;;  %v1153_v44 = vsel %vm1082_vm2, %v1033_v19, 0 }
 0x296   : > { %6477 = vmatpush3.bf16.xpose.msra.mxu1 %v1141_v20 }
 0x298   : > { %v1073_v21 = vpop.permute.xlu1 %1072  ;;  %v1065_v23 = vpop.permute.xlu0 %1064 }
 0x299   : > { %6975 = vmatprep.subr.msk.bf16.mxu0 %vm1082_vm2, %v1073_v21  ;;  %v1201_v55 = vsel %vm1082_vm2, %v1065_v23, 0 }
 0x29a   : > { %6525 = vmatpush3.bf16.xpose.msra.mxu0 %v1189_v26 }
 0x29c   : > { %v1043_v28 = vpop.permute.xlu1 %1042 }
 0x29d   : > { %v2645_v29 = vpop.permute.xlu0 %2644  ;;  %6968 = vmatprep.subr.msk.bf16.mxu1 %vm1082_vm2, %v1043_v28 }
 0x29e   : > { %6479 = vmatpush3.bf16.xpose.msra.mxu1 %v1144_v53 }
 0x2a0   : > { %v1075_v32 = vpop.permute.xlu1 %1074 }
 0x2a1   : > { %v2663_v37 = vpop.permute.xlu0 %2662  ;;  %6976 = vmatprep.subr.msk.bf16.mxu0 %vm1082_vm2, %v1075_v32 }
 0x2a2   : > { %6527 = vmatpush3.bf16.xpose.msra.mxu0 %v1192_v33 }
 0x2a4   : > { %v1045_v38 = vpop.permute.xlu1 %1044 }
 0x2a5   : > { %v2647_v39 = vpop.permute.xlu0 %2646  ;;  %6969 = vmatprep.subr.msk.bf16.mxu1 %vm1082_vm2, %v1045_v38 }
 0x2a6   : > { %6481 = vmatpush3.bf16.xpose.msra.mxu1 %v1147_v41 }
 0x2a8   : > { %v1077_v42 = vpop.permute.xlu1 %1076 }
 0x2a9   : > { %v2695_v45 = vpop.permute.xlu0 %2694  ;;  %6977 = vmatprep.subr.msk.bf16.mxu0 %vm1082_vm2, %v1077_v42 }
 0x2aa   : > { %6529 = vmatpush3.bf16.xpose.msra.mxu0 %v1195_v43 }
 0x2ac   : > { %v1047_v47 = vpop.permute.xlu1 %1046 }
 0x2ad   : > { %v2679_v49 = vpop.permute.xlu0 %2678  ;;  %6970 = vmatprep.subr.msk.bf16.mxu1 %vm1082_vm2, %v1047_v47 }
 0x2ae   : > { %6483 = vmatpush3.bf16.xpose.msra.mxu1 %v1150_v50 }
 0x2b0   : > { %v1079_v51 = vpop.permute.xlu1 %1078 }
 0x2b1   : > { %v2665_v31 = vpop.permute.xlu0 %2664  ;;  %6978 = vmatprep.subr.msk.bf16.mxu0 %vm1082_vm2, %v1079_v51 }
 0x2b2   : > { %6531 = vmatpush3.bf16.xpose.msra.mxu0 %v1198_v52 }
 0x2b4   : > { %v1049_v35 = vpop.permute.xlu1 %1048 }
 0x2b5   : > { %v2697_v40 = vpop.permute.xlu0 %2696  ;;  %6971 = vmatprep.subr.msk.bf16.mxu1 %vm1082_vm2, %v1049_v35 }
 0x2b6   : > { %6485 = vmatpush3.bf16.xpose.msra.mxu1 %v1153_v44 }
 0x2b8   : > { %v1081_v54 = vpop.permute.xlu1 %1080 }
 0x2b9   : > { %v2667_v57 = vpop.permute.xlu0 %2666  ;;  %6979 = vmatprep.subr.msk.bf16.mxu0 %vm1082_vm2, %v1081_v54 }
 0x2ba   : > { %6533 = vmatpush3.bf16.xpose.msra.mxu0 %v1201_v55 }
 0x2bc   : > { %v2661_v58 = vpop.permute.xlu1 %2660 }
 0x2bd   : > { %v2699_v60 = vpop.permute.xlu0 %2698  ;;  %6487 = vmatmul.mubr.msk.bf16.vlgmr.msra.gmra.mrb[0].mxu1 %vm1082_vm2, %v8328_v0  ;;  %6566 = vmatprep.subr.bf16.mxu1 %v2661_v58 }
 0x2be   : > { %6488 = vmatprep.mubr.msk.bf16.mxu1 %vm1082_vm2, %v8326_v62  ;;  %6567 = vmatpush3.bf16.msra.mxu1 %v2645_v29 }
 0x2bf   : > { %6568 = vmatprep.subr.bf16.mxu1 %v2663_v37 }
 0x2c0   : > { %v2693_v63 = vpop.permute.xlu1 %2692 }
 0x2c1   : > { %v2683_v1 = vpop.permute.xlu0 %2682  ;;  %6535 = vmatmul.mubr.msk.bf16.vlgmr.msra.gmra.mrb[32].mxu0 %vm1082_vm2, %v8328_v0  ;;  %6678 = vmatprep.subr.bf16.mxu0 %v2693_v63 }
 0x2c2   : > { %6536 = vmatprep.mubr.msk.bf16.mxu0 %vm1082_vm2, %v8326_v62  ;;  %6569 = vmatpush3.bf16.msra.mxu1 %v2647_v39 }
 0x2c3   : > { %6570 = vmatprep.subr.bf16.mxu1 %v2665_v31 }
 0x2c4   : > { %v2677_v2 = vpop.permute.xlu1 %2676 }
 0x2c5   : > { %v2669_v3 = vpop.permute.xlu0 %2668  ;;  %6489 = vmatmul.mubr.msk.bf16.gmra.mrb[4].mxu1 %vm1082_vm2, %v8326_v62  ;;  %6679 = vmatpush3.bf16.msra.mxu0 %v2677_v2 }
 0x2c6   : > { %6490 = vmatprep.mubr.msk.bf16.mxu1 %vm1082_vm2, %v8342_v12  ;;  %6680 = vmatprep.subr.bf16.mxu0 %v2695_v45 }
 0x2c8   : > { %v2649_v4 = vpop.permute.xlu1 %2648 }
 0x2c9   : > { %v2653_v5 = vpop.permute.xlu0 %2652  ;;  %6537 = vmatmul.mubr.msk.bf16.gmra.mrb[36].mxu0 %vm1082_vm2, %v8326_v62  ;;  %6571 = vmatpush3.bf16.msra.mxu1 %v2649_v4 }
 0x2ca   : > { %6681 = vmatpush3.bf16.msra.mxu0 %v2679_v49  ;;  %6538 = vmatprep.mubr.msk.bf16.mxu0 %vm1082_vm2, %v8342_v12 }
 0x2cb   : > { %6572 = vmatprep.subr.bf16.mxu1 %v2667_v57  ;;  %6682 = vmatprep.subr.bf16.mxu0 %v2697_v40 }
 0x2cc   : > { %v2681_v0 = vpop.permute.xlu1 %2680 }
 0x2cd   : > { %v2685_v6 = vpop.permute.xlu0 %2684  ;;  %6491 = vmatmul.mubr.msk.bf16.gmra.mrb[8].mxu1 %vm1082_vm2, %v8342_v12 }
 0x2ce   : > { %6683 = vmatpush3.bf16.msra.mxu0 %v2681_v0  ;;  %6492 = vmatprep.mubr.msk.bf16.mxu1 %vm1082_vm2, %v8340_v10 }
 0x2cf   : > { %6684 = vmatprep.subr.bf16.mxu0 %v2699_v60 }
 0x2d0   : > { %v2651_v7 = vpop.permute.xlu1 %2650 }
 0x2d1   : > { %v2671_v8 = vpop.permute.xlu0 %2670  ;;  %6539 = vmatmul.mubr.msk.bf16.gmra.mrb[40].mxu0 %vm1082_vm2, %v8342_v12  ;;  %6573 = vmatpush3.bf16.msra.mxu1 %v2651_v7 }
 0x2d2   : > { %6685 = vmatpush3.bf16.msra.mxu0 %v2683_v1  ;;  %6540 = vmatprep.mubr.msk.bf16.mxu0 %vm1082_vm2, %v8340_v10 }
 0x2d3   : > { %6574 = vmatprep.subr.bf16.mxu1 %v2669_v3 }
 0x2d4   : > { %v2701_v62 = vpop.permute.xlu1 %2700 }
 0x2d5   : > { %v2703_v11 = vpop.permute.xlu0 %2702  ;;  %6493 = vmatmul.mubr.msk.bf16.gmra.mrb[12].mxu1 %vm1082_vm2, %v8340_v10  ;;  %6686 = vmatprep.subr.bf16.mxu0 %v2701_v62 }
 0x2d6   : > { %6575 = vmatpush3.bf16.msra.mxu1 %v2653_v5  ;;  %6494 = vmatprep.mubr.msk.bf16.mxu1 %vm1082_vm2, %v8352_v24 }
 0x2d7   : > { %6576 = vmatprep.subr.bf16.mxu1 %v2671_v8  ;;  %6687 = vmatpush3.bf16.msra.mxu0 %v2685_v6 }
 0x2d8   : > { %6688 = vmatprep.subr.bf16.mxu0 %v2703_v11  ;;  %v2655_v12 = vpop.permute.xlu1 %2654 }
 0x2d9   : > { %v2687_v14 = vpop.permute.xlu0 %2686  ;;  %6541 = vmatmul.mubr.msk.bf16.gmra.mrb[44].mxu0 %vm1082_vm2, %v8340_v10 }
 0x2da   : > { %6577 = vmatpush3.bf16.msra.mxu1 %v2655_v12  ;;  %6542 = vmatprep.mubr.msk.bf16.mxu0 %vm1082_vm2, %v8352_v24 }
 0x2db   : > { %6689 = vmatpush3.bf16.msra.mxu0 %v2687_v14 }
 0x2dc   : > { %v2705_v15 = vpop.permute.xlu1 %2704 }
 0x2dd   : > { %v2673_v16 = vpop.permute.xlu0 %2672  ;;  %6495 = vmatmul.mubr.msk.bf16.gmra.mrb[16].mxu1 %vm1082_vm2, %v8352_v24  ;;  %6690 = vmatprep.subr.bf16.mxu0 %v2705_v15 }
 0x2de   : > { %6578 = vmatprep.subr.bf16.mxu1 %v2673_v16  ;;  %6496 = vmatprep.mubr.msk.bf16.mxu1 %vm1082_vm2, %v8350_v22 }
 0x2e1   : > { %v2657_v17 = vpop.permute.xlu0 %2656  ;;  %6543 = vmatmul.mubr.msk.bf16.gmra.mrb[48].mxu0 %vm1082_vm2, %v8352_v24 }
 0x2e2   : > { %6579 = vmatpush3.bf16.msra.mxu1 %v2657_v17  ;;  %6544 = vmatprep.mubr.msk.bf16.mxu0 %vm1082_vm2, %v8350_v22 }
 0x2e5   : > { %v2689_v10 = vpop.permute.xlu0 %2688  ;;  %6497 = vmatmul.mubr.msk.bf16.gmra.mrb[20].mxu1 %vm1082_vm2, %v8350_v22 }
 0x2e6   : > { %6691 = vmatpush3.bf16.msra.mxu0 %v2689_v10  ;;  %6498 = vmatprep.mubr.msk.bf16.mxu1 %vm1082_vm2, %v8362_v36 }
 0x2e9   : > { %v2675_v18 = vpop.permute.xlu0 %2674  ;;  %6545 = vmatmul.mubr.msk.bf16.gmra.mrb[52].mxu0 %vm1082_vm2, %v8350_v22 }
 0x2ea   : > { %6580 = vmatprep.subr.bf16.mxu1 %v2675_v18  ;;  %6546 = vmatprep.mubr.msk.bf16.mxu0 %vm1082_vm2, %v8362_v36 }
 0x2ed   : > { %6499 = vmatmul.mubr.msk.bf16.gmra.mrb[24].mxu1 %vm1082_vm2, %v8362_v36 }
 0x2ee   : > { %6500 = vmatprep.mubr.msk.bf16.mxu1 %vm1082_vm2, %v8360_v34 }
 0x2f1   : > { %6547 = vmatmul.mubr.msk.bf16.gmra.mrb[56].mxu0 %vm1082_vm2, %v8362_v36 }
 0x2f2   : > { %6548 = vmatprep.mubr.msk.bf16.mxu0 %vm1082_vm2, %v8360_v34 }
 0x2f5   : > { %6501 = vmatmul.mubr.msk.bf16.gmra.mrb[28].mxu1 %vm1082_vm2, %v8360_v34 }
 0x2f6   : > { %6502 = vmatprep.mubr.msk.bf16.mxu1 %vm1082_vm2, %v8372_v48 }
 0x2f9   : > { %6549 = vmatmul.mubr.msk.bf16.gmra.mrb[60].mxu0 %vm1082_vm2, %v8360_v34 }
 0x2fa   : > { %6550 = vmatprep.mubr.msk.bf16.mxu0 %vm1082_vm2, %v8372_v48 }
 0x2fd   : > { %6503 = vmatmul.mubr.msk.bf16.gmra.mrb[32].mxu1 %vm1082_vm2, %v8372_v48 }
 0x2fe   : > { %6504 = vmatprep.mubr.msk.bf16.mxu1 %vm1082_vm2, %v8370_v46 }
 0x301   : > { %6551 = vmatmul.mubr.msk.bf16.gmra.mrb[64].mxu0 %vm1082_vm2, %v8372_v48 }
 0x302   : > { %6552 = vmatprep.mubr.msk.bf16.mxu0 %vm1082_vm2, %v8370_v46 }
 0x305   : > { %6505 = vmatmul.mubr.msk.bf16.gmra.mrb[36].mxu1 %vm1082_vm2, %v8370_v46 }
 0x306   : > { %6506 = vmatprep.mubr.msk.bf16.mxu1 %vm1082_vm2, %v8384_v61 }
 0x309   : > { %6553 = vmatmul.mubr.msk.bf16.gmra.mrb[68].mxu0 %vm1082_vm2, %v8370_v46 }
 0x30a   : > { %6554 = vmatprep.mubr.msk.bf16.mxu0 %vm1082_vm2, %v8384_v61 }
 0x30d   : > { %6507 = vmatmul.mubr.msk.bf16.gmra.mrb[40].mxu1 %vm1082_vm2, %v8384_v61 }
 0x30e   : > { %6508 = vmatprep.mubr.msk.bf16.mxu1 %vm1082_vm2, %v8382_v59 }
 0x311   : > { %6555 = vmatmul.mubr.msk.bf16.gmra.mrb[72].mxu0 %vm1082_vm2, %v8384_v61 }
 0x312   : > { %6556 = vmatprep.mubr.msk.bf16.mxu0 %vm1082_vm2, %v8382_v59 }
 0x315   : > { %6509 = vmatmul.mubr.msk.bf16.gmra.mrb[44].mxu1 %vm1082_vm2, %v8382_v59 }
 0x316   : > { %6510 = vmatprep.mubr.msk.bf16.mxu1 %vm1082_vm2, %v8394_v13 }
 0x319   : > { %6557 = vmatmul.mubr.msk.bf16.gmra.mrb[76].mxu0 %vm1082_vm2, %v8382_v59 }
 0x31a   : > { %6558 = vmatprep.mubr.msk.bf16.mxu0 %vm1082_vm2, %v8394_v13 }
 0x31d   : > { %6511 = vmatmul.mubr.msk.bf16.gmra.mrb[48].mxu1 %vm1082_vm2, %v8394_v13 }
 0x31e   : > { %6512 = vmatprep.mubr.msk.bf16.mxu1 %vm1082_vm2, %v8392_v9 }
 0x321   : > { %6559 = vmatmul.mubr.msk.bf16.gmra.mrb[80].mxu0 %vm1082_vm2, %v8394_v13 }
 0x322   : > { %6560 = vmatprep.mubr.msk.bf16.mxu0 %vm1082_vm2, %v8392_v9 }
 0x325   : > { %6513 = vmatmul.mubr.msk.bf16.gmra.mrb[52].mxu1 %vm1082_vm2, %v8392_v9 }
 0x326   : > { %6514 = vmatprep.mubr.msk.bf16.mxu1 %vm1082_vm2, %v8404_v27 }
 0x329   : > { %6561 = vmatmul.mubr.msk.bf16.gmra.mrb[84].mxu0 %vm1082_vm2, %v8392_v9 }
 0x32a   : > { %6562 = vmatprep.mubr.msk.bf16.mxu0 %vm1082_vm2, %v8404_v27 }
 0x32d   : > { %6515 = vmatmul.mubr.msk.bf16.gmra.mrb[56].mxu1 %vm1082_vm2, %v8404_v27 }
 0x32e   : > { %6516 = vmatprep.mubr.msk.bf16.mxu1 %vm1082_vm2, %v8402_v25 }
 0x331   : > { %6563 = vmatmul.mubr.msk.bf16.gmra.mrb[88].mxu0 %vm1082_vm2, %v8404_v27 }
 0x332   : > { %6564 = vmatprep.mubr.msk.bf16.mxu0 %vm1082_vm2, %v8402_v25 }
 0x335   : > { %6517 = vmatmul.mubr.msk.bf16.gmra.mrb[60].mxu1 %vm1082_vm2, %v8402_v25 }
 0x339   : > { %6565 = vmatmul.mubr.msk.bf16.gmra.mrb[92].mxu0 %vm1082_vm2, %v8402_v25 }
 0x390   : > { %v8692_v22 = vpop.f32.mrb[0].mxu1 }
 0x391   : > { %v8694_v24 = vpop.f32.mrb[1].mxu1 }
 0x392   : > { %v1613_v36 = vmax.f32 %v8692_v22, %v8694_v24  ;;  %v8698_v46 = vpop.f32.mrb[2].mxu1 }
 0x393   : > { %v8700_v48 = vpop.f32.mrb[3].mxu1 }
 0x394   : > { %v8702_v59 = vpop.f32.mrb[32].mxu0  ;;  %1614 = vmax.xlane.f32.xlu0 %v1613_v36  ;;  %v1616_v61 = vmax.f32 %v8698_v46, %v8700_v48 }
 0x395   : > { %12186 = vst [vmem:[#allocation9_spill] sm:$0xff] %v8702_v59  ;;  %v8706_v9 = vpop.f32.mrb[33].mxu0 }
 0x396   : > { %12187 = vst [vmem:[#allocation10_spill] sm:$0xff] %v8706_v9  ;;  %v8710_v25 = vpop.f32.mrb[34].mxu0  ;;  %1617 = vmax.xlane.f32.xlu1 %v1616_v61 }
 0x397   : > { %v8712_v27 = vpop.f32.mrb[35].mxu0 }
 0x398   : > { %v8716_v20 = vpop.f32.mrb[4].mxu1 }
 0x399   : > { %v8718_v21 = vpop.f32.mrb[5].mxu1 }
 0x39a   : > { %v8720_v23 = vpop.f32.mrb[6].mxu1  ;;  %v1619_v26 = vmax.f32 %v8716_v20, %v8718_v21 }
 0x39b   : > { %v8724_v28 = vpop.f32.mrb[7].mxu1 }
 0x39c   : > { %v1622_v29 = vmax.f32 %v8720_v23, %v8724_v28  ;;  %v8728_v53 = vpop.f32.mrb[36].mxu0  ;;  %1620 = vmax.xlane.f32.xlu1 %v1619_v26 }
 0x39d   : > { %v8730_v32 = vpop.f32.mrb[37].mxu0 }
 0x39e   : > { %v8734_v37 = vpop.f32.mrb[38].mxu0  ;;  %1623 = vmax.xlane.f32.xlu0 %v1622_v29 }
 0x39f   : > { %v8736_v38 = vpop.f32.mrb[39].mxu0 }
 0x3a0   : > { %v8740_v41 = vpop.f32.mrb[8].mxu1 }
 0x3a1   : > { %v8742_v42 = vpop.f32.mrb[9].mxu1 }
 0x3a2   : > { %v8744_v43 = vpop.f32.mrb[10].mxu1  ;;  %v1625_v45 = vmax.f32 %v8740_v41, %v8742_v42 }
 0x3a3   : > { %v8748_v47 = vpop.f32.mrb[11].mxu1 }
 0x3a4   : > { %v1628_v49 = vmax.f32 %v8744_v43, %v8748_v47  ;;  %v8752_v50 = vpop.f32.mrb[40].mxu0  ;;  %1626 = vmax.xlane.f32.xlu1 %v1625_v45 }
 0x3a5   : > { %12188 = vst [vmem:[#allocation11_spill] sm:$0xff] %v8752_v50  ;;  %v8754_v51 = vpop.f32.mrb[41].mxu0 }
 0x3a6   : > { %12189 = vst [vmem:[#allocation12_spill] sm:$0xff] %v8754_v51  ;;  %v8758_v31 = vpop.f32.mrb[42].mxu0  ;;  %1629 = vmax.xlane.f32.xlu0 %v1628_v49 }
 0x3a7   : > { %v8760_v35 = vpop.f32.mrb[43].mxu0 }
 0x3a8   : > { %v8764_v44 = vpop.f32.mrb[12].mxu1 }
 0x3a9   : > { %v8766_v54 = vpop.f32.mrb[13].mxu1 }
 0x3aa   : > { %v8768_v55 = vpop.f32.mrb[14].mxu1  ;;  %v1631_v57 = vmax.f32 %v8764_v44, %v8766_v54 }
 0x3ab   : > { %v8772_v58 = vpop.f32.mrb[15].mxu1 }
 0x3ac   : > { %v1634_v60 = vmax.f32 %v8768_v55, %v8772_v58  ;;  %v8776_v63 = vpop.f32.mrb[44].mxu0  ;;  %1632 = vmax.xlane.f32.xlu1 %v1631_v57 }
 0x3ad   : > { %v8778_v1 = vpop.f32.mrb[45].mxu0 }
 0x3ae   : > { %v8782_v3 = vpop.f32.mrb[46].mxu0  ;;  %1635 = vmax.xlane.f32.xlu0 %v1634_v60 }
 0x3af   : > { %v8784_v4 = vpop.f32.mrb[47].mxu0 }
 0x3b0   : > { %v8788_v0 = vpop.f32.mrb[16].mxu1 }
 0x3b1   : > { %12190 = vst [vmem:[#allocation13_spill] sm:$0xff] %v8788_v0  ;;  %v8790_v6 = vpop.f32.mrb[17].mxu1 }
 0x3b2   : > { %12191 = vst [vmem:[#allocation14_spill] sm:$0xff] %v8790_v6  ;;  %v8792_v7 = vpop.f32.mrb[18].mxu1  ;;  %v1637_v8 = vmax.f32 %v8788_v0, %v8790_v6 }
 0x3b3   : > { %12192 = vst [vmem:[#allocation15_spill] sm:$0xff] %v8792_v7  ;;  %v8796_v62 = vpop.f32.mrb[19].mxu1 }
 0x3b4   : > { %12193 = vst [vmem:[#allocation16_spill] sm:$0xff] %v8796_v62  ;;  %v1640_v11 = vmax.f32 %v8792_v7, %v8796_v62  ;;  %v8800_v12 = vpop.f32.mrb[48].mxu0  ;;  %1638 = vmax.xlane.f32.xlu1 %v1637_v8 }
 0x3b5   : > { %v8802_v14 = vpop.f32.mrb[49].mxu0 }
 0x3b6   : > { %v8806_v16 = vpop.f32.mrb[50].mxu0  ;;  %1641 = vmax.xlane.f32.xlu0 %v1640_v11 }
 0x3b7   : > { %v8808_v17 = vpop.f32.mrb[51].mxu0 }
 0x3b8   : > { %v8812_v18 = vpop.f32.mrb[20].mxu1 }
 0x3b9   : > { %12194 = vst [vmem:[#allocation17_spill] sm:$0xff] %v8812_v18  ;;  %v8814_v36 = vpop.f32.mrb[21].mxu1 }
 0x3ba   : > { %12195 = vst [vmem:[#allocation18_spill] sm:$0xff] %v8814_v36  ;;  %v8816_v61 = vpop.f32.mrb[22].mxu1  ;;  %v1643_v26 = vmax.f32 %v8812_v18, %v8814_v36 }
 0x3bb   : > { %12196 = vst [vmem:[#allocation19_spill] sm:$0xff] %v8816_v61  ;;  %v8820_v29 = vpop.f32.mrb[23].mxu1 }
 0x3bc   : > { %12197 = vst [vmem:[#allocation20_spill] sm:$0xff] %v8820_v29  ;;  %v1646_v45 = vmax.f32 %v8816_v61, %v8820_v29  ;;  %v8824_v49 = vpop.f32.mrb[52].mxu0  ;;  %1644 = vmax.xlane.f32.xlu1 %v1643_v26 }
 0x3bd   : > { %v8826_v57 = vpop.f32.mrb[53].mxu0 }
 0x3be   : > { %v8830_v8 = vpop.f32.mrb[54].mxu0  ;;  %1647 = vmax.xlane.f32.xlu0 %v1646_v45 }
 0x3bf   : > { %v8832_v11 = vpop.f32.mrb[55].mxu0 }
 0x3c0   : > { %v8836_v5 = vpop.f32.mrb[24].mxu1 }
 0x3c1   : > { %12198 = vst [vmem:[#allocation21_spill] sm:$0xff] %v8836_v5  ;;  %v8838_v15 = vpop.f32.mrb[25].mxu1 }
 0x3c2   : > { %12199 = vst [vmem:[#allocation22_spill] sm:$0xff] %v8838_v15  ;;  %v8840_v40 = vpop.f32.mrb[26].mxu1  ;;  %v1649_v26 = vmax.f32 %v8836_v5, %v8838_v15 }
 0x3c3   : > { %12200 = vst [vmem:[#allocation23_spill] sm:$0xff] %v8840_v40  ;;  %v8844_v2 = vpop.f32.mrb[27].mxu1 }
 0x3c4   : > { %12201 = vst [vmem:[#allocation24_spill] sm:$0xff] %v8844_v2  ;;  %v1652_v60 = vmax.f32 %v8840_v40, %v8844_v2  ;;  %v8848_v45 = vpop.f32.mrb[56].mxu0  ;;  %1650 = vmax.xlane.f32.xlu1 %v1649_v26 }
 0x3c5   : > { %v8850_v39 = vpop.f32.mrb[57].mxu0 }
 0x3c6   : > { %v8854_v52 = vpop.f32.mrb[58].mxu0  ;;  %1653 = vmax.xlane.f32.xlu0 %v1652_v60 }
 0x3c7   : > { %v8856_v19 = vpop.f32.mrb[59].mxu0 }
 0x3c8   : > { %v8860_v13 = vpop.f32.mrb[28].mxu1 }
 0x3c9   : > { %12202 = vst [vmem:[#allocation25_spill] sm:$0xff] %v8860_v13  ;;  %v8862_v15 = vpop.f32.mrb[29].mxu1 }
 0x3ca   : > { %12203 = vst [vmem:[#allocation26_spill] sm:$0xff] %v8862_v15  ;;  %v8864_v2 = vpop.f32.mrb[30].mxu1  ;;  %v1655_v26 = vmax.f32 %v8860_v13, %v8862_v15 }
 0x3cb   : > { %12204 = vst [vmem:[#allocation27_spill] sm:$0xff] %v8864_v2  ;;  %v8868_v40 = vpop.f32.mrb[31].mxu1 }
 0x3cc   : > { %12205 = vst [vmem:[#allocation28_spill] sm:$0xff] %v8868_v40  ;;  %v1658_v10 = vmax.f32 %v8864_v2, %v8868_v40  ;;  %v8872_v60 = vpop.f32.mrb[60].mxu0  ;;  %1656 = vmax.xlane.f32.xlu1 %v1655_v26 }
 0x3cd   : > { %v8874_v5 = vpop.f32.mrb[61].mxu0 }
 0x3ce   : > { %v8878_v29 = vpop.f32.mrb[62].mxu0  ;;  %1659 = vmax.xlane.f32.xlu0 %v1658_v10 }
 0x3cf   : > { %v8880_v61 = vpop.f32.mrb[63].mxu0 }
 0x3d0   : > { %v8884_v13 = vpop.f32.mrb[32].mxu1 }
 0x3d1   : > { %12206 = vst [vmem:[#allocation29_spill] sm:$0xff] %v8884_v13  ;;  %v8886_v36 = vpop.f32.mrb[33].mxu1 }
 0x3d2   : > { %12207 = vst [vmem:[#allocation30_spill] sm:$0xff] %v8886_v36  ;;  %v1661_v26 = vmax.f32 %v8884_v13, %v8886_v36  ;;  %v8890_v40 = vpop.f32.mrb[34].mxu1 }
 0x3d3   : > { %12208 = vst [vmem:[#allocation31_spill] sm:$0xff] %v8890_v40  ;;  %v8892_v2 = vpop.f32.mrb[35].mxu1 }
 0x3d4   : > { %12209 = vst [vmem:[#allocation32_spill] sm:$0xff] %v8892_v2  ;;  %v1664_v33 = vmax.f32 %v8890_v40, %v8892_v2  ;;  %v8896_v10 = vpop.f32.mrb[64].mxu0  ;;  %1662 = vmax.xlane.f32.xlu1 %v1661_v26 }
 0x3d5   : > { %12210 = vst [vmem:[#allocation33_spill] sm:$0xff] %v8896_v10  ;;  %v8898_v18 = vpop.f32.mrb[65].mxu0 }
 0x3d6   : > { %12211 = vst [vmem:[#allocation34_spill] sm:$0xff] %v8898_v18  ;;  %v8902_v30 = vpop.f32.mrb[66].mxu0  ;;  %1665 = vmax.xlane.f32.xlu0 %v1664_v33 }
 0x3d7   : > { %12212 = vst [vmem:[#allocation35_spill] sm:$0xff] %v8902_v30  ;;  %v8904_v62 = vpop.f32.mrb[67].mxu0 }
 0x3d8   : > { %12213 = vst [vmem:[#allocation36_spill] sm:$0xff] %v8904_v62  ;;  %v8908_v13 = vpop.f32.mrb[36].mxu1 }
 0x3d9   : > { %12214 = vst [vmem:[#allocation37_spill] sm:$0xff] %v8908_v13  ;;  %v8910_v7 = vpop.f32.mrb[37].mxu1 }
 0x3da   : > { %12215 = vst [vmem:[#allocation38_spill] sm:$0xff] %v8910_v7  ;;  %v1667_v26 = vmax.f32 %v8908_v13, %v8910_v7  ;;  %v8914_v2 = vpop.f32.mrb[38].mxu1 }
 0x3db   : > { %12216 = vst [vmem:[#allocation39_spill] sm:$0xff] %v8914_v2  ;;  %v8916_v40 = vpop.f32.mrb[39].mxu1 }
 0x3dc   : > { %12217 = vst [vmem:[#allocation40_spill] sm:$0xff] %v8916_v40  ;;  %v1670_v15 = vmax.f32 %v8914_v2, %v8916_v40  ;;  %v8920_v33 = vpop.f32.mrb[68].mxu0  ;;  %1668 = vmax.xlane.f32.xlu1 %v1667_v26 }
 0x3dd   : > { %12218 = vst [vmem:[#allocation41_spill] sm:$0xff] %v8920_v33  ;;  %v8922_v6 = vpop.f32.mrb[69].mxu0 }
 0x3de   : > { %12219 = vst [vmem:[#allocation42_spill] sm:$0xff] %v8922_v6  ;;  %v8926_v0 = vpop.f32.mrb[70].mxu0  ;;  %1671 = vmax.xlane.f32.xlu0 %v1670_v15 }
 0x3df   : > { %12220 = vst [vmem:[#allocation43_spill] sm:$0xff] %v8926_v0  ;;  %v8928_v18 = vpop.f32.mrb[71].mxu0 }
 0x3e0   : > { %12221 = vst [vmem:[#allocation44_spill] sm:$0xff] %v8928_v18  ;;  %v8932_v13 = vpop.f32.mrb[40].mxu1 }
 0x3e1   : > { %12222 = vst [vmem:[#allocation45_spill] sm:$0xff] %v8932_v13  ;;  %v8934_v10 = vpop.f32.mrb[41].mxu1 }
 0x3e2   : > { %12223 = vst [vmem:[#allocation46_spill] sm:$0xff] %v8934_v10  ;;  %v1673_v26 = vmax.f32 %v8932_v13, %v8934_v10  ;;  %v8938_v40 = vpop.f32.mrb[42].mxu1 }
 0x3e3   : > { %12224 = vst [vmem:[#allocation47_spill] sm:$0xff] %v8938_v40  ;;  %v8940_v2 = vpop.f32.mrb[43].mxu1 }
 0x3e4   : > { %12225 = vst [vmem:[#allocation48_spill] sm:$0xff] %v8940_v2  ;;  %v1676_v36 = vmax.f32 %v8938_v40, %v8940_v2  ;;  %v8944_v15 = vpop.f32.mrb[72].mxu0  ;;  %1674 = vmax.xlane.f32.xlu1 %v1673_v26 }
 0x3e5   : > { %12226 = vst [vmem:[#allocation49_spill] sm:$0xff] %v8944_v15  ;;  %v8946_v6 = vpop.f32.mrb[73].mxu0 }
 0x3e6   : > { %12227 = vst [vmem:[#allocation50_spill] sm:$0xff] %v8946_v6  ;;  %v8950_v33 = vpop.f32.mrb[74].mxu0  ;;  %1677 = vmax.xlane.f32.xlu0 %v1676_v36 }
 0x3e7   : > { %12228 = vst [vmem:[#allocation51_spill] sm:$0xff] %v8950_v33  ;;  %v8952_v18 = vpop.f32.mrb[75].mxu0 }
 0x3e8   : > { %12229 = vst [vmem:[#allocation52_spill] sm:$0xff] %v8952_v18  ;;  %v8956_v13 = vpop.f32.mrb[44].mxu1 }
 0x3e9   : > { %12230 = vst [vmem:[#allocation53_spill] sm:$0xff] %v8956_v13  ;;  %v8958_v0 = vpop.f32.mrb[45].mxu1 }
 0x3ea   : > { %12231 = vst [vmem:[#allocation54_spill] sm:$0xff] %v8958_v0  ;;  %v1679_v26 = vmax.f32 %v8956_v13, %v8958_v0  ;;  %v8962_v2 = vpop.f32.mrb[46].mxu1 }
 0x3eb   : > { %12232 = vst [vmem:[#allocation55_spill] sm:$0xff] %v8962_v2  ;;  %v8964_v40 = vpop.f32.mrb[47].mxu1 }
 0x3ec   : > { %12233 = vst [vmem:[#allocation56_spill] sm:$0xff] %v8964_v40  ;;  %v1682_v7 = vmax.f32 %v8962_v2, %v8964_v40  ;;  %v8968_v36 = vpop.f32.mrb[76].mxu0  ;;  %1680 = vmax.xlane.f32.xlu0 %v1679_v26 }
 0x3ed   : > { %12234 = vst [vmem:[#allocation57_spill] sm:$0xff] %v8968_v36  ;;  %v8970_v6 = vpop.f32.mrb[77].mxu0 }
 0x3ee   : > { %12235 = vst [vmem:[#allocation58_spill] sm:$0xff] %v8970_v6  ;;  %v8974_v15 = vpop.f32.mrb[78].mxu0 }
 0x3ef   : > { %12236 = vst [vmem:[#allocation59_spill] sm:$0xff] %v8974_v15  ;;  %v8976_v18 = vpop.f32.mrb[79].mxu0 }
 0x3f0   : > { %12237 = vst [vmem:[#allocation60_spill] sm:$0xff] %v8976_v18  ;;  %1683 = vmax.xlane.f32.xlu0 %v1682_v7  ;;  %v8980_v13 = vpop.f32.mrb[48].mxu1 }
 0x3f1   : > { %12238 = vst [vmem:[#allocation61_spill] sm:$0xff] %v8980_v13  ;;  %v8982_v33 = vpop.f32.mrb[49].mxu1 }
 0x3f2   : > { %12239 = vst [vmem:[#allocation62_spill] sm:$0xff] %v8982_v33  ;;  %v1685_v26 = vmax.f32 %v8980_v13, %v8982_v33  ;;  %v8986_v40 = vpop.f32.mrb[50].mxu1 }
 0x3f3   : > { %12240 = vst [vmem:[#allocation63_spill] sm:$0xff] %v8986_v40  ;;  %v8988_v2 = vpop.f32.mrb[51].mxu1 }
 0x3f4   : > { %12241 = vst [vmem:[#allocation64_spill] sm:$0xff] %v8988_v2  ;;  %v1688_v10 = vmax.f32 %v8986_v40, %v8988_v2  ;;  %v8992_v6 = vpop.f32.mrb[80].mxu0  ;;  %1686 = vmax.xlane.f32.xlu1 %v1685_v26 }
 0x3f5   : > { %12242 = vst [vmem:[#allocation65_spill] sm:$0xff] %v8992_v6  ;;  %v8994_v36 = vpop.f32.mrb[81].mxu0 }
 0x3f6   : > { %12243 = vst [vmem:[#allocation66_spill] sm:$0xff] %v8994_v36  ;;  %v8998_v0 = vpop.f32.mrb[82].mxu0  ;;  %1689 = vmax.xlane.f32.xlu0 %v1688_v10 }
 0x3f7   : > { %12244 = vst [vmem:[#allocation67_spill] sm:$0xff] %v8998_v0  ;;  %v9000_v18 = vpop.f32.mrb[83].mxu0 }
 0x3f8   : > { %12245 = vst [vmem:[#allocation68_spill] sm:$0xff] %v9000_v18  ;;  %v9004_v13 = vpop.f32.mrb[52].mxu1 }
 0x3f9   : > { %12246 = vst [vmem:[#allocation69_spill] sm:$0xff] %v9004_v13  ;;  %v9006_v15 = vpop.f32.mrb[53].mxu1 }
 0x3fa   : > { %12247 = vst [vmem:[#allocation70_spill] sm:$0xff] %v9006_v15  ;;  %v1691_v26 = vmax.f32 %v9004_v13, %v9006_v15  ;;  %v9010_v2 = vpop.f32.mrb[54].mxu1  ;;  %v12265_v15 = vmax.f32 %v8728_v53, %v8730_v32 }
 0x3fb   : > { %12248 = vst [vmem:[#allocation71_spill] sm:$0xff] %v9010_v2  ;;  %v9012_v40 = vpop.f32.mrb[55].mxu1 }
 0x3fc   : > { %12249 = vst [vmem:[#allocation72_spill] sm:$0xff] %v9012_v40  ;;  %v1694_v7 = vmax.f32 %v9010_v2, %v9012_v40  ;;  %v9016_v10 = vpop.f32.mrb[84].mxu0  ;;  %1692 = vmax.xlane.f32.xlu0 %v1691_v26 }
 0x3fd   : > { %12250 = vst [vmem:[#allocation73_spill] sm:$0xff] %v9016_v10  ;;  %v9018_v36 = vpop.f32.mrb[85].mxu0 }
 0x3fe   : > { %12251 = vst [vmem:[#allocation74_spill] sm:$0xff] %v9018_v36  ;;  %v9022_v6 = vpop.f32.mrb[86].mxu0  ;;  %1695 = vmax.xlane.f32.xlu1 %v1694_v7 }
 0x3ff   : > { %12252 = vst [vmem:[#allocation75_spill] sm:$0xff] %v9022_v6  ;;  %v9024_v18 = vpop.f32.mrb[87].mxu0 }
 0x400   : > { %12253 = vst [vmem:[#allocation76_spill] sm:$0xff] %v9024_v18  ;;  %v9028_v13 = vpop.f32.mrb[56].mxu1 }
 0x401   : > { %12254 = vst [vmem:[#allocation77_spill] sm:$0xff] %v9028_v13  ;;  %v9030_v0 = vpop.f32.mrb[57].mxu1 }
 0x402   : > { %12255 = vst [vmem:[#allocation78_spill] sm:$0xff] %v9030_v0  ;;  %v1697_v26 = vmax.f32 %v9028_v13, %v9030_v0  ;;  %v9034_v40 = vpop.f32.mrb[58].mxu1  ;;  %v12262_v13 = vmax.f32 %v8702_v59, %v8706_v9 }
 0x403   : > { %12256 = vst [vmem:[#allocation79_spill] sm:$0xff] %v9034_v40  ;;  %v9036_v2 = vpop.f32.mrb[59].mxu1 }
 0x404   : > { %12257 = vst [vmem:[#allocation80_spill] sm:$0xff] %v9036_v2  ;;  %v1700_v33 = vmax.f32 %v9034_v40, %v9036_v2  ;;  %v9040_v7 = vpop.f32.mrb[88].mxu0  ;;  %1698 = vmax.xlane.f32.xlu0 %v1697_v26 }
 0x405   : > { %12258 = vst [vmem:[#allocation81_spill] sm:$0xff] %v9040_v7  ;;  %v9042_v36 = vpop.f32.mrb[89].mxu0 }
 0x406   : > { %12259 = vst [vmem:[#allocation82_spill] sm:$0xff] %v9042_v36  ;;  %v9046_v18 = vpop.f32.mrb[90].mxu0  ;;  %1701 = vmax.xlane.f32.xlu1 %v1700_v33 }
 0x407   : > { %12260 = vst [vmem:[#allocation83_spill] sm:$0xff] %v9046_v18  ;;  %v9048_v6 = vpop.f32.mrb[91].mxu0 }
 0x408   : > { %12261 = vst [vmem:[#allocation84_spill] sm:$0xff] %v9048_v6  ;;  %2094 = vmax.xlane.f32.xlu0 %v12262_v13  ;;  %v9055_v2 = vpop.f32.mrb[60].mxu1  ;;  %v12269_v13 = vmax.f32 %v8710_v25, %v8712_v27 }
 0x409   : > { %12263 = vst [vmem:[#allocation85_spill] sm:$0xff] %v9055_v2  ;;  %v9057_v26 = vpop.f32.mrb[61].mxu1 }
 0x40a   : > { %12264 = vst [vmem:[#allocation86_spill] sm:$0xff] %v9057_v26  ;;  %2100 = vmax.xlane.f32.xlu1 %v12265_v15  ;;  %v9064_v33 = vpop.f32.mrb[62].mxu1  ;;  %v12272_v15 = vmax.f32 %v8752_v50, %v8754_v51 }
 0x40b   : > { %12266 = vst [vmem:[#allocation87_spill] sm:$0xff] %v9064_v33  ;;  %v9066_v36 = vpop.f32.mrb[63].mxu1 }
 0x40c   : > { %12267 = vst [vmem:[#allocation88_spill] sm:$0xff] %v9066_v36  ;;  %v9070_v9 = vpop.f32.mrb[92].mxu0  ;;  %2097 = vmax.xlane.f32.xlu0 %v12269_v13  ;;  %v12274_v36 = vmax.f32 %v8734_v37, %v8736_v38 }
 0x40d   : > { %12268 = vst [vmem:[#allocation89_spill] sm:$0xff] %v9070_v9  ;;  %v9075_v59 = vpop.f32.mrb[93].mxu0 }
 0x40e   : > { %12270 = vst [vmem:[#allocation90_spill] sm:$0xff] %v9075_v59  ;;  %v9079_v26 = vpop.f32.mrb[94].mxu0  ;;  %2106 = vmax.xlane.f32.xlu1 %v12272_v15 }
 0x40f   : > { %12271 = vst [vmem:[#allocation91_spill] sm:$0xff] %v9079_v26  ;;  %v9084_v2 = vpop.f32.mrb[95].mxu0 }
 0x410   : > { %12273 = vst [vmem:[#allocation92_spill] sm:$0xff] %v9084_v2  ;;  %2103 = vmax.xlane.f32.xlu0 %v12274_v36 }
 0x41f   : > { %2658 = vrot.lane.b32.xlu1 %v8360_v34, %s8054_s23 }
 0x421   : > { %v1615_v13 = vpop.xlane.xlu0 %1614 }
 0x422   : > { %v1709_v40 = vsub.f32 %v8692_v22, %v1615_v13  ;;  %v1710_v15 = vsub.f32 %v8694_v24, %v1615_v13  ;;  %v12275_v24 = vmax.f32 %v8776_v63, %v8778_v1 }
 0x423   : > { %v1618_v59 = vpop.xlane.xlu1 %1617 }
 0x424   : > { %v1773_v9 = vmul.f32 1.442695, %v1709_v40  ;;  %v1775_v33 = vmul.f32 1.442695, %v1710_v15  ;;  %v1711_v0 = vsub.f32 %v8698_v46, %v1618_v59  ;;  %v1712_v2 = vsub.f32 %v8700_v48, %v1618_v59 }
 0x425   : > { %v12276_v48 = vmax.f32 %v8758_v31, %v8760_v35 }
 0x426   : > { %2706 = vrot.lane.b32.xlu0 %v8494_v56, %s8054_s23  ;;  %7305 = vpow2.f32 %v1773_v9  ;;  %v1777_v56 = vmul.f32 1.442695, %v1711_v0  ;;  %v1779_v26 = vmul.f32 1.442695, %v1712_v2  ;;  %v12278_v0 = vmax.f32 %v8782_v3, %v8784_v4 }
 0x427   : > { %7307 = vpow2.f32 %v1775_v33  ;;  %v12279_v33 = vmax.f32 %v8824_v49, %v8826_v57 }
 0x428   : > { %7309 = vpow2.f32 %v1777_v56 }
 0x429   : > { %v1621_v51 = vpop.xlane.xlu1 %1620  ;;  %7311 = vpow2.f32 %v1779_v26 }
 0x42a   : > { %v1713_v36 = vsub.f32 %v8716_v20, %v1621_v51  ;;  %v1714_v34 = vsub.f32 %v8718_v21, %v1621_v51  ;;  %v12277_v20 = vmax.f32 %v8800_v12, %v8802_v14 }
 0x42b   : > { %v1624_v50 = vpop.xlane.xlu0 %1623 }
 0x42c   : > { %v1781_v22 = vmul.f32 1.442695, %v1713_v36  ;;  %v1783_v40 = vmul.f32 1.442695, %v1714_v34  ;;  %v1715_v46 = vsub.f32 %v8720_v23, %v1624_v50  ;;  %v1716_v59 = vsub.f32 %v8724_v28, %v1624_v50 }
 0x42d   : > { %v12280_v36 = vmax.f32 %v8806_v16, %v8808_v17 }
 0x42e   : > { %7313 = vpow2.f32 %v1781_v22  ;;  %v1785_v23 = vmul.f32 1.442695, %v1715_v46  ;;  %v1787_v28 = vmul.f32 1.442695, %v1716_v59  ;;  %v12282_v59 = vmax.f32 %v8848_v45, %v8850_v39 }
 0x42f   : > { %7315 = vpow2.f32 %v1783_v40 }
 0x430   : > { %v9114_v2 = vpop.eup %7305  ;;  %7317 = vpow2.f32 %v1785_v23 }
 0x431   : > { %v1627_v13 = vpop.xlane.xlu1 %1626  ;;  %v9119_v26 = vpop.eup %7307  ;;  %7319 = vpow2.f32 %v1787_v28 }
 0x432   : > { %v1717_v9 = vsub.f32 %v8740_v41, %v1627_v13  ;;  %v1718_v21 = vsub.f32 %v8742_v42, %v1627_v13  ;;  %v1901_v34 = vadd.f32 %v9119_v26, %v9114_v2  ;;  %v9131_v56 = vpop.eup %7309  ;;  %v12281_v13 = vmax.f32 %v8830_v8, %v8832_v11 }
 0x433   : > { %v1630_v51 = vpop.xlane.xlu0 %1629  ;;  %v9133_v22 = vpop.eup %7311 }
 0x434   : > { %v1789_v50 = vmul.f32 1.442695, %v1717_v9  ;;  %v1719_v41 = vsub.f32 %v8744_v43, %v1630_v51  ;;  %v1791_v15 = vmul.f32 1.442695, %v1718_v21  ;;  %v1720_v42 = vsub.f32 %v8748_v47, %v1630_v51 }
 0x435   : > { %v1904_v9 = vadd.f32 %v9133_v22, %v9131_v56 }
 0x436   : > { %7321 = vpow2.f32 %v1789_v50  ;;  %v1793_v43 = vmul.f32 1.442695, %v1719_v41 }
 0x437   : > { %7323 = vpow2.f32 %v1791_v15 }
 0x438   : > { %v9135_v47 = vpop.eup %7313  ;;  %7325 = vpow2.f32 %v1793_v43 }
 0x439   : > { %v1633_v40 = vpop.xlane.xlu1 %1632  ;;  %v9140_v46 = vpop.eup %7315 }
 0x43a   : > { %v1907_v51 = vadd.f32 %v9140_v46, %v9135_v47  ;;  %v9151_v23 = vpop.eup %7317 }
 0x43b   : > { %v1636_v21 = vpop.xlane.xlu0 %1635  ;;  %v9154_v28 = vpop.eup %7319 }
 0x43c   : > { %v1724_v41 = vsub.f32 %v8772_v58, %v1636_v21 }
 0x443   : > { %2112 = vmax.xlane.f32.xlu1 %v12275_v24  ;;  %v1795_v24 = vmul.f32 1.442695, %v1720_v42 }
 0x445   : > { %2109 = vmax.xlane.f32.xlu0 %v12276_v48  ;;  %v1721_v48 = vsub.f32 %v8764_v44, %v1633_v40  ;;  %7327 = vpow2.f32 %v1795_v24  ;;  %v1723_v44 = vsub.f32 %v8768_v55, %v1636_v21  ;;  %v1910_v55 = vadd.f32 %v9154_v28, %v9151_v23 }
 0x447   : > { %2118 = vmax.xlane.f32.xlu1 %v12277_v20  ;;  %v1722_v20 = vsub.f32 %v8766_v54, %v1633_v40  ;;  %v12284_v54 = vmax.f32 %v8854_v52, %v8856_v19  ;;  %v1801_v42 = vmul.f32 1.442695, %v1723_v44  ;;  %v12289_v40 = vmax.f32 %v8878_v29, %v8880_v61 }
 0x449   : > { %2115 = vmax.xlane.f32.xlu0 %v12278_v0  ;;  %v1797_v0 = vmul.f32 1.442695, %v1721_v48  ;;  %v1799_v50 = vmul.f32 1.442695, %v1722_v20  ;;  %v9180_v48 = vpop.xlane.xlu0 %1641 }
 0x44b   : > { %2124 = vmax.xlane.f32.xlu1 %v12279_v33  ;;  %v9157_v33 = vpop.eup %7321  ;;  %7329 = vpow2.f32 %v1797_v0  ;;  %v12294_v0 = vld [vmem:[#allocation34_spill] sm:$0xff] }
 0x44c   : > { %12283 = vst [vmem:[#allocation93_spill] sm:$0xff] %v9157_v33  ;;  %v9162_v15 = vpop.eup %7323  ;;  %7331 = vpow2.f32 %v1799_v50 }
 0x44d   : > { %2121 = vmax.xlane.f32.xlu0 %v12280_v36  ;;  %12285 = vst [vmem:[#allocation94_spill] sm:$0xff] %v9162_v15  ;;  %v12286_v36 = vmax.f32 %v8872_v60, %v8874_v5  ;;  %v9169_v58 = vpop.eup %7325  ;;  %v1913_v43 = vadd.f32 %v9162_v15, %v9157_v33  ;;  %7333 = vpow2.f32 %v1801_v42  ;;  %v9189_v21 = vpop.xlane.xlu0 %1647 }
 0x44e   : > { %12287 = vst [vmem:[#allocation95_spill] sm:$0xff] %v9169_v58 }
 0x44f   : > { %1902 = vadd.xlane.f32.xlu1 %v1901_v34  ;;  %v1803_v34 = vmul.f32 1.442695, %v1724_v41  ;;  %v9173_v24 = vpop.eup %7327  ;;  %v12297_v41 = vld [vmem:[#allocation43_spill] sm:$0xff] }
 0x450   : > { %12288 = vst [vmem:[#allocation96_spill] sm:$0xff] %v9173_v24 }
 0x451   : > { %2127 = vmax.xlane.f32.xlu0 %v12281_v13  ;;  %7335 = vpow2.f32 %v1803_v34  ;;  %v1916_v13 = vadd.f32 %v9173_v24, %v9169_v58  ;;  %v12308_v58 = vld [vmem:[#allocation42_spill] sm:$0xff] }
 0x453   : > { %2130 = vmax.xlane.f32.xlu1 %v12282_v59  ;;  %v9203_v34 = vpop.xlane.xlu0 %1653 }
 0x455   : > { %1905 = vadd.xlane.f32.xlu0 %v1904_v9  ;;  %v9182_v59 = vpop.eup %7329  ;;  %v12291_v9 = vmax.f32 %v8902_v30, %v8904_v62 }
 0x456   : > { %12290 = vst [vmem:[#allocation97_spill] sm:$0xff] %v9182_v59  ;;  %v9187_v20 = vpop.eup %7331 }
 0x457   : > { %1908 = vadd.xlane.f32.xlu1 %v1907_v51  ;;  %12292 = vst [vmem:[#allocation98_spill] sm:$0xff] %v9187_v20  ;;  %v12293_v51 = vld [vmem:[#allocation33_spill] sm:$0xff]  ;;  %v9194_v50 = vpop.eup %7333 }
 0x458   : > { %v12295_v44 = vmax.f32 %v12293_v51, %v12294_v0  ;;  %12296 = vst [vmem:[#allocation99_spill] sm:$0xff] %v9194_v50  ;;  %v12315_v51 = vld [vmem:[#allocation50_spill] sm:$0xff] }
 0x459   : > { %2133 = vmax.xlane.f32.xlu0 %v12284_v54  ;;  %v12298_v54 = vld [vmem:[#allocation44_spill] sm:$0xff] }
 0x45a   : > { %v12299_v42 = vmax.f32 %v12297_v41, %v12298_v54  ;;  %v12305_v54 = vld [vmem:[#allocation58_spill] sm:$0xff] }
 0x45b   : > { %2136 = vmax.xlane.f32.xlu1 %v12286_v36  ;;  %v1919_v36 = vadd.f32 %v9187_v20, %v9182_v59  ;;  %v9212_v33 = vpop.xlane.xlu0 %1659 }
 0x45d   : > { %1911 = vadd.xlane.f32.xlu0 %v1910_v55  ;;  %v9201_v55 = vpop.eup %7335 }
 0x45e   : > { %12300 = vst [vmem:[#allocation100_spill] sm:$0xff] %v9201_v55 }
 0x45f   : > { %1914 = vadd.xlane.f32.xlu1 %v1913_v43  ;;  %v12301_v43 = vld [vmem:[#allocation51_spill] sm:$0xff] }
 0x461   : > { %2139 = vmax.xlane.f32.xlu0 %v12289_v40  ;;  %v12302_v40 = vld [vmem:[#allocation52_spill] sm:$0xff] }
 0x463   : > { %1917 = vadd.xlane.f32.xlu1 %v1916_v13  ;;  %v12303_v13 = vmax.f32 %v12301_v43, %v12302_v40  ;;  %v9219_v41 = vpop.xlane.xlu0 %1665  ;;  %v12311_v43 = vld [vmem:[#allocation60_spill] sm:$0xff] }
 0x465   : > { %2145 = vmax.xlane.f32.xlu0 %v12291_v9  ;;  %v1922_v9 = vadd.f32 %v9201_v55, %v9194_v50 }
 0x467   : > { %2142 = vmax.xlane.f32.xlu1 %v12295_v44  ;;  %v9210_v44 = vpop.xlane.xlu1 %1638 }
 0x469   : > { %2151 = vmax.xlane.f32.xlu0 %v12299_v42  ;;  %v12304_v42 = vld [vmem:[#allocation57_spill] sm:$0xff] }
 0x46a   : > { %v12306_v59 = vmax.f32 %v12304_v42, %v12305_v54  ;;  %v12318_v42 = vld [vmem:[#allocation68_spill] sm:$0xff] }
 0x46b   : > { %1920 = vadd.xlane.f32.xlu1 %v1919_v36  ;;  %v9217_v20 = vpop.xlane.xlu1 %1644  ;;  %v12307_v36 = vld [vmem:[#allocation41_spill] sm:$0xff]  ;;  %v9229_v0 = vpop.xlane.xlu0 %1671 }
 0x46c   : > { %v12309_v40 = vmax.f32 %v12307_v36, %v12308_v58  ;;  %12313 = vst [vmem:[#allocation101_spill] sm:$0xff] %v9229_v0  ;;  %v12322_v36 = vld [vmem:[#allocation66_spill] sm:$0xff] }
 0x46d   : > { %2157 = vmax.xlane.f32.xlu0 %v12303_v13  ;;  %v12310_v13 = vld [vmem:[#allocation59_spill] sm:$0xff] }
 0x46e   : > { %v12312_v50 = vmax.f32 %v12310_v13, %v12311_v43 }
 0x46f   : > { %1923 = vadd.xlane.f32.xlu1 %v1922_v9  ;;  %v9227_v55 = vpop.xlane.xlu1 %1650  ;;  %v12314_v9 = vld [vmem:[#allocation49_spill] sm:$0xff] }
 0x470   : > { %v12316_v54 = vmax.f32 %v12314_v9, %v12315_v51  ;;  %v12328_v9 = vld [vmem:[#allocation76_spill] sm:$0xff] }
 0x471   : > { %2160 = vmax.xlane.f32.xlu0 %v12306_v59  ;;  %v12317_v59 = vld [vmem:[#allocation67_spill] sm:$0xff] }
 0x472   : > { %v12319_v24 = vmax.f32 %v12317_v59, %v12318_v42 }
 0x473   : > { %2148 = vmax.xlane.f32.xlu1 %v12309_v40  ;;  %v9237_v15 = vpop.xlane.xlu1 %1656  ;;  %v9239_v58 = vpop.xlane.xlu0 %1677  ;;  %v12321_v40 = vld [vmem:[#allocation65_spill] sm:$0xff] }
 0x474   : > { %12320 = vst [vmem:[#allocation102_spill] sm:$0xff] %v9239_v58  ;;  %v12323_v43 = vmax.f32 %v12321_v40, %v12322_v36 }
 0x475   : > { %2163 = vmax.xlane.f32.xlu0 %v12312_v50  ;;  %v12324_v50 = vld [vmem:[#allocation74_spill] sm:$0xff] }
 0x476   : > { %v12325_v13 = vmax.f32 %v9016_v10, %v12324_v50 }
 0x477   : > { %2154 = vmax.xlane.f32.xlu1 %v12316_v54  ;;  %v9247_v0 = vpop.xlane.xlu1 %1662  ;;  %v12327_v54 = vld [vmem:[#allocation75_spill] sm:$0xff] }
 0x478   : > { %v12329_v42 = vmax.f32 %v12327_v54, %v12328_v9  ;;  %v12341_v54 = vld [vmem:[#allocation9_spill] sm:$0xff] }
 0x479   : > { %2169 = vmax.xlane.f32.xlu0 %v12319_v24  ;;  %v9249_v51 = vpop.xlane.xlu0 %1680  ;;  %v12330_v24 = vld [vmem:[#allocation82_spill] sm:$0xff] }
 0x47a   : > { %12326 = vst [vmem:[#allocation103_spill] sm:$0xff] %v9249_v51  ;;  %v12331_v59 = vmax.f32 %v9040_v7, %v12330_v24 }
 0x47b   : > { %2166 = vmax.xlane.f32.xlu1 %v12323_v43  ;;  %v9257_v58 = vpop.xlane.xlu1 %1668  ;;  %v12332_v43 = vmax.f32 %v9046_v18, %v9048_v6 }
 0x47d   : > { %2172 = vmax.xlane.f32.xlu0 %v12325_v13  ;;  %v9262_v50 = vpop.xlane.xlu0 %1683 }
 0x47e   : > { %12333 = vst [vmem:[#allocation104_spill] sm:$0xff] %v9262_v50 }
 0x47f   : > { %2175 = vmax.xlane.f32.xlu1 %v12329_v42  ;;  %v9264_v13 = vpop.xlane.xlu1 %1674 }
 0x480   : > { %12334 = vst [vmem:[#allocation105_spill] sm:$0xff] %v9264_v13 }
 0x481   : > { %2178 = vmax.xlane.f32.xlu0 %v12331_v59 }
 0x483   : > { %2181 = vmax.xlane.f32.xlu1 %v12332_v43  ;;  %v9266_v10 = vpop.xlane.xlu0 %1689  ;;  %v9268_v36 = vpop.xlane.xlu1 %1686  ;;  %v12342_v43 = vld [vmem:[#allocation10_spill] sm:$0xff] }
 0x484   : > { %12335 = vst [vmem:[#allocation106_spill] sm:$0xff] %v9266_v10  ;;  %12336 = vst [vmem:[#allocation107_spill] sm:$0xff] %v9268_v36 }
 0x489   : > { %v9270_v9 = vpop.xlane.xlu0 %1692 }
 0x48a   : > { %12337 = vst [vmem:[#allocation108_spill] sm:$0xff] %v9270_v9 }
 0x48b   : > { %v9272_v42 = vpop.xlane.xlu1 %1695 }
 0x48c   : > { %12338 = vst [vmem:[#allocation109_spill] sm:$0xff] %v9272_v42 }
 0x491   : > { %v9274_v24 = vpop.xlane.xlu0 %1698 }
 0x492   : > { %12339 = vst [vmem:[#allocation110_spill] sm:$0xff] %v9274_v24 }
 0x493   : > { %v9276_v59 = vpop.xlane.xlu1 %1701 }
 0x494   : > { %12340 = vst [vmem:[#allocation111_spill] sm:$0xff] %v9276_v59 }
 0x495   : > { %v2095_v7 = vpop.xlane.xlu0 %2094 }
 0x496   : > { %v2189_v6 = vsub.f32 %v12341_v54, %v2095_v7  ;;  %v2190_v18 = vsub.f32 %v12342_v43, %v2095_v7 }
 0x497   : > { %v2101_v40 = vpop.xlane.xlu1 %2100 }
 0x498   : > { %v2253_v50 = vmul.f32 1.442695, %v2189_v6  ;;  %v2193_v51 = vsub.f32 %v8728_v53, %v2101_v40  ;;  %v2255_v10 = vmul.f32 1.442695, %v2190_v18  ;;  %v2194_v36 = vsub.f32 %v8730_v32, %v2101_v40  ;;  %v12343_v18 = vld [vmem:[#allocation11_spill] sm:$0xff] }
 0x499   : > { %v2098_v13 = vpop.xlane.xlu0 %2097 }
 0x49a   : > { %7337 = vpow2.f32 %v2253_v50  ;;  %v2191_v42 = vsub.f32 %v8710_v25, %v2098_v13  ;;  %v2192_v24 = vsub.f32 %v8712_v27, %v2098_v13  ;;  %v2261_v9 = vmul.f32 1.442695, %v2193_v51  ;;  %v12344_v27 = vld [vmem:[#allocation12_spill] sm:$0xff] }
 0x49b   : > { %7339 = vpow2.f32 %v2255_v10  ;;  %v2107_v59 = vpop.xlane.xlu1 %2106  ;;  %v2263_v54 = vmul.f32 1.442695, %v2194_v36 }
 0x49c   : > { %v2257_v62 = vmul.f32 1.442695, %v2191_v42  ;;  %v2259_v30 = vmul.f32 1.442695, %v2192_v24  ;;  %v2197_v40 = vsub.f32 %v12343_v18, %v2107_v59  ;;  %v2198_v10 = vsub.f32 %v12344_v27, %v2107_v59  ;;  %v12351_v18 = vld [vmem:[#allocation87_spill] sm:$0xff] }
 0x49d   : > { %v2104_v7 = vpop.xlane.xlu0 %2103 }
 0x49e   : > { %7341 = vpow2.f32 %v2257_v62  ;;  %v2195_v6 = vsub.f32 %v8734_v37, %v2104_v7  ;;  %v2196_v53 = vsub.f32 %v8736_v38, %v2104_v7  ;;  %v2269_v37 = vmul.f32 1.442695, %v2197_v40  ;;  %v12352_v40 = vld [vmem:[#allocation88_spill] sm:$0xff] }
 0x49f   : > { %7343 = vpow2.f32 %v2259_v30  ;;  %v2659_v32 = vpop.permute.xlu1 %2658  ;;  %v2271_v38 = vmul.f32 1.442695, %v2198_v10  ;;  %v12354_v10 = vld [vmem:[#allocation13_spill] sm:$0xff] }
 0x4a0   : > { %7345 = vpow2.f32 %v2261_v9  ;;  %v2265_v25 = vmul.f32 1.442695, %v2195_v6  ;;  %6581 = vmatpush3.bf16.msra.mxu1 %v2659_v32  ;;  %v2267_v51 = vmul.f32 1.442695, %v2196_v53 }
 0x4a1   : > { %7347 = vpow2.f32 %v2263_v54  ;;  %v2707_v50 = vpop.permute.xlu0 %2706 }
 0x4a2   : > { %7349 = vpow2.f32 %v2265_v25  ;;  %6692 = vmatprep.subr.bf16.mxu0 %v2707_v50  ;;  %v12353_v25 = vmax.f32 %v12351_v18, %v12352_v40  ;;  %v12355_v50 = vld [vmem:[#allocation14_spill] sm:$0xff] }
 0x4a3   : > { %7351 = vpow2.f32 %v2267_v51  ;;  %v1725_v51 = vsub.f32 %v12354_v10, %v9210_v44 }
 0x4a4   : > { %v9288_v62 = vpop.eup %7337  ;;  %7353 = vpow2.f32 %v2269_v37  ;;  %v1726_v37 = vsub.f32 %v12355_v50, %v9210_v44  ;;  %v12361_v44 = vld [vmem:[#allocation19_spill] sm:$0xff] }
 0x4a5   : > { %v9290_v30 = vpop.eup %7339  ;;  %7355 = vpow2.f32 %v2271_v38  ;;  %v12356_v38 = vld [vmem:[#allocation15_spill] sm:$0xff]  ;;  %v1731_v50 = vsub.f32 %v12361_v44, %v9189_v21  ;;  %v12366_v44 = vld [vmem:[#allocation24_spill] sm:$0xff] }
 0x4a6   : > { %v2381_v36 = vadd.f32 %v9290_v30, %v9288_v62 }
 0x4a8   : > { %v9294_v9 = vpop.eup %7341  ;;  %2382 = vadd.xlane.f32.xlu0 %v2381_v36  ;;  %v1727_v36 = vsub.f32 %v12356_v38, %v9180_v48  ;;  %v12362_v38 = vld [vmem:[#allocation20_spill] sm:$0xff] }
 0x4a9   : > { %v9296_v24 = vpop.eup %7343 }
 0x4aa   : > { %v9298_v13 = vpop.eup %7345  ;;  %v2384_v42 = vadd.f32 %v9296_v24, %v9294_v9 }
 0x4ab   : > { %12345 = vst [vmem:[#allocation9_spill] sm:$0xff] %v9298_v13  ;;  %v9302_v59 = vpop.eup %7347 }
 0x4ac   : > { %12346 = vst [vmem:[#allocation10_spill] sm:$0xff] %v9302_v59  ;;  %v9304_v43 = vpop.eup %7349  ;;  %2385 = vadd.xlane.f32.xlu1 %v2384_v42  ;;  %v2387_v6 = vadd.f32 %v9302_v59, %v9298_v13  ;;  %v12357_v42 = vld [vmem:[#allocation16_spill] sm:$0xff]  ;;  %v1809_v13 = vmul.f32 1.442695, %v1727_v36 }
 0x4ad   : > { %12347 = vst [vmem:[#allocation11_spill] sm:$0xff] %v9304_v43  ;;  %v9306_v54 = vpop.eup %7351 }
 0x4ae   : > { %12348 = vst [vmem:[#allocation12_spill] sm:$0xff] %v9306_v54  ;;  %v2390_v7 = vadd.f32 %v9306_v54, %v9304_v43  ;;  %v9312_v53 = vpop.eup %7353  ;;  %v12359_v43 = vld [vmem:[#allocation17_spill] sm:$0xff]  ;;  %v1732_v54 = vsub.f32 %v12362_v38, %v9189_v21  ;;  %v1736_v21 = vsub.f32 %v12366_v44, %v9203_v34 }
 0x4af   : > { %12349 = vst [vmem:[#allocation112_spill] sm:$0xff] %v9312_v53  ;;  %v9314_v32 = vpop.eup %7355 }
 0x4b0   : > { %2391 = vadd.xlane.f32.xlu0 %v2390_v7  ;;  %2388 = vadd.xlane.f32.xlu1 %v2387_v6  ;;  %12350 = vst [vmem:[#allocation113_spill] sm:$0xff] %v9314_v32  ;;  %v2393_v27 = vadd.f32 %v9314_v32, %v9312_v53  ;;  %v1728_v7 = vsub.f32 %v12357_v42, %v9180_v48  ;;  %v12358_v6 = vld [vmem:[#allocation8_spill] sm:$0xff]  ;;  %v12360_v32 = vld [vmem:[#allocation18_spill] sm:$0xff]  ;;  %v12363_v42 = vld [vmem:[#allocation21_spill] sm:$0xff] }
 0x4b1   : > { %v1729_v53 = vsub.f32 %v12359_v43, %v9217_v20  ;;  %v1730_v10 = vsub.f32 %v12360_v32, %v9217_v20  ;;  %v12364_v43 = vld [vmem:[#allocation22_spill] sm:$0xff]  ;;  %v1817_v20 = vmul.f32 1.442695, %v1731_v50  ;;  %v12365_v32 = vld [vmem:[#allocation23_spill] sm:$0xff] }
 0x4b2   : > { %v1811_v59 = vmul.f32 1.442695, %v1728_v7  ;;  %v1735_v36 = vsub.f32 %v12365_v32, %v9203_v34  ;;  %v1819_v7 = vmul.f32 1.442695, %v1732_v54 }
 0x4b3   : > { %v1813_v48 = vmul.f32 1.442695, %v1729_v53 }
 0x4b4   : > { %1707 = vmax.xlane.f32.xlu1 %v12353_v25  ;;  %v1805_v25 = vmul.f32 1.442695, %v1725_v51  ;;  %v1733_v51 = vsub.f32 %v12363_v42, %v9227_v55  ;;  %v12368_v42 = vld [vmem:[#allocation26_spill] sm:$0xff] }
 0x4b6   : > { %7357 = vpow2.f32 %v1805_v25  ;;  %v1821_v53 = vmul.f32 1.442695, %v1733_v51  ;;  %v1738_v51 = vsub.f32 %v12368_v42, %v9237_v15 }
 0x4b8   : > { %2394 = vadd.xlane.f32.xlu1 %v2393_v27  ;;  %v1807_v27 = vmul.f32 1.442695, %v1726_v37  ;;  %v1734_v37 = vsub.f32 %v12364_v43, %v9227_v55  ;;  %v1827_v55 = vmul.f32 1.442695, %v1736_v21 }
 0x4ba   : > { %7359 = vpow2.f32 %v1807_v27  ;;  %v1823_v25 = vmul.f32 1.442695, %v1734_v37  ;;  %v1825_v27 = vmul.f32 1.442695, %v1735_v36 }
 0x4bb   : > { %7361 = vpow2.f32 %v1809_v13  ;;  %v12367_v13 = vld [vmem:[#allocation25_spill] sm:$0xff] }
 0x4bc   : > { %7363 = vpow2.f32 %v1811_v59  ;;  %v1737_v50 = vsub.f32 %v12367_v13, %v9237_v15  ;;  %v12376_v13 = vld [vmem:[#allocation29_spill] sm:$0xff] }
 0x4bd   : > { %7365 = vpow2.f32 %v1813_v48 }
 0x4c0   : > { %v9355_v43 = vpop.eup %7357 }
 0x4c1   : > { %12369 = vst [vmem:[#allocation87_spill] sm:$0xff] %v9355_v43 }
 0x4c4   : > { %v9357_v32 = vpop.eup %7359 }
 0x4c5   : > { %12370 = vst [vmem:[#allocation88_spill] sm:$0xff] %v9357_v32 }
 0x4c6   : > { %2690 = vrot.lane.b32.xlu0 %v12358_v6, %s8054_s23  ;;  %v1815_v6 = vmul.f32 1.442695, %v1730_v10 }
 0x4c8   : > { %7367 = vpow2.f32 %v1815_v6 }
 0x4c9   : > { %7369 = vpow2.f32 %v1817_v20 }
 0x4ca   : > { %7371 = vpow2.f32 %v1819_v7 }
 0x4cb   : > { %7373 = vpow2.f32 %v1821_v53 }
 0x4cc   : > { %7375 = vpow2.f32 %v1823_v25  ;;  %v1831_v25 = vmul.f32 1.442695, %v1738_v51 }
 0x4cd   : > { %7377 = vpow2.f32 %v1825_v27 }
 0x4ce   : > { %7379 = vpow2.f32 %v1827_v55 }
 0x4d0   : > { %v2113_v38 = vpop.xlane.xlu1 %2112 }
 0x4d1   : > { %v2201_v10 = vsub.f32 %v8776_v63, %v2113_v38  ;;  %v2202_v59 = vsub.f32 %v8778_v1, %v2113_v38  ;;  %v1829_v1 = vmul.f32 1.442695, %v1737_v50  ;;  %v12374_v38 = vld [vmem:[#allocation28_spill] sm:$0xff]  ;;  %v1741_v50 = vsub.f32 %v12376_v13, %v9247_v0 }
 0x4d2   : > { %v2110_v54 = vpop.xlane.xlu0 %2109  ;;  %v1740_v27 = vsub.f32 %v12374_v38, %v9212_v33 }
 0x4d3   : > { %v2199_v34 = vsub.f32 %v8758_v31, %v2110_v54  ;;  %v2200_v48 = vsub.f32 %v8760_v35, %v2110_v54  ;;  %v2277_v63 = vmul.f32 1.442695, %v2201_v10  ;;  %v2279_v36 = vmul.f32 1.442695, %v2202_v59  ;;  %v9359_v31 = vpop.eup %7361  ;;  %v12372_v35 = vld [vmem:[#allocation27_spill] sm:$0xff] }
 0x4d4   : > { %v2119_v6 = vpop.xlane.xlu1 %2118  ;;  %12371 = vst [vmem:[#allocation13_spill] sm:$0xff] %v9359_v31  ;;  %v1739_v44 = vsub.f32 %v12372_v35, %v9212_v33  ;;  %v9365_v53 = vpop.eup %7363 }
 0x4d5   : > { %v2273_v37 = vmul.f32 1.442695, %v2199_v34  ;;  %v2275_v20 = vmul.f32 1.442695, %v2200_v48  ;;  %12373 = vst [vmem:[#allocation14_spill] sm:$0xff] %v9365_v53  ;;  %v9369_v55 = vpop.eup %7365  ;;  %v2206_v42 = vsub.f32 %v8802_v14, %v2119_v6 }
 0x4d6   : > { %v2116_v7 = vpop.xlane.xlu0 %2115  ;;  %12375 = vst [vmem:[#allocation15_spill] sm:$0xff] %v9369_v55  ;;  %v9373_v54 = vpop.eup %7367  ;;  %v1833_v33 = vmul.f32 1.442695, %v1739_v44 }
 0x4d7   : > { %7381 = vpow2.f32 %v2273_v37  ;;  %v2203_v15 = vsub.f32 %v8782_v3, %v2116_v7  ;;  %v2204_v21 = vsub.f32 %v8784_v4, %v2116_v7  ;;  %v2205_v3 = vsub.f32 %v8800_v12, %v2119_v6  ;;  %v9376_v48 = vpop.eup %7369 }
 0x4d8   : > { %7383 = vpow2.f32 %v2275_v20  ;;  %v2125_v10 = vpop.xlane.xlu1 %2124  ;;  %12377 = vst [vmem:[#allocation16_spill] sm:$0xff] %v9376_v48  ;;  %v9379_v51 = vpop.eup %7371  ;;  %v1835_v37 = vmul.f32 1.442695, %v1740_v27  ;;  %v2287_v14 = vmul.f32 1.442695, %v2206_v42 }
 0x4d9   : > { %7385 = vpow2.f32 %v2277_v63  ;;  %v2281_v59 = vmul.f32 1.442695, %v2203_v15  ;;  %v2283_v4 = vmul.f32 1.442695, %v2204_v21  ;;  %12378 = vst [vmem:[#allocation8_spill] sm:$0xff] %v9379_v51  ;;  %v9382_v7 = vpop.eup %7373  ;;  %v2209_v13 = vsub.f32 %v8824_v49, %v2125_v10 }
 0x4da   : > { %7387 = vpow2.f32 %v2279_v36  ;;  %v2122_v34 = vpop.xlane.xlu0 %2121  ;;  %v1837_v36 = vmul.f32 1.442695, %v1741_v50  ;;  %v9384_v12 = vpop.eup %7375  ;;  %v2285_v35 = vmul.f32 1.442695, %v2205_v3  ;;  %v2210_v50 = vsub.f32 %v8826_v57, %v2125_v10  ;;  %v12383_v10 = vld [vmem:[#allocation85_spill] sm:$0xff] }
 0x4db   : > { %7389 = vpow2.f32 %v1829_v1  ;;  %v2207_v63 = vsub.f32 %v8806_v16, %v2122_v34  ;;  %v2208_v1 = vsub.f32 %v8808_v17, %v2122_v34  ;;  %v9387_v15 = vpop.eup %7377  ;;  %v12379_v16 = vld [vmem:[#allocation30_spill] sm:$0xff]  ;;  %v2293_v57 = vmul.f32 1.442695, %v2209_v13 }
 0x4dc   : > { %7391 = vpow2.f32 %v1831_v25  ;;  %v1903_v20 = vpop.xlane.xlu1 %1902  ;;  %v9389_v6 = vpop.eup %7379  ;;  %v1742_v21 = vsub.f32 %v12379_v16, %v9247_v0 }
 0x4dd   : > { %7393 = vpow2.f32 %v2281_v59  ;;  %v2289_v25 = vmul.f32 1.442695, %v2207_v63  ;;  %v2291_v59 = vmul.f32 1.442695, %v2208_v1  ;;  %v2295_v1 = vmul.f32 1.442695, %v2210_v50 }
 0x4de   : > { %7395 = vpow2.f32 %v2283_v4  ;;  %v2128_v44 = vpop.xlane.xlu0 %2127  ;;  %v1839_v42 = vmul.f32 1.442695, %v1742_v21 }
 0x4df   : > { %7397 = vpow2.f32 %v1833_v33  ;;  %v2211_v0 = vsub.f32 %v8830_v8, %v2128_v44  ;;  %v2212_v49 = vsub.f32 %v8832_v11, %v2128_v44 }
 0x4e0   : > { %7399 = vpow2.f32 %v1835_v37  ;;  %v9393_v38 = vpop.xlane.xlu1 %2130 }
 0x4e1   : > { %v9395_v27 = vpop.eup %7381  ;;  %7401 = vpow2.f32 %v1837_v36  ;;  %v12384_v36 = vld [vmem:[#allocation86_spill] sm:$0xff]  ;;  %v2297_v11 = vmul.f32 1.442695, %v2211_v0  ;;  %v2299_v13 = vmul.f32 1.442695, %v2212_v49 }
 0x4e2   : > { %v9398_v17 = vpop.eup %7383  ;;  %7403 = vpow2.f32 %v2285_v35  ;;  %v1906_v3 = vpop.xlane.xlu0 %1905  ;;  %v12385_v35 = vmax.f32 %v12383_v10, %v12384_v36 }
 0x4e3   : > { %v9401_v4 = vpop.eup %7385  ;;  %7405 = vpow2.f32 %v2287_v14  ;;  %v2396_v34 = vadd.f32 %v9398_v17, %v9395_v27  ;;  %v2213_v14 = vsub.f32 %v8848_v45, %v9393_v38 }
 0x4e4   : > { %12380 = vst [vmem:[#allocation17_spill] sm:$0xff] %v9401_v4  ;;  %v9406_v33 = vpop.eup %7387  ;;  %7407 = vpow2.f32 %v2289_v25  ;;  %v1909_v37 = vpop.xlane.xlu1 %1908 }
 0x4e5   : > { %12381 = vst [vmem:[#allocation18_spill] sm:$0xff] %v9406_v33  ;;  %v9409_v63 = vpop.eup %7389  ;;  %7409 = vrcp.f32 %v1903_v20  ;;  %1704 = vmax.xlane.f32.xlu0 %v12385_v35  ;;  %2397 = vadd.xlane.f32.xlu1 %v2396_v34  ;;  %v1925_v20 = vadd.f32 %v9357_v32, %v9355_v43  ;;  %v2399_v44 = vadd.f32 %v9406_v33, %v9401_v4  ;;  %v12397_v43 = vld [vmem:[#allocation92_spill] sm:$0xff] }
 0x4e6   : > { %12382 = vst [vmem:[#allocation19_spill] sm:$0xff] %v9409_v63  ;;  %v9414_v8 = vpop.eup %7391  ;;  %7411 = vpow2.f32 %v2291_v59  ;;  %v2134_v16 = vpop.xlane.xlu0 %2133  ;;  %v1928_v35 = vadd.f32 %v9365_v53, %v9359_v31  ;;  %v12394_v53 = vld [vmem:[#allocation90_spill] sm:$0xff] }
 0x4e7   : > { %12386 = vst [vmem:[#allocation20_spill] sm:$0xff] %v9414_v8  ;;  %v9418_v21 = vpop.eup %7393  ;;  %7413 = vrcp.f32 %v1906_v3  ;;  %v2301_v3 = vmul.f32 1.442695, %v2213_v14  ;;  %v2216_v14 = vsub.f32 %v8856_v19, %v2134_v16 }
 0x4e8   : > { %12387 = vst [vmem:[#allocation21_spill] sm:$0xff] %v9418_v21  ;;  %v9424_v25 = vpop.eup %7395  ;;  %7415 = vpow2.f32 %v1839_v42  ;;  %v2137_v50 = vpop.xlane.xlu1 %2136 }
 0x4e9   : > { %12388 = vst [vmem:[#allocation22_spill] sm:$0xff] %v9424_v25  ;;  %v9426_v59 = vpop.eup %7397  ;;  %7417 = vpow2.f32 %v2293_v57  ;;  %1926 = vadd.xlane.f32.xlu0 %v1925_v20  ;;  %2400 = vadd.xlane.f32.xlu1 %v2399_v44  ;;  %v2402_v42 = vadd.f32 %v9424_v25, %v9418_v21  ;;  %v2214_v57 = vsub.f32 %v8850_v39, %v9393_v38 }
 0x4ea   : > { %12389 = vst [vmem:[#allocation23_spill] sm:$0xff] %v9426_v59  ;;  %v9428_v45 = vpop.eup %7399  ;;  %7419 = vpow2.f32 %v2295_v1  ;;  %v1912_v0 = vpop.xlane.xlu0 %1911  ;;  %v2215_v1 = vsub.f32 %v8854_v52, %v2134_v16  ;;  %v2217_v39 = vsub.f32 %v8872_v60, %v2137_v50  ;;  %v2218_v19 = vsub.f32 %v8874_v5, %v2137_v50 }
 0x4eb   : > { %12390 = vst [vmem:[#allocation24_spill] sm:$0xff] %v9428_v45  ;;  %v9430_v34 = vpop.eup %7401  ;;  %7421 = vpow2.f32 %v2297_v11  ;;  %v2303_v31 = vmul.f32 1.442695, %v2214_v57 }
 0x4ec   : > { %v9436_v49 = vpop.eup %7403  ;;  %7423 = vpow2.f32 %v2299_v13  ;;  %v1915_v20 = vpop.xlane.xlu1 %1914  ;;  %v12391_v13 = vld [vmem:[#allocation31_spill] sm:$0xff] }
 0x4ed   : > { %v9440_v44 = vpop.eup %7405  ;;  %7425 = vrcp.f32 %v1909_v37  ;;  %1929 = vadd.xlane.f32.xlu0 %v1928_v35  ;;  %2403 = vadd.xlane.f32.xlu1 %v2402_v42  ;;  %v1743_v25 = vsub.f32 %v12391_v13, %v9219_v41  ;;  %v12392_v37 = vld [vmem:[#allocation32_spill] sm:$0xff]  ;;  %v2307_v42 = vmul.f32 1.442695, %v2216_v14  ;;  %v12393_v13 = vld [vmem:[#allocation89_spill] sm:$0xff] }
 0x4ee   : > { %v9444_v11 = vpop.eup %7407  ;;  %7427 = vpow2.f32 %v2301_v3  ;;  %v2140_v21 = vpop.xlane.xlu0 %2139  ;;  %v1744_v52 = vsub.f32 %v12392_v37, %v9219_v41  ;;  %v2305_v3 = vmul.f32 1.442695, %v2215_v1  ;;  %v12395_v60 = vmax.f32 %v12393_v13, %v12394_v53 }
 0x4ef   : > { %v7410_v4 = vpop.eup %7409  ;;  %7429 = vrcp.f32 %v1912_v0  ;;  %v2219_v33 = vsub.f32 %v8878_v29, %v2140_v21  ;;  %v12396_v0 = vld [vmem:[#allocation91_spill] sm:$0xff]  ;;  %v2309_v1 = vmul.f32 1.442695, %v2217_v39  ;;  %v2220_v14 = vsub.f32 %v8880_v61, %v2140_v21 }
 0x4f0   : > { %v9449_v38 = vpop.eup %7411  ;;  %7431 = vrcp.f32 %v1915_v20  ;;  %v1918_v16 = vpop.xlane.xlu1 %1917  ;;  %v12398_v32 = vmax.f32 %v12396_v0, %v12397_v43  ;;  %v2029_v5 = vmul.f32 %v7410_v4, %v9114_v2  ;;  %v2030_v57 = vmul.f32 %v7410_v4, %v9119_v26  ;;  %v12401_v4 = vld [vmem:[#allocation37_spill] sm:$0xff] }
 0x4f1   : > { %v7414_v35 = vpop.eup %7413  ;;  %7433 = vrcp.f32 %v1918_v16  ;;  %2184 = vmax.xlane.f32.xlu0 %v12395_v60  ;;  %v2405_v37 = vadd.f32 %v9440_v44, %v9436_v49  ;;  %v2311_v2 = vmul.f32 1.442695, %v2218_v19  ;;  %v1745_v39 = vsub.f32 %v12401_v4, %v9257_v58 }
 0x4f2   : > { %2187 = vmax.xlane.f32.xlu1 %v12398_v32  ;;  %v9461_v41 = vpop.eup %7415  ;;  %v2031_v50 = vmul.f32 %v7414_v35, %v9131_v56  ;;  %v2032_v20 = vmul.f32 %v7414_v35, %v9133_v22  ;;  %v2408_v32 = vadd.f32 %v9449_v38, %v9444_v11  ;;  %7435 = vpow2.f32 %v2303_v31 }
 0x4f3   : > { %v9467_v29 = vpop.eup %7417  ;;  %7437 = vpow2.f32 %v2305_v3  ;;  %v2313_v61 = vmul.f32 1.442695, %v2219_v33  ;;  %v2315_v31 = vmul.f32 1.442695, %v2220_v14  ;;  %v1931_v19 = vadd.f32 %v9373_v54, %v9369_v55 }
 0x4f4   : > { %12399 = vst [vmem:[#allocation25_spill] sm:$0xff] %v9467_v29  ;;  %v9474_v16 = vpop.eup %7419  ;;  %v2574_v56 = vpack.c.bf16 %v2032_v20, %v2030_v57  ;;  %v2573_v60 = vpack.c.bf16 %v2031_v50, %v2029_v5  ;;  %v9476_v26 = vpop.xlane.xlu1 %2142  ;;  %7439 = vpow2.f32 %v2307_v42  ;;  %v1934_v5 = vadd.f32 %v9379_v51, %v9376_v48  ;;  %v12402_v42 = vld [vmem:[#allocation38_spill] sm:$0xff]  ;;  %v12403_v48 = vld [vmem:[#allocation35_spill] sm:$0xff]  ;;  %v12406_v51 = vld [vmem:[#allocation96_spill] sm:$0xff] }
 0x4f5   : > { %12400 = vst [vmem:[#allocation26_spill] sm:$0xff] %v9474_v16  ;;  %v9478_v22 = vpop.eup %7421  ;;  %2406 = vadd.xlane.f32.xlu0 %v2405_v37  ;;  %7441 = vpow2.f32 %v2309_v1  ;;  %v1841_v3 = vmul.f32 1.442695, %v1743_v25  ;;  %v1843_v33 = vmul.f32 1.442695, %v1744_v52  ;;  %v2146_v57 = vpop.xlane.xlu0 %2145  ;;  %v2411_v14 = vadd.f32 %v9474_v16, %v9467_v29  ;;  %v12405_v16 = vld [vmem:[#allocation94_spill] sm:$0xff] }
 0x4f6   : > { %2409 = vadd.xlane.f32.xlu1 %v2408_v32  ;;  %v9482_v21 = vpop.eup %7423  ;;  %2772 = vmatprep.mubr.bf16.mxu1 %v2574_v56  ;;  %7443 = vpow2.f32 %v2311_v2  ;;  %v1746_v32 = vsub.f32 %v12402_v42, %v9257_v58  ;;  %v1845_v1 = vmul.f32 1.442695, %v1745_v39  ;;  %v2223_v58 = vsub.f32 %v12403_v48, %v2146_v57  ;;  %v12404_v39 = vld [vmem:[#allocation36_spill] sm:$0xff] }
 0x4f7   : > { %v7426_v35 = vpop.eup %7425  ;;  %2773 = vmatmul.mubr.bf16.vlgmr.msra.gmra.mrb[64].mxu1 %v2573_v60  ;;  %7445 = vpow2.f32 %v2313_v61  ;;  %v2224_v61 = vsub.f32 %v12404_v39, %v2146_v57  ;;  %v12410_v57 = vld [vmem:[#allocation40_spill] sm:$0xff] }
 0x4f8   : > { %v9488_v50 = vpop.eup %7427  ;;  %v1921_v20 = vpop.xlane.xlu1 %1920  ;;  %v2034_v60 = vmul.f32 %v7426_v35, %v9140_v46  ;;  %v2033_v52 = vmul.f32 %v7426_v35, %v9135_v47  ;;  %7447 = vpow2.f32 %v2315_v31  ;;  %v1847_v55 = vmul.f32 1.442695, %v1746_v32  ;;  %v12407_v47 = vld [vmem:[#allocation101_spill] sm:$0xff]  ;;  %v12408_v35 = vld [vmem:[#allocation39_spill] sm:$0xff] }
 0x4f9   : > { %v7430_v37 = vpop.eup %7429  ;;  %1932 = vadd.xlane.f32.xlu0 %v1931_v19  ;;  %v2414_v19 = vadd.f32 %v9482_v21, %v9478_v22  ;;  %v12409_v31 = vld [vmem:[#allocation33_spill] sm:$0xff]  ;;  %7449 = vrcp.f32 %v1921_v20  ;;  %v1937_v20 = vadd.f32 %v9384_v12, %v9382_v7  ;;  %v2323_v39 = vmul.f32 1.442695, %v2224_v61 }
 0x4fa   : > { %1935 = vadd.xlane.f32.xlu1 %v1934_v5  ;;  %v7432_v56 = vpop.eup %7431  ;;  %v2036_v25 = vmul.f32 %v7430_v37, %v9154_v28  ;;  %v2035_v2 = vmul.f32 %v7430_v37, %v9151_v23  ;;  %v1747_v23 = vsub.f32 %v12408_v35, %v12407_v47  ;;  %v2221_v37 = vsub.f32 %v12409_v31, %v9476_v26  ;;  %v12416_v35 = vld [vmem:[#allocation43_spill] sm:$0xff] }
 0x4fb   : > { %v7434_v4 = vpop.eup %7433  ;;  %v2038_v46 = vmul.f32 %v7432_v56, %v12405_v16 }
 0x4fc   : > { %v2578_v5 = vpack.c.bf16 %v2036_v25, %v2034_v60  ;;  %v2577_v42 = vpack.c.bf16 %v2035_v2, %v2033_v52  ;;  %v1924_v29 = vpop.xlane.xlu1 %1923  ;;  %v2040_v28 = vmul.f32 %v7434_v4, %v12406_v51  ;;  %v9508_v48 = vpop.eup %7435  ;;  %v1748_v60 = vsub.f32 %v12410_v57, %v12407_v47  ;;  %v12411_v25 = vld [vmem:[#allocation34_spill] sm:$0xff]  ;;  %v12419_v57 = vld [vmem:[#allocation45_spill] sm:$0xff] }
 0x4fd   : > { %2412 = vadd.xlane.f32.xlu0 %v2411_v14  ;;  %v2222_v16 = vsub.f32 %v12411_v25, %v9476_v26  ;;  %7451 = vrcp.f32 %v1924_v29  ;;  %v9514_v32 = vpop.eup %7437  ;;  %v2321_v52 = vmul.f32 1.442695, %v2223_v58  ;;  %v1940_v14 = vadd.f32 %v9389_v6, %v9387_v15 }
 0x4fe   : > { %2415 = vadd.xlane.f32.xlu1 %v2414_v19  ;;  %2780 = vmatprep.mubr.bf16.mxu1 %v2578_v5  ;;  %v2582_v51 = vpack.c.bf16 %v2040_v28, %v2038_v46  ;;  %12412 = vst [vmem:[#allocation27_spill] sm:$0xff] %v9514_v32  ;;  %7453 = vpow2.f32 %v1841_v3  ;;  %v9520_v2 = vpop.eup %7439  ;;  %v2152_v19 = vpop.xlane.xlu0 %2151  ;;  %v1849_v29 = vmul.f32 1.442695, %v1747_v23  ;;  %v2317_v5 = vmul.f32 1.442695, %v2221_v37  ;;  %v12414_v3 = vld [vmem:[#allocation95_spill] sm:$0xff] }
 0x4ff   : > { %2781 = vmatmul.mubr.bf16.gmra.mrb[68].mxu1 %v2577_v42  ;;  %7455 = vpow2.f32 %v1843_v33  ;;  %v9522_v26 = vpop.eup %7441  ;;  %v2039_v58 = vmul.f32 %v7434_v4, %v12414_v3  ;;  %v1851_v46 = vmul.f32 1.442695, %v1748_v60  ;;  %v2319_v28 = vmul.f32 1.442695, %v2222_v16  ;;  %v12417_v23 = vld [vmem:[#allocation93_spill] sm:$0xff]  ;;  %v12421_v16 = vld [vmem:[#allocation44_spill] sm:$0xff] }
 0x500   : > { %2788 = vmatprep.mubr.bf16.mxu1 %v2582_v51  ;;  %12413 = vst [vmem:[#allocation28_spill] sm:$0xff] %v9522_v26  ;;  %7457 = vpow2.f32 %v1845_v1  ;;  %v9525_v42 = vpop.eup %7443  ;;  %v2149_v47 = vpop.xlane.xlu1 %2148  ;;  %v2417_v33 = vadd.f32 %v9508_v48, %v9488_v50  ;;  %v2227_v1 = vsub.f32 %v12416_v35, %v2152_v19  ;;  %v2037_v31 = vmul.f32 %v7432_v56, %v12417_v23  ;;  %v12418_v4 = vld [vmem:[#allocation105_spill] sm:$0xff]  ;;  %v12424_v3 = vld [vmem:[#allocation42_spill] sm:$0xff] }
 0x501   : > { %1938 = vadd.xlane.f32.xlu0 %v1937_v20  ;;  %7459 = vpow2.f32 %v1847_v55  ;;  %v9529_v61 = vpop.eup %7445  ;;  %v2420_v37 = vadd.f32 %v9520_v2, %v9514_v32  ;;  %v1749_v25 = vsub.f32 %v12419_v57, %v12418_v4  ;;  %v12420_v55 = vld [vmem:[#allocation46_spill] sm:$0xff]  ;;  %v2228_v51 = vsub.f32 %v12421_v16, %v2152_v19 }
 0x502   : > { %1941 = vadd.xlane.f32.xlu1 %v1940_v14  ;;  %12415 = vst [vmem:[#allocation29_spill] sm:$0xff] %v9529_v61  ;;  %7461 = vpow2.f32 %v2321_v52  ;;  %v1750_v60 = vsub.f32 %v12420_v55, %v12418_v4  ;;  %v9540_v20 = vpop.eup %7447  ;;  %v12423_v52 = vld [vmem:[#allocation41_spill] sm:$0xff]  ;;  %v2226_v35 = vsub.f32 %v12424_v3, %v2149_v47  ;;  %v2581_v56 = vpack.c.bf16 %v2039_v58, %v2037_v31  ;;  %v2158_v23 = vpop.xlane.xlu0 %2157 }
 0x503   : > { %7463 = vpow2.f32 %v2323_v39  ;;  %12422 = vst [vmem:[#allocation30_spill] sm:$0xff] %v9540_v20  ;;  %v2225_v14 = vsub.f32 %v12423_v52, %v2149_v47  ;;  %v7450_v32 = vpop.eup %7449  ;;  %v2329_v57 = vmul.f32 1.442695, %v2227_v1  ;;  %v1943_v39 = vadd.f32 %v9414_v8, %v9409_v63 }
 0x504   : > { %7465 = vpow2.f32 %v2317_v5  ;;  %v1946_v19 = vadd.f32 %v9428_v45, %v9426_v59  ;;  %v1853_v4 = vmul.f32 1.442695, %v1749_v25  ;;  %v1855_v55 = vmul.f32 1.442695, %v1750_v60  ;;  %v2155_v3 = vpop.xlane.xlu1 %2154  ;;  %v12429_v25 = vld [vmem:[#allocation100_spill] sm:$0xff]  ;;  %v12431_v45 = vld [vmem:[#allocation99_spill] sm:$0xff] }
 0x505   : > { %2418 = vadd.xlane.f32.xlu0 %v2417_v33  ;;  %7467 = vpow2.f32 %v2319_v28  ;;  %v2331_v47 = vmul.f32 1.442695, %v2228_v51  ;;  %v12425_v33 = vld [vmem:[#allocation102_spill] sm:$0xff]  ;;  %v12426_v28 = vld [vmem:[#allocation47_spill] sm:$0xff]  ;;  %v2327_v16 = vmul.f32 1.442695, %v2226_v35  ;;  %v2426_v35 = vadd.f32 %v9540_v20, %v9529_v61 }
 0x506   : > { %2421 = vadd.xlane.f32.xlu1 %v2420_v37  ;;  %7469 = vpow2.f32 %v1849_v29  ;;  %v1751_v31 = vsub.f32 %v12426_v28, %v12425_v33  ;;  %v12427_v29 = vld [vmem:[#allocation48_spill] sm:$0xff]  ;;  %v2325_v37 = vmul.f32 1.442695, %v2225_v14  ;;  %v12430_v51 = vld [vmem:[#allocation97_spill] sm:$0xff]  ;;  %v12433_v28 = vld [vmem:[#allocation51_spill] sm:$0xff]  ;;  %v2423_v14 = vadd.f32 %v9525_v42, %v9522_v26 }
 0x507   : > { %2789 = vmatmul.mubr.bf16.gmra.mrb[72].mxu1 %v2581_v56  ;;  %v7452_v5 = vpop.eup %7451  ;;  %7471 = vpow2.f32 %v1851_v46  ;;  %v1752_v1 = vsub.f32 %v12427_v29, %v12425_v33  ;;  %v12428_v56 = vld [vmem:[#allocation98_spill] sm:$0xff]  ;;  %v2041_v59 = vmul.f32 %v7450_v32, %v12430_v51  ;;  %v2231_v33 = vsub.f32 %v12433_v28, %v2158_v23  ;;  %v12438_v26 = vld [vmem:[#allocation103_spill] sm:$0xff]  ;;  %v12439_v20 = vld [vmem:[#allocation53_spill] sm:$0xff] }
 0x508   : > { %v9548_v58 = vpop.eup %7453  ;;  %v2042_v46 = vmul.f32 %v7450_v32, %v12428_v56  ;;  %v2044_v60 = vmul.f32 %v7452_v5, %v12429_v25  ;;  %v2043_v63 = vmul.f32 %v7452_v5, %v12431_v45  ;;  %7473 = vpow2.f32 %v2329_v57  ;;  %v9570_v56 = vpop.xlane.xlu0 %2160  ;;  %v12437_v25 = vld [vmem:[#allocation49_spill] sm:$0xff] }
 0x509   : > { %1944 = vadd.xlane.f32.xlu0 %v1943_v39  ;;  %v9554_v52 = vpop.eup %7455  ;;  %7475 = vpow2.f32 %v2331_v47  ;;  %v1857_v57 = vmul.f32 1.442695, %v1751_v31  ;;  %v2229_v51 = vsub.f32 %v12437_v25, %v2155_v3  ;;  %v1859_v61 = vmul.f32 1.442695, %v1752_v1 }
 0x50a   : > { %1947 = vadd.xlane.f32.xlu1 %v1946_v19  ;;  %v9560_v8 = vpop.eup %7457  ;;  %v12435_v19 = vld [vmem:[#allocation52_spill] sm:$0xff]  ;;  %v2586_v32 = vpack.c.bf16 %v2044_v60, %v2042_v46  ;;  %v2585_v45 = vpack.c.bf16 %v2043_v63, %v2041_v59  ;;  %7477 = vpow2.f32 %v2325_v37  ;;  %v1753_v47 = vsub.f32 %v12439_v20, %v12438_v26  ;;  %v12442_v20 = vld [vmem:[#allocation54_spill] sm:$0xff] }
 0x50b   : > { %12432 = vst [vmem:[#allocation85_spill] sm:$0xff] %v9560_v8  ;;  %v9567_v39 = vpop.eup %7459  ;;  %v2232_v29 = vsub.f32 %v12435_v19, %v2158_v23  ;;  %7479 = vpow2.f32 %v2327_v16  ;;  %v12440_v23 = vld [vmem:[#allocation50_spill] sm:$0xff]  ;;  %v2337_v63 = vmul.f32 1.442695, %v2231_v33  ;;  %v1949_v59 = vadd.f32 %v9461_v41, %v9430_v34  ;;  %v12444_v60 = vld [vmem:[#allocation104_spill] sm:$0xff] }
 0x50c   : > { %12434 = vst [vmem:[#allocation86_spill] sm:$0xff] %v9567_v39  ;;  %v9572_v5 = vpop.eup %7461  ;;  %v2230_v19 = vsub.f32 %v12440_v23, %v2155_v3  ;;  %2796 = vmatprep.mubr.bf16.mxu1 %v2586_v32  ;;  %7481 = vpow2.f32 %v1853_v4  ;;  %v1952_v31 = vadd.f32 %v9554_v52, %v9548_v58  ;;  %v1754_v1 = vsub.f32 %v12442_v20, %v12438_v26  ;;  %v12445_v4 = vld [vmem:[#allocation55_spill] sm:$0xff]  ;;  %v2164_v25 = vpop.xlane.xlu0 %2163  ;;  %v12448_v26 = vld [vmem:[#allocation57_spill] sm:$0xff] }
 0x50d   : > { %12436 = vst [vmem:[#allocation31_spill] sm:$0xff] %v9572_v5  ;;  %2424 = vadd.xlane.f32.xlu0 %v2423_v14  ;;  %v9575_v28 = vpop.eup %7463  ;;  %7483 = vpow2.f32 %v1855_v55  ;;  %v2339_v16 = vmul.f32 1.442695, %v2232_v29  ;;  %v1755_v33 = vsub.f32 %v12445_v4, %v12444_v60  ;;  %v2333_v14 = vmul.f32 1.442695, %v2229_v51 }
 0x50e   : > { %2427 = vadd.xlane.f32.xlu1 %v2426_v35  ;;  %v9580_v46 = vpop.eup %7465  ;;  %7485 = vpow2.f32 %v1857_v57  ;;  %v1861_v32 = vmul.f32 1.442695, %v1753_v47  ;;  %v2335_v23 = vmul.f32 1.442695, %v2230_v19  ;;  %v2233_v29 = vsub.f32 %v12448_v26, %v9570_v56  ;;  %v12454_v26 = vld [vmem:[#allocation61_spill] sm:$0xff] }
 0x50f   : > { %12441 = vst [vmem:[#allocation32_spill] sm:$0xff] %v9580_v46  ;;  %2797 = vmatmul.mubr.bf16.gmra.mrb[76].mxu1 %v2585_v45  ;;  %v9586_v37 = vpop.eup %7467  ;;  %7487 = vpow2.f32 %v1859_v61  ;;  %v12447_v45 = vld [vmem:[#allocation56_spill] sm:$0xff]  ;;  %v2432_v51 = vadd.f32 %v9575_v28, %v9572_v5  ;;  %v12449_v61 = vld [vmem:[#allocation58_spill] sm:$0xff]  ;;  %v1865_v20 = vmul.f32 1.442695, %v1755_v33  ;;  %v1955_v33 = vadd.f32 %v9567_v39, %v9560_v8  ;;  %v12472_v39 = vld [vmem:[#allocation69_spill] sm:$0xff] }
 0x510   : > { %v9590_v3 = vpop.eup %7469  ;;  %v1756_v55 = vsub.f32 %v12447_v45, %v12444_v60  ;;  %7489 = vpow2.f32 %v2337_v63  ;;  %v2429_v57 = vadd.f32 %v9586_v37, %v9580_v46  ;;  %v2234_v47 = vsub.f32 %v12449_v61, %v9570_v56  ;;  %v12451_v60 = vld [vmem:[#allocation59_spill] sm:$0xff]  ;;  %v12455_v5 = vld [vmem:[#allocation60_spill] sm:$0xff] }
 0x511   : > { %12443 = vst [vmem:[#allocation89_spill] sm:$0xff] %v9590_v3  ;;  %1950 = vadd.xlane.f32.xlu0 %v1949_v59  ;;  %v9594_v35 = vpop.eup %7471  ;;  %v1863_v59 = vmul.f32 1.442695, %v1754_v1  ;;  %7491 = vpow2.f32 %v2339_v16  ;;  %v2235_v19 = vsub.f32 %v12451_v60, %v2164_v25  ;;  %v12453_v45 = vld [vmem:[#allocation107_spill] sm:$0xff]  ;;  %v2236_v1 = vsub.f32 %v12455_v5, %v2164_v25  ;;  %v2170_v60 = vpop.xlane.xlu0 %2169  ;;  %v12460_v25 = vld [vmem:[#allocation106_spill] sm:$0xff] }
 0x512   : > { %1953 = vadd.xlane.f32.xlu1 %v1952_v31  ;;  %12446 = vst [vmem:[#allocation90_spill] sm:$0xff] %v9594_v35  ;;  %v9606_v31 = vpop.eup %7473  ;;  %7493 = vpow2.f32 %v2333_v14  ;;  %v1867_v4 = vmul.f32 1.442695, %v1756_v55  ;;  %v1757_v46 = vsub.f32 %v12454_v26, %v12453_v45  ;;  %v2341_v56 = vmul.f32 1.442695, %v2233_v29  ;;  %v12458_v55 = vld [vmem:[#allocation62_spill] sm:$0xff] }
 0x513   : > { %12450 = vst [vmem:[#allocation91_spill] sm:$0xff] %v9606_v31  ;;  %v9609_v63 = vpop.eup %7475  ;;  %7495 = vpow2.f32 %v2335_v23  ;;  %v1958_v14 = vadd.f32 %v9594_v35, %v9590_v3  ;;  %v2343_v61 = vmul.f32 1.442695, %v2234_v47  ;;  %v2345_v29 = vmul.f32 1.442695, %v2235_v19 }
 0x514   : > { %12452 = vst [vmem:[#allocation92_spill] sm:$0xff] %v9609_v63  ;;  %v9614_v16 = vpop.eup %7477  ;;  %7497 = vpow2.f32 %v1861_v32  ;;  %v12461_v32 = vld [vmem:[#allocation63_spill] sm:$0xff]  ;;  %v1869_v3 = vmul.f32 1.442695, %v1757_v46  ;;  %v2347_v8 = vmul.f32 1.442695, %v2236_v1  ;;  %v2438_v19 = vadd.f32 %v9609_v63, %v9606_v31 }
 0x515   : > { %2430 = vadd.xlane.f32.xlu0 %v2429_v57  ;;  %12456 = vst [vmem:[#allocation37_spill] sm:$0xff] %v9614_v16  ;;  %v9620_v57 = vpop.eup %7479  ;;  %7499 = vpow2.f32 %v1863_v59  ;;  %v1759_v23 = vsub.f32 %v12461_v32, %v12460_v25  ;;  %v12463_v59 = vld [vmem:[#allocation64_spill] sm:$0xff]  ;;  %v12473_v63 = vld [vmem:[#allocation66_spill] sm:$0xff] }
 0x516   : > { %2433 = vadd.xlane.f32.xlu1 %v2432_v51  ;;  %12457 = vst [vmem:[#allocation38_spill] sm:$0xff] %v9620_v57  ;;  %v1758_v51 = vsub.f32 %v12458_v55, %v12453_v45  ;;  %v9624_v5 = vpop.eup %7481  ;;  %7501 = vpow2.f32 %v1865_v20  ;;  %v1760_v35 = vsub.f32 %v12463_v59, %v12460_v25  ;;  %v2167_v45 = vpop.xlane.xlu1 %2166  ;;  %v12465_v55 = vld [vmem:[#allocation67_spill] sm:$0xff]  ;;  %v2435_v32 = vadd.f32 %v9620_v57, %v9614_v16  ;;  %v12467_v46 = vld [vmem:[#allocation68_spill] sm:$0xff]  ;;  %v12469_v59 = vld [vmem:[#allocation65_spill] sm:$0xff] }
 0x517   : > { %12459 = vst [vmem:[#allocation35_spill] sm:$0xff] %v9624_v5  ;;  %v9628_v26 = vpop.eup %7483  ;;  %7503 = vpow2.f32 %v1867_v4  ;;  %v2239_v20 = vsub.f32 %v12465_v55, %v2170_v60  ;;  %v1873_v1 = vmul.f32 1.442695, %v1759_v23  ;;  %v12471_v57 = vld [vmem:[#allocation108_spill] sm:$0xff] }
 0x518   : > { %12462 = vst [vmem:[#allocation36_spill] sm:$0xff] %v9628_v26  ;;  %v9632_v47 = vpop.eup %7485  ;;  %7505 = vpow2.f32 %v2341_v56  ;;  %v1871_v4 = vmul.f32 1.442695, %v1758_v51  ;;  %v2237_v56 = vsub.f32 %v12469_v59, %v2167_v45  ;;  %v1875_v16 = vmul.f32 1.442695, %v1760_v35  ;;  %v12476_v35 = vld [vmem:[#allocation70_spill] sm:$0xff] }
 0x519   : > { %1956 = vadd.xlane.f32.xlu0 %v1955_v33  ;;  %12464 = vst [vmem:[#allocation94_spill] sm:$0xff] %v9632_v47  ;;  %v9639_v33 = vpop.eup %7487  ;;  %7507 = vpow2.f32 %v2343_v61  ;;  %v1761_v31 = vsub.f32 %v12472_v39, %v12471_v57  ;;  %v2238_v51 = vsub.f32 %v12473_v63, %v2167_v45  ;;  %v1961_v23 = vadd.f32 %v9628_v26, %v9624_v5  ;;  %v12478_v63 = vld [vmem:[#allocation109_spill] sm:$0xff] }
 0x51a   : > { %1959 = vadd.xlane.f32.xlu1 %v1958_v14  ;;  %12466 = vst [vmem:[#allocation96_spill] sm:$0xff] %v9639_v33  ;;  %v2240_v14 = vsub.f32 %v12467_v46, %v2170_v60  ;;  %v9642_v25 = vpop.eup %7489  ;;  %7509 = vpow2.f32 %v2345_v29  ;;  %v2353_v60 = vmul.f32 1.442695, %v2239_v20  ;;  %v1964_v29 = vadd.f32 %v9639_v33, %v9632_v47  ;;  %v12489_v26 = vld [vmem:[#allocation77_spill] sm:$0xff] }
 0x51b   : > { %12468 = vst [vmem:[#allocation101_spill] sm:$0xff] %v9642_v25  ;;  %v9645_v55 = vpop.eup %7491  ;;  %7511 = vpow2.f32 %v2347_v8  ;;  %v2173_v8 = vpop.xlane.xlu0 %2172  ;;  %v2349_v20 = vmul.f32 1.442695, %v2237_v56  ;;  %v1877_v47 = vmul.f32 1.442695, %v1761_v31  ;;  %v12484_v31 = vld [vmem:[#allocation74_spill] sm:$0xff] }
 0x51c   : > { %12470 = vst [vmem:[#allocation39_spill] sm:$0xff] %v9645_v55  ;;  %v9650_v61 = vpop.eup %7493  ;;  %7513 = vpow2.f32 %v1869_v3  ;;  %v2355_v39 = vmul.f32 1.442695, %v2240_v14  ;;  %v12479_v3 = vld [vmem:[#allocation71_spill] sm:$0xff]  ;;  %v2351_v5 = vmul.f32 1.442695, %v2238_v51  ;;  %v2444_v56 = vadd.f32 %v9645_v55, %v9642_v25 }
 0x51d   : > { %2436 = vadd.xlane.f32.xlu0 %v2435_v32  ;;  %12474 = vst [vmem:[#allocation33_spill] sm:$0xff] %v9650_v61  ;;  %v9656_v32 = vpop.eup %7495  ;;  %7515 = vpow2.f32 %v1871_v4  ;;  %v1763_v45 = vsub.f32 %v12479_v3, %v12478_v63  ;;  %v12480_v4 = vld [vmem:[#allocation72_spill] sm:$0xff] }
 0x51e   : > { %2439 = vadd.xlane.f32.xlu1 %v2438_v19  ;;  %12475 = vst [vmem:[#allocation40_spill] sm:$0xff] %v9656_v32  ;;  %v1762_v19 = vsub.f32 %v12476_v35, %v12471_v57  ;;  %v9660_v46 = vpop.eup %7497  ;;  %7517 = vpow2.f32 %v1873_v1  ;;  %v1764_v33 = vsub.f32 %v12480_v4, %v12478_v63  ;;  %v2176_v57 = vpop.xlane.xlu1 %2175  ;;  %v12482_v35 = vld [vmem:[#allocation73_spill] sm:$0xff]  ;;  %v2441_v3 = vadd.f32 %v9656_v32, %v9650_v61  ;;  %v12486_v4 = vld [vmem:[#allocation75_spill] sm:$0xff]  ;;  %v12488_v32 = vld [vmem:[#allocation110_spill] sm:$0xff] }
 0x51f   : > { %12477 = vst [vmem:[#allocation34_spill] sm:$0xff] %v9660_v46  ;;  %v9664_v59 = vpop.eup %7499  ;;  %7519 = vpow2.f32 %v1875_v16  ;;  %v2241_v1 = vsub.f32 %v12482_v35, %v2173_v8  ;;  %v1881_v51 = vmul.f32 1.442695, %v1763_v45  ;;  %v1765_v25 = vsub.f32 %v12489_v26, %v12488_v32  ;;  %v12490_v55 = vld [vmem:[#allocation76_spill] sm:$0xff] }
 0x520   : > { %v9668_v14 = vpop.eup %7501  ;;  %7521 = vpow2.f32 %v2353_v60  ;;  %v1879_v16 = vmul.f32 1.442695, %v1762_v19  ;;  %v2243_v60 = vsub.f32 %v12486_v4, %v2176_v57  ;;  %v1883_v61 = vmul.f32 1.442695, %v1764_v33  ;;  %v12493_v33 = vld [vmem:[#allocation78_spill] sm:$0xff] }
 0x521   : > { %1962 = vadd.xlane.f32.xlu0 %v1961_v23  ;;  %12481 = vst [vmem:[#allocation95_spill] sm:$0xff] %v9668_v14  ;;  %v9675_v23 = vpop.eup %7503  ;;  %7523 = vpow2.f32 %v2355_v39  ;;  %v2244_v19 = vsub.f32 %v12490_v55, %v2176_v57  ;;  %v1967_v45 = vadd.f32 %v9664_v59, %v9660_v46  ;;  %v12494_v55 = vld [vmem:[#allocation111_spill] sm:$0xff] }
 0x522   : > { %1965 = vadd.xlane.f32.xlu1 %v1964_v29  ;;  %12483 = vst [vmem:[#allocation43_spill] sm:$0xff] %v9675_v23  ;;  %v2242_v29 = vsub.f32 %v12484_v31, %v2173_v8  ;;  %v9678_v63 = vpop.eup %7505  ;;  %7525 = vpow2.f32 %v2349_v20  ;;  %v2357_v8 = vmul.f32 1.442695, %v2241_v1  ;;  %v1970_v20 = vadd.f32 %v9675_v23, %v9668_v14 }
 0x523   : > { %12485 = vst [vmem:[#allocation93_spill] sm:$0xff] %v9678_v63  ;;  %v9681_v35 = vpop.eup %7507  ;;  %7527 = vpow2.f32 %v2351_v5  ;;  %v2179_v5 = vpop.xlane.xlu0 %2178  ;;  %v2361_v1 = vmul.f32 1.442695, %v2243_v60  ;;  %v1885_v14 = vmul.f32 1.442695, %v1765_v25  ;;  %v12498_v25 = vld [vmem:[#allocation82_spill] sm:$0xff] }
 0x524   : > { %12487 = vst [vmem:[#allocation105_spill] sm:$0xff] %v9681_v35  ;;  %v9686_v39 = vpop.eup %7509  ;;  %7529 = vpow2.f32 %v1877_v47  ;;  %v2359_v26 = vmul.f32 1.442695, %v2242_v29  ;;  %v12495_v47 = vld [vmem:[#allocation79_spill] sm:$0xff]  ;;  %v2363_v46 = vmul.f32 1.442695, %v2244_v19 }
 0x525   : > { %2442 = vadd.xlane.f32.xlu0 %v2441_v3  ;;  %12491 = vst [vmem:[#allocation45_spill] sm:$0xff] %v9686_v39  ;;  %v9692_v3 = vpop.eup %7511  ;;  %7531 = vpow2.f32 %v1879_v16  ;;  %v1767_v57 = vsub.f32 %v12495_v47, %v12494_v55  ;;  %v12496_v16 = vld [vmem:[#allocation80_spill] sm:$0xff]  ;;  %v2447_v47 = vadd.f32 %v9681_v35, %v9678_v63 }
 0x526   : > { %2445 = vadd.xlane.f32.xlu1 %v2444_v56  ;;  %12492 = vst [vmem:[#allocation46_spill] sm:$0xff] %v9692_v3  ;;  %v1766_v56 = vsub.f32 %v12493_v33, %v12488_v32  ;;  %v9696_v31 = vpop.eup %7513  ;;  %7533 = vpow2.f32 %v1881_v51  ;;  %v1768_v23 = vsub.f32 %v12496_v16, %v12494_v55  ;;  %v2182_v32 = vpop.xlane.xlu1 %2181  ;;  %v12497_v33 = vld [vmem:[#allocation81_spill] sm:$0xff]  ;;  %v2450_v60 = vadd.f32 %v9692_v3, %v9686_v39  ;;  %v12499_v16 = vld [vmem:[#allocation83_spill] sm:$0xff]  ;;  %v12500_v35 = vld [vmem:[#allocation84_spill] sm:$0xff] }
 0x527   : > { %v9700_v4 = vpop.eup %7515  ;;  %7535 = vpow2.f32 %v1883_v61  ;;  %v2245_v51 = vsub.f32 %v12497_v33, %v2179_v5  ;;  %v1889_v19 = vmul.f32 1.442695, %v1767_v57  ;;  %v2248_v39 = vsub.f32 %v12500_v35, %v2182_v32 }
 0x528   : > { %v9704_v29 = vpop.eup %7517  ;;  %7537 = vpow2.f32 %v2357_v8  ;;  %v1887_v61 = vmul.f32 1.442695, %v1766_v56  ;;  %v2247_v8 = vsub.f32 %v12499_v16, %v2182_v32  ;;  %v1891_v63 = vmul.f32 1.442695, %v1768_v23 }
 0x529   : > { %1968 = vadd.xlane.f32.xlu0 %v1967_v45  ;;  %v9711_v45 = vpop.eup %7519  ;;  %7539 = vpow2.f32 %v2359_v26  ;;  %v2365_v56 = vmul.f32 1.442695, %v2245_v51  ;;  %v1973_v26 = vadd.f32 %v9700_v4, %v9696_v31 }
 0x52a   : > { %1971 = vadd.xlane.f32.xlu1 %v1970_v20  ;;  %v2246_v20 = vsub.f32 %v12498_v25, %v2179_v5  ;;  %v9714_v55 = vpop.eup %7521  ;;  %7541 = vpow2.f32 %v2361_v1  ;;  %v1976_v5 = vadd.f32 %v9711_v45, %v9704_v29 }
 0x52b   : > { %v9717_v33 = vpop.eup %7523  ;;  %7543 = vpow2.f32 %v2363_v46  ;;  %v2369_v46 = vmul.f32 1.442695, %v2247_v8 }
 0x52c   : > { %v9720_v3 = vpop.eup %7525  ;;  %7545 = vpow2.f32 %v1885_v14  ;;  %v2367_v1 = vmul.f32 1.442695, %v2246_v20  ;;  %v2371_v14 = vmul.f32 1.442695, %v2248_v39  ;;  %v2456_v51 = vadd.f32 %v9717_v33, %v9714_v55 }
 0x52d   : > { %2448 = vadd.xlane.f32.xlu0 %v2447_v47  ;;  %v9726_v57 = vpop.eup %7527  ;;  %7547 = vpow2.f32 %v1887_v61 }
 0x52e   : > { %2451 = vadd.xlane.f32.xlu1 %v2450_v60  ;;  %v9728_v47 = vpop.eup %7529  ;;  %7549 = vpow2.f32 %v1889_v19  ;;  %v2453_v32 = vadd.f32 %v9726_v57, %v9720_v3 }
 0x52f   : > { %v9730_v23 = vpop.eup %7531  ;;  %7551 = vpow2.f32 %v1891_v63 }
 0x530   : > { %v9732_v35 = vpop.eup %7533  ;;  %7553 = vpow2.f32 %v2365_v56  ;;  %v1979_v20 = vadd.f32 %v9730_v23, %v9728_v47 }
 0x531   : > { %1974 = vadd.xlane.f32.xlu0 %v1973_v26  ;;  %12501 = vst [vmem:[#allocation44_spill] sm:$0xff] %v9732_v35  ;;  %v9738_v60 = vpop.eup %7535  ;;  %7555 = vpow2.f32 %v2367_v1 }
 0x532   : > { %1977 = vadd.xlane.f32.xlu1 %v1976_v5  ;;  %v9740_v61 = vpop.eup %7537  ;;  %7557 = vpow2.f32 %v2369_v46  ;;  %v1982_v19 = vadd.f32 %v9738_v60, %v9732_v35 }
 0x533   : > { %12502 = vst [vmem:[#allocation41_spill] sm:$0xff] %v9740_v61  ;;  %v9742_v63 = vpop.eup %7539  ;;  %7559 = vpow2.f32 %v2371_v14 }
 0x534   : > { %12503 = vst [vmem:[#allocation42_spill] sm:$0xff] %v9742_v63  ;;  %v9744_v39 = vpop.eup %7541  ;;  %v2459_v1 = vadd.f32 %v9742_v63, %v9740_v61 }
 0x535   : > { %v2383_v25 = vpop.xlane.xlu0 %2382  ;;  %2454 = vadd.xlane.f32.xlu0 %v2453_v32  ;;  %12504 = vst [vmem:[#allocation102_spill] sm:$0xff] %v9744_v39  ;;  %v9750_v16 = vpop.eup %7543 }
 0x536   : > { %2457 = vadd.xlane.f32.xlu1 %v2456_v51  ;;  %7561 = vrcp.f32 %v2383_v25  ;;  %12505 = vst [vmem:[#allocation47_spill] sm:$0xff] %v9750_v16  ;;  %v9752_v8 = vpop.eup %7545  ;;  %v2462_v46 = vadd.f32 %v9750_v16, %v9744_v39 }
 0x537   : > { %12506 = vst [vmem:[#allocation48_spill] sm:$0xff] %v9752_v8  ;;  %v9754_v26 = vpop.eup %7547 }
 0x538   : > { %12507 = vst [vmem:[#allocation98_spill] sm:$0xff] %v9754_v26  ;;  %v9756_v5 = vpop.eup %7549 }
 0x539   : > { %v2386_v56 = vpop.xlane.xlu1 %2385  ;;  %1980 = vadd.xlane.f32.xlu0 %v1979_v20  ;;  %12508 = vst [vmem:[#allocation100_spill] sm:$0xff] %v9756_v5  ;;  %v9762_v14 = vpop.eup %7551 }
 0x53a   : > { %1983 = vadd.xlane.f32.xlu1 %v1982_v19  ;;  %7563 = vrcp.f32 %v2386_v56  ;;  %12509 = vst [vmem:[#allocation97_spill] sm:$0xff] %v9762_v14  ;;  %v9764_v32 = vpop.eup %7553  ;;  %v1985_v56 = vadd.f32 %v9754_v26, %v9752_v8  ;;  %v1988_v39 = vadd.f32 %v9762_v14, %v9756_v5 }
 0x53b   : > { %12510 = vst [vmem:[#allocation99_spill] sm:$0xff] %v9764_v32  ;;  %v9766_v20 = vpop.eup %7555 }
 0x53c   : > { %12511 = vst [vmem:[#allocation51_spill] sm:$0xff] %v9766_v20  ;;  %v9768_v19 = vpop.eup %7557 }
 0x53d   : > { %v2392_v51 = vpop.xlane.xlu0 %2391  ;;  %v2389_v25 = vpop.xlane.xlu1 %2388  ;;  %2460 = vadd.xlane.f32.xlu0 %v2459_v1  ;;  %12512 = vst [vmem:[#allocation52_spill] sm:$0xff] %v9768_v19 }
 0x53e   : > { %2463 = vadd.xlane.f32.xlu1 %v2462_v46  ;;  %7565 = vrcp.f32 %v2392_v51  ;;  %v9774_v61 = vpop.eup %7559 }
 0x53f   : > { %7567 = vrcp.f32 %v2389_v25  ;;  %12513 = vst [vmem:[#allocation49_spill] sm:$0xff] %v9774_v61  ;;  %v2465_v25 = vadd.f32 %v9766_v20, %v9764_v32  ;;  %v2468_v8 = vadd.f32 %v9774_v61, %v9768_v19  ;;  %v12514_v19 = vld [vmem:[#allocation12_spill] sm:$0xff] }
 0x540   : > { %v7562_v16 = vpop.eup %7561 }
 0x541   : > { %v2691_v63 = vpop.permute.xlu0 %2690  ;;  %1986 = vadd.xlane.f32.xlu0 %v1985_v56  ;;  %v1708_v1 = vpop.xlane.xlu1 %1707  ;;  %v2509_v5 = vmul.f32 %v7562_v16, %v9288_v62  ;;  %v12515_v62 = vld [vmem:[#allocation10_spill] sm:$0xff] }
 0x542   : > { %1989 = vadd.xlane.f32.xlu1 %v1988_v39  ;;  %v1771_v46 = vsub.f32 %v12351_v18, %v1708_v1  ;;  %v1772_v51 = vsub.f32 %v12352_v40, %v1708_v1  ;;  %6693 = vmatpush3.bf16.msra.mxu0 %v2691_v63  ;;  %v2510_v18 = vmul.f32 %v7562_v16, %v9290_v30 }
 0x544   : > { %v7564_v26 = vpop.eup %7563  ;;  %v1897_v14 = vmul.f32 1.442695, %v1771_v46  ;;  %v1899_v35 = vmul.f32 1.442695, %v1772_v51 }
 0x545   : > { %v2511_v56 = vmul.f32 %v7564_v26, %v9294_v9  ;;  %2466 = vadd.xlane.f32.xlu0 %v2465_v25  ;;  %v2512_v40 = vmul.f32 %v7564_v26, %v9296_v24  ;;  %v12516_v9 = vld [vmem:[#allocation9_spill] sm:$0xff]  ;;  %v12173_v26 = vmov 0  }
 0x546   : > { %2469 = vadd.xlane.f32.xlu1 %v2468_v8  ;;  %7569 = vpow2.f32 %v1897_v14  ;;  %v12517_v8 = vld [vmem:[#allocation11_spill] sm:$0xff]  ;;  %5165 = vmatprep.subr.bf16.mxu0 %v12173_v26 }
 0x547   : > { %7571 = vpow2.f32 %v1899_v35  ;;  %v2576_v63 = vpack.c.bf16 %v2512_v40, %v2510_v18  ;;  %v2575_v39 = vpack.c.bf16 %v2511_v56, %v2509_v5  ;;  %v2395_v5 = vpop.xlane.xlu1 %2394 }
 0x548   : > { %v7566_v1 = vpop.eup %7565  ;;  %7573 = vrcp.f32 %v2395_v5 }
 0x549   : > { %v7568_v32 = vpop.eup %7567  ;;  %2933 = vmatprep.mubr.bf16.mxu0 %v2576_v63  ;;  %v2516_v61 = vmul.f32 %v7566_v1, %v12514_v19  ;;  %v2515_v20 = vmul.f32 %v7566_v1, %v12517_v8 }
 0x54a   : > { %2934 = vmatmul.mubr.bf16.vlgmr.msra.gmra.mrb[96].mxu0 %v2575_v39  ;;  %v2514_v46 = vmul.f32 %v7568_v32, %v12515_v62  ;;  %v2513_v25 = vmul.f32 %v7568_v32, %v12516_v9 }
 0x54c   : > { %v2580_v51 = vpack.c.bf16 %v2516_v61, %v2514_v46  ;;  %v2579_v24 = vpack.c.bf16 %v2515_v20, %v2513_v25  ;;  %v12519_v25 = vld [vmem:[#allocation112_spill] sm:$0xff] }
 0x54e   : > { %2941 = vmatprep.mubr.bf16.mxu0 %v2580_v51 }
 0x550   : > { %v9790_v30 = vpop.eup %7569 }
 0x551   : > { %v9792_v35 = vpop.eup %7571 }
 0x552   : > { %2942 = vmatmul.mubr.bf16.gmra.mrb[100].mxu0 %v2579_v24  ;;  %v1994_v16 = vadd.f32 %v9792_v35, %v9790_v30  ;;  %v7574_v1 = vpop.eup %7573 }
 0x553   : > { %v2517_v8 = vmul.f32 %v7574_v1, %v12519_v25  ;;  %v12522_v25 = vld [vmem:[#allocation14_spill] sm:$0xff] }
 0x554   : > { %1995 = vadd.xlane.f32.xlu1 %v1994_v16 }
 0x572   : > { %v1705_v61 = vpop.xlane.xlu0 %1704  ;;  %v2398_v14 = vpop.xlane.xlu1 %2397 }
 0x573   : > { %v1769_v32 = vsub.f32 %v12383_v10, %v1705_v61  ;;  %v1770_v19 = vsub.f32 %v12384_v36, %v1705_v61  ;;  %7575 = vrcp.f32 %v2398_v14  ;;  %v12518_v10 = vld [vmem:[#allocation113_spill] sm:$0xff] }
 0x574   : > { %v2518_v9 = vmul.f32 %v7574_v1, %v12518_v10  ;;  %v12520_v1 = vld [vmem:[#allocation88_spill] sm:$0xff] }
 0x575   : > { %v1893_v20 = vmul.f32 1.442695, %v1769_v32  ;;  %v1895_v56 = vmul.f32 1.442695, %v1770_v19 }
 0x576   : > { %v1927_v18 = vpop.xlane.xlu0 %1926  ;;  %v2401_v40 = vpop.xlane.xlu1 %2400 }
 0x577   : > { %7577 = vpow2.f32 %v1893_v20 }
 0x578   : > { %7579 = vpow2.f32 %v1895_v56 }
 0x579   : > { %7581 = vrcp.f32 %v1927_v18 }
 0x57a   : > { %7583 = vrcp.f32 %v2401_v40  ;;  %v1930_v63 = vpop.xlane.xlu0 %1929  ;;  %v2404_v39 = vpop.xlane.xlu1 %2403 }
 0x57b   : > { %7585 = vrcp.f32 %v1930_v63 }
 0x57c   : > { %7587 = vrcp.f32 %v2404_v39 }
 0x57d   : > { %v7576_v62 = vpop.eup %7575 }
 0x57e   : > { %v2185_v46 = vpop.xlane.xlu0 %2184  ;;  %v2520_v36 = vmul.f32 %v7576_v62, %v9398_v17  ;;  %v2519_v24 = vmul.f32 %v7576_v62, %v9395_v27 }
 0x57f   : > { %v2188_v51 = vpop.xlane.xlu1 %2187  ;;  %v2249_v16 = vsub.f32 %v12393_v13, %v2185_v46  ;;  %v2250_v5 = vsub.f32 %v12394_v53, %v2185_v46  ;;  %v12521_v46 = vld [vmem:[#allocation87_spill] sm:$0xff] }
 0x580   : > { %v2251_v61 = vsub.f32 %v12396_v0, %v2188_v51  ;;  %v2252_v14 = vsub.f32 %v12397_v43, %v2188_v51  ;;  %v2584_v32 = vpack.c.bf16 %v2520_v36, %v2518_v9  ;;  %v2583_v19 = vpack.c.bf16 %v2519_v24, %v2517_v8  ;;  %v12523_v24 = vld [vmem:[#allocation18_spill] sm:$0xff] }
 0x581   : > { %v9807_v20 = vpop.eup %7577  ;;  %v2373_v56 = vmul.f32 1.442695, %v2249_v16  ;;  %v2375_v18 = vmul.f32 1.442695, %v2250_v5  ;;  %v12524_v5 = vld [vmem:[#allocation13_spill] sm:$0xff] }
 0x582   : > { %v2377_v40 = vmul.f32 1.442695, %v2251_v61  ;;  %v9809_v17 = vpop.eup %7579  ;;  %v2379_v63 = vmul.f32 1.442695, %v2252_v14  ;;  %v2407_v39 = vpop.xlane.xlu0 %2406  ;;  %2949 = vmatprep.mubr.bf16.mxu0 %v2584_v32  ;;  %v12525_v14 = vld [vmem:[#allocation22_spill] sm:$0xff] }
 0x583   : > { %v2410_v27 = vpop.xlane.xlu1 %2409  ;;  %v7582_v13 = vpop.eup %7581  ;;  %7589 = vpow2.f32 %v2373_v56  ;;  %2950 = vmatmul.mubr.bf16.gmra.mrb[104].mxu0 %v2583_v19  ;;  %v1991_v53 = vadd.f32 %v9809_v17, %v9807_v20  ;;  %v12526_v19 = vld [vmem:[#allocation17_spill] sm:$0xff] }
 0x584   : > { %v7584_v43 = vpop.eup %7583  ;;  %7591 = vpow2.f32 %v2375_v18  ;;  %v2046_v62 = vmul.f32 %v7582_v13, %v12520_v1  ;;  %v2045_v51 = vmul.f32 %v7582_v13, %v12521_v46  ;;  %v12527_v18 = vld [vmem:[#allocation21_spill] sm:$0xff] }
 0x585   : > { %v7586_v0 = vpop.eup %7585  ;;  %7593 = vpow2.f32 %v2377_v40  ;;  %1992 = vadd.xlane.f32.xlu0 %v1991_v53  ;;  %v2522_v16 = vmul.f32 %v7584_v43, %v12523_v24  ;;  %v2521_v56 = vmul.f32 %v7584_v43, %v12526_v19 }
 0x586   : > { %v7588_v10 = vpop.eup %7587  ;;  %7595 = vpow2.f32 %v2379_v63  ;;  %v1933_v9 = vpop.xlane.xlu0 %1932  ;;  %v2048_v8 = vmul.f32 %v7586_v0, %v12522_v25  ;;  %v2047_v61 = vmul.f32 %v7586_v0, %v12524_v5 }
 0x587   : > { %v1936_v36 = vpop.xlane.xlu1 %1935  ;;  %7597 = vrcp.f32 %v2407_v39  ;;  %v2524_v32 = vmul.f32 %v7588_v10, %v12525_v14  ;;  %v2523_v40 = vmul.f32 %v7588_v10, %v12527_v18 }
 0x588   : > { %7599 = vrcp.f32 %v2410_v27  ;;  %v2590_v53 = vpack.c.bf16 %v2048_v8, %v2046_v62  ;;  %v2589_v13 = vpack.c.bf16 %v2047_v61, %v2045_v51 }
 0x589   : > { %7601 = vrcp.f32 %v1933_v9  ;;  %v2588_v63 = vpack.c.bf16 %v2524_v32, %v2522_v16  ;;  %v2587_v1 = vpack.c.bf16 %v2523_v40, %v2521_v56  ;;  %v12528_v40 = vld [vmem:[#allocation15_spill] sm:$0xff] }
 0x58a   : > { %7603 = vrcp.f32 %v1936_v36  ;;  %2804 = vmatprep.mubr.bf16.mxu1 %v2590_v53  ;;  %v2413_v46 = vpop.xlane.xlu0 %2412 }
 0x58b   : > { %v2416_v25 = vpop.xlane.xlu1 %2415  ;;  %7605 = vrcp.f32 %v2413_v46  ;;  %2957 = vmatprep.mubr.bf16.mxu0 %v2588_v63  ;;  %2805 = vmatmul.mubr.bf16.gmra.mrb[80].mxu1 %v2589_v13 }
 0x58c   : > { %7607 = vrcp.f32 %v2416_v25  ;;  %2958 = vmatmul.mubr.bf16.gmra.mrb[108].mxu0 %v2587_v1  ;;  %v12530_v25 = vld [vmem:[#allocation16_spill] sm:$0xff] }
 0x58d   : > { %v9821_v39 = vpop.eup %7589 }
 0x58e   : > { %v9823_v43 = vpop.eup %7591  ;;  %v1939_v0 = vpop.xlane.xlu0 %1938 }
 0x58f   : > { %v1942_v27 = vpop.xlane.xlu1 %1941  ;;  %v9825_v62 = vpop.eup %7593  ;;  %7609 = vrcp.f32 %v1939_v0  ;;  %v2471_v51 = vadd.f32 %v9823_v43, %v9821_v39 }
 0x590   : > { %v9829_v10 = vpop.eup %7595  ;;  %7611 = vrcp.f32 %v1942_v27 }
 0x591   : > { %v7598_v9 = vpop.eup %7597  ;;  %2472 = vadd.xlane.f32.xlu0 %v2471_v51  ;;  %v2474_v36 = vadd.f32 %v9829_v10, %v9825_v62 }
 0x592   : > { %v7600_v8 = vpop.eup %7599  ;;  %v2419_v24 = vpop.xlane.xlu0 %2418  ;;  %v2526_v16 = vmul.f32 %v7598_v9, %v9440_v44  ;;  %v2525_v61 = vmul.f32 %v7598_v9, %v9436_v49  ;;  %v12529_v44 = vld [vmem:[#allocation8_spill] sm:$0xff]  ;;  %v12531_v9 = vld [vmem:[#allocation26_spill] sm:$0xff] }
 0x593   : > { %v2422_v5 = vpop.xlane.xlu1 %2421  ;;  %v7602_v14 = vpop.eup %7601  ;;  %2475 = vadd.xlane.f32.xlu1 %v2474_v36  ;;  %7613 = vrcp.f32 %v2419_v24  ;;  %v2528_v32 = vmul.f32 %v7600_v8, %v9449_v38  ;;  %v2527_v19 = vmul.f32 %v7600_v8, %v9444_v11  ;;  %v12532_v8 = vld [vmem:[#allocation25_spill] sm:$0xff] }
 0x594   : > { %v7604_v56 = vpop.eup %7603  ;;  %7615 = vrcp.f32 %v2422_v5  ;;  %v2050_v18 = vmul.f32 %v7602_v14, %v9373_v54  ;;  %v2049_v53 = vmul.f32 %v7602_v14, %v12528_v40 }
 0x595   : > { %v7606_v13 = vpop.eup %7605  ;;  %v2592_v63 = vpack.c.bf16 %v2528_v32, %v2526_v16  ;;  %v2591_v1 = vpack.c.bf16 %v2527_v19, %v2525_v61  ;;  %v2052_v46 = vmul.f32 %v7604_v56, %v12529_v44  ;;  %v2051_v49 = vmul.f32 %v7604_v56, %v12530_v25 }
 0x596   : > { %v7608_v0 = vpop.eup %7607  ;;  %v1945_v27 = vpop.xlane.xlu0 %1944  ;;  %v2530_v38 = vmul.f32 %v7606_v13, %v12531_v9  ;;  %v2529_v24 = vmul.f32 %v7606_v13, %v12532_v8 }
 0x597   : > { %v1948_v51 = vpop.xlane.xlu1 %1947  ;;  %2965 = vmatprep.mubr.bf16.mxu0 %v2592_v63  ;;  %7617 = vrcp.f32 %v1945_v27  ;;  %v2594_v11 = vpack.c.bf16 %v2052_v46, %v2050_v18  ;;  %v2593_v36 = vpack.c.bf16 %v2051_v49, %v2049_v53  ;;  %v2532_v54 = vmul.f32 %v7608_v0, %v9482_v21  ;;  %v7881_v49 = vld [vmem:[%s8235_s21 + $0x10] sm:$0xff] }
 0x598   : > { %2966 = vmatmul.mubr.bf16.gmra.mrb[112].mxu0 %v2591_v1  ;;  %7619 = vrcp.f32 %v1948_v51  ;;  %v2531_v16 = vmul.f32 %v7608_v0, %v9478_v22  ;;  %v7882_v0 = vld [vmem:[%s8235_s21 + $0x18] sm:$0xff] }
 0x599   : > { %v7610_v5 = vpop.eup %7609  ;;  %2812 = vmatprep.mubr.bf16.mxu1 %v2594_v11  ;;  %v2596_v61 = vpack.c.bf16 %v2532_v54, %v2530_v38  ;;  %v7199_v27 = vpack.i.bf16 %v7882_v0, %v7881_v49  ;;  %v12535_v54 = vld [vmem:[#allocation19_spill] sm:$0xff]  ;;  %v12540_v0 = vld [vmem:[#allocation29_spill] sm:$0xff] }
 0x59a   : > { %v7612_v14 = vpop.eup %7611  ;;  %2813 = vmatmul.mubr.bf16.gmra.mrb[84].mxu1 %v2593_v36  ;;  %v2425_v32 = vpop.xlane.xlu0 %2424  ;;  %v2054_v56 = vmul.f32 %v7610_v5, %v9384_v12  ;;  %v2053_v18 = vmul.f32 %v7610_v5, %v9382_v7  ;;  %v2595_v22 = vpack.c.bf16 %v2531_v16, %v2529_v24  ;;  %v7883_v24 = vld [vmem:[%s8235_s21] sm:$0xff]  ;;  %v7884_v16 = vld [vmem:[%s8235_s21 + $0x8] sm:$0xff] }
 0x59b   : > { %v2428_v19 = vpop.xlane.xlu1 %2427  ;;  %7621 = vrcp.f32 %v2425_v32  ;;  %2973 = vmatprep.mubr.bf16.mxu0 %v2596_v61  ;;  %v2056_v21 = vmul.f32 %v7612_v14, %v9389_v6  ;;  %v2055_v40 = vmul.f32 %v7612_v14, %v9387_v15  ;;  %v12533_v6 = vld [vmem:[#allocation27_spill] sm:$0xff]  ;;  %v12536_v5 = vld [vmem:[#allocation24_spill] sm:$0xff] }
 0x59c   : > { %7623 = vrcp.f32 %v2428_v19  ;;  %v12537_v14 = vld [vmem:[#allocation23_spill] sm:$0xff] }
 0x59d   : > { %v7614_v53 = vpop.eup %7613  ;;  %v2598_v13 = vpack.c.bf16 %v2056_v21, %v2054_v56  ;;  %v2597_v46 = vpack.c.bf16 %v2055_v40, %v2053_v18  ;;  %v7885_v56 = vld [vmem:[%s8235_s21 + $0x20] sm:$0xff]  ;;  %v7886_v18 = vld [vmem:[%s8235_s21 + $0x28] sm:$0xff] }
 0x59e   : > { %v7616_v63 = vpop.eup %7615  ;;  %v1951_v1 = vpop.xlane.xlu0 %1950  ;;  %v2534_v12 = vmul.f32 %v7614_v53, %v9508_v48  ;;  %v2533_v15 = vmul.f32 %v7614_v53, %v9488_v50  ;;  %v7194_v50 = vpack.i.bf16 %v7884_v16, %v7883_v24  ;;  %v7204_v21 = vpack.i.bf16 %v7886_v18, %v7885_v56 }
 0x59f   : > { %v1954_v44 = vpop.xlane.xlu1 %1953  ;;  %7625 = vrcp.f32 %v1951_v1  ;;  %2820 = vmatprep.mubr.bf16.mxu1 %v2598_v13  ;;  %v2536_v7 = vmul.f32 %v7616_v63, %v9520_v2  ;;  %v2535_v25 = vmul.f32 %v7616_v63, %v12533_v6  ;;  %v12534_v2 = vld [vmem:[#allocation20_spill] sm:$0xff] }
 0x5a0   : > { %2974 = vmatmul.mubr.bf16.gmra.mrb[116].mxu0 %v2595_v22  ;;  %7627 = vrcp.f32 %v1954_v44 }
 0x5a1   : > { %v7618_v51 = vpop.eup %7617  ;;  %v2600_v9 = vpack.c.bf16 %v2536_v7, %v2534_v12  ;;  %v2599_v19 = vpack.c.bf16 %v2535_v25, %v2533_v15  ;;  %v7887_v7 = vld [vmem:[%s8235_s21 + $0x30] sm:$0xff]  ;;  %v7888_v15 = vld [vmem:[%s8235_s21 + $0x38] sm:$0xff]  ;;  %v12539_v25 = vld [vmem:[#allocation28_spill] sm:$0xff] }
 0x5a2   : > { %v7620_v38 = vpop.eup %7619  ;;  %2821 = vmatmul.mubr.bf16.gmra.mrb[88].mxu1 %v2597_v46  ;;  %v2431_v48 = vpop.xlane.xlu0 %2430  ;;  %v2058_v36 = vmul.f32 %v7618_v51, %v12534_v2  ;;  %v2057_v8 = vmul.f32 %v7618_v51, %v12535_v54  ;;  %v12538_v46 = vld [vmem:[#allocation30_spill] sm:$0xff]  ;;  %v7209_v6 = vpack.i.bf16 %v7888_v15, %v7887_v7  ;;  %v7889_v51 = vld [vmem:[%s8235_s21 + $0x40] sm:$0xff]  ;;  %v7898_v15 = vld [vmem:[%s8235_s21 + $0x88] sm:$0xff] }
 0x5a3   : > { %v2434_v11 = vpop.xlane.xlu1 %2433  ;;  %7629 = vrcp.f32 %v2431_v48  ;;  %2981 = vmatprep.mubr.bf16.mxu0 %v2600_v9  ;;  %v2060_v61 = vmul.f32 %v7620_v38, %v12536_v5  ;;  %v2059_v32 = vmul.f32 %v7620_v38, %v12537_v14  ;;  %v7892_v5 = vld [vmem:[%s8235_s21 + $0x58] sm:$0xff]  ;;  %v7897_v7 = vld [vmem:[%s8235_s21 + $0x80] sm:$0xff] }
 0x5a4   : > { %7631 = vrcp.f32 %v2434_v11  ;;  %7200 = vrot.lane.b32.xlu1 %v7199_v27, %s8057_s25 }
 0x5a5   : > { %v7622_v40 = vpop.eup %7621  ;;  %v2602_v22 = vpack.c.bf16 %v2060_v61, %v2058_v36  ;;  %v2601_v1 = vpack.c.bf16 %v2059_v32, %v2057_v8  ;;  %v7894_v32 = vld [vmem:[%s8235_s21 + $0x68] sm:$0xff] }
 0x5a6   : > { %v7624_v53 = vpop.eup %7623  ;;  %v1957_v13 = vpop.xlane.xlu0 %1956  ;;  %v2538_v44 = vmul.f32 %v7622_v40, %v9525_v42  ;;  %v2537_v49 = vmul.f32 %v7622_v40, %v12539_v25  ;;  %v7890_v42 = vld [vmem:[%s8235_s21 + $0x48] sm:$0xff] }
 0x5a7   : > { %v1960_v63 = vpop.xlane.xlu1 %1959  ;;  %7633 = vrcp.f32 %v1957_v13  ;;  %2828 = vmatprep.mubr.bf16.mxu1 %v2602_v22  ;;  %v2540_v12 = vmul.f32 %v7624_v53, %v12538_v46  ;;  %7195 = vrot.lane.b32.xlu0 %v7194_v50, %s8057_s25  ;;  %v2539_v27 = vmul.f32 %v7624_v53, %v12540_v0  ;;  %v7214_v9 = vpack.i.bf16 %v7890_v42, %v7889_v51  ;;  %v7891_v50 = vld [vmem:[%s8235_s21 + $0x50] sm:$0xff]  ;;  %v7896_v13 = vld [vmem:[%s8235_s21 + $0x78] sm:$0xff]  ;;  %v12544_v42 = vld [vmem:[#allocation85_spill] sm:$0xff] }
 0x5a8   : > { %2982 = vmatmul.mubr.bf16.gmra.mrb[120].mxu0 %v2599_v19  ;;  %7635 = vrcp.f32 %v1960_v63  ;;  %7205 = vrot.lane.b32.xlu1 %v7204_v21, %s8057_s25  ;;  %v7219_v61 = vpack.i.bf16 %v7892_v5, %v7891_v50  ;;  %v7895_v53 = vld [vmem:[%s8235_s21 + $0x70] sm:$0xff]  ;;  %v12542_v46 = vld [vmem:[#allocation31_spill] sm:$0xff] }
 0x5a9   : > { %v7626_v38 = vpop.eup %7625  ;;  %v2604_v48 = vpack.c.bf16 %v2540_v12, %v2538_v44  ;;  %v2603_v14 = vpack.c.bf16 %v2539_v27, %v2537_v49  ;;  %v7229_v63 = vpack.i.bf16 %v7896_v13, %v7895_v53  ;;  %v12543_v27 = vld [vmem:[#allocation86_spill] sm:$0xff] }
 0x5aa   : > { %v7628_v11 = vpop.eup %7627  ;;  %2829 = vmatmul.mubr.bf16.gmra.mrb[92].mxu1 %v2601_v1  ;;  %v2437_v2 = vpop.xlane.xlu0 %2436  ;;  %v2062_v54 = vmul.f32 %v7626_v38, %v9461_v41  ;;  %v2061_v8 = vmul.f32 %v7626_v38, %v9430_v34  ;;  %v7893_v41 = vld [vmem:[%s8235_s21 + $0x60] sm:$0xff]  ;;  %v12545_v38 = vld [vmem:[#allocation90_spill] sm:$0xff] }
 0x5ab   : > { %v2440_v36 = vpop.xlane.xlu1 %2439  ;;  %7637 = vrcp.f32 %v2437_v2  ;;  %2989 = vmatprep.mubr.bf16.mxu0 %v2604_v48  ;;  %v2064_v24 = vmul.f32 %v7628_v11, %v9554_v52  ;;  %v2063_v16 = vmul.f32 %v7628_v11, %v9548_v58  ;;  %7210 = vrot.lane.b32.xlu0 %v7209_v6, %s8057_s25  ;;  %v7224_v34 = vpack.i.bf16 %v7894_v32, %v7893_v41  ;;  %v12541_v1 = vld [vmem:[#allocation32_spill] sm:$0xff]  ;;  %v12546_v11 = vld [vmem:[#allocation89_spill] sm:$0xff] }
 0x5ac   : > { %7639 = vrcp.f32 %v2440_v36  ;;  %7215 = vrot.lane.b32.xlu1 %v7214_v9, %s8057_s25  ;;  %v12548_v41 = vld [vmem:[#allocation92_spill] sm:$0xff] }
 0x5ad   : > { %v7630_v19 = vpop.eup %7629  ;;  %v2606_v56 = vpack.c.bf16 %v2064_v24, %v2062_v54  ;;  %v2605_v21 = vpack.c.bf16 %v2063_v16, %v2061_v8 }
 0x5ae   : > { %v7632_v18 = vpop.eup %7631  ;;  %v1963_v52 = vpop.xlane.xlu0 %1962  ;;  %v2542_v40 = vmul.f32 %v7630_v19, %v9586_v37  ;;  %v2541_v44 = vmul.f32 %v7630_v19, %v12541_v1  ;;  %v7234_v37 = vpack.i.bf16 %v7898_v15, %v7897_v7  ;;  %v7900_v19 = vld [vmem:[%s8235_s21 + $0x98] sm:$0xff]  ;;  %v12551_v1 = vld [vmem:[#allocation36_spill] sm:$0xff] }
 0x5af   : > { %v1966_v58 = vpop.xlane.xlu1 %1965  ;;  %7641 = vrcp.f32 %v1963_v52  ;;  %2836 = vmatprep.mubr.bf16.mxu1 %v2606_v56  ;;  %v2544_v22 = vmul.f32 %v7632_v18, %v9575_v28  ;;  %7220 = vrot.lane.b32.xlu0 %v7219_v61, %s8057_s25  ;;  %v2543_v12 = vmul.f32 %v7632_v18, %v12542_v46  ;;  %v12547_v61 = vld [vmem:[#allocation38_spill] sm:$0xff]  ;;  %v12549_v18 = vld [vmem:[#allocation37_spill] sm:$0xff]  ;;  %v12552_v46 = vld [vmem:[#allocation35_spill] sm:$0xff] }
 0x5b0   : > { %2990 = vmatmul.mubr.bf16.gmra.mrb[124].mxu0 %v2603_v14  ;;  %7643 = vrcp.f32 %v1966_v58  ;;  %7225 = vrot.lane.b32.xlu1 %v7224_v34, %s8057_s25  ;;  %v7899_v34 = vld [vmem:[%s8235_s21 + $0x90] sm:$0xff]  ;;  %v12550_v58 = vld [vmem:[#allocation91_spill] sm:$0xff]  ;;  %v12553_v7 = vld [vmem:[#allocation96_spill] sm:$0xff] }
 0x5b1   : > { %v7634_v6 = vpop.eup %7633  ;;  %v2608_v25 = vpack.c.bf16 %v2544_v22, %v2542_v40  ;;  %v2607_v36 = vpack.c.bf16 %v2543_v12, %v2541_v44  ;;  %v7239_v56 = vpack.i.bf16 %v7900_v19, %v7899_v34  ;;  %v12559_v19 = vld [vmem:[#allocation34_spill] sm:$0xff] }
 0x5b2   : > { %v7636_v49 = vpop.eup %7635  ;;  %2837 = vmatmul.mubr.bf16.gmra.mrb[96].mxu1 %v2605_v21  ;;  %v2443_v28 = vpop.xlane.xlu0 %2442  ;;  %v2066_v51 = vmul.f32 %v7634_v6, %v12543_v27  ;;  %v2065_v9 = vmul.f32 %v7634_v6, %v12544_v42 }
 0x5b3   : > { %v2446_v0 = vpop.xlane.xlu1 %2445  ;;  %7645 = vrcp.f32 %v2443_v28  ;;  %2997 = vmatprep.mubr.bf16.mxu0 %v2608_v25  ;;  %v2068_v48 = vmul.f32 %v7636_v49, %v12545_v38  ;;  %v2067_v2 = vmul.f32 %v7636_v49, %v12546_v11  ;;  %7230 = vrot.lane.b32.xlu0 %v7229_v63, %s8057_s25 }
 0x5b4   : > { %7647 = vrcp.f32 %v2446_v0  ;;  %7235 = vrot.lane.b32.xlu1 %v7234_v37, %s8057_s25  ;;  %v12554_v37 = vld [vmem:[#allocation94_spill] sm:$0xff] }
 0x5b5   : > { %v7638_v54 = vpop.eup %7637  ;;  %v2610_v8 = vpack.c.bf16 %v2068_v48, %v2066_v51  ;;  %v2609_v5 = vpack.c.bf16 %v2067_v2, %v2065_v9  ;;  %v12555_v9 = vld [vmem:[#allocation40_spill] sm:$0xff]  ;;  %v12556_v48 = vld [vmem:[#allocation39_spill] sm:$0xff] }
 0x5b6   : > { %v7640_v24 = vpop.eup %7639  ;;  %v1969_v16 = vpop.xlane.xlu0 %1968  ;;  %v2546_v14 = vmul.f32 %v7638_v54, %v12547_v61  ;;  %v2545_v52 = vmul.f32 %v7638_v54, %v12549_v18  ;;  %v7901_v2 = vld [vmem:[%s8235_s21 + $0xa0] sm:$0xff]  ;;  %v12560_v18 = vld [vmem:[#allocation43_spill] sm:$0xff] }
 0x5b7   : > { %v1972_v50 = vpop.xlane.xlu1 %1971  ;;  %7649 = vrcp.f32 %v1969_v16  ;;  %2844 = vmatprep.mubr.bf16.mxu1 %v2610_v8  ;;  %v2548_v32 = vmul.f32 %v7640_v24, %v12548_v41  ;;  %4232 = vrot.lane.b32.xlu0 %v12173_v26, %s8054_s23  ;;  %v2547_v21 = vmul.f32 %v7640_v24, %v12550_v58  ;;  %v12557_v8 = vld [vmem:[#allocation33_spill] sm:$0xff]  ;;  %v12561_v58 = vld [vmem:[#allocation95_spill] sm:$0xff] }
 0x5b8   : > { %2998 = vmatmul.mubr.bf16.gmra.mrb[128].mxu0 %v2607_v36  ;;  %7651 = vrcp.f32 %v1972_v50  ;;  %v7902_v36 = vld [vmem:[%s8235_s21 + $0xa8] sm:$0xff] }
 0x5b9   : > { %v7642_v40 = vpop.eup %7641  ;;  %v2612_v22 = vpack.c.bf16 %v2548_v32, %v2546_v14  ;;  %v2611_v25 = vpack.c.bf16 %v2547_v21, %v2545_v52  ;;  %v7244_v54 = vpack.i.bf16 %v7902_v36, %v7901_v2  ;;  %v12558_v16 = vld [vmem:[#allocation101_spill] sm:$0xff] }
 0x5ba   : > { %v7644_v53 = vpop.eup %7643  ;;  %2845 = vmatmul.mubr.bf16.gmra.mrb[100].mxu1 %v2609_v5  ;;  %v2449_v13 = vpop.xlane.xlu0 %2448  ;;  %v2070_v44 = vmul.f32 %v7642_v40, %v12551_v1  ;;  %v2069_v12 = vmul.f32 %v7642_v40, %v12552_v46  ;;  %v7903_v40 = vld [vmem:[%s8235_s21 + $0xb0] sm:$0xff] }
 0x5bb   : > { %v2452_v63 = vpop.xlane.xlu1 %2451  ;;  %7653 = vrcp.f32 %v2449_v13  ;;  %3005 = vmatprep.mubr.bf16.mxu0 %v2612_v22  ;;  %v2072_v15 = vmul.f32 %v7644_v53, %v12553_v7  ;;  %v2071_v6 = vmul.f32 %v7644_v53, %v12554_v37  ;;  %7240 = vrot.lane.b32.xlu0 %v7239_v56, %s8057_s25  ;;  %v7904_v22 = vld [vmem:[%s8235_s21 + $0xb8] sm:$0xff]  ;;  %v12562_v7 = vld [vmem:[#allocation105_spill] sm:$0xff]  ;;  %v12563_v37 = vld [vmem:[#allocation46_spill] sm:$0xff] }
 0x5bc   : > { %7655 = vrcp.f32 %v2452_v63  ;;  %v7249_v53 = vpack.i.bf16 %v7904_v22, %v7903_v40  ;;  %v7909_v40 = vld [vmem:[%s8235_s21 + $0xe0] sm:$0xff]  ;;  %v7910_v22 = vld [vmem:[%s8235_s21 + $0xe8] sm:$0xff] }
 0x5bd   : > { %v7646_v49 = vpop.eup %7645  ;;  %v2614_v28 = vpack.c.bf16 %v2072_v15, %v2070_v44  ;;  %v2613_v42 = vpack.c.bf16 %v2071_v6, %v2069_v12 }
 0x5be   : > { %v7648_v0 = vpop.eup %7647  ;;  %v1975_v27 = vpop.xlane.xlu0 %1974  ;;  %v2550_v38 = vmul.f32 %v7646_v49, %v12555_v9  ;;  %v2549_v24 = vmul.f32 %v7646_v49, %v12557_v8  ;;  %v7906_v49 = vld [vmem:[%s8235_s21 + $0xc8] sm:$0xff] }
 0x5bf   : > { %v1978_v51 = vpop.xlane.xlu1 %1977  ;;  %7657 = vrcp.f32 %v1975_v27  ;;  %2852 = vmatprep.mubr.bf16.mxu1 %v2614_v28  ;;  %v2552_v11 = vmul.f32 %v7648_v0, %v12556_v48  ;;  %4185 = vrot.lane.b32.xlu0 %v12173_v26, %s8058_s26  ;;  %v2551_v50 = vmul.f32 %v7648_v0, %v12558_v16  ;;  %v12564_v0 = vld [vmem:[#allocation93_spill] sm:$0xff] }
 0x5c0   : > { %3006 = vmatmul.mubr.bf16.gmra.mrb[132].mxu0 %v2611_v25  ;;  %7659 = vrcp.f32 %v1978_v51  ;;  %v7905_v25 = vld [vmem:[%s8235_s21 + $0xc0] sm:$0xff]  ;;  %v12565_v51 = vld [vmem:[#allocation45_spill] sm:$0xff] }
 0x5c1   : > { %v7650_v5 = vpop.eup %7649  ;;  %v2616_v61 = vpack.c.bf16 %v2552_v11, %v2550_v38  ;;  %v2615_v13 = vpack.c.bf16 %v2551_v50, %v2549_v24  ;;  %v7254_v28 = vpack.i.bf16 %v7906_v49, %v7905_v25  ;;  %v7912_v25 = vld [vmem:[%s8235_s21 + $0xf8] sm:$0xff] }
 0x5c2   : > { %v7652_v14 = vpop.eup %7651  ;;  %2853 = vmatmul.mubr.bf16.gmra.mrb[104].mxu1 %v2613_v42  ;;  %v2455_v41 = vpop.xlane.xlu0 %2454  ;;  %v2074_v34 = vmul.f32 %v7650_v5, %v9664_v59  ;;  %v2073_v56 = vmul.f32 %v7650_v5, %v12559_v19  ;;  %v7907_v5 = vld [vmem:[%s8235_s21 + $0xd0] sm:$0xff] }
 0x5c3   : > { %v2458_v32 = vpop.xlane.xlu1 %2457  ;;  %7661 = vrcp.f32 %v2455_v41  ;;  %3013 = vmatprep.mubr.bf16.mxu0 %v2616_v61  ;;  %v2076_v52 = vmul.f32 %v7652_v14, %v12560_v18  ;;  %v2075_v21 = vmul.f32 %v7652_v14, %v12561_v58  ;;  %7245 = vrot.lane.b32.xlu0 %v7244_v54, %s8057_s25  ;;  %v7908_v61 = vld [vmem:[%s8235_s21 + $0xd8] sm:$0xff] }
 0x5c4   : > { %7663 = vrcp.f32 %v2458_v32  ;;  %v7259_v14 = vpack.i.bf16 %v7908_v61, %v7907_v5 }
 0x5c5   : > { %v7654_v63 = vpop.eup %7653  ;;  %v2618_v1 = vpack.c.bf16 %v2076_v52, %v2074_v34  ;;  %v2617_v12 = vpack.c.bf16 %v2075_v21, %v2073_v56 }
 0x5c6   : > { %v7656_v59 = vpop.eup %7655  ;;  %v1981_v44 = vpop.xlane.xlu0 %1980  ;;  %v2554_v15 = vmul.f32 %v7654_v63, %v12562_v7  ;;  %v2553_v27 = vmul.f32 %v7654_v63, %v12564_v0 }
 0x5c7   : > { %v1984_v46 = vpop.xlane.xlu1 %1983  ;;  %7665 = vrcp.f32 %v1981_v44  ;;  %2860 = vmatprep.mubr.bf16.mxu1 %v2618_v1  ;;  %v2556_v6 = vmul.f32 %v7656_v59, %v12563_v37  ;;  %7250 = vrot.lane.b32.xlu0 %v7249_v53, %s8057_s25  ;;  %v2555_v42 = vmul.f32 %v7656_v59, %v12565_v51  ;;  %v7264_v53 = vpack.i.bf16 %v7910_v22, %v7909_v40  ;;  %v12566_v37 = vld [vmem:[#allocation44_spill] sm:$0xff] }
 0x5c8   : > { %3014 = vmatmul.mubr.bf16.gmra.mrb[136].mxu0 %v2615_v13  ;;  %7667 = vrcp.f32 %v1984_v46 }
 0x5c9   : > { %v7658_v9 = vpop.eup %7657  ;;  %v2620_v38 = vpack.c.bf16 %v2556_v6, %v2554_v15  ;;  %v7911_v6 = vld [vmem:[%s8235_s21 + $0xf0] sm:$0xff]  ;;  %s12181_s21 = smov 64  }
 0x5ca   : > { %v7660_v48 = vpop.eup %7659  ;;  %v6582_v11 = vpop.f32.mrb[64].mxu1  ;;  %2861 = vmatmul.mubr.bf16.gmra.mrb[108].mxu1 %v2617_v12  ;;  %v2078_v36 = vmul.f32 %v7658_v9, %v9700_v4  ;;  %v2077_v54 = vmul.f32 %v7658_v9, %v9696_v31  ;;  %v2619_v31 = vpack.c.bf16 %v2555_v42, %v2553_v27  ;;  %v7269_v49 = vpack.i.bf16 %v7912_v25, %v7911_v6 }
 0x5cb   : > { %v2461_v2 = vpop.xlane.xlu0 %2460  ;;  %v6583_v8 = vpop.f32.mrb[65].mxu1  ;;  %3021 = vmatprep.mubr.bf16.mxu0 %v2620_v38  ;;  %v2080_v16 = vmul.f32 %v7660_v48, %v9711_v45  ;;  %v2079_v50 = vmul.f32 %v7660_v48, %v9704_v29  ;;  %7255 = vrot.lane.b32.xlu0 %v7254_v28, %s8057_s25 }
 0x5cc   : > { %7669 = vrcp.f32 %v2461_v2  ;;  %v2464_v24 = vpop.xlane.xlu1 %2463  ;;  %v9942_v41 = vadd.f32 %v6583_v8, %v6582_v11  ;;  %v6585_v32 = vpop.f32.mrb[66].mxu1  ;;  %v12568_v11 = vld [vmem:[#allocation47_spill] sm:$0xff]  ;;  %v12570_v8 = vld [vmem:[#allocation102_spill] sm:$0xff] }
 0x5cd   : > { %7671 = vrcp.f32 %v2464_v24  ;;  %v7662_v4 = vpop.eup %7661  ;;  %v6586_v34 = vpop.f32.mrb[67].mxu1  ;;  %v2622_v19 = vpack.c.bf16 %v2080_v16, %v2078_v36  ;;  %v2621_v29 = vpack.c.bf16 %v2079_v50, %v2077_v54  ;;  %v12569_v36 = vld [vmem:[#allocation41_spill] sm:$0xff] }
 0x5ce   : > { %v7664_v56 = vpop.eup %7663  ;;  %v9944_v18 = vadd.f32 %v6586_v34, %v6585_v32  ;;  %v2558_v52 = vmul.f32 %v7662_v4, %v9726_v57  ;;  %v2557_v13 = vmul.f32 %v7662_v4, %v9720_v3 }
 0x5cf   : > { %v1987_v45 = vpop.xlane.xlu0 %1986  ;;  %2868 = vmatprep.mubr.bf16.mxu1 %v2622_v19  ;;  %v2560_v21 = vmul.f32 %v7664_v56, %v9717_v33  ;;  %7260 = vrot.lane.b32.xlu0 %v7259_v14, %s8057_s25  ;;  %v2559_v63 = vmul.f32 %v7664_v56, %v9714_v55  ;;  %v12571_v14 = vld [vmem:[#allocation98_spill] sm:$0xff]  ;;  %v12573_v19 = vld [vmem:[#allocation97_spill] sm:$0xff] }
 0x5d0   : > { %7673 = vrcp.f32 %v1987_v45  ;;  %v1990_v58 = vpop.xlane.xlu1 %1989  ;;  %3022 = vmatmul.mubr.bf16.gmra.mrb[140].mxu0 %v2619_v31  ;;  %v12572_v31 = vld [vmem:[#allocation48_spill] sm:$0xff] }
 0x5d1   : > { %7675 = vrcp.f32 %v1990_v58  ;;  %v7666_v1 = vpop.eup %7665  ;;  %v2624_v57 = vpack.c.bf16 %v2560_v21, %v2558_v52  ;;  %v12574_v45 = vld [vmem:[#allocation100_spill] sm:$0xff] }
 0x5d2   : > { %v7668_v59 = vpop.eup %7667  ;;  %v6588_v44 = vpop.f32.mrb[68].mxu1  ;;  %2869 = vmatmul.mubr.bf16.gmra.mrb[112].mxu1 %v2621_v29  ;;  %v2082_v33 = vmul.f32 %v7666_v1, %v9730_v23  ;;  %v2081_v12 = vmul.f32 %v7666_v1, %v9728_v47  ;;  %v2623_v23 = vpack.c.bf16 %v2559_v63, %v2557_v13 }
 0x5d3   : > { %v2467_v46 = vpop.xlane.xlu0 %2466  ;;  %v6589_v7 = vpop.f32.mrb[69].mxu1  ;;  %3029 = vmatprep.mubr.bf16.mxu0 %v2624_v57  ;;  %v2084_v3 = vmul.f32 %v7668_v59, %v9738_v60  ;;  %v2083_v55 = vmul.f32 %v7668_v59, %v12566_v37  ;;  %7265 = vrot.lane.b32.xlu0 %v7264_v53, %s8057_s25  ;;  %v12567_v60 = vld [vmem:[#allocation42_spill] sm:$0xff]  ;;  %v12575_v57 = vld [vmem:[#allocation51_spill] sm:$0xff] }
 0x5d4   : > { %7677 = vrcp.f32 %v2467_v46  ;;  %v2470_v15 = vpop.xlane.xlu1 %2469  ;;  %v9960_v28 = vadd.f32 %v6589_v7, %v6588_v44  ;;  %v6591_v0 = vpop.f32.mrb[70].mxu1  ;;  %v12576_v44 = vld [vmem:[#allocation49_spill] sm:$0xff]  ;;  %v12578_v7 = vld [vmem:[#allocation52_spill] sm:$0xff] }
 0x5d5   : > { %7679 = vrcp.f32 %v2470_v15  ;;  %v6592_v47 = vpop.f32.mrb[71].mxu1  ;;  %v2626_v51 = vpack.c.bf16 %v2084_v3, %v2082_v33  ;;  %v2625_v38 = vpack.c.bf16 %v2083_v55, %v2081_v12  ;;  %v12577_v33 = vld [vmem:[#allocation99_spill] sm:$0xff] }
 0x5d6   : > { %v7670_v27 = vpop.eup %7669  ;;  %v9962_v9 = vadd.f32 %v6592_v47, %v6591_v0  ;;  %v7279_v47 = vld [vmem:[%s11968_s5 + $0x88] sm:$0xff]  }
 0x5d7   : > { %v7672_v42 = vpop.eup %7671  ;;  %v2562_v48 = vmul.f32 %v7670_v27, %v12567_v60  ;;  %2876 = vmatprep.mubr.bf16.mxu1 %v2626_v51  ;;  %7270 = vrot.lane.b32.xlu0 %v7269_v49, %s8057_s25  ;;  %v2561_v54 = vmul.f32 %v7670_v27, %v12569_v36  ;;  %v7278_v27 = vld [vmem:[%s11968_s5 + $0x80] sm:$0xff]   ;;  %v3222_v36 = vlaneseq }
 0x5d8   : > { %v2564_v2 = vmul.f32 %v7672_v42, %v12568_v11  ;;  %3030 = vmatmul.mubr.bf16.gmra.mrb[144].mxu0 %v2623_v23  ;;  %v2563_v24 = vmul.f32 %v7672_v42, %v12570_v8  ;;  %v7280_v42 = vld [vmem:[%s11968_s5 + $0x90] sm:$0xff]   ;;  %v7281_v60 = vld [vmem:[%s11968_s5 + $0x40] sm:$0xff]   ;;  %v7283_v11 = vld [vmem:[%s11968_s5 + $0x98] sm:$0xff]  }
 0x5d9   : > { %5166 = vmatpush1.bf16.msra.mxu0 %v7278_v27  ;;  %6790 = vmatprep.subr.bf16.mxu1 %v7281_v60  ;;  %v7286_v8 = vld [vmem:[%s11968_s5 + $0xa0] sm:$0xff]  }
 0x5da   : > { %v7674_v16 = vpop.eup %7673  ;;  %v2628_v50 = vpack.c.bf16 %v2564_v2, %v2562_v48  ;;  %v6594_v61 = vpop.f32.mrb[72].mxu1  ;;  %2877 = vmatmul.mubr.bf16.gmra.mrb[116].mxu1 %v2625_v38  ;;  %v2627_v21 = vpack.c.bf16 %v2563_v24, %v2561_v54  ;;  %5167 = vmatprep.subr.bf16.mxu0 %v12173_v26  ;;  %v7282_v48 = vld [vmem:[%s11968_s5] sm:$0xff]   ;;  %v7284_v2 = vld [vmem:[%s11968_s5 + $0x48] sm:$0xff]   ;;  %v7287_v24 = vld [vmem:[%s11968_s5 + $0x50] sm:$0xff]  }
 0x5db   : > { %v7676_v5 = vpop.eup %7675  ;;  %v2086_v32 = vmul.f32 %v7674_v16, %v12571_v14  ;;  %v2085_v4 = vmul.f32 %v7674_v16, %v12572_v31  ;;  %v6595_v34 = vpop.f32.mrb[73].mxu1  ;;  %6791 = vmatpush3.bf16.msra.mxu1 %v7282_v48  ;;  %v7285_v54 = vld [vmem:[%s11968_s5 + $0x8] sm:$0xff]   ;;  %v10031_v14 = vld [vmem:[%s11967_s4] ss:$0 sm:$0xff] }
 0x5dc   : > { %3037 = vmatprep.mubr.bf16.mxu0 %v2628_v50  ;;  %v2088_v56 = vmul.f32 %v7676_v5, %v12573_v19  ;;  %v2087_v29 = vmul.f32 %v7676_v5, %v12574_v45  ;;  %v9973_v52 = vadd.f32 %v6595_v34, %v6594_v61  ;;  %v6597_v58 = vpop.f32.mrb[74].mxu1  ;;  %6792 = vmatprep.subr.bf16.mxu1 %v7284_v2  ;;  %v10020_v50 = vshrl.u32 %v3222_v36, 7  ;;  %v7288_v5 = vld [vmem:[%s11968_s5 + $0x10] sm:$0xff]   ;;  %v7289_v61 = vld [vmem:[%s11968_s5 + $0xa8] sm:$0xff]  }
 0x5dd   : > { %v6598_v22 = vpop.f32.mrb[75].mxu1  ;;  %5168 = vmatpush1.bf16.msra.mxu0 %v7279_v47  ;;  %v7296_v2 = vld [vmem:[%s11968_s5 + $0x68] sm:$0xff]   ;;  %v2783_v36 = vadd.f32 %v9960_v28, %v10031_v14 }
 0x5de   : > { %v7678_v40 = vpop.eup %7677  ;;  %v2630_v53 = vpack.c.bf16 %v2088_v56, %v2086_v32  ;;  %v9975_v63 = vadd.f32 %v6598_v22, %v6597_v58  ;;  %v2629_v1 = vpack.c.bf16 %v2087_v29, %v2085_v4  ;;  %5169 = vmatprep.subr.bf16.mxu0 %v12173_v26  ;;  %v7290_v58 = vld [vmem:[%s11968_s5 + $0x58] sm:$0xff]  }
 0x5df   : > { %v7680_v13 = vpop.eup %7679  ;;  %v2566_v59 = vmul.f32 %v7678_v40, %v12575_v57  ;;  %v2565_v12 = vmul.f32 %v7678_v40, %v12577_v33  ;;  %6793 = vmatpush3.bf16.msra.mxu1 %v7285_v54  ;;  %v10051_v57 = vadd.s32 8, %v10020_v50 }
 0x5e0   : > { %2884 = vmatprep.mubr.bf16.mxu1 %v2630_v53  ;;  %v2568_v46 = vmul.f32 %v7680_v13, %v12576_v44  ;;  %3038 = vmatmul.mubr.bf16.gmra.mrb[148].mxu0 %v2627_v21  ;;  %v2567_v15 = vmul.f32 %v7680_v13, %v12578_v7  ;;  %v2775_v21 = vadd.f32 %v9942_v41, %v10031_v14  ;;  %v10054_v41 = vadd.s32 16, %v10020_v50 }
 0x5e1   : > { %v1996_v51 = vpop.xlane.xlu1 %1995  ;;  %5170 = vmatpush1.bf16.msra.mxu0 %v7280_v42  ;;  %6794 = vmatprep.subr.bf16.mxu1 %v7287_v24  ;;  %v3266_v47 = vand.u32 15, %v10051_v57 }
 0x5e2   : > { %v2632_v3 = vpack.c.bf16 %v2568_v46, %v2566_v59  ;;  %2885 = vmatmul.mubr.bf16.gmra.mrb[120].mxu1 %v2629_v1  ;;  %v6600_v37 = vpop.f32.mrb[76].mxu1  ;;  %v2631_v49 = vpack.c.bf16 %v2567_v15, %v2565_v12  ;;  %7681 = vrcp.f32 %v1996_v51  ;;  %5171 = vmatprep.subr.bf16.mxu0 %v12173_v26  ;;  %v2778_v59 = vadd.f32 %v9944_v18, %v10031_v14  ;;  %v7293_v12 = vld [vmem:[%s11968_s5 + $0x60] sm:$0xff]  }
 0x5e3   : > { %v6601_v55 = vpop.f32.mrb[77].mxu1  ;;  %6795 = vmatpush3.bf16.msra.mxu1 %v7288_v5  ;;  %v7294_v18 = vld [vmem:[%s11968_s5 + $0x20] sm:$0xff]   ;;  %v3273_v51 = vand.u32 15, %v10054_v41  ;;  %v7297_v5 = vld [vmem:[%s11968_s5 + $0x28] sm:$0xff]   ;;  %vm10124_vm6 = vcmp.ne.s32.totalorder %v3266_v47, 15 }
 0x5e4   : > { %3045 = vmatprep.mubr.bf16.mxu0 %v2632_v3  ;;  %v9981_v6 = vadd.f32 %v6601_v55, %v6600_v37  ;;  %v6603_v25 = vpop.f32.mrb[78].mxu1  ;;  %6796 = vmatprep.subr.bf16.mxu1 %v7290_v58  ;;  %v7295_v37 = vld [vmem:[%s11968_s5 + $0xb8] sm:$0xff]  }
 0x5e5   : > { %v6604_v0 = vpop.f32.mrb[79].mxu1  ;;  %5172 = vmatpush1.bf16.msra.mxu0 %v7283_v11  ;;  %vm10128_vm7 = vcmp.ne.s32.totalorder %v3273_v51, 0 }
 0x5e6   : > { %v9983_v23 = vadd.f32 %v6604_v0, %v6603_v25  ;;  %5173 = vmatprep.subr.bf16.mxu0 %v12173_v26 }
 0x5e8   : > { %3046 = vmatmul.mubr.bf16.gmra.mrb[152].mxu0 %v2631_v49 }
 0x5e9   : > { %5174 = vmatpush1.bf16.msra.mxu0 %v7286_v8 }
 0x5ea   : > { %5175 = vmatprep.subr.bf16.mxu0 %v12173_v26 }
 0x5ec   : > { %v7682_v16 = vpop.eup %7681 }
 0x5ed   : > { %5176 = vmatpush1.bf16.msra.mxu0 %v7289_v61  ;;  %v2092_v56 = vmul.f32 %v7682_v16, %v9792_v35  ;;  %v2091_v29 = vmul.f32 %v7682_v16, %v9790_v30  ;;  %v7291_v35 = vld [vmem:[%s11968_s5 + $0x18] sm:$0xff]   ;;  %v7292_v30 = vld [vmem:[%s11968_s5 + $0xb0] sm:$0xff]   ;;  %v7298_v61 = vld [vmem:[%s11968_s5 + $0xc0] sm:$0xff]  }
 0x5ee   : > { %5177 = vmatprep.subr.bf16.mxu0 %v12173_v26  ;;  %6797 = vmatpush3.bf16.msra.mxu1 %v7291_v35 }
 0x5ef   : > { %6798 = vmatprep.subr.bf16.mxu1 %v7293_v12 }
 0x5f1   : > { %5178 = vmatpush1.bf16.msra.mxu0 %v7292_v30 }
 0x5f2   : > { %5179 = vmatprep.subr.bf16.mxu0 %v12173_v26  ;;  %6799 = vmatpush3.bf16.msra.mxu1 %v7294_v18  ;;  %v7304_v18 = vld [vmem:[%s11968_s5 + $0xd0] sm:$0xff]  }
 0x5f3   : > { %6800 = vmatprep.subr.bf16.mxu1 %v7296_v2  ;;  %v2791_v2 = vadd.f32 %v9973_v52, %v10031_v14 }
 0x5f5   : > { %5180 = vmatpush1.bf16.msra.mxu0 %v7295_v37 }
 0x5f6   : > { %5181 = vmatprep.subr.bf16.mxu0 %v12173_v26  ;;  %6801 = vmatpush3.bf16.msra.mxu1 %v7297_v5 }
 0x5f9   : > { %5182 = vmatpush1.bf16.msra.mxu0 %v7298_v61 }
 0x5fa   : > { %5183 = vmatprep.subr.bf16.mxu0 %v12173_v26 }
 0x612   : > { %v1993_v38 = vpop.xlane.xlu0 %1992 }
 0x613   : > { %7683 = vrcp.f32 %v1993_v38 }
 0x61d   : > { %v7684_v32 = vpop.eup %7683  ;;  %v6694_v31 = vpop.f32.mrb[96].mxu0 }
 0x61e   : > { %v2473_v4 = vpop.xlane.xlu0 %2472  ;;  %v6695_v34 = vpop.f32.mrb[97].mxu0  ;;  %v2090_v19 = vmul.f32 %v7684_v32, %v9809_v17  ;;  %v2089_v45 = vmul.f32 %v7684_v32, %v9807_v20  ;;  %v3259_v17 = vand.u32 15, %v10020_v50  ;;  %v2786_v32 = vadd.f32 %v9962_v9, %v10031_v14 }
 0x61f   : > { %7685 = vrcp.f32 %v2473_v4  ;;  %v6696_v40 = vadd.f32 %v6695_v34, %v6694_v31  ;;  %v6697_v22 = vpop.f32.mrb[98].mxu0 }
 0x620   : > { %v2476_v20 = vpop.xlane.xlu1 %2475  ;;  %v6698_v53 = vpop.f32.mrb[99].mxu0  ;;  %v2634_v13 = vpack.c.bf16 %v2092_v56, %v2090_v19  ;;  %v2633_v1 = vpack.c.bf16 %v2091_v29, %v2089_v45  ;;  %vm10068_vm3 = vcmp.ne.s32.totalorder %v3259_v17, 0 }
 0x621   : > { %7687 = vrcp.f32 %v2476_v20  ;;  %v2936_v44 = vadd.f32 %v6696_v40, %v2775_v21  ;;  %v6699_v46 = vadd.f32 %v6698_v53, %v6697_v22  ;;  %v7299_v22 = vld [vmem:[%s11968_s5 + $0x70] sm:$0xff]  }
 0x622   : > { %v7196_v33 = vpop.permute.xlu0 %7195  ;;  %2892 = vmatprep.mubr.bf16.mxu1 %v2634_v13  ;;  %v7300_v20 = vld [vmem:[%s11968_s5 + $0x30] sm:$0xff]   ;;  %6802 = vmatprep.subr.bf16.mxu1 %v7299_v22  ;;  %v3229_v22 = vadd.s32 48, %v10020_v50 }
 0x623   : > { %v2939_v7 = vadd.f32 %v6699_v46, %v2778_v59  ;;  %v7198_v15 = vunpack.i.h.bf16 %v7196_v33  ;;  %v7197_v3 = vunpack.i.l.bf16 %v7196_v33  ;;  %2893 = vmatmul.mubr.bf16.gmra.mrb[124].mxu1 %v2633_v1  ;;  %v7302_v33 = vld [vmem:[%s11968_s5 + $0x78] sm:$0xff]  }
 0x624   : > { %v7201_v55 = vpop.permute.xlu1 %7200  ;;  %6803 = vmatpush3.bf16.msra.mxu1 %v7300_v20 }
 0x625   : > { %v3190_v49 = vsel %vm1082_vm2, %v2936_v44, %v7197_v3  ;;  %v10074_v0 = vsel %vm1082_vm2, %v2939_v7, %v7198_v15  ;;  %v6700_v27 = vpop.f32.mrb[100].mxu0  ;;  %v7202_v16 = vunpack.i.l.bf16 %v7201_v55  ;;  %v7203_v29 = vunpack.i.h.bf16 %v7201_v55  ;;  %v7303_v3 = vld [vmem:[%s11968_s5 + $0x38] sm:$0xff]   ;;  %6804 = vmatprep.subr.bf16.mxu1 %v7302_v33 }
 0x626   : > { %v3736_v42 = vrot.slane %v3190_v49, 7  ;;  %v3737_v38 = vrot.slane %v10074_v0, 7  ;;  %v3929_v60 = vrot.slane %v3190_v49, 1  ;;  %v3930_v48 = vrot.slane %v10074_v0, 1  ;;  %v6701_v11 = vpop.f32.mrb[101].mxu0  ;;  %v10171_v47 = vpop.permute.xlu0 %7210 }
 0x627   : > { %v6702_v54 = vadd.f32 %v6701_v11, %v6700_v27  ;;  %v6703_v8 = vpop.f32.mrb[102].mxu0  ;;  %v4121_v24 = vpack.c.bf16 %v10074_v0, %v3190_v49  ;;  %v7212_v41 = vunpack.i.l.bf16 %v10171_v47 }
 0x628   : > { %v6704_v31 = vpop.f32.mrb[103].mxu0  ;;  %v3738_v4 = vsel %vm3735_vm4, %v3736_v42, %v3737_v38  ;;  %v3831_v28 = vsel %vm3735_vm4, 0.0, %v3736_v42  ;;  %v3931_v34 = vsel %vm3928_vm5, %v3929_v60, %v3930_v48  ;;  %6805 = vmatpush3.bf16.msra.mxu1 %v7303_v3  ;;  %v3226_v42 = vadd.s32 24, %v10020_v50 }
 0x629   : > { %v7686_v19 = vpop.eup %7685  ;;  %v2944_v56 = vadd.f32 %v6702_v54, %v2783_v36  ;;  %v6705_v45 = vadd.f32 %v6704_v31, %v6703_v8  ;;  %4187 = vrot.lane.b32.xlu0 %v4121_v24, %s8058_s26  ;;  %4313 = vrot.lane.b32.xlu1 %v4121_v24, %s12181_s21  ;;  %v3896_v9 = vsel %vm10068_vm3, %v3831_v28, 0.0  ;;  %v3227_v60 = vadd.s32 32, %v10020_v50 }
 0x62a   : > { %v10102_v58 = vpack.c.bf16 %v3738_v4, %v3896_v9  ;;  %v2570_v21 = vmul.f32 %v7686_v19, %v9823_v43  ;;  %v2569_v40 = vmul.f32 %v7686_v19, %v9821_v39  ;;  %v7301_v39 = vld [vmem:[%s11968_s5 + $0xc8] sm:$0xff]   ;;  %6942 = vmatprep.subr.bf16.mxu1 %v12173_v26  ;;  %v10173_v51 = vpop.permute.xlu0 %7220  ;;  %v3280_v24 = vand.u32 15, %v3226_v42 }
 0x62b   : > { %v7688_v17 = vpop.eup %7687  ;;  %v2947_v35 = vadd.f32 %v6705_v45, %v2786_v32  ;;  %v3192_v30 = vsel %vm1082_vm2, %v2944_v56, %v7202_v16  ;;  %5184 = vmatpush1.bf16.msra.mxu0 %v7301_v39  ;;  %v3287_v61 = vand.u32 15, %v3227_v60  ;;  %v2794_v32 = vadd.f32 %v9975_v63, %v10031_v14 }
 0x62c   : > { %v3739_v43 = vrot.slane %v3192_v30, 7  ;;  %v3932_v53 = vrot.slane %v3192_v30, 1  ;;  %v2572_v13 = vmul.f32 %v7688_v17, %v9829_v10  ;;  %v2571_v1 = vmul.f32 %v7688_v17, %v9825_v62  ;;  %5185 = vmatprep.subr.bf16.mxu0 %v12173_v26 }
 0x62d   : > { %v10120_v57 = vsel %vm1082_vm2, %v2947_v35, %v7203_v29  ;;  %4280 = vrot.lane.b32.xlu1 %v10102_v58, %s8057_s25  ;;  %vm10186_vm8 = vcmp.ne.s32.totalorder %v3280_v24, 15  ;;  %v2802_v45 = vadd.f32 %v9983_v23, %v10031_v14  ;;  %vm10192_vm9 = vcmp.ne.s32.totalorder %v3287_v61, 0 }
 0x62e   : > { %v3741_v44 = vrot.slane %v10120_v57, 7  ;;  %v3934_v10 = vrot.slane %v10120_v57, 1  ;;  %v2636_v62 = vpack.c.bf16 %v2572_v13, %v2570_v21  ;;  %v2635_v46 = vpack.c.bf16 %v2571_v1, %v2569_v40  ;;  %v10179_v16 = vpop.permute.xlu0 %7230 }
 0x62f   : > { %v4122_v12 = vpack.c.bf16 %v10120_v57, %v3192_v30  ;;  %v3933_v7 = vsel %vm3928_vm5, %v3930_v48, %v3932_v53  ;;  %v3740_v15 = vsel %vm3735_vm4, %v3737_v38, %v3739_v43  ;;  %5186 = vmatpush1.bf16.msra.mxu0 %v7304_v18  ;;  %v7206_v38 = vpop.permute.xlu1 %7205  ;;  %v3301_v42 = vand.u32 15, %v3229_v22 }
 0x630   : > { %3053 = vmatprep.mubr.bf16.mxu0 %v2636_v62  ;;  %v4090_v37 = vsel %vm10124_vm6, %v3933_v7, 0.0  ;;  %v3742_v55 = vsel %vm3735_vm4, %v3739_v43, %v3741_v44  ;;  %v3898_v25 = vsel %vm10128_vm7, %v3740_v15, 0.0  ;;  %v10157_v49 = vsel %vm3928_vm5, %v3932_v53, %v3934_v10 }
 0x631   : > { %3054 = vmatmul.mubr.bf16.gmra.mrb[156].mxu0 %v2635_v46  ;;  %4189 = vrot.lane.b32.xlu0 %v4122_v12, %s8058_s26  ;;  %v4153_v0 = vpack.c.bf16 %v4090_v37, %v3931_v34  ;;  %v10160_v27 = vpack.c.bf16 %v3742_v55, %v3898_v25  ;;  %v7207_v8 = vunpack.i.l.bf16 %v7206_v38  ;;  %v7208_v28 = vunpack.i.h.bf16 %v7206_v38 }
 0x632   : > { %4315 = vrot.lane.b32.xlu1 %v4122_v12, %s12181_s21  ;;  %v2799_v34 = vadd.f32 %v9981_v6, %v10031_v14  ;;  %v3228_v6 = vadd.s32 40, %v10020_v50  ;;  %v10199_v17 = vpop.permute.xlu0 %4232  ;;  %v7213_v25 = vunpack.i.h.bf16 %v10171_v47  ;;  %vm10229_vm12 = vcmp.ne.s32.totalorder %v3301_v42, 0 }
 0x634   : > { %v3294_v57 = vand.u32 15, %v3228_v6 }
 0x635   : > { %4234 = vrot.lane.b32.xlu0 %v4153_v0, %s8054_s23 }
 0x636   : > { %4410 = vrot.lane.b32.xlu1 %v4122_v12, %s8060_s24  ;;  %vm3676_vm11 = vcmp.ne.s32.totalorder %v3294_v57, 15 }
 0x639   : > { %4378 = vrot.lane.b32.xlu0 %v10160_v27, %s8053_s12 }
 0x63a   : > { %4346 = vrot.lane.b32.xlu1 %v4153_v0, %s12585_s20 }
 0x63e   : > { %4282 = vrot.lane.b32.xlu1 %v10160_v27, %s8057_s25 }
 0x656   : > { %v6706_v48 = vpop.f32.mrb[104].mxu0 }
 0x657   : > { %v6707_v11 = vpop.f32.mrb[105].mxu0 }
 0x658   : > { %v6708_v36 = vadd.f32 %v6707_v11, %v6706_v48  ;;  %v6709_v54 = vpop.f32.mrb[106].mxu0  ;;  %v10224_v11 = vpop.permute.xlu0 %7240 }
 0x659   : > { %v6710_v5 = vpop.f32.mrb[107].mxu0 }
 0x65a   : > { %v2952_v31 = vadd.f32 %v6708_v36, %v2791_v2  ;;  %v6711_v4 = vadd.f32 %v6710_v5, %v6709_v54  ;;  %v3230_v36 = vadd.s32 56, %v10020_v50  ;;  %v3231_v54 = vadd.s32 64, %v10020_v50 }
 0x65c   : > { %v2955_v19 = vadd.f32 %v6711_v4, %v2794_v32  ;;  %v3194_v52 = vsel %vm1082_vm2, %v2952_v31, %v7207_v8  ;;  %v7216_v4 = vpop.permute.xlu1 %7215  ;;  %v10255_v63 = vpop.permute.xlu0 %4185 }
 0x65d   : > { %v3743_v29 = vrot.slane %v3194_v52, 7  ;;  %v3936_v9 = vrot.slane %v3194_v52, 1 }
 0x65e   : > { %v3195_v21 = vsel %vm1082_vm2, %v2955_v19, %v7208_v28  ;;  %v6606_v40 = vpop.f32.mrb[80].mxu1 }
 0x65f   : > { %v3745_v35 = vrot.slane %v3195_v21, 7  ;;  %v3938_v30 = vrot.slane %v3195_v21, 1  ;;  %v6712_v20 = vpop.f32.mrb[108].mxu0  ;;  %v6607_v23 = vpop.f32.mrb[81].mxu1  ;;  %v4123_v39 = vpack.c.bf16 %v3195_v21, %v3194_v52  ;;  %v3937_v43 = vsel %vm3928_vm5, %v3934_v10, %v3936_v9 }
 0x660   : > { %v6608_v53 = vadd.f32 %v6607_v23, %v6606_v40  ;;  %v6713_v13 = vpop.f32.mrb[109].mxu0  ;;  %v6609_v1 = vpop.f32.mrb[82].mxu1  ;;  %v4092_v59 = vsel %vm10186_vm8, %v3937_v43, 0.0  ;;  %v3744_v62 = vsel %vm3735_vm4, %v3741_v44, %v3743_v29  ;;  %v3315_v21 = vand.u32 15, %v3231_v54 }
 0x661   : > { %v6714_v46 = vadd.f32 %v6713_v13, %v6712_v20  ;;  %v6715_v33 = vpop.f32.mrb[110].mxu0  ;;  %v6610_v12 = vpop.f32.mrb[83].mxu1  ;;  %4191 = vrot.lane.b32.xlu0 %v4123_v39, %s8058_s26  ;;  %4317 = vrot.lane.b32.xlu1 %v4123_v39, %s12181_s21  ;;  %v4154_v10 = vpack.c.bf16 %v4092_v59, %v10157_v49  ;;  %v3746_v7 = vsel %vm3735_vm4, %v3743_v29, %v3745_v35  ;;  %v3900_v15 = vsel %vm10192_vm9, %v3744_v62, 0.0 }
 0x662   : > { %v6611_v3 = vadd.f32 %v6610_v12, %v6609_v1  ;;  %v6716_v18 = vpop.f32.mrb[111].mxu0  ;;  %v10216_v37 = vpack.c.bf16 %v3746_v7, %v3900_v15  ;;  %v3939_v44 = vsel %vm3928_vm5, %v3936_v9, %v3938_v30  ;;  %v3308_v9 = vand.u32 15, %v3230_v36 }
 0x663   : > { %v2960_v55 = vadd.f32 %v6714_v46, %v2799_v34  ;;  %v6717_v0 = vadd.f32 %v6716_v18, %v6715_v33  ;;  %6391 = vmatprep.mubr.msk.bf16.mxu0 %vm4442_vm10, %v4154_v10  ;;  %v10258_v40 = vadd.s32 72, %v10020_v50  ;;  %v2807_v6 = vadd.f32 %v6608_v53, %v10031_v14 }
 0x664   : > { %12590 = vst [vmem:[#allocation103_spill] sm:$0xff] %v10216_v37  ;;  %v3233_v23 = vadd.s32 80, %v10020_v50  ;;  %v7218_v43 = vunpack.i.h.bf16 %v7216_v4  ;;  %v2810_v1 = vadd.f32 %v6611_v3, %v10031_v14  ;;  %vm10267_vm13 = vcmp.ne.s32.totalorder %v3308_v9, 15 }
 0x665   : > { %v3196_v49 = vsel %vm1082_vm2, %v2960_v55, %v7212_v41  ;;  %v2963_v38 = vadd.f32 %v6717_v0, %v2802_v45  ;;  %4236 = vrot.lane.b32.xlu0 %v4154_v10, %s8054_s23  ;;  %4412 = vrot.lane.b32.xlu1 %v4123_v39, %s8060_s24  ;;  %vm10271_vm14 = vcmp.ne.s32.totalorder %v3315_v21, 0  ;;  %v10282_v55 = vadd.s32 88, %v10020_v50 }
 0x666   : > { %v3747_v60 = vrot.slane %v3196_v49, 7  ;;  %v3940_v48 = vrot.slane %v3196_v49, 1  ;;  %v3329_v3 = vand.u32 15, %v3233_v23  ;;  %v7226_v23 = vpop.permute.xlu1 %7225 }
 0x667   : > { %v10227_v2 = vsel %vm1082_vm2, %v2963_v38, %v7213_v25  ;;  %v10285_v25 = vadd.s32 96, %v10020_v50  ;;  %v7222_v38 = vunpack.i.l.bf16 %v10173_v51 }
 0x668   : > { %v3749_v8 = vrot.slane %v10227_v2, 7  ;;  %v3942_v24 = vrot.slane %v10227_v2, 1  ;;  %v10238_v5 = vpack.c.bf16 %v10227_v2, %v3196_v49  ;;  %v3941_v61 = vsel %vm3928_vm5, %v3938_v30, %v3940_v48 }
 0x669   : > { %4380 = vrot.lane.b32.xlu0 %v10216_v37, %s8053_s12  ;;  %4348 = vrot.lane.b32.xlu1 %v4154_v10, %s12585_s20  ;;  %v4094_v32 = vsel %vm3676_vm11, %v3941_v61, 0.0  ;;  %v3748_v31 = vsel %vm3735_vm4, %v3745_v35, %v3747_v60  ;;  %v7217_v30 = vunpack.i.l.bf16 %v7216_v4  ;;  %v3322_v10 = vand.u32 15, %v10258_v40 }
 0x66a   : > { %v10245_v28 = vpack.c.bf16 %v4094_v32, %v3939_v44  ;;  %v3750_v34 = vsel %vm3735_vm4, %v3747_v60, %v3749_v8  ;;  %v3902_v19 = vsel %vm10229_vm12, %v3748_v31, 0.0  ;;  %v3943_v52 = vsel %vm3928_vm5, %v3940_v48, %v3942_v24  ;;  %v10299_v32 = vpop.permute.xlu0 %7245 }
 0x66b   : > { %v6718_v56 = vpop.f32.mrb[112].mxu0  ;;  %v10253_v45 = vpack.c.bf16 %v3750_v34, %v3902_v19  ;;  %v7223_v49 = vunpack.i.h.bf16 %v10173_v51  ;;  %vm10319_vm15 = vcmp.ne.s32.totalorder %v3322_v10, 15  ;;  %vm10323_vm3 = vcmp.ne.s32.totalorder %v3329_v3, 0 }
 0x66c   : > { %v6719_v29 = vpop.f32.mrb[113].mxu0 }
 0x66d   : > { %12593 = vst [vmem:[#allocation53_spill] sm:$0xff] %v10253_v45  ;;  %v6720_v22 = vadd.f32 %v6719_v29, %v6718_v56  ;;  %v6721_v35 = vpop.f32.mrb[114].mxu0  ;;  %v6612_v20 = vpop.f32.mrb[84].mxu1  ;;  %4193 = vrot.lane.b32.xlu0 %v10238_v5, %s8058_s26  ;;  %4284 = vrot.lane.b32.xlu1 %v10216_v37, %s8057_s25 }
 0x66e   : > { %v6722_v39 = vpop.f32.mrb[115].mxu0  ;;  %v6613_v13 = vpop.f32.mrb[85].mxu1 }
 0x66f   : > { %v2968_v41 = vadd.f32 %v6720_v22, %v2807_v6  ;;  %v6723_v59 = vadd.f32 %v6722_v39, %v6721_v35  ;;  %v6614_v53 = vadd.f32 %v6613_v13, %v6612_v20  ;;  %v6615_v62 = vpop.f32.mrb[86].mxu1 }
 0x670   : > { %v6616_v46 = vpop.f32.mrb[87].mxu1 }
 0x671   : > { %v2971_v7 = vadd.f32 %v6723_v59, %v2810_v1  ;;  %v3198_v15 = vsel %vm1082_vm2, %v2968_v41, %v7217_v30  ;;  %v6617_v18 = vadd.f32 %v6616_v46, %v6615_v62  ;;  %4238 = vrot.lane.b32.xlu0 %v10245_v28, %s8054_s23  ;;  %4319 = vrot.lane.b32.xlu1 %v10238_v5, %s12181_s21  ;;  %v3343_v41 = vand.u32 15, %v10285_v25 }
 0x672   : > { %v3751_v57 = vrot.slane %v3198_v15, 7  ;;  %v3944_v44 = vrot.slane %v3198_v15, 1  ;;  %v2815_v42 = vadd.f32 %v6614_v53, %v10031_v14  ;;  %v10335_v62 = vadd.s32 104, %v10020_v50 }
 0x673   : > { %v10288_v0 = vsel %vm1082_vm2, %v2971_v7, %v7218_v43  ;;  %v6724_v60 = vpop.f32.mrb[116].mxu0  ;;  %v2818_v31 = vadd.f32 %v6617_v18, %v10031_v14  ;;  %v10338_v46 = vadd.s32 112, %v10020_v50  ;;  %v7228_v7 = vunpack.i.h.bf16 %v7226_v23 }
 0x674   : > { %v3753_v48 = vrot.slane %v10288_v0, 7  ;;  %v3946_v47 = vrot.slane %v10288_v0, 1  ;;  %v6725_v36 = vpop.f32.mrb[117].mxu0  ;;  %v10296_v54 = vpack.c.bf16 %v10288_v0, %v3198_v15  ;;  %v3945_v61 = vsel %vm3928_vm5, %v3942_v24, %v3944_v44 }
 0x675   : > { %v6726_v4 = vadd.f32 %v6725_v36, %v6724_v60  ;;  %v6727_v34 = vpop.f32.mrb[118].mxu0  ;;  %v6618_v19 = vpop.f32.mrb[88].mxu1  ;;  %4382 = vrot.lane.b32.xlu0 %v10253_v45, %s8053_s12  ;;  %v4096_v51 = vsel %vm10267_vm13, %v3945_v61, 0.0  ;;  %v3752_v56 = vsel %vm3735_vm4, %v3749_v8, %v3751_v57  ;;  %4414 = vrot.lane.b32.xlu1 %v10238_v5, %s8060_s24  ;;  %v7227_v15 = vunpack.i.l.bf16 %v7226_v23 }
 0x676   : > { %v6728_v29 = vpop.f32.mrb[119].mxu0  ;;  %v6619_v9 = vpop.f32.mrb[89].mxu1  ;;  %v10311_v24 = vpack.c.bf16 %v4096_v51, %v3943_v52  ;;  %v3754_v21 = vsel %vm3735_vm4, %v3751_v57, %v3753_v48  ;;  %v3904_v40 = vsel %vm10271_vm14, %v3752_v56, 0.0  ;;  %v3947_v6 = vsel %vm3928_vm5, %v3944_v44, %v3946_v47 }
 0x677   : > { %v2976_v22 = vadd.f32 %v6726_v4, %v2815_v42  ;;  %v6729_v35 = vadd.f32 %v6728_v29, %v6727_v34  ;;  %v6620_v30 = vadd.f32 %v6619_v9, %v6618_v19  ;;  %v6621_v2 = vpop.f32.mrb[90].mxu1  ;;  %v10317_v20 = vpack.c.bf16 %v3754_v21, %v3904_v40 }
 0x678   : > { %v6622_v8 = vpop.f32.mrb[91].mxu1  ;;  %v3336_v52 = vand.u32 15, %v10282_v55  ;;  %v10349_v55 = vpop.permute.xlu0 %7250  ;;  %vm10373_vm7 = vcmp.ne.s32.totalorder %v3343_v41, 0  ;;  %v10384_v5 = vadd.s32 120, %v10020_v50 }
 0x679   : > { %12598 = vst [vmem:[#allocation50_spill] sm:$0xff] %v10317_v20  ;;  %v3200_v43 = vsel %vm1082_vm2, %v2976_v22, %v7222_v38  ;;  %v2979_v13 = vadd.f32 %v6729_v35, %v2818_v31  ;;  %v6623_v1 = vadd.f32 %v6622_v8, %v6621_v2  ;;  %4195 = vrot.lane.b32.xlu0 %v10296_v54, %s8058_s26  ;;  %v3357_v8 = vand.u32 15, %v10338_v46 }
 0x67a   : > { %v3755_v59 = vrot.slane %v3200_v43, 7  ;;  %v3948_v53 = vrot.slane %v3200_v43, 1  ;;  %4350 = vrot.lane.b32.xlu1 %v10245_v28, %s12585_s20  ;;  %v2823_v12 = vadd.f32 %v6620_v30, %v10031_v14  ;;  %vm10368_vm6 = vcmp.ne.s32.totalorder %v3336_v52, 15 }
 0x67b   : > { %v10341_v33 = vsel %vm1082_vm2, %v2979_v13, %v7223_v49  ;;  %v6730_v10 = vpop.f32.mrb[120].mxu0  ;;  %v2826_v0 = vadd.f32 %v6623_v1, %v10031_v14  ;;  %v10387_v52 = vadd.s32 128, %v10020_v50  ;;  %v7232_v13 = vunpack.i.l.bf16 %v10179_v16 }
 0x67c   : > { %v3757_v18 = vrot.slane %v10341_v33, 7  ;;  %v3950_v3 = vrot.slane %v10341_v33, 1  ;;  %v6731_v57 = vpop.f32.mrb[121].mxu0  ;;  %v10347_v44 = vpack.c.bf16 %v10341_v33, %v3200_v43  ;;  %v3949_v25 = vsel %vm3928_vm5, %v3946_v47, %v3948_v53  ;;  %v10393_v33 = vpop.permute.xlu0 %7255 }
 0x67d   : > { %v6732_v42 = vadd.f32 %v6731_v57, %v6730_v10  ;;  %v6733_v49 = vpop.f32.mrb[122].mxu0  ;;  %v6624_v38 = vpop.f32.mrb[92].mxu1  ;;  %4240 = vrot.lane.b32.xlu0 %v10311_v24, %s8054_s23  ;;  %v4098_v60 = vsel %vm10319_vm15, %v3949_v25, 0.0  ;;  %v3756_v36 = vsel %vm3735_vm4, %v3753_v48, %v3755_v59  ;;  %v7233_v43 = vunpack.i.h.bf16 %v10179_v16 }
 0x67e   : > { %v6734_v61 = vpop.f32.mrb[123].mxu0  ;;  %v6625_v31 = vpop.f32.mrb[93].mxu1  ;;  %4286 = vrot.lane.b32.xlu1 %v10253_v45, %s8057_s25  ;;  %v10360_v4 = vpack.c.bf16 %v4098_v60, %v3947_v6  ;;  %v3758_v47 = vsel %vm3735_vm4, %v3755_v59, %v3757_v18  ;;  %v3906_v34 = vsel %vm10323_vm3, %v3756_v36, 0.0  ;;  %v3951_v19 = vsel %vm3928_vm5, %v3948_v53, %v3950_v3 }
 0x67f   : > { %v2984_v51 = vadd.f32 %v6732_v42, %v2823_v12  ;;  %v6735_v56 = vadd.f32 %v6734_v61, %v6733_v49  ;;  %v6626_v29 = vadd.f32 %v6625_v31, %v6624_v38  ;;  %v6627_v9 = vpop.f32.mrb[94].mxu1  ;;  %v10366_v21 = vpack.c.bf16 %v3758_v47, %v3906_v34 }
 0x680   : > { %v6628_v48 = vpop.f32.mrb[95].mxu1  ;;  %v3350_v6 = vand.u32 15, %v10335_v62  ;;  %vm10420_vm9 = vcmp.ne.s32.totalorder %v3357_v8, 0  ;;  %v3371_v22 = vand.u32 15, %v10387_v52 }
 0x681   : > { %12603 = vst [vmem:[#allocation54_spill] sm:$0xff] %v10366_v21  ;;  %v2987_v35 = vadd.f32 %v6735_v56, %v2826_v0  ;;  %v3202_v30 = vsel %vm1082_vm2, %v2984_v51, %v7227_v15  ;;  %v6629_v2 = vadd.f32 %v6628_v48, %v6627_v9  ;;  %4384 = vrot.lane.b32.xlu0 %v10317_v20, %s8053_s12  ;;  %v10414_v56 = vpop.permute.xlu1 %7235 }
 0x682   : > { %v3759_v23 = vrot.slane %v3202_v30, 7  ;;  %v3952_v39 = vrot.slane %v3202_v30, 1  ;;  %4321 = vrot.lane.b32.xlu1 %v10296_v54, %s12181_s21  ;;  %v2831_v41 = vadd.f32 %v6626_v29, %v10031_v14  ;;  %vm10416_vm8 = vcmp.ne.s32.totalorder %v3350_v6, 15 }
 0x683   : > { %v3203_v1 = vsel %vm1082_vm2, %v2987_v35, %v7228_v7  ;;  %v6736_v59 = vpop.f32.mrb[124].mxu0  ;;  %v2834_v15 = vadd.f32 %v6629_v2, %v10031_v14  ;;  %v3364_v29 = vand.u32 15, %v10384_v5  ;;  %v10435_v2 = vadd.s32 144, %v10020_v50 }
 0x684   : > { %v3761_v53 = vrot.slane %v3203_v1, 7  ;;  %v3954_v62 = vrot.slane %v3203_v1, 1  ;;  %v6737_v46 = vpop.f32.mrb[125].mxu0  ;;  %v10395_v12 = vpack.c.bf16 %v3203_v1, %v3202_v30  ;;  %v3953_v10 = vsel %vm3928_vm5, %v3950_v3, %v3952_v39 }
 0x685   : > { %v6738_v57 = vadd.f32 %v6737_v46, %v6736_v59  ;;  %v6739_v25 = vpop.f32.mrb[126].mxu0  ;;  %v6630_v0 = vpop.f32.mrb[96].mxu1  ;;  %4197 = vrot.lane.b32.xlu0 %v10347_v44, %s8058_s26  ;;  %v4100_v16 = vsel %vm10368_vm6, %v3953_v10, 0.0  ;;  %v3760_v7 = vsel %vm3735_vm4, %v3757_v18, %v3759_v23  ;;  %v10432_v30 = vadd.s32 136, %v10020_v50 }
 0x686   : > { %v6740_v42 = vpop.f32.mrb[127].mxu0  ;;  %v6631_v49 = vpop.f32.mrb[97].mxu1  ;;  %4416 = vrot.lane.b32.xlu1 %v10296_v54, %s8060_s24  ;;  %v10406_v38 = vpack.c.bf16 %v4100_v16, %v3951_v19  ;;  %v3955_v3 = vsel %vm3928_vm5, %v3952_v39, %v3954_v62  ;;  %v3762_v60 = vsel %vm3735_vm4, %v3759_v23, %v3761_v53  ;;  %v3908_v36 = vsel %vm10373_vm7, %v3760_v7, 0.0 }
 0x687   : > { %v2992_v61 = vadd.f32 %v6738_v57, %v2831_v41  ;;  %v6741_v31 = vadd.f32 %v6740_v42, %v6739_v25  ;;  %v6632_v47 = vadd.f32 %v6631_v49, %v6630_v0  ;;  %v6633_v34 = vpop.f32.mrb[98].mxu1  ;;  %v10412_v51 = vpack.c.bf16 %v3762_v60, %v3908_v36  ;;  %v10445_v59 = vpop.permute.xlu0 %7260 }
 0x688   : > { %v6634_v18 = vpop.f32.mrb[99].mxu1  ;;  %v7238_v5 = vunpack.i.h.bf16 %v10414_v56  ;;  %v7237_v52 = vunpack.i.l.bf16 %v10414_v56  ;;  %vm10467_vm11 = vcmp.ne.s32.totalorder %v3364_v29, 15  ;;  %vm10471_vm12 = vcmp.ne.s32.totalorder %v3371_v22, 0 }
 0x689   : > { %v3204_v9 = vsel %vm1082_vm2, %v2992_v61, %v7232_v13  ;;  %v2995_v48 = vadd.f32 %v6741_v31, %v2834_v15  ;;  %v6635_v40 = vadd.f32 %v6634_v18, %v6633_v34  ;;  %4242 = vrot.lane.b32.xlu0 %v10360_v4, %s8054_s23  ;;  %v2839_v23 = vadd.f32 %v6632_v47, %v10031_v14 }
 0x68a   : > { %v3763_v35 = vrot.slane %v3204_v9, 7  ;;  %v3956_v6 = vrot.slane %v3204_v9, 1  ;;  %4352 = vrot.lane.b32.xlu1 %v10311_v24, %s12585_s20  ;;  %v3378_v54 = vand.u32 15, %v10432_v30  ;;  %v3385_v19 = vand.u32 15, %v10435_v2 }
 0x68b   : > { %v10438_v8 = vsel %vm1082_vm2, %v2995_v48, %v7233_v43  ;;  %v6742_v39 = vpop.f32.mrb[128].mxu0  ;;  %v2842_v10 = vadd.f32 %v6635_v40, %v10031_v14  ;;  %v10481_v29 = vadd.s32 152, %v10020_v50  ;;  %v10486_v22 = vadd.s32 160, %v10020_v50 }
 0x68c   : > { %v3765_v13 = vrot.slane %v10438_v8, 7  ;;  %v3958_v1 = vrot.slane %v10438_v8, 1  ;;  %v6743_v41 = vpop.f32.mrb[129].mxu0  ;;  %v10448_v46 = vpack.c.bf16 %v10438_v8, %v3204_v9  ;;  %v3957_v43 = vsel %vm3928_vm5, %v3954_v62, %v3956_v6 }
 0x68d   : > { %v6744_v15 = vadd.f32 %v6743_v41, %v6742_v39  ;;  %v6745_v57 = vpop.f32.mrb[130].mxu0  ;;  %v6636_v25 = vpop.f32.mrb[100].mxu1  ;;  %4386 = vrot.lane.b32.xlu0 %v10366_v21, %s8053_s12  ;;  %v4102_v0 = vsel %vm10416_vm8, %v3957_v43, 0.0  ;;  %v3764_v16 = vsel %vm3735_vm4, %v3761_v53, %v3763_v35  ;;  %v10489_v30 = vadd.s32 168, %v10020_v50 }
 0x68e   : > { %v6746_v7 = vpop.f32.mrb[131].mxu0  ;;  %v6637_v42 = vpop.f32.mrb[101].mxu1  ;;  %4288 = vrot.lane.b32.xlu1 %v10317_v20, %s8057_s25  ;;  %v10459_v49 = vpack.c.bf16 %v4102_v0, %v3955_v3  ;;  %v3766_v62 = vsel %vm3735_vm4, %v3763_v35, %v3765_v13  ;;  %v3910_v60 = vsel %vm10420_vm9, %v3764_v16, 0.0  ;;  %v3959_v36 = vsel %vm3928_vm5, %v3956_v6, %v3958_v1 }
 0x68f   : > { %v3000_v61 = vadd.f32 %v6744_v15, %v2839_v23  ;;  %v6747_v31 = vadd.f32 %v6746_v7, %v6745_v57  ;;  %v6638_v47 = vadd.f32 %v6637_v42, %v6636_v25  ;;  %v6639_v34 = vpop.f32.mrb[102].mxu1  ;;  %v10465_v18 = vpack.c.bf16 %v3766_v62, %v3910_v60  ;;  %v10497_v41 = vpop.permute.xlu0 %7265 }
 0x690   : > { %v6640_v53 = vpop.f32.mrb[103].mxu1  ;;  %v7243_v2 = vunpack.i.h.bf16 %v10224_v11  ;;  %v7242_v8 = vunpack.i.l.bf16 %v10224_v11  ;;  %vm10521_vm13 = vcmp.ne.s32.totalorder %v3378_v54, 15  ;;  %vm10525_vm14 = vcmp.ne.s32.totalorder %v3385_v19, 0 }
 0x691   : > { %v3003_v9 = vadd.f32 %v6747_v31, %v2842_v10  ;;  %v3206_v48 = vsel %vm1082_vm2, %v3000_v61, %v7237_v52  ;;  %v6641_v40 = vadd.f32 %v6640_v53, %v6639_v34  ;;  %4420 = vrot.lane.b32.xlu0 %v10395_v12, %s8060_s24  ;;  %v2847_v39 = vadd.f32 %v6638_v47, %v10031_v14 }
 0x692   : > { %v3767_v35 = vrot.slane %v3206_v48, 7  ;;  %v3960_v6 = vrot.slane %v3206_v48, 1  ;;  %4323 = vrot.lane.b32.xlu1 %v10347_v44, %s12181_s21  ;;  %v3399_v3 = vand.u32 15, %v10486_v22  ;;  %v10537_v54 = vadd.s32 176, %v10020_v50 }
 0x693   : > { %v10494_v23 = vsel %vm1082_vm2, %v3003_v9, %v7238_v5  ;;  %v6748_v52 = vpop.f32.mrb[132].mxu0  ;;  %v2850_v11 = vadd.f32 %v6641_v40, %v10031_v14  ;;  %v10545_v22 = vadd.s32 192, %v10020_v50  ;;  %vm4491_vm6 = vcmask 785408  }
 0x694   : > { %v3769_v43 = vrot.slane %v10494_v23, 7  ;;  %v3962_v10 = vrot.slane %v10494_v23, 1  ;;  %v6749_v15 = vpop.f32.mrb[133].mxu0  ;;  %v10502_v57 = vpack.c.bf16 %v10494_v23, %v3206_v48  ;;  %v3961_v25 = vsel %vm3928_vm5, %v3958_v1, %v3960_v6 }
 0x695   : > { %v6750_v0 = vadd.f32 %v6749_v15, %v6748_v52  ;;  %v6751_v5 = vpop.f32.mrb[134].mxu0  ;;  %v6642_v16 = vpop.f32.mrb[104].mxu1  ;;  %4244 = vrot.lane.b32.xlu0 %v10406_v38, %s8054_s23  ;;  %v4104_v7 = vsel %vm10467_vm11, %v3961_v25, 0.0  ;;  %v3768_v42 = vsel %vm3735_vm4, %v3765_v13, %v3767_v35  ;;  %v7247_v15 = vunpack.i.l.bf16 %v10299_v32 }
 0x696   : > { %v6752_v62 = vpop.f32.mrb[135].mxu0  ;;  %v6643_v60 = vpop.f32.mrb[105].mxu1  ;;  %4418 = vrot.lane.b32.xlu1 %v10347_v44, %s8060_s24  ;;  %v10513_v61 = vpack.c.bf16 %v4104_v7, %v3959_v36  ;;  %v3770_v1 = vsel %vm3735_vm4, %v3767_v35, %v3769_v43  ;;  %v3912_v31 = vsel %vm10471_vm12, %v3768_v42, 0.0  ;;  %v3963_v47 = vsel %vm3928_vm5, %v3960_v6, %v3962_v10 }
 0x697   : > { %v3008_v34 = vadd.f32 %v6750_v0, %v2847_v39  ;;  %v6753_v53 = vadd.f32 %v6752_v62, %v6751_v5  ;;  %v6644_v56 = vadd.f32 %v6643_v60, %v6642_v16  ;;  %v6645_v9 = vpop.f32.mrb[106].mxu1  ;;  %v10519_v48 = vpack.c.bf16 %v3770_v1, %v3912_v31  ;;  %v10532_v39 = vpop.permute.xlu0 %7270 }
 0x698   : > { %v6646_v13 = vpop.f32.mrb[107].mxu1  ;;  %v3392_v36 = vand.u32 15, %v10481_v29  ;;  %12620 = vst [vmem:[#allocation104_spill] sm:$0xff] %v10532_v39  ;;  %v10542_v29 = vadd.s32 184, %v10020_v50  ;;  %v3406_v0 = vand.u32 15, %v10489_v30  ;;  %vm10588_vm3 = vcmp.ne.s32.totalorder %v3399_v3, 0 }
 0x699   : > { %v3208_v35 = vsel %vm1082_vm2, %v3008_v34, %v7242_v8  ;;  %v3011_v6 = vadd.f32 %v6753_v53, %v2850_v11  ;;  %v6647_v23 = vadd.f32 %v6646_v13, %v6645_v9  ;;  %4327 = vrot.lane.b32.xlu0 %v10448_v46, %s12181_s21  ;;  %v7248_v8 = vunpack.i.h.bf16 %v10299_v32 }
 0x69a   : > { %v3771_v19 = vrot.slane %v3208_v35, 7  ;;  %v3964_v52 = vrot.slane %v3208_v35, 1  ;;  %4354 = vrot.lane.b32.xlu1 %v10360_v4, %s12585_s20  ;;  %v2855_v7 = vadd.f32 %v6644_v56, %v10031_v14  ;;  %vm10584_vm15 = vcmp.ne.s32.totalorder %v3392_v36, 15 }
 0x69b   : > { %v10550_v25 = vsel %vm1082_vm2, %v3011_v6, %v7243_v2  ;;  %v6754_v11 = vpop.f32.mrb[136].mxu0  ;;  %v10556_v62 = vpop.permute.xlu1 %4313  ;;  %v2858_v32 = vadd.f32 %v6647_v23, %v10031_v14  ;;  %vm4604_vm7 = vcmask 916480   ;;  %vm10599_vm8 = vcmp.ne.s32.totalorder %v3406_v0, 15 }
 0x69c   : > { %v3773_v5 = vrot.slane %v10550_v25, 7  ;;  %v3966_v16 = vrot.slane %v10550_v25, 1  ;;  %v6755_v42 = vpop.f32.mrb[137].mxu0  ;;  %v10559_v60 = vpack.c.bf16 %v10550_v25, %v3208_v35  ;;  %v3965_v30 = vsel %vm3928_vm5, %v3962_v10, %v3964_v52  ;;  %v10578_v6 = vpop.permute.xlu0 %4187 }
 0x69d   : > { %v6756_v1 = vadd.f32 %v6755_v42, %v6754_v11  ;;  %v6757_v2 = vpop.f32.mrb[138].mxu0  ;;  %v6648_v31 = vpop.f32.mrb[108].mxu1  ;;  %4201 = vrot.lane.b32.xlu0 %v10448_v46, %s8058_s26  ;;  %v3772_v34 = vsel %vm3735_vm4, %v3769_v43, %v3771_v19  ;;  %v4106_v9 = vsel %vm10521_vm13, %v3965_v30, 0.0  ;;  %vm4685_vm9 = vcmask 654336  }
 0x69e   : > { %v6758_v53 = vpop.f32.mrb[139].mxu0  ;;  %v6649_v56 = vpop.f32.mrb[109].mxu1  ;;  %4290 = vrot.lane.b32.xlu1 %v10366_v21, %s8057_s25  ;;  %v3774_v14 = vsel %vm3735_vm4, %v3771_v19, %v3773_v5  ;;  %v3914_v13 = vsel %vm10525_vm14, %v3772_v34, 0.0  ;;  %v3967_v10 = vsel %vm3928_vm5, %v3964_v52, %v3966_v16  ;;  %v10580_v42 = vpack.c.bf16 %v4106_v9, %v3963_v47 }
 0x69f   : > { %v3016_v43 = vadd.f32 %v6756_v1, %v2855_v7  ;;  %v6759_v35 = vadd.f32 %v6758_v53, %v6757_v2  ;;  %v6650_v23 = vadd.f32 %v6649_v56, %v6648_v31  ;;  %v6651_v11 = vpop.f32.mrb[110].mxu1  ;;  %v4281_v30 = vpop.permute.xlu1 %4280  ;;  %v10582_v26 = vpack.c.bf16 %v3774_v14, %v3914_v13 }
 0x6a0   : > { %v6652_v40 = vpop.f32.mrb[111].mxu1  ;;  %v3413_v52 = vand.u32 15, %v10537_v54  ;;  %v3420_v2 = vand.u32 15, %v10542_v29  ;;  %v3427_v54 = vand.u32 15, %v10545_v22  ;;  %v7252_v34 = vunpack.i.l.bf16 %v10349_v55  ;;  %v10618_v22 = vld [vmem:[%s11967_s4] ss:$0 sm:$0xff] }
 0x6a1   : > { %v3210_v7 = vsel %vm1082_vm2, %v3016_v43, %v7247_v15  ;;  %v3019_v1 = vadd.f32 %v6759_v35, %v2858_v32  ;;  %v6653_v47 = vadd.f32 %v6652_v40, %v6651_v11  ;;  %4246 = vrot.lane.b32.xlu0 %v10459_v49, %s8054_s23  ;;  %v4445_v15 = vsel %vm4442_vm10, 0, %v10255_v63 }
 0x6a2   : > { %v3775_v36 = vrot.slane %v3210_v7, 7  ;;  %v3968_v31 = vrot.slane %v3210_v7, 1  ;;  %4325 = vrot.lane.b32.xlu1 %v10395_v12, %s12181_s21  ;;  %v7253_v32 = vunpack.i.h.bf16 %v10349_v55  ;;  %v2863_v63 = vadd.f32 %v10618_v22, %v6650_v23 }
 0x6a3   : > { %v10609_v29 = vsel %vm1082_vm2, %v3019_v1, %v7248_v8  ;;  %v6760_v53 = vpop.f32.mrb[140].mxu0  ;;  %v10611_v56 = vpop.permute.xlu0 %4189  ;;  %v2866_v13 = vadd.f32 %v10618_v22, %v6653_v47  ;;  %vm10653_vm11 = vcmp.ne.s32.totalorder %v3413_v52, 0  ;;  %v7257_v52 = vunpack.i.l.bf16 %v10393_v33 }
 0x6a4   : > { %v3970_v9 = vrot.slane %v10609_v29, 1  ;;  %v6761_v14 = vpop.f32.mrb[141].mxu0  ;;  %v10621_v55 = vpop.permute.xlu1 %4315  ;;  %v10624_v8 = vpack.c.bf16 %v10609_v29, %v3210_v7  ;;  %v3969_v40 = vsel %vm3928_vm5, %v3966_v16, %v3968_v31  ;;  %v3776_v23 = vsel %vm3735_vm4, %v3773_v5, %v3775_v36 }
 0x6a5   : > { %v6762_v43 = vadd.f32 %v6761_v14, %v6760_v53  ;;  %v6763_v35 = vpop.f32.mrb[142].mxu0  ;;  %v6654_v11 = vpop.f32.mrb[112].mxu1  ;;  %4390 = vrot.lane.b32.xlu0 %v10465_v18, %s8053_s12  ;;  %v4108_v7 = vsel %vm10584_vm15, %v3969_v40, 0.0  ;;  %v12627_v47 = vrot.slane %v10609_v29, 7  ;;  %v3916_v14 = vsel %vm10588_vm3, %v3776_v23, 0.0 }
 0x6a6   : > { %v6764_v1 = vpop.f32.mrb[143].mxu0  ;;  %v6655_v0 = vpop.f32.mrb[113].mxu1  ;;  %4199 = vrot.lane.b32.xlu1 %v10395_v12, %s8058_s26  ;;  %v3971_v16 = vsel %vm3928_vm5, %v3968_v31, %v3970_v9  ;;  %v10647_v39 = vpack.c.bf16 %v4108_v7, %v3967_v10  ;;  %v4541_v12 = vsel %vm1082_vm2, %v10199_v17, %v4281_v30  ;;  %v10664_v10 = vadd.s32 208, %v10020_v50 }
 0x6a7   : > { %v3778_v53 = vsel %vm3735_vm4, %v3775_v36, %v12627_v47  ;;  %v3024_v25 = vadd.f32 %v6762_v43, %v2863_v63  ;;  %v6765_v21 = vadd.f32 %v6764_v1, %v6763_v35  ;;  %v6656_v5 = vadd.f32 %v6655_v0, %v6654_v11  ;;  %v6657_v20 = vpop.f32.mrb[114].mxu1  ;;  %v10645_v45 = vpop.permute.xlu0 %4234 }
 0x6a8   : > { %v6658_v19 = vpop.f32.mrb[115].mxu1  ;;  %v4411_v40 = vpop.permute.xlu1 %4410  ;;  %v10651_v37 = vpack.c.bf16 %v3778_v53, %v3916_v14  ;;  %v10658_v36 = vadd.s32 200, %v10020_v50  ;;  %v4493_v30 = vsel %vm4491_vm6, %v4445_v15, %v10199_v17  ;;  %vm10671_vm12 = vcmp.ne.s32.totalorder %v3420_v2, 15 }
 0x6a9   : > { %v3212_v31 = vsel %vm1082_vm2, %v3024_v25, %v7252_v34  ;;  %v3027_v0 = vadd.f32 %v6765_v21, %v2866_v13  ;;  %v6659_v63 = vadd.f32 %v6658_v19, %v6657_v20  ;;  %4424 = vrot.lane.b32.xlu0 %v10502_v57, %s8060_s24  ;;  %v2871_v21 = vadd.f32 %v10618_v22, %v6656_v5 }
 0x6aa   : > { %v3779_v43 = vrot.slane %v3212_v31, 7  ;;  %v3972_v35 = vrot.slane %v3212_v31, 1  ;;  %4356 = vrot.lane.b32.xlu1 %v10406_v38, %s12585_s20  ;;  %v4573_v15 = vsel %vm616_vm1, %v4541_v12, %v10556_v62  ;;  %vm10682_vm13 = vcmp.ne.s32.totalorder %v3427_v54, 0 }
 0x6ab   : > { %v10676_v20 = vsel %vm1082_vm2, %v3027_v0, %v7253_v32  ;;  %v2874_v13 = vadd.f32 %v10618_v22, %v6659_v63  ;;  %v6766_v11 = vpop.f32.mrb[144].mxu0  ;;  %v4379_v17 = vpop.permute.xlu0 %4378  ;;  %v7258_v19 = vunpack.i.h.bf16 %v10393_v33 }
 0x6ac   : > { %v3781_v2 = vrot.slane %v10676_v20, 7  ;;  %v3974_v1 = vrot.slane %v10676_v20, 1  ;;  %v6767_v7 = vpop.f32.mrb[145].mxu0  ;;  %v4347_v32 = vpop.permute.xlu1 %4346  ;;  %v10689_v47 = vpack.c.bf16 %v10676_v20, %v3212_v31  ;;  %v3973_v53 = vsel %vm3928_vm5, %v3970_v9, %v3972_v35 }
 0x6ad   : > { %v6768_v14 = vadd.f32 %v6767_v7, %v6766_v11  ;;  %v6769_v25 = vpop.f32.mrb[146].mxu0  ;;  %v6660_v5 = vpop.f32.mrb[116].mxu1  ;;  %v4654_v62 = vsel %vm528_vm0, %v4347_v32, %v4379_v17  ;;  %v4606_v54 = vsel %vm4604_vm7, %v4573_v15, %v4347_v32  ;;  %4360 = vrot.lane.b32.xlu0 %v10513_v61, %s12585_s20  ;;  %v4110_v12 = vsel %vm10599_vm8, %v3973_v53, 0.0 }
 0x6ae   : > { %v6770_v0 = vpop.f32.mrb[147].mxu0  ;;  %v4687_v31 = vsel %vm4685_vm9, %v4654_v62, %v4411_v40  ;;  %v6661_v63 = vpop.f32.mrb[117].mxu1  ;;  %5036 = vmatprep.mubr.bf16.mxu1 %v4606_v54  ;;  %4292 = vrot.lane.b32.xlu1 %v10412_v51, %s8057_s25  ;;  %v10702_v9 = vpack.c.bf16 %v4110_v12, %v3971_v16  ;;  %v12634_v11 = vrot.slane %v10609_v29, 7  ;;  %v3782_v16 = vsel %vm3735_vm4, %v3779_v43, %v3781_v2 }
 0x6af   : > { %v3032_v15 = vadd.f32 %v6768_v14, %v2871_v21  ;;  %v6771_v7 = vadd.f32 %v6770_v0, %v6769_v25  ;;  %v6662_v3 = vadd.f32 %v6661_v63, %v6660_v5  ;;  %v6663_v32 = vpop.f32.mrb[118].mxu1  ;;  %5037 = vmatmul.mubr.bf16.vlgmr.msra.gmra.mrb[128].mxu1 %v4493_v30  ;;  %5198 = vmatmul.mubr.bf16.vlgmr.msra.gmra.mrb[160].mxu0 %v4687_v31  ;;  %v3434_v21 = vand.u32 15, %v10658_v36  ;;  %v7914_v30 = vld [vmem:[%s11968_s5 + $0x80] sm:$0xff]  }
 0x6b0   : > { %v3780_v17 = vsel %vm3735_vm4, %v12634_v11, %v3779_v43  ;;  %v6664_v40 = vpop.f32.mrb[119].mxu1  ;;  %6392 = vmatprep.mubr.msk.bf16.mxu0 %vm4442_vm10, %v10245_v28  ;;  %v3975_v29 = vsel %vm3928_vm5, %v3972_v35, %v3974_v1  ;;  %v3441_v53 = vand.u32 15, %v10664_v10  ;;  %6953 = vmatpush1.bf16.msra.mxu1 %v7914_v30  ;;  %v10724_v28 = vadd.s32 216, %v10020_v50 }
 0x6b1   : > { %v3918_v33 = vsel %vm10653_vm11, %v3780_v17, 0.0  ;;  %v3214_v44 = vsel %vm1082_vm2, %v3032_v15, %v7257_v52  ;;  %v3035_v14 = vadd.f32 %v6771_v7, %v2874_v13  ;;  %v6665_v25 = vadd.f32 %v6664_v40, %v6663_v32  ;;  %4296 = vrot.lane.b32.xlu0 %v10519_v48, %s8057_s25 }
 0x6b2   : > { %v3783_v43 = vrot.slane %v3214_v44, 7  ;;  %v3976_v35 = vrot.slane %v3214_v44, 1  ;;  %4388 = vrot.lane.b32.xlu1 %v10412_v51, %s8053_s12  ;;  %v10728_v36 = vpack.c.bf16 %v3782_v16, %v3918_v33  ;;  %v10731_v10 = vadd.s32 224, %v10020_v50 }
 0x6b3   : > { %v12635_v5 = vmov 0   ;;  %v7263_v52 = vunpack.i.h.bf16 %v10445_v59  ;;  %v7262_v13 = vunpack.i.l.bf16 %v10445_v59  ;;  %v10737_v62 = vsel %vm1082_vm2, %v3035_v14, %v7258_v19  ;;  %v6772_v12 = vpop.f32.mrb[148].mxu0  ;;  %v7915_v59 = vld [vmem:[%s11968_s5 + $0x88] sm:$0xff]  }
 0x6b4   : > { %6943 = vmatprep.subr.bf16.mxu1 %v12635_v5  ;;  %v2879_v54 = vadd.f32 %v10618_v22, %v6662_v3  ;;  %v3785_v0 = vrot.slane %v10737_v62, 7  ;;  %v3978_v31 = vrot.slane %v10737_v62, 1  ;;  %v6773_v63 = vpop.f32.mrb[149].mxu0  ;;  %v10743_v11 = vpack.c.bf16 %v10737_v62, %v3214_v44 }
 0x6b5   : > { %v3977_v17 = vsel %vm3928_vm5, %v3974_v1, %v3976_v35  ;;  %6954 = vmatpush1.bf16.msra.mxu1 %v7915_v59  ;;  %v2882_v19 = vadd.f32 %v10618_v22, %v6665_v25  ;;  %v6774_v15 = vadd.f32 %v6773_v63, %v6772_v12  ;;  %v6775_v7 = vpop.f32.mrb[150].mxu0  ;;  %v6666_v3 = vpop.f32.mrb[120].mxu1  ;;  %4331 = vrot.lane.b32.xlu0 %v10559_v60, %s12181_s21  ;;  %vm10774_vm14 = vcmp.ne.s32.totalorder %v3434_v21, 15 }
 0x6b6   : > { %v4112_v32 = vsel %vm10671_vm12, %v3977_v17, 0.0  ;;  %v3784_v1 = vsel %vm3735_vm4, %v3781_v2, %v3783_v43  ;;  %6944 = vmatprep.subr.bf16.mxu1 %v12635_v5  ;;  %v6776_v33 = vpop.f32.mrb[151].mxu0  ;;  %v6667_v40 = vpop.f32.mrb[121].mxu1  ;;  %4422 = vrot.lane.b32.xlu1 %v10448_v46, %s8060_s24  ;;  %v3786_v30 = vsel %vm3735_vm4, %v3783_v43, %v3785_v0  ;;  %v3979_v34 = vsel %vm3928_vm5, %v3976_v35, %v3978_v31  ;;  %v7916_v46 = vld [vmem:[%s11968_s5 + $0x90] sm:$0xff]  }
 0x6b7   : > { %v10760_v16 = vpack.c.bf16 %v4112_v32, %v3975_v29  ;;  %v3920_v44 = vsel %vm10682_vm13, %v3784_v1, 0.0  ;;  %v3040_v14 = vadd.f32 %v6774_v15, %v2879_v54  ;;  %v6777_v20 = vadd.f32 %v6776_v33, %v6775_v7  ;;  %v6669_v2 = vpop.f32.mrb[122].mxu1 }
 0x6b8   : > { %v6668_v25 = vadd.f32 %v6667_v40, %v6666_v3  ;;  %v10766_v62 = vpack.c.bf16 %v3786_v30, %v3920_v44  ;;  %v6670_v12 = vpop.f32.mrb[123].mxu1  ;;  %vm10780_vm15 = vcmp.ne.s32.totalorder %v3441_v53, 0  ;;  %v7268_v59 = vunpack.i.h.bf16 %v10497_v41 }
 0x6b9   : > { %6955 = vmatpush1.bf16.msra.mxu1 %v7916_v46  ;;  %v3216_v29 = vsel %vm1082_vm2, %v3040_v14, %v7262_v13  ;;  %v3043_v43 = vadd.f32 %v6777_v20, %v2882_v19  ;;  %v6671_v63 = vadd.f32 %v6670_v12, %v6669_v2  ;;  %4205 = vrot.lane.b32.xlu0 %v10559_v60, %s8058_s26  ;;  %v3448_v13 = vand.u32 15, %v10724_v28  ;;  %v7917_v28 = vld [vmem:[%s11968_s5 + $0x98] sm:$0xff]  }
 0x6ba   : > { %v3787_v35 = vrot.slane %v3216_v29, 7  ;;  %v3980_v54 = vrot.slane %v3216_v29, 1  ;;  %4358 = vrot.lane.b32.xlu1 %v10459_v49, %s12585_s20  ;;  %6945 = vmatprep.subr.bf16.mxu1 %v12635_v5  ;;  %v7267_v21 = vunpack.i.l.bf16 %v10497_v41  ;;  %v3455_v7 = vand.u32 15, %v10731_v10 }
 0x6bb   : > { %v3217_v19 = vsel %vm1082_vm2, %v3043_v43, %v7263_v52  ;;  %v6778_v15 = vpop.f32.mrb[152].mxu0  ;;  %v2887_v40 = vadd.f32 %v10618_v22, %v6668_v25  ;;  %v2890_v2 = vadd.f32 %v10618_v22, %v6671_v63  ;;  %vm3698_vm3 = vcmp.ne.s32.totalorder %v3448_v13, 15 }
 0x6bc   : > { %v3789_v3 = vrot.slane %v3217_v19, 7  ;;  %v3982_v32 = vrot.slane %v3217_v19, 1  ;;  %v6779_v1 = vpop.f32.mrb[153].mxu0  ;;  %v10790_v53 = vpack.c.bf16 %v3217_v19, %v3216_v29  ;;  %v3981_v33 = vsel %vm3928_vm5, %v3978_v31, %v3980_v54  ;;  %v7918_v29 = vld [vmem:[%s11968_s5 + $0xa0] sm:$0xff]  }
 0x6bd   : > { %6956 = vmatpush1.bf16.msra.mxu1 %v7917_v28  ;;  %v6780_v41 = vadd.f32 %v6779_v1, %v6778_v15  ;;  %v6781_v30 = vpop.f32.mrb[154].mxu0  ;;  %4250 = vrot.lane.b32.xlu0 %v10580_v42, %s8054_s23  ;;  %v4114_v10 = vsel %vm10774_vm14, %v3981_v33, 0.0  ;;  %v3788_v52 = vsel %vm3735_vm4, %v3785_v0, %v3787_v35  ;;  %vm10823_vm8 = vcmp.ne.s32.totalorder %v3455_v7, 0  ;;  %v7919_v1 = vld [vmem:[%s11968_s5 + $0xa8] sm:$0xff]  }
 0x6be   : > { %6946 = vmatprep.subr.bf16.mxu1 %v12635_v5  ;;  %v6782_v31 = vpop.f32.mrb[155].mxu0  ;;  %4294 = vrot.lane.b32.xlu1 %v10465_v18, %s8057_s25  ;;  %v10805_v44 = vpack.c.bf16 %v4114_v10, %v3979_v34  ;;  %v3790_v14 = vsel %vm3735_vm4, %v3787_v35, %v3789_v3  ;;  %v3922_v20 = vsel %vm10780_vm15, %v3788_v52, 0.0  ;;  %v3983_v25 = vsel %vm3928_vm5, %v3980_v54, %v3982_v32 }
 0x6bf   : > { %v3048_v12 = vadd.f32 %v6780_v41, %v2887_v40  ;;  %v6783_v46 = vadd.f32 %v6782_v31, %v6781_v30  ;;  %v10812_v0 = vpack.c.bf16 %v3790_v14, %v3922_v20  ;;  %v7920_v40 = vld [vmem:[%s11968_s5 + $0xb0] sm:$0xff]   ;;  %v4283_v41 = vpop.permute.xlu1 %4282  ;;  %v7922_v30 = vld [vmem:[%s11968_s5 + $0xc0] sm:$0xff]   ;;  %v7923_v31 = vld [vmem:[%s11968_s5 + $0xc8] sm:$0xff]  }
 0x6c1   : > { %6957 = vmatpush1.bf16.msra.mxu1 %v7918_v29  ;;  %v3218_v34 = vsel %vm1082_vm2, %v3048_v12, %v7267_v21  ;;  %v3051_v43 = vadd.f32 %v6783_v46, %v2890_v2  ;;  %4394 = vrot.lane.b32.xlu0 %v10582_v26, %s8053_s12  ;;  %v4448_v29 = vsel %vm4442_vm10, %v10102_v58, %v10578_v6 }
 0x6c2   : > { %6947 = vmatprep.subr.bf16.mxu1 %v12635_v5  ;;  %v3791_v23 = vrot.slane %v3218_v34, 7  ;;  %v3984_v35 = vrot.slane %v3218_v34, 1  ;;  %4329 = vrot.lane.b32.xlu1 %v10502_v57, %s12181_s21 }
 0x6c3   : > { %v10828_v54 = vsel %vm1082_vm2, %v3051_v43, %v7268_v59 }
 0x6c4   : > { %v3793_v17 = vrot.slane %v10828_v54, 7  ;;  %v3986_v21 = vrot.slane %v10828_v54, 1  ;;  %v3985_v19 = vsel %vm3928_vm5, %v3982_v32, %v3984_v35  ;;  %v3792_v15 = vsel %vm3735_vm4, %v3789_v3, %v3791_v23 }
 0x6c5   : > { %6958 = vmatpush1.bf16.msra.mxu1 %v7919_v1  ;;  %4428 = vrot.lane.b32.xlu0 %v10624_v8, %s8060_s24  ;;  %v4116_v13 = vsel %vm3698_vm3, %v3985_v19, 0.0  ;;  %v3924_v59 = vsel %vm10823_vm8, %v3792_v15, 0.0  ;;  %v10842_v7 = vpack.c.bf16 %v10828_v54, %v3218_v34 }
 0x6c6   : > { %6948 = vmatprep.subr.bf16.mxu1 %v12635_v5  ;;  %4203 = vrot.lane.b32.xlu1 %v10502_v57, %s8058_s26  ;;  %v10847_v3 = vpack.c.bf16 %v4116_v13, %v3983_v25  ;;  %v3794_v32 = vsel %vm3735_vm4, %v3791_v23, %v3793_v17  ;;  %v10855_v33 = vsel %vm3928_vm5, %v3984_v35, %v3986_v21  ;;  %v7921_v57 = vld [vmem:[%s11968_s5 + $0xb8] sm:$0xff]   ;;  %v7924_v25 = vld [vmem:[%s11968_s5 + $0xd0] sm:$0xff]  }
 0x6c7   : > { %v10857_v28 = vpack.c.bf16 %v3794_v32, %v3924_v59  ;;  %v4496_v23 = vsel %vm4491_vm6, %v4448_v29, %v10645_v45  ;;  %v4451_v13 = vsel %vm4442_vm10, %v10160_v27, %v10611_v56 }
 0x6c9   : > { %6959 = vmatpush1.bf16.msra.mxu1 %v7920_v40  ;;  %4364 = vrot.lane.b32.xlu0 %v10647_v39, %s12585_s20 }
 0x6ca   : > { %6949 = vmatprep.subr.bf16.mxu1 %v12635_v5  ;;  %4248 = vrot.lane.b32.xlu1 %v10513_v61, %s8054_s23 }
 0x6cd   : > { %6960 = vmatpush1.bf16.msra.mxu1 %v7921_v57  ;;  %4300 = vrot.lane.b32.xlu0 %v10651_v37, %s8057_s25 }
 0x6ce   : > { %6950 = vmatprep.subr.bf16.mxu1 %v12635_v5  ;;  %4392 = vrot.lane.b32.xlu1 %v10519_v48, %s8053_s12 }
 0x6d1   : > { %6961 = vmatpush1.bf16.msra.mxu1 %v7922_v30  ;;  %4335 = vrot.lane.b32.xlu0 %v10689_v47, %s12181_s21 }
 0x6d2   : > { %6951 = vmatprep.subr.bf16.mxu1 %v12635_v5  ;;  %4426 = vrot.lane.b32.xlu1 %v10559_v60, %s8060_s24  ;;  %v4543_v60 = vsel %vm1082_vm2, %v10645_v45, %v4283_v41 }
 0x6d3   : > { %v10883_v10 = vpop.permute.xlu0 %4191  ;;  %v4318_v52 = vpop.permute.xlu1 %4317  ;;  %v4575_v46 = vsel %vm616_vm1, %v4543_v60, %v10621_v55 }
 0x6d5   : > { %6962 = vmatpush1.bf16.msra.mxu1 %v7923_v31  ;;  %4209 = vrot.lane.b32.xlu0 %v10689_v47, %s8058_s26 }
 0x6d6   : > { %6952 = vmatprep.subr.bf16.mxu1 %v12635_v5  ;;  %4362 = vrot.lane.b32.xlu1 %v10580_v42, %s12585_s20 }
 0x6d7   : > { %v4237_v14 = vpop.permute.xlu0 %4236  ;;  %v4413_v20 = vpop.permute.xlu1 %4412 }
 0x6d8   : > { %v4499_v40 = vsel %vm4491_vm6, %v4451_v13, %v4237_v14 }
 0x6d9   : > { %6963 = vmatpush1.bf16.msra.mxu1 %v7924_v25  ;;  %4254 = vrot.lane.b32.xlu0 %v10702_v9, %s8054_s23 }
 0x6da   : > { %4298 = vrot.lane.b32.xlu1 %v10582_v26, %s8057_s25 }
 0x6db   : > { %v4381_v2 = vpop.permute.xlu0 %4380  ;;  %v4349_v12 = vpop.permute.xlu1 %4348 }
 0x6dc   : > { %v4656_v34 = vsel %vm528_vm0, %v4349_v12, %v4381_v2  ;;  %v4609_v43 = vsel %vm4604_vm7, %v4575_v46, %v4349_v12 }
 0x6dd   : > { %4398 = vrot.lane.b32.xlu0 %v10728_v36, %s8053_s12  ;;  %5044 = vmatprep.mubr.bf16.mxu1 %v4609_v43  ;;  %v4690_v35 = vsel %vm4685_vm9, %v4656_v34, %v4413_v20  ;;  %v12642_v34 = vld [vmem:[#allocation103_spill] sm:$0xff] }
 0x6de   : > { %4333 = vrot.lane.b32.xlu1 %v10624_v8, %s12181_s21  ;;  %5045 = vmatmul.mubr.bf16.gmra.mrb[132].mxu1 %v4496_v23  ;;  %v4454_v43 = vsel %vm4442_vm10, %v12642_v34, %v10883_v10 }
 0x6df   : > { %5206 = vmatmul.mubr.bf16.gmra.mrb[164].mxu0 %v4690_v35  ;;  %v10916_v55 = vpop.permute.xlu0 %4193  ;;  %v4285_v58 = vpop.permute.xlu1 %4284 }
 0x6e0   : > { %6393 = vmatprep.mubr.msk.bf16.mxu0 %vm4442_vm10, %v10311_v24  ;;  %v4545_v15 = vsel %vm1082_vm2, %v4237_v14, %v4285_v58 }
 0x6e1   : > { %4432 = vrot.lane.b32.xlu0 %v10743_v11, %s8060_s24  ;;  %v4577_v1 = vsel %vm616_vm1, %v4545_v15, %v4318_v52 }
 0x6e2   : > { %4207 = vrot.lane.b32.xlu1 %v10624_v8, %s8058_s26 }
 0x6e3   : > { %v4239_v45 = vpop.permute.xlu0 %4238  ;;  %v4320_v6 = vpop.permute.xlu1 %4319 }
 0x6e4   : > { %v4502_v58 = vsel %vm4491_vm6, %v4454_v43, %v4239_v45 }
 0x6e5   : > { %4368 = vrot.lane.b32.xlu0 %v10760_v16, %s12585_s20 }
 0x6e6   : > { %4252 = vrot.lane.b32.xlu1 %v10647_v39, %s8054_s23 }
 0x6e7   : > { %v4383_v63 = vpop.permute.xlu0 %4382  ;;  %v4415_v19 = vpop.permute.xlu1 %4414 }
 0x6e9   : > { %4304 = vrot.lane.b32.xlu0 %v10766_v62, %s8057_s25 }
 0x6ea   : > { %4396 = vrot.lane.b32.xlu1 %v10651_v37, %s8053_s12 }
 0x6eb   : > { %v10933_v24 = vpop.permute.xlu0 %4195 }
 0x6ec   : > { %v4351_v8 = vpop.permute.xlu1 %4350 }
 0x6ed   : > { %v4658_v59 = vsel %vm528_vm0, %v4351_v8, %v4383_v63  ;;  %4339 = vrot.lane.b32.xlu0 %v10790_v53, %s12181_s21  ;;  %v4612_v32 = vsel %vm4604_vm7, %v4577_v1, %v4351_v8  ;;  %v3253_v1 = vadd.s32 240, %v10020_v50 }
 0x6ee   : > { %4430 = vrot.lane.b32.xlu1 %v10689_v47, %s8060_s24  ;;  %5052 = vmatprep.mubr.bf16.mxu1 %v4612_v32  ;;  %v4693_v57 = vsel %vm4685_vm9, %v4658_v59, %v4415_v19 }
 0x6ef   : > { %5053 = vmatmul.mubr.bf16.gmra.mrb[136].mxu1 %v4499_v40  ;;  %5214 = vmatmul.mubr.bf16.gmra.mrb[168].mxu0 %v4693_v57  ;;  %v10947_v41 = vpop.permute.xlu0 %4240  ;;  %v12643_v57 = vld [vmem:[#allocation104_spill] sm:$0xff] }
 0x6f0   : > { %6394 = vmatprep.mubr.msk.bf16.mxu0 %vm4442_vm10, %v10360_v4  ;;  %v4287_v27 = vpop.permute.xlu1 %4286 }
 0x6f1   : > { %4213 = vrot.lane.b32.xlu0 %v10790_v53, %s8058_s26  ;;  %v4547_v60 = vsel %vm1082_vm2, %v4239_v45, %v4287_v27  ;;  %v3254_v45 = vadd.s32 248, %v10020_v50  ;;  %v7272_v27 = vunpack.i.l.bf16 %v12643_v57 }
 0x6f2   : > { %4366 = vrot.lane.b32.xlu1 %v10702_v9, %s12585_s20  ;;  %v4579_v29 = vsel %vm616_vm1, %v4547_v60, %v4320_v6 }
 0x6f3   : > { %v4385_v56 = vpop.permute.xlu0 %4384 }
 0x6f4   : > { %v10955_v47 = vpop.permute.xlu1 %4321 }
 0x6f5   : > { %4258 = vrot.lane.b32.xlu0 %v10805_v44, %s8054_s23 }
 0x6f6   : > { %v6672_v30 = vpop.f32.mrb[124].mxu1  ;;  %4302 = vrot.lane.b32.xlu1 %v10728_v36, %s8057_s25 }
 0x6f7   : > { %v6673_v52 = vpop.f32.mrb[125].mxu1  ;;  %v10961_v31 = vpop.permute.xlu0 %4197 }
 0x6f8   : > { %v6674_v4 = vadd.f32 %v6673_v52, %v6672_v30  ;;  %v6675_v14 = vpop.f32.mrb[126].mxu1  ;;  %v4417_v20 = vpop.permute.xlu1 %4416  ;;  %v3476_v52 = vand.u32 15, %v3254_v45 }
 0x6f9   : > { %v6676_v25 = vpop.f32.mrb[127].mxu1  ;;  %4402 = vrot.lane.b32.xlu0 %v10812_v0, %s8053_s12 }
 0x6fa   : > { %v6677_v2 = vadd.f32 %v6676_v25, %v6675_v14  ;;  %4337 = vrot.lane.b32.xlu1 %v10743_v11, %s12181_s21  ;;  %v3469_v25 = vand.u32 15, %v3253_v1  ;;  %vm11017_vm12 = vcmp.ne.s32.totalorder %v3476_v52, 15 }
 0x6fb   : > { %v10968_v12 = vpop.permute.xlu0 %4242 }
 0x6fc   : > { %v4353_v46 = vpop.permute.xlu1 %4352  ;;  %v2898_v14 = vadd.f32 %v10618_v22, %v6677_v2  ;;  %vm11026_vm13 = vcmp.ne.s32.totalorder %v3469_v25, 0 }
 0x6fd   : > { %v4660_v23 = vsel %vm528_vm0, %v4353_v46, %v4385_v56  ;;  %4372 = vrot.lane.b32.xlu0 %v10847_v3, %s12585_s20  ;;  %v4615_v35 = vsel %vm4604_vm7, %v4579_v29, %v4353_v46  ;;  %v7273_v46 = vunpack.i.h.bf16 %v12643_v57 }
 0x6fe   : > { %4211 = vrot.lane.b32.xlu1 %v10743_v11, %s8058_s26  ;;  %5060 = vmatprep.mubr.bf16.mxu1 %v4615_v35  ;;  %v4696_v63 = vsel %vm4685_vm9, %v4660_v23, %v4417_v20  ;;  %v3252_v11 = vadd.s32 232, %v10020_v50 }
 0x6ff   : > { %5061 = vmatmul.mubr.bf16.gmra.mrb[140].mxu1 %v4502_v58  ;;  %5222 = vmatmul.mubr.bf16.gmra.mrb[172].mxu0 %v4696_v63  ;;  %v4387_v6 = vpop.permute.xlu0 %4386 }
 0x700   : > { %6395 = vmatprep.mubr.msk.bf16.mxu0 %vm4442_vm10, %v10406_v38  ;;  %v4289_v10 = vpop.permute.xlu1 %4288  ;;  %v2895_v38 = vadd.f32 %v10618_v22, %v6674_v4  ;;  %v3462_v40 = vand.u32 15, %v3252_v11  ;;  %v12646_v22 = vld [vmem:[#allocation53_spill] sm:$0xff] }
 0x701   : > { %4308 = vrot.lane.b32.xlu0 %v10857_v28, %s8057_s25  ;;  %v4549_v4 = vsel %vm1082_vm2, %v10947_v41, %v4289_v10  ;;  %v4457_v2 = vsel %vm4442_vm10, %v12646_v22, %v10916_v55 }
 0x702   : > { %4256 = vrot.lane.b32.xlu1 %v10760_v16, %s8054_s23  ;;  %vm11008_vm11 = vcmp.ne.s32.totalorder %v3462_v40, 15  ;;  %v4505_v45 = vsel %vm4491_vm6, %v4457_v2, %v10947_v41 }
 0x703   : > { %v10989_v19 = vpop.permute.xlu0 %4420 }
 0x704   : > { %v6784_v15 = vpop.f32.mrb[156].mxu0  ;;  %v10992_v8 = vpop.permute.xlu1 %4323 }
 0x705   : > { %v6785_v13 = vpop.f32.mrb[157].mxu0 }
 0x706   : > { %v6786_v59 = vadd.f32 %v6785_v13, %v6784_v15  ;;  %v6787_v32 = vpop.f32.mrb[158].mxu0  ;;  %4400 = vrot.lane.b32.xlu1 %v10766_v62, %s8053_s12 }
 0x707   : > { %v6788_v56 = vpop.f32.mrb[159].mxu0  ;;  %v10999_v30 = vpop.permute.xlu0 %4244 }
 0x708   : > { %v3056_v20 = vadd.f32 %v6786_v59, %v2895_v38  ;;  %v6789_v60 = vadd.f32 %v6788_v56, %v6787_v32  ;;  %v4419_v50 = vpop.permute.xlu1 %4418 }
 0x70a   : > { %v3220_v29 = vsel %vm1082_vm2, %v3056_v20, %v7272_v27  ;;  %v3059_v34 = vadd.f32 %v6789_v60, %v2898_v14  ;;  %4434 = vrot.lane.b32.xlu1 %v10790_v53, %s8060_s24  ;;  %v4581_v53 = vsel %vm616_vm1, %v4549_v4, %v10955_v47 }
 0x70b   : > { %v3795_v23 = vrot.slane %v3220_v29, 7  ;;  %v3988_v35 = vrot.slane %v3220_v29, 1  ;;  %v11015_v58 = vpop.permute.xlu0 %4327 }
 0x70c   : > { %v3221_v10 = vsel %vm1082_vm2, %v3059_v34, %v7273_v46  ;;  %v4355_v11 = vpop.permute.xlu1 %4354  ;;  %v12651_v34 = vld [vmem:[#allocation50_spill] sm:$0xff] }
 0x70d   : > { %v3797_v55 = vrot.slane %v3221_v10, 7  ;;  %v3990_v1 = vrot.slane %v3221_v10, 1  ;;  %v4662_v13 = vsel %vm528_vm0, %v4355_v11, %v4387_v6  ;;  %v11031_v38 = vpack.c.bf16 %v3221_v10, %v3220_v29 }
 0x70e   : > { %4370 = vrot.lane.b32.xlu1 %v10805_v44, %s12585_s20  ;;  %v4618_v59 = vsel %vm4604_vm7, %v4581_v53, %v4355_v11  ;;  %v4699_v47 = vsel %vm4685_vm9, %v4662_v13, %v4419_v50  ;;  %v3989_v41 = vsel %vm3928_vm5, %v3986_v21, %v3988_v35  ;;  %v3796_v32 = vsel %vm3735_vm4, %v3793_v17, %v3795_v23 }
 0x70f   : > { %4343 = vrot.lane.b32.xlu0 %v11031_v38, %s12181_s21  ;;  %5068 = vmatprep.mubr.bf16.mxu1 %v4618_v59  ;;  %v11045_v6 = vpop.permute.xlu0 %4201  ;;  %v4118_v40 = vsel %vm11008_vm11, %v3989_v41, 0.0  ;;  %v3991_v57 = vsel %vm3928_vm5, %v3988_v35, %v3990_v1  ;;  %v4024_v27 = vsel %vm3928_vm5, %v3990_v1, 0.0  ;;  %v3798_v56 = vsel %vm3735_vm4, %v3795_v23, %v3797_v55  ;;  %v12652_v55 = vld [vmem:[#allocation54_spill] sm:$0xff] }
 0x710   : > { %5069 = vmatmul.mubr.bf16.gmra.mrb[144].mxu1 %v4505_v45  ;;  %5230 = vmatmul.mubr.bf16.gmra.mrb[176].mxu0 %v4699_v47  ;;  %v4291_v54 = vpop.permute.xlu1 %4290  ;;  %v11053_v17 = vpack.c.bf16 %v4118_v40, %v10855_v33  ;;  %v4120_v21 = vsel %vm11017_vm12, %v4024_v27, 0.0  ;;  %v3926_v52 = vsel %vm11026_vm13, %v3796_v32, 0.0  ;;  %v4460_v43 = vsel %vm4442_vm10, %v12651_v34, %v10933_v24 }
 0x711   : > { %6396 = vmatprep.mubr.msk.bf16.mxu0 %vm4442_vm10, %v10459_v49  ;;  %v11061_v14 = vpack.c.bf16 %v4120_v21, %v3991_v57  ;;  %v4152_v20 = vpack.c.bf16 %v3798_v56, %v3926_v52  ;;  %v4551_v49 = vsel %vm1082_vm2, %v10968_v12, %v4291_v54  ;;  %v4508_v2 = vsel %vm4491_vm6, %v4460_v43, %v10968_v12 }
 0x712   : > { %4306 = vrot.lane.b32.xlu1 %v10812_v0, %s8057_s25  ;;  %v4583_v29 = vsel %vm616_vm1, %v4551_v49, %v10992_v8 }
 0x713   : > { %4262 = vrot.lane.b32.xlu0 %v11053_v17, %s8054_s23  ;;  %v4247_v33 = vpop.permute.xlu0 %4246 }
 0x714   : > { %v4326_v60 = vpop.permute.xlu1 %4325 }
 0x716   : > { %4341 = vrot.lane.b32.xlu1 %v10842_v7, %s12181_s21 }
 0x717   : > { %4376 = vrot.lane.b32.xlu0 %v11061_v14, %s12585_s20  ;;  %v4391_v50 = vpop.permute.xlu0 %4390 }
 0x718   : > { %v4200_v25 = vpop.permute.xlu1 %4199 }
 0x71a   : > { %4215 = vrot.lane.b32.xlu1 %v10842_v7, %s8058_s26  ;;  %s11292_s26 = sand.u32 1, %s8043_s28  }
 0x71b   : > { %4436 = vrot.lane.b32.xlu0 %v10842_v7, %s8060_s24  ;;  %v4425_v4 = vpop.permute.xlu0 %4424  ;;  %s6164_s17 = scalar_lea.sflag [#allocation5], %s11292_s26 }
 0x71c   : > { %v4357_v46 = vpop.permute.xlu1 %4356 }
 0x71d   : > { %v4621_v22 = vsel %vm4604_vm7, %v4583_v29, %v4357_v46  ;;  %v4469_v29 = vsel %vm4442_vm10, %v10465_v18, %v11045_v6 }
 0x71e   : > { %4260 = vrot.lane.b32.xlu1 %v10847_v3, %s8054_s23  ;;  %5076 = vmatprep.mubr.bf16.mxu1 %v4621_v22 }
 0x71f   : > { %4408 = vrot.lane.b32.xlu0 %v12635_v5, %s8053_s12  ;;  %5077 = vmatmul.mubr.bf16.gmra.mrb[148].mxu1 %v4508_v2  ;;  %v4361_v7 = vpop.permute.xlu0 %4360 }
 0x720   : > { %v4293_v23 = vpop.permute.xlu1 %4292 }
 0x721   : > { %v4553_v11 = vsel %vm1082_vm2, %v10999_v30, %v4293_v23 }
 0x722   : > { %4374 = vrot.lane.b32.xlu1 %v11053_v17, %s12585_s20  ;;  %v4585_v15 = vsel %vm616_vm1, %v4553_v11, %v4326_v60 }
 0x723   : > { %4440 = vrot.lane.b32.xlu0 %v12635_v5, %s8060_s24  ;;  %v4297_v24 = vpop.permute.xlu0 %4296 }
 0x724   : > { %v4389_v8 = vpop.permute.xlu1 %4388 }
 0x725   : > { %v4664_v35 = vsel %vm528_vm0, %v4357_v46, %v4389_v8 }
 0x726   : > { %4310 = vrot.lane.b32.xlu1 %v4152_v20, %s8057_s25  ;;  %v4702_v12 = vsel %vm4685_vm9, %v4664_v35, %v10989_v19  ;;  %v4463_v19 = vsel %vm4442_vm10, %v12652_v55, %v10961_v31  ;;  %s8061_s25 = smov [#allocation4]  }
 0x727   : > { %5238 = vmatmul.mubr.bf16.gmra.mrb[180].mxu0 %v4702_v12  ;;  %v4332_v63 = vpop.permute.xlu0 %4331  ;;  %v4511_v13 = vsel %vm4491_vm6, %v4463_v19, %v10999_v30  ;;  %v4466_v30 = vsel %vm4442_vm10, %v10412_v51, %v4200_v25 }
 0x728   : > { %6397 = vmatprep.mubr.msk.bf16.mxu0 %vm4442_vm10, %v10513_v61  ;;  %v4423_v10 = vpop.permute.xlu1 %4422  ;;  %v4514_v56 = vsel %vm4491_vm6, %v4466_v30, %v4247_v33 }
 0x72a   : > { %4404 = vrot.lane.b32.xlu1 %v10857_v28, %s8053_s12 }
 0x72b   : > { %v11103_v53 = vpop.permute.xlu0 %4205 }
 0x72c   : > { %v4359_v45 = vpop.permute.xlu1 %4358 }
 0x72d   : > { %v4666_v1 = vsel %vm528_vm0, %v4359_v45, %v4391_v50  ;;  %v4624_v61 = vsel %vm4604_vm7, %v4585_v15, %v4359_v45 }
 0x72e   : > { %4406 = vrot.lane.b32.xlu1 %v4152_v20, %s8053_s12  ;;  %5084 = vmatprep.mubr.bf16.mxu1 %v4624_v61  ;;  %v4705_v59 = vsel %vm4685_vm9, %v4666_v1, %v4423_v10 }
 0x72f   : > { %5085 = vmatmul.mubr.bf16.gmra.mrb[152].mxu1 %v4511_v13  ;;  %5246 = vmatmul.mubr.bf16.gmra.mrb[184].mxu0 %v4705_v59  ;;  %v4251_v47 = vpop.permute.xlu0 %4250  ;;  %v4475_v59 = vsel %vm4442_vm10, %v10582_v26, %v11103_v53 }
 0x730   : > { %6398 = vmatprep.mubr.msk.bf16.mxu0 %vm4442_vm10, %v10580_v42  ;;  %v4295_v41 = vpop.permute.xlu1 %4294 }
 0x731   : > { %v4555_v31 = vsel %vm1082_vm2, %v4247_v33, %v4295_v41 }
 0x732   : > { %4438 = vrot.lane.b32.xlu1 %v11031_v38, %s8060_s24  ;;  %v4587_v32 = vsel %vm616_vm1, %v4555_v31, %v11015_v58  ;;  %s6303_s24 = sshll.u32 %s11292_s26, 8 }
 0x733   : > { %v4395_v40 = vpop.permute.xlu0 %4394  ;;  %v4627_v57 = vsel %vm4604_vm7, %v4587_v32, %v4361_v7  ;;  %s11314_s20 = scalar_lea.vmem [#allocation4], %s6303_s24 }
 0x734   : > { %v4330_v27 = vpop.permute.xlu1 %4329  ;;  %5092 = vmatprep.mubr.bf16.mxu1 %v4627_v57  ;;  %s6193_s13 = sshll.u32 %s11314_s20, 4  ;;  %s11814_s13 = int_to_ptr.vmem [resolvable:$true] %s6193_s13 }
 0x735   : > { %s7957_s12 = scalar_lea.vmem %s11814_s13, 4096 }
 0x736   : > { %p7958_p11 = scmp.ne.s32.totalorder %s11814_s13, %s7957_s12 }
 0x737   : > { %5093 = vmatmul.mubr.bf16.gmra.mrb[156].mxu1 %v4514_v56  ;;  %v4429_v42 = vpop.permute.xlu0 %4428 }
 0x738   : > { %v4204_v54 = vpop.permute.xlu1 %4203  ;;  %p7959_p12 = pnand %p7958_p11, %p8148_p5 }
 0x739   : > { %v4472_v6 = vsel %vm4442_vm10, %v10519_v48, %v4204_v54 }
 0x73a   : > { %v4520_v35 = vsel %vm4491_vm6, %v4472_v6, %v4251_v47  ;;  %p7960_p13 = pneg %p7959_p12 }
 0x73b   : > { %v4365_v21 = vpop.permute.xlu0 %4364 }
 0x73c   : > { %v4249_v52 = vpop.permute.xlu1 %4248 }
 0x73d   : > { %v4557_v25 = vsel %vm1082_vm2, %v4249_v52, %v4297_v24  ;;  %v4517_v43 = vsel %vm4491_vm6, %v4469_v29, %v4249_v52 }
 0x73e   : > { %v4589_v46 = vsel %vm616_vm1, %v4557_v25, %v4330_v27 }
 0x73f   : > { %v4301_v20 = vpop.permute.xlu0 %4300 }
 0x740   : > { %v4393_v38 = vpop.permute.xlu1 %4392 }
 0x741   : > { %v4668_v60 = vsel %vm528_vm0, %v4361_v7, %v4393_v38 }
 0x742   : > { %v4708_v58 = vsel %vm4685_vm9, %v4668_v60, %v4425_v4 }
 0x743   : > { %5254 = vmatmul.mubr.bf16.gmra.mrb[188].mxu0 %v4708_v58  ;;  %v4336_v51 = vpop.permute.xlu0 %4335 }
 0x744   : > { %6399 = vmatprep.mubr.msk.bf16.mxu0 %vm4442_vm10, %v10647_v39  ;;  %v4427_v50 = vpop.permute.xlu1 %4426 }
 0x747   : > { %v11131_v33 = vpop.permute.xlu0 %4209 }
 0x748   : > { %v4363_v49 = vpop.permute.xlu1 %4362  ;;  %v4481_v25 = vsel %vm4442_vm10, %v10728_v36, %v11131_v33 }
 0x749   : > { %v4670_v34 = vsel %vm528_vm0, %v4363_v49, %v4395_v40  ;;  %v4630_v4 = vsel %vm4604_vm7, %v4589_v46, %v4363_v49 }
 0x74a   : > { %5100 = vmatprep.mubr.bf16.mxu1 %v4630_v4  ;;  %v4711_v39 = vsel %vm4685_vm9, %v4670_v34, %v4427_v50 }
 0x74b   : > { %5101 = vmatmul.mubr.bf16.gmra.mrb[160].mxu1 %v4517_v43  ;;  %5262 = vmatmul.mubr.bf16.gmra.mrb[192].mxu0 %v4711_v39  ;;  %v4255_v22 = vpop.permute.xlu0 %4254  ;;  %v11192_v39 = vld [vmem:[%s11969_s6] ss:$0 sm:$0xff] }
 0x74c   : > { %6400 = vmatprep.mubr.msk.bf16.mxu0 %vm4442_vm10, %v10702_v9  ;;  %v4299_v2 = vpop.permute.xlu1 %4298 }
 0x74d   : > { %v4559_v7 = vsel %vm1082_vm2, %v4251_v47, %v4299_v2 }
 0x74e   : > { %v4591_v18 = vsel %vm616_vm1, %v4559_v7, %v4332_v63 }
 0x74f   : > { %v4399_v23 = vpop.permute.xlu0 %4398  ;;  %v4633_v24 = vsel %vm4604_vm7, %v4591_v18, %v4365_v21 }
 0x750   : > { %v4334_v8 = vpop.permute.xlu1 %4333  ;;  %5108 = vmatprep.mubr.bf16.mxu1 %v4633_v24 }
 0x753   : > { %5109 = vmatmul.mubr.bf16.gmra.mrb[164].mxu1 %v4520_v35  ;;  %v4433_v12 = vpop.permute.xlu0 %4432 }
 0x754   : > { %v4208_v10 = vpop.permute.xlu1 %4207 }
 0x755   : > { %v4478_v53 = vsel %vm4442_vm10, %v10651_v37, %v4208_v10 }
 0x756   : > { %v4526_v56 = vsel %vm4491_vm6, %v4478_v53, %v4255_v22 }
 0x757   : > { %v4369_v11 = vpop.permute.xlu0 %4368 }
 0x758   : > { %v4253_v9 = vpop.permute.xlu1 %4252 }
 0x759   : > { %v4561_v19 = vsel %vm1082_vm2, %v4253_v9, %v4301_v20  ;;  %v4523_v31 = vsel %vm4491_vm6, %v4475_v59, %v4253_v9 }
 0x75a   : > { %v4593_v13 = vsel %vm616_vm1, %v4561_v19, %v4334_v8 }
 0x75b   : > { %v4305_v15 = vpop.permute.xlu0 %4304 }
 0x75c   : > { %v4397_v45 = vpop.permute.xlu1 %4396 }
 0x75d   : > { %v4672_v55 = vsel %vm528_vm0, %v4365_v21, %v4397_v45 }
 0x75e   : > { %v4714_v63 = vsel %vm4685_vm9, %v4672_v55, %v4429_v42 }
 0x75f   : > { %5270 = vmatmul.mubr.bf16.gmra.mrb[196].mxu0 %v4714_v63  ;;  %v11154_v1 = vpop.permute.xlu0 %4339 }
 0x760   : > { %6401 = vmatprep.mubr.msk.bf16.mxu0 %vm4442_vm10, %v10760_v16  ;;  %v4431_v48 = vpop.permute.xlu1 %4430 }
 0x763   : > { %v11166_v30 = vpop.permute.xlu0 %4213 }
 0x764   : > { %v4367_v61 = vpop.permute.xlu1 %4366 }
 0x765   : > { %v4674_v47 = vsel %vm528_vm0, %v4367_v61, %v4399_v23  ;;  %v4636_v41 = vsel %vm4604_vm7, %v4593_v13, %v4367_v61 }
 0x766   : > { %5116 = vmatprep.mubr.bf16.mxu1 %v4636_v41  ;;  %v4717_v16 = vsel %vm4685_vm9, %v4674_v47, %v4431_v48 }
 0x767   : > { %5117 = vmatmul.mubr.bf16.gmra.mrb[168].mxu1 %v4523_v31  ;;  %5278 = vmatmul.mubr.bf16.gmra.mrb[200].mxu0 %v4717_v16  ;;  %v4259_v42 = vpop.permute.xlu0 %4258  ;;  %v4487_v31 = vsel %vm4442_vm10, %v10812_v0, %v11166_v30 }
 0x768   : > { %6402 = vmatprep.mubr.msk.bf16.mxu0 %vm4442_vm10, %v10805_v44  ;;  %v4303_v32 = vpop.permute.xlu1 %4302 }
 0x769   : > { %v4563_v40 = vsel %vm1082_vm2, %v4255_v22, %v4303_v32 }
 0x76a   : > { %v4595_v26 = vsel %vm616_vm1, %v4563_v40, %v4336_v51 }
 0x76b   : > { %v4639_v57 = vsel %vm4604_vm7, %v4595_v26, %v4369_v11  ;;  %v4403_v21 = vpop.permute.xlu0 %4402 }
 0x76c   : > { %v4338_v27 = vpop.permute.xlu1 %4337  ;;  %5124 = vmatprep.mubr.bf16.mxu1 %v4639_v57 }
 0x76f   : > { %5125 = vmatmul.mubr.bf16.gmra.mrb[172].mxu1 %v4526_v56  ;;  %v11176_v60 = vpop.permute.xlu0 %4372 }
 0x770   : > { %v4212_v54 = vpop.permute.xlu1 %4211 }
 0x771   : > { %v4484_v35 = vsel %vm4442_vm10, %v10766_v62, %v4212_v54 }
 0x772   : > { %v4532_v62 = vsel %vm4491_vm6, %v4484_v35, %v4259_v42 }
 0x773   : > { %v4309_v49 = vpop.permute.xlu0 %4308 }
 0x774   : > { %v4257_v44 = vpop.permute.xlu1 %4256 }
 0x775   : > { %v4565_v58 = vsel %vm1082_vm2, %v4257_v44, %v4305_v15 }
 0x776   : > { %v4597_v50 = vsel %vm616_vm1, %v4565_v58, %v4338_v27 }
 0x778   : > { %v4401_v52 = vpop.permute.xlu1 %4400 }
 0x779   : > { %v4676_v20 = vsel %vm528_vm0, %v4369_v11, %v4401_v52 }
 0x77a   : > { %v4720_v38 = vsel %vm4685_vm9, %v4676_v20, %v4433_v12 }
 0x77b   : > { %5286 = vmatmul.mubr.bf16.gmra.mrb[204].mxu0 %v4720_v38 }
 0x77c   : > { %6403 = vmatprep.mubr.msk.bf16.mxu0 %vm4442_vm10, %v10847_v3  ;;  %v4435_v37 = vpop.permute.xlu1 %4434  ;;  %v4529_v3 = vsel %vm4491_vm6, %v4481_v25, %v4257_v44 }
 0x780   : > { %v4371_v51 = vpop.permute.xlu1 %4370 }
 0x781   : > { %v4678_v46 = vsel %vm528_vm0, %v4371_v51, %v4403_v21  ;;  %v4642_v29 = vsel %vm4604_vm7, %v4597_v50, %v4371_v51  ;;  %v4344_v12 = vpop.permute.xlu0 %4343 }
 0x782   : > { %v6806_v34 = vpop.f32.mrb[128].mxu1  ;;  %v5199_v4 = vpop.f32.mrb[160].mxu0  ;;  %5132 = vmatprep.mubr.bf16.mxu1 %v4642_v29  ;;  %v4723_v43 = vsel %vm4685_vm9, %v4678_v46, %v4435_v37 }
 0x783   : > { %v6807_v22 = vpop.f32.mrb[129].mxu1  ;;  %v5201_v2 = vpop.f32.mrb[161].mxu0  ;;  %5133 = vmatmul.mubr.bf16.gmra.mrb[176].mxu1 %v4529_v3  ;;  %5294 = vmatmul.mubr.bf16.gmra.mrb[208].mxu0 %v4723_v43 }
 0x784   : > { %v6808_v36 = vadd.f32 %v6807_v22, %v6806_v34  ;;  %v6809_v33 = vpop.f32.mrb[130].mxu1  ;;  %v5202_v7 = vpop.f32.mrb[162].mxu0  ;;  %6404 = vmatprep.mubr.msk.bf16.mxu0 %vm4442_vm10, %v11053_v17 }
 0x785   : > { %v6810_v18 = vpop.f32.mrb[131].mxu1  ;;  %v5204_v24 = vpop.f32.mrb[163].mxu0 }
 0x786   : > { %v5039_v6 = vadd.f32 %v6808_v36, %v11192_v39  ;;  %v6811_v23 = vadd.f32 %v6810_v18, %v6809_v33  ;;  %v4307_v8 = vpop.permute.xlu1 %4306  ;;  %v4263_v63 = vpop.permute.xlu0 %4262 }
 0x787   : > { %v4567_v10 = vsel %vm1082_vm2, %v4259_v42, %v4307_v8 }
 0x788   : > { %v11200_v11 = vadd.f32 %v5199_v4, %v5039_v6  ;;  %v5042_v9 = vadd.f32 %v6811_v23, %v11192_v39  ;;  %v4599_v45 = vsel %vm616_vm1, %v4567_v10, %v11154_v1 }
 0x789   : > { %v4645_v17 = vsel %vm4604_vm7, %v4599_v45, %v11176_v60 }
 0x78a   : > { %7689 = vtanh.f32 %v11200_v11  ;;  %v11208_v15 = vadd.f32 %v5202_v7, %v5042_v9  ;;  %v4342_v55 = vpop.permute.xlu1 %4341  ;;  %5140 = vmatprep.mubr.bf16.mxu1 %v4645_v17  ;;  %v4377_v61 = vpop.permute.xlu0 %4376 }
 0x78b   : > { %5141 = vmatmul.mubr.bf16.gmra.mrb[180].mxu1 %v4532_v62 }
 0x78c   : > { %7691 = vtanh.f32 %v11208_v15 }
 0x78e   : > { %v4216_v48 = vpop.permute.xlu1 %4215  ;;  %v4437_v40 = vpop.permute.xlu0 %4436 }
 0x78f   : > { %v4490_v27 = vsel %vm4442_vm10, %v10857_v28, %v4216_v48 }
 0x790   : > { %v4538_v54 = vsel %vm4491_vm6, %v4490_v27, %v4263_v63 }
 0x792   : > { %v4261_v19 = vpop.permute.xlu1 %4260  ;;  %v4409_v30 = vpop.permute.xlu0 %4408 }
 0x793   : > { %v4569_v1 = vsel %vm1082_vm2, %v4261_v19, %v4309_v49  ;;  %v4535_v32 = vsel %vm4491_vm6, %v4487_v31, %v4261_v19  ;;  %v4684_v38 = vsel %vm528_vm0, %v4377_v61, %v4409_v30 }
 0x794   : > { %v7690_v13 = vpop.eup %7689  ;;  %v4601_v47 = vsel %vm616_vm1, %v4569_v1, %v4342_v55 }
 0x795   : > { %5582 = vrot.lane.b32.xlu1 %v7690_v13, %s8054_s23 }
 0x796   : > { %v4375_v59 = vpop.permute.xlu1 %4374  ;;  %v7692_v41 = vpop.eup %7691 }
 0x797   : > { %v4648_v16 = vsel %vm4604_vm7, %v4601_v47, %v4375_v59  ;;  %5584 = vrot.lane.b32.xlu0 %v7692_v41, %s8054_s23  ;;  %v4441_v28 = vpop.permute.xlu0 %4440 }
 0x798   : > { %5148 = vmatprep.mubr.bf16.mxu1 %v4648_v16  ;;  %v4732_v37 = vsel %vm4685_vm9, %v4684_v38, %v4441_v28 }
 0x799   : > { %5149 = vmatmul.mubr.bf16.gmra.mrb[184].mxu1 %v4535_v32 }
 0x79a   : > { %v4311_v26 = vpop.permute.xlu1 %4310 }
 0x79b   : > { %v4571_v53 = vsel %vm1082_vm2, %v4263_v63, %v4311_v26 }
 0x79c   : > { %v4603_v57 = vsel %vm616_vm1, %v4571_v53, %v4344_v12 }
 0x79d   : > { %v4651_v56 = vsel %vm4604_vm7, %v4603_v57, %v4377_v61  ;;  %v6406_v57 = vmul.f32 -1.442695, %v11200_v11 }
 0x79e   : > { %v4405_v0 = vpop.permute.xlu1 %4404  ;;  %5156 = vmatprep.mubr.bf16.mxu1 %v4651_v56 }
 0x79f   : > { %v4680_v42 = vsel %vm528_vm0, %v11176_v60, %v4405_v0 }
 0x7a0   : > { %v4726_v44 = vsel %vm4685_vm9, %v4680_v42, %v4437_v40 }
 0x7a1   : > { %5157 = vmatmul.mubr.bf16.gmra.mrb[188].mxu1 %v4538_v54  ;;  %5302 = vmatmul.mubr.bf16.gmra.mrb[212].mxu0 %v4726_v44  ;;  %v6407_v54 = vmul.f32 -1.442695, %v11208_v15 }
 0x7a2   : > { %6405 = vmatprep.mubr.msk.bf16.mxu0 %vm4442_vm10, %v11061_v14  ;;  %v4407_v21 = vpop.permute.xlu1 %4406  ;;  %5317 = vmatprep.mubr.bf16.mxu1 %v12635_v5 }
 0x7a3   : > { %v4682_v52 = vsel %vm528_vm0, %v4375_v59, %v4407_v21 }
 0x7a6   : > { %v4439_v20 = vpop.permute.xlu1 %4438 }
 0x7a7   : > { %v4729_v60 = vsel %vm4685_vm9, %v4682_v52, %v4439_v20 }
 0x7a9   : > { %5310 = vmatmul.mubr.bf16.gmra.mrb[216].mxu0 %v4729_v60  ;;  %5318 = vmatmul.mubr.bf16.vlgmr.msra.gmra.mrb[192].mxu1 %v4732_v37 }
 0x7b1   : > { %v6812_v58 = vpop.f32.mrb[132].mxu1 }
 0x7b2   : > { %v5207_v51 = vpop.f32.mrb[164].mxu0  ;;  %v6813_v50 = vpop.f32.mrb[133].mxu1 }
 0x7b3   : > { %v6814_v25 = vadd.f32 %v6813_v50, %v6812_v58  ;;  %v5209_v14 = vpop.f32.mrb[165].mxu0  ;;  %v6815_v49 = vpop.f32.mrb[134].mxu1 }
 0x7b4   : > { %v5210_v46 = vpop.f32.mrb[166].mxu0  ;;  %v6816_v5 = vpop.f32.mrb[135].mxu1 }
 0x7b5   : > { %v5047_v29 = vadd.f32 %v6814_v25, %v11192_v39  ;;  %v6817_v34 = vadd.f32 %v6816_v5, %v6815_v49  ;;  %v5212_v4 = vpop.f32.mrb[167].mxu0 }
 0x7b7   : > { %v11238_v3 = vadd.f32 %v5207_v51, %v5047_v29  ;;  %v5050_v43 = vadd.f32 %v6817_v34, %v11192_v39 }
 0x7b9   : > { %7693 = vtanh.f32 %v11238_v3  ;;  %v11242_v22 = vadd.f32 %v5210_v46, %v5050_v43 }
 0x7bb   : > { %7695 = vtanh.f32 %v11242_v22 }
 0x7c2   : > { %v6818_v2 = vpop.f32.mrb[136].mxu1  ;;  %v5215_v36 = vpop.f32.mrb[168].mxu0 }
 0x7c3   : > { %v7694_v33 = vpop.eup %7693  ;;  %v6819_v7 = vpop.f32.mrb[137].mxu1 }
 0x7c4   : > { %v5217_v18 = vpop.f32.mrb[169].mxu0  ;;  %v6820_v6 = vadd.f32 %v6819_v7, %v6818_v2  ;;  %v6821_v23 = vpop.f32.mrb[138].mxu1  ;;  %5586 = vrot.lane.b32.xlu1 %v7694_v33, %s8054_s23 }
 0x7c5   : > { %v5218_v24 = vpop.f32.mrb[170].mxu0  ;;  %v6822_v8 = vpop.f32.mrb[139].mxu1 }
 0x7c6   : > { %v5220_v35 = vpop.f32.mrb[171].mxu0  ;;  %v7696_v12 = vpop.eup %7695  ;;  %v5055_v10 = vadd.f32 %v6820_v6, %v11192_v39  ;;  %v6823_v9 = vadd.f32 %v6822_v8, %v6821_v23 }
 0x7c7   : > { %5588 = vrot.lane.b32.xlu0 %v7696_v12, %s8054_s23 }
 0x7c8   : > { %v11248_v45 = vadd.f32 %v5215_v36, %v5055_v10  ;;  %v5058_v17 = vadd.f32 %v6823_v9, %v11192_v39 }
 0x7ca   : > { %v11251_v55 = vadd.f32 %v5218_v24, %v5058_v17  ;;  %7697 = vtanh.f32 %v11248_v45 }
 0x7cc   : > { %7699 = vtanh.f32 %v11251_v55 }
 0x7d2   : > { %v6824_v62 = vpop.f32.mrb[140].mxu1  ;;  %v5223_v63 = vpop.f32.mrb[172].mxu0 }
 0x7d3   : > { %v6825_v48 = vpop.f32.mrb[141].mxu1  ;;  %v5225_v19 = vpop.f32.mrb[173].mxu0 }
 0x7d4   : > { %v6826_v61 = vadd.f32 %v6825_v48, %v6824_v62  ;;  %v6827_v1 = vpop.f32.mrb[142].mxu1  ;;  %v5226_v13 = vpop.f32.mrb[174].mxu0 }
 0x7d5   : > { %v7698_v59 = vpop.eup %7697  ;;  %v6828_v47 = vpop.f32.mrb[143].mxu1 }
 0x7d6   : > { %v5228_v41 = vpop.f32.mrb[175].mxu0  ;;  %v5063_v31 = vadd.f32 %v6826_v61, %v11192_v39  ;;  %v6829_v16 = vadd.f32 %v6828_v47, %v6827_v1  ;;  %5590 = vrot.lane.b32.xlu1 %v7698_v59, %s8054_s23  ;;  %v7700_v32 = vpop.eup %7699 }
 0x7d7   : > { %5592 = vrot.lane.b32.xlu0 %v7700_v32, %s8054_s23 }
 0x7d8   : > { %v11257_v40 = vadd.f32 %v5223_v63, %v5063_v31  ;;  %v5066_v26 = vadd.f32 %v6829_v16, %v11192_v39 }
 0x7da   : > { %7701 = vtanh.f32 %v11257_v40  ;;  %v11262_v53 = vadd.f32 %v5226_v13, %v5066_v26 }
 0x7dc   : > { %7703 = vtanh.f32 %v11262_v53 }
 0x7dd   : > { %7705 = vpow2.f32 %v6406_v57 }
 0x7de   : > { %7707 = vpow2.f32 %v6407_v54 }
 0x7e3   : > { %v6830_v27 = vpop.f32.mrb[144].mxu1  ;;  %v5231_v56 = vpop.f32.mrb[176].mxu0 }
 0x7e4   : > { %v7702_v0 = vpop.eup %7701  ;;  %v6831_v30 = vpop.f32.mrb[145].mxu1 }
 0x7e5   : > { %v5233_v42 = vpop.f32.mrb[177].mxu0  ;;  %v6832_v44 = vadd.f32 %v6831_v30, %v6830_v27  ;;  %v6833_v21 = vpop.f32.mrb[146].mxu1  ;;  %5594 = vrot.lane.b32.xlu1 %v7702_v0, %s8054_s23  ;;  %v7925_v27 = vld [vmem:[%s8177_s10] sm:$0xff] }
 0x7e6   : > { %v5234_v28 = vpop.f32.mrb[178].mxu0  ;;  %v6834_v52 = vpop.f32.mrb[147].mxu1 }
 0x7e7   : > { %v5236_v20 = vpop.f32.mrb[179].mxu0  ;;  %v7704_v38 = vpop.eup %7703  ;;  %v5071_v60 = vadd.f32 %v6832_v44, %v11192_v39  ;;  %v6835_v37 = vadd.f32 %v6834_v52, %v6833_v21  ;;  %v7926_v21 = vld [vmem:[%s8177_s10 + $0x8] sm:$0xff] }
 0x7e8   : > { %5596 = vrot.lane.b32.xlu0 %v7704_v38, %s8054_s23  ;;  %v7706_v51 = vpop.eup %7705 }
 0x7e9   : > { %v11270_v11 = vadd.f32 %v5231_v56, %v5071_v60  ;;  %v5074_v58 = vadd.f32 %v6835_v37, %v11192_v39  ;;  %v7708_v25 = vpop.eup %7707  ;;  %v5422_v49 = vadd.f32 1.0, %v7706_v51 }
 0x7ea   : > { %v5423_v4 = vadd.f32 1.0, %v7708_v25 }
 0x7eb   : > { %v11273_v15 = vadd.f32 %v5234_v28, %v5074_v58  ;;  %7709 = vtanh.f32 %v11270_v11 }
 0x7ed   : > { %7711 = vtanh.f32 %v11273_v15 }
 0x7ee   : > { %7713 = vrcp.f32 %v5422_v49 }
 0x7ef   : > { %7715 = vrcp.f32 %v5423_v4 }
 0x7f2   : > { %v6836_v50 = vpop.f32.mrb[148].mxu1 }
 0x7f3   : > { %v6837_v14 = vpop.f32.mrb[149].mxu1 }
 0x7f4   : > { %v6838_v46 = vadd.f32 %v6837_v14, %v6836_v50  ;;  %v6839_v5 = vpop.f32.mrb[150].mxu1  ;;  %v6408_v50 = vmul.f32 -1.442695, %v11238_v3  ;;  %v6409_v14 = vmul.f32 -1.442695, %v11242_v22 }
 0x7f5   : > { %v6840_v29 = vpop.f32.mrb[151].mxu1  ;;  %v7710_v34 = vpop.eup %7709 }
 0x7f6   : > { %v6841_v43 = vadd.f32 %v6840_v29, %v6839_v5  ;;  %5598 = vrot.lane.b32.xlu1 %v7710_v34, %s8054_s23  ;;  %v5079_v36 = vadd.f32 %v6838_v46, %v11192_v39 }
 0x7f7   : > { %v7712_v2 = vpop.eup %7711 }
 0x7f8   : > { %5600 = vrot.lane.b32.xlu0 %v7712_v2, %s8054_s23  ;;  %v5082_v6 = vadd.f32 %v6841_v43, %v11192_v39  ;;  %v11287_v35 = vpop.eup %7713 }
 0x7f9   : > { %v11289_v62 = vpop.eup %7715  ;;  %v5710_v13 = vsub.f32 1.0, %v11287_v35 }
 0x7fa   : > { %v5239_v33 = vpop.f32.mrb[180].mxu0  ;;  %v5711_v16 = vsub.f32 1.0, %v11289_v62 }
 0x7fb   : > { %v11280_v7 = vadd.f32 %v5239_v33, %v5079_v36  ;;  %v5241_v18 = vpop.f32.mrb[181].mxu0  ;;  %v5742_v56 = vmul.f32 %v7925_v27, %v5710_v13  ;;  %v6411_v13 = vmul.f32 -1.442695, %v11251_v55 }
 0x7fc   : > { %v5242_v23 = vpop.f32.mrb[182].mxu0  ;;  %v5743_v28 = vmul.f32 %v7926_v21, %v5711_v16  ;;  %v6412_v21 = vmul.f32 -1.442695, %v11257_v40  ;;  %v6413_v40 = vmul.f32 -1.442695, %v11262_v53 }
 0x7fd   : > { %7717 = vtanh.f32 %v11280_v7  ;;  %v11284_v24 = vadd.f32 %v5242_v23, %v5082_v6  ;;  %v5244_v8 = vpop.f32.mrb[183].mxu0 }
 0x7ff   : > { %7719 = vtanh.f32 %v11284_v24 }
 0x802   : > { %v6842_v12 = vpop.f32.mrb[152].mxu1  ;;  %v5247_v10 = vpop.f32.mrb[184].mxu0 }
 0x803   : > { %v6843_v9 = vpop.f32.mrb[153].mxu1  ;;  %v5249_v17 = vpop.f32.mrb[185].mxu0 }
 0x804   : > { %v6844_v63 = vadd.f32 %v6843_v9, %v6842_v12  ;;  %v6845_v48 = vpop.f32.mrb[154].mxu1  ;;  %v5250_v19 = vpop.f32.mrb[186].mxu0  ;;  %v6410_v9 = vmul.f32 -1.442695, %v11248_v45 }
 0x805   : > { %v6846_v61 = vpop.f32.mrb[155].mxu1  ;;  %v5252_v1 = vpop.f32.mrb[187].mxu0 }
 0x806   : > { %v5087_v59 = vadd.f32 %v6844_v63, %v11192_v39  ;;  %v6847_v47 = vadd.f32 %v6846_v61, %v6845_v48 }
 0x807   : > { %v7718_v41 = vpop.eup %7717  ;;  %v5583_v31 = vpop.permute.xlu1 %5582 }
 0x808   : > { %v11298_v32 = vadd.f32 %v5247_v10, %v5087_v59  ;;  %v5090_v26 = vadd.f32 %v6847_v47, %v11192_v39  ;;  %v5678_v57 = vmul.f32 %v11287_v35, %v5583_v31  ;;  %5602 = vrot.lane.b32.xlu1 %v7718_v41, %s8054_s23 }
 0x809   : > { %v7720_v0 = vpop.eup %7719  ;;  %v5585_v42 = vpop.permute.xlu0 %5584 }
 0x80a   : > { %7721 = vtanh.f32 %v11298_v32  ;;  %v11305_v30 = vadd.f32 %v5250_v19, %v5090_v26  ;;  %v6848_v54 = vpop.f32.mrb[156].mxu1  ;;  %v11307_v44 = vadd.f32 %v5742_v56, %v5678_v57  ;;  %v5679_v52 = vmul.f32 %v11289_v62, %v5585_v42  ;;  %5604 = vrot.lane.b32.xlu0 %v7720_v0, %s8054_s23 }
 0x80b   : > { %v6849_v20 = vpop.f32.mrb[157].mxu1 }
 0x80c   : > { %v6850_v38 = vadd.f32 %v6849_v20, %v6848_v54  ;;  %v6851_v60 = vpop.f32.mrb[158].mxu1  ;;  %5806 = vst.msk [vmem:[%s11314_s20] sm:$0xff] %vm528_vm0, %v11307_v44  ;;  %v11319_v37 = vadd.f32 %v5743_v28, %v5679_v52  ;;  %7723 = vtanh.f32 %v11305_v30 }
 0x80d   : > { %v6852_v58 = vpop.f32.mrb[159].mxu1  ;;  %7725 = vpow2.f32 %v6408_v50 }
 0x80e   : > { %v6853_v51 = vadd.f32 %v6852_v58, %v6851_v60  ;;  %5807 = vst.msk [vmem:[%s11314_s20 + $0x8] sm:$0xff] %vm528_vm0, %v11319_v37  ;;  %v5095_v49 = vadd.f32 %v6850_v38, %v11192_v39  ;;  %7727 = vpow2.f32 %v6409_v14 }
 0x810   : > { %v5098_v34 = vadd.f32 %v6853_v51, %v11192_v39 }
 0x814   : > { %v7722_v25 = vpop.eup %7721 }
 0x815   : > { %5606 = vrot.lane.b32.xlu1 %v7722_v25, %s8054_s23 }
 0x816   : > { %v5255_v46 = vpop.f32.mrb[188].mxu0  ;;  %v7724_v2 = vpop.eup %7723 }
 0x817   : > { %v11329_v5 = vadd.f32 %v5255_v46, %v5095_v49  ;;  %v5257_v29 = vpop.f32.mrb[189].mxu0  ;;  %5608 = vrot.lane.b32.xlu0 %v7724_v2, %s8054_s23  ;;  %v7726_v22 = vpop.eup %7725  ;;  %v7927_v2 = vld [vmem:[%s8177_s10 + $0x10] sm:$0xff] }
 0x818   : > { %v5258_v3 = vpop.f32.mrb[190].mxu0  ;;  %v5424_v23 = vadd.f32 1.0, %v7726_v22  ;;  %v7728_v48 = vpop.eup %7727 }
 0x819   : > { %7729 = vtanh.f32 %v11329_v5  ;;  %v11333_v4 = vadd.f32 %v5258_v3, %v5098_v34  ;;  %v5260_v43 = vpop.f32.mrb[191].mxu0  ;;  %v5425_v41 = vadd.f32 1.0, %v7728_v48 }
 0x81b   : > { %7731 = vtanh.f32 %v11333_v4 }
 0x81c   : > { %7733 = vrcp.f32 %v5424_v23 }
 0x81d   : > { %7735 = vpow2.f32 %v6410_v9 }
 0x81e   : > { %v6854_v36 = vpop.f32.mrb[160].mxu1  ;;  %v5263_v33 = vpop.f32.mrb[192].mxu0 }
 0x81f   : > { %v6855_v18 = vpop.f32.mrb[161].mxu1  ;;  %v5265_v6 = vpop.f32.mrb[193].mxu0 }
 0x820   : > { %v6856_v8 = vadd.f32 %v6855_v18, %v6854_v36  ;;  %v6857_v12 = vpop.f32.mrb[162].mxu1  ;;  %v5266_v10 = vpop.f32.mrb[194].mxu0  ;;  %v7928_v6 = vld [vmem:[%s8177_s10 + $0x18] sm:$0xff] }
 0x821   : > { %v6858_v17 = vpop.f32.mrb[163].mxu1  ;;  %v5268_v63 = vpop.f32.mrb[195].mxu0 }
 0x822   : > { %v5103_v19 = vadd.f32 %v6856_v8, %v11192_v39  ;;  %v6859_v61 = vadd.f32 %v6858_v17, %v6857_v12 }
 0x823   : > { %v7730_v1 = vpop.eup %7729 }
 0x824   : > { %v11340_v59 = vadd.f32 %v5263_v33, %v5103_v19  ;;  %v5106_v47 = vadd.f32 %v6859_v61, %v11192_v39  ;;  %5610 = vrot.lane.b32.xlu1 %v7730_v1, %s8054_s23 }
 0x825   : > { %v7732_v26 = vpop.eup %7731 }
 0x826   : > { %7737 = vtanh.f32 %v11340_v59  ;;  %v11345_v45 = vadd.f32 %v5266_v10, %v5106_v47  ;;  %v6860_v31 = vpop.f32.mrb[164].mxu1  ;;  %5612 = vrot.lane.b32.xlu0 %v7732_v26, %s8054_s23  ;;  %v11349_v0 = vpop.eup %7733 }
 0x827   : > { %v6861_v16 = vpop.f32.mrb[165].mxu1  ;;  %7739 = vpow2.f32 %v6411_v13  ;;  %v7736_v42 = vpop.eup %7735  ;;  %v5712_v25 = vsub.f32 1.0, %v11349_v0 }
 0x828   : > { %v6862_v57 = vadd.f32 %v6861_v16, %v6860_v31  ;;  %v6863_v27 = vpop.f32.mrb[166].mxu1  ;;  %7741 = vrcp.f32 %v5425_v41  ;;  %v5426_v60 = vadd.f32 1.0, %v7736_v42 }
 0x829   : > { %v6864_v55 = vpop.f32.mrb[167].mxu1  ;;  %7743 = vtanh.f32 %v11345_v45  ;;  %v5744_v22 = vmul.f32 %v7927_v2, %v5712_v25 }
 0x82a   : > { %v6865_v56 = vadd.f32 %v6864_v55, %v6863_v27  ;;  %v5111_v28 = vadd.f32 %v6862_v57, %v11192_v39  ;;  %7745 = vpow2.f32 %v6412_v21  ;;  %v6414_v21 = vmul.f32 -1.442695, %v11270_v11 }
 0x82c   : > { %v5114_v50 = vadd.f32 %v6865_v56, %v11192_v39 }
 0x830   : > { %v7738_v54 = vpop.eup %7737 }
 0x831   : > { %5614 = vrot.lane.b32.xlu1 %v7738_v54, %s8054_s23  ;;  %v7740_v52 = vpop.eup %7739 }
 0x832   : > { %v5271_v20 = vpop.f32.mrb[196].mxu0  ;;  %v11354_v38 = vpop.eup %7741  ;;  %v5427_v49 = vadd.f32 1.0, %v7740_v52 }
 0x833   : > { %v11356_v58 = vadd.f32 %v5271_v20, %v5111_v28  ;;  %v5273_v51 = vpop.f32.mrb[197].mxu0  ;;  %v7744_v34 = vpop.eup %7743  ;;  %v5713_v43 = vsub.f32 1.0, %v11354_v38 }
 0x834   : > { %v5274_v14 = vpop.f32.mrb[198].mxu0  ;;  %5616 = vrot.lane.b32.xlu0 %v7744_v34, %s8054_s23  ;;  %v7746_v13 = vpop.eup %7745  ;;  %v7929_v34 = vld [vmem:[%s8177_s10 + $0x20] sm:$0xff] }
 0x835   : > { %7747 = vtanh.f32 %v11356_v58  ;;  %v11362_v46 = vadd.f32 %v5274_v14, %v5114_v50  ;;  %v5276_v29 = vpop.f32.mrb[199].mxu0  ;;  %v5745_v23 = vmul.f32 %v7928_v6, %v5713_v43  ;;  %v5428_v55 = vadd.f32 1.0, %v7746_v13 }
 0x836   : > { %v5587_v3 = vpop.permute.xlu1 %5586  ;;  %7749 = vrcp.f32 %v5426_v60 }
 0x837   : > { %v5680_v53 = vmul.f32 %v11349_v0, %v5587_v3  ;;  %7751 = vpow2.f32 %v6413_v40  ;;  %v6415_v40 = vmul.f32 -1.442695, %v11273_v15 }
 0x838   : > { %7753 = vrcp.f32 %v5427_v49 }
 0x839   : > { %v11368_v36 = vadd.f32 %v5744_v22, %v5680_v53  ;;  %v5589_v33 = vpop.permute.xlu0 %5588  ;;  %7755 = vtanh.f32 %v11362_v46  ;;  %v7930_v22 = vld [vmem:[%s8177_s10 + $0x28] sm:$0xff] }
 0x83a   : > { %v5681_v18 = vmul.f32 %v11354_v38, %v5589_v33  ;;  %v6866_v8 = vpop.f32.mrb[168].mxu1  ;;  %v5279_v12 = vpop.f32.mrb[200].mxu0 }
 0x83b   : > { %5808 = vst.msk [vmem:[%s11314_s20 + $0x10] sm:$0xff] %vm528_vm0, %v11368_v36  ;;  %v6867_v10 = vpop.f32.mrb[169].mxu1  ;;  %v5281_v9 = vpop.f32.mrb[201].mxu0 }
 0x83c   : > { %v11376_v17 = vadd.f32 %v5745_v23, %v5681_v18  ;;  %v6868_v63 = vadd.f32 %v6867_v10, %v6866_v8  ;;  %v6869_v48 = vpop.f32.mrb[170].mxu1  ;;  %v5282_v19 = vpop.f32.mrb[202].mxu0 }
 0x83d   : > { %v6870_v61 = vpop.f32.mrb[171].mxu1  ;;  %v5284_v1 = vpop.f32.mrb[203].mxu0 }
 0x83e   : > { %5809 = vst.msk [vmem:[%s11314_s20 + $0x18] sm:$0xff] %vm528_vm0, %v11376_v17  ;;  %v5119_v47 = vadd.f32 %v6868_v63, %v11192_v39  ;;  %v6871_v41 = vadd.f32 %v6870_v61, %v6869_v48 }
 0x83f   : > { %v7748_v31 = vpop.eup %7747 }
 0x840   : > { %v11382_v16 = vadd.f32 %v5279_v12, %v5119_v47  ;;  %v5122_v26 = vadd.f32 %v6871_v41, %v11192_v39  ;;  %5618 = vrot.lane.b32.xlu1 %v7748_v31, %s8054_s23  ;;  %v11386_v57 = vpop.eup %7749  ;;  %v6416_v31 = vmul.f32 -1.442695, %v11280_v7  ;;  %v7931_v7 = vld [vmem:[%s8177_s10 + $0x30] sm:$0xff] }
 0x841   : > { %v7752_v27 = vpop.eup %7751  ;;  %v5714_v25 = vsub.f32 1.0, %v11386_v57 }
 0x842   : > { %7757 = vtanh.f32 %v11382_v16  ;;  %v11389_v56 = vadd.f32 %v5282_v19, %v5122_v26  ;;  %v6872_v42 = vpop.f32.mrb[172].mxu1  ;;  %v11391_v54 = vpop.eup %7753  ;;  %v5429_v51 = vadd.f32 1.0, %v7752_v27 }
 0x843   : > { %v6873_v28 = vpop.f32.mrb[173].mxu1  ;;  %v7756_v52 = vpop.eup %7755  ;;  %7759 = vrcp.f32 %v5428_v55  ;;  %v5715_v11 = vsub.f32 1.0, %v11391_v54  ;;  %v5746_v3 = vmul.f32 %v7929_v34, %v5714_v25 }
 0x844   : > { %v6874_v20 = vadd.f32 %v6873_v28, %v6872_v42  ;;  %v6875_v60 = vpop.f32.mrb[174].mxu1  ;;  %5620 = vrot.lane.b32.xlu0 %v7756_v52, %s8054_s23  ;;  %7761 = vpow2.f32 %v6414_v21 }
 0x845   : > { %v6876_v50 = vpop.f32.mrb[175].mxu1  ;;  %7763 = vtanh.f32 %v11389_v56  ;;  %v5747_v53 = vmul.f32 %v7930_v22, %v5715_v11  ;;  %v7932_v22 = vld [vmem:[%s8177_s10 + $0x38] sm:$0xff] }
 0x846   : > { %v6877_v14 = vadd.f32 %v6876_v50, %v6875_v60  ;;  %7765 = vrcp.f32 %v5429_v51  ;;  %v5127_v6 = vadd.f32 %v6874_v20, %v11192_v39  ;;  %v6417_v50 = vmul.f32 -1.442695, %v11284_v24 }
 0x847   : > { %7767 = vpow2.f32 %v6415_v40 }
 0x848   : > { %v5591_v49 = vpop.permute.xlu1 %5590  ;;  %v5130_v10 = vadd.f32 %v6877_v14, %v11192_v39 }
 0x849   : > { %v5682_v29 = vmul.f32 %v11386_v57, %v5591_v49  ;;  %v5593_v43 = vpop.permute.xlu0 %5592 }
 0x84a   : > { %v5683_v15 = vmul.f32 %v11391_v54, %v5593_v43 }
 0x84b   : > { %v11401_v2 = vadd.f32 %v5746_v3, %v5682_v29 }
 0x84c   : > { %v7758_v33 = vpop.eup %7757  ;;  %v11408_v18 = vadd.f32 %v5747_v53, %v5683_v15 }
 0x84d   : > { %5810 = vst.msk [vmem:[%s11314_s20 + $0x20] sm:$0xff] %vm528_vm0, %v11401_v2  ;;  %5622 = vrot.lane.b32.xlu1 %v7758_v33, %s8054_s23  ;;  %v11418_v9 = vpop.eup %7759 }
 0x84e   : > { %v5287_v23 = vpop.f32.mrb[204].mxu0  ;;  %5811 = vst.msk [vmem:[%s11314_s20 + $0x28] sm:$0xff] %vm528_vm0, %v11408_v18  ;;  %v7762_v48 = vpop.eup %7761  ;;  %v5716_v26 = vsub.f32 1.0, %v11418_v9 }
 0x84f   : > { %v11415_v8 = vadd.f32 %v5287_v23, %v5127_v6  ;;  %v5289_v12 = vpop.f32.mrb[205].mxu0  ;;  %v7764_v1 = vpop.eup %7763  ;;  %v5430_v41 = vadd.f32 1.0, %v7762_v48 }
 0x850   : > { %v5290_v63 = vpop.f32.mrb[206].mxu0  ;;  %v11423_v13 = vpop.eup %7765  ;;  %5624 = vrot.lane.b32.xlu0 %v7764_v1, %s8054_s23  ;;  %v5748_v25 = vmul.f32 %v7931_v7, %v5716_v26 }
 0x851   : > { %7769 = vtanh.f32 %v11415_v8  ;;  %v11421_v19 = vadd.f32 %v5290_v63, %v5130_v10  ;;  %v5292_v61 = vpop.f32.mrb[207].mxu0  ;;  %v7768_v47 = vpop.eup %7767  ;;  %v5717_v52 = vsub.f32 1.0, %v11423_v13 }
 0x852   : > { %v5431_v42 = vadd.f32 1.0, %v7768_v47  ;;  %v6418_v47 = vmul.f32 -1.442695, %v11298_v32  ;;  %v6419_v32 = vmul.f32 -1.442695, %v11305_v30 }
 0x853   : > { %7771 = vtanh.f32 %v11421_v19  ;;  %v5749_v53 = vmul.f32 %v7932_v22, %v5717_v52 }
 0x854   : > { %7773 = vrcp.f32 %v5430_v41 }
 0x855   : > { %7775 = vpow2.f32 %v6416_v31 }
 0x856   : > { %v6878_v27 = vpop.f32.mrb[176].mxu1  ;;  %v5295_v55 = vpop.f32.mrb[208].mxu0  ;;  %7777 = vrcp.f32 %v5431_v42 }
 0x857   : > { %v6879_v21 = vpop.f32.mrb[177].mxu1  ;;  %v5297_v28 = vpop.f32.mrb[209].mxu0  ;;  %7779 = vpow2.f32 %v6417_v50 }
 0x858   : > { %v6880_v20 = vadd.f32 %v6879_v21, %v6878_v27  ;;  %v5595_v60 = vpop.permute.xlu1 %5594  ;;  %v6881_v51 = vpop.f32.mrb[178].mxu1 }
 0x859   : > { %v5684_v40 = vmul.f32 %v11418_v9, %v5595_v60  ;;  %v5298_v14 = vpop.f32.mrb[210].mxu0  ;;  %v6882_v11 = vpop.f32.mrb[179].mxu1 }
 0x85a   : > { %v5135_v49 = vadd.f32 %v6880_v20, %v11192_v39  ;;  %v6883_v29 = vadd.f32 %v6882_v11, %v6881_v51  ;;  %v5300_v34 = vpop.f32.mrb[211].mxu0  ;;  %v5597_v3 = vpop.permute.xlu0 %5596  ;;  %v7933_v51 = vld [vmem:[%s8177_s10 + $0x40] sm:$0xff]  ;;  %v7934_v11 = vld [vmem:[%s8177_s10 + $0x48] sm:$0xff] }
 0x85b   : > { %v7770_v43 = vpop.eup %7769  ;;  %v11434_v15 = vadd.f32 %v5748_v25, %v5684_v40  ;;  %v5685_v24 = vmul.f32 %v11423_v13, %v5597_v3 }
 0x85c   : > { %v11438_v33 = vadd.f32 %v5295_v55, %v5135_v49  ;;  %v5138_v6 = vadd.f32 %v6883_v29, %v11192_v39  ;;  %5626 = vrot.lane.b32.xlu1 %v7770_v43, %s8054_s23 }
 0x85d   : > { %5812 = vst.msk [vmem:[%s11314_s20 + $0x30] sm:$0xff] %vm528_vm0, %v11434_v15  ;;  %v11445_v23 = vadd.f32 %v5749_v53, %v5685_v24  ;;  %v7772_v48 = vpop.eup %7771 }
 0x85e   : > { %7781 = vtanh.f32 %v11438_v33  ;;  %v11448_v12 = vadd.f32 %v5298_v14, %v5138_v6  ;;  %v6884_v10 = vpop.f32.mrb[180].mxu1  ;;  %5628 = vrot.lane.b32.xlu0 %v7772_v48, %s8054_s23  ;;  %v11455_v31 = vpop.eup %7773 }
 0x85f   : > { %5813 = vst.msk [vmem:[%s11314_s20 + $0x38] sm:$0xff] %vm528_vm0, %v11445_v23  ;;  %v6885_v63 = vpop.f32.mrb[181].mxu1  ;;  %v7776_v27 = vpop.eup %7775  ;;  %v5718_v21 = vsub.f32 1.0, %v11455_v31 }
 0x860   : > { %v6886_v61 = vadd.f32 %v6885_v63, %v6884_v10  ;;  %v6887_v1 = vpop.f32.mrb[182].mxu1  ;;  %7783 = vtanh.f32 %v11448_v12  ;;  %v11458_v55 = vpop.eup %7777  ;;  %v5432_v42 = vadd.f32 1.0, %v7776_v27  ;;  %v6420_v63 = vmul.f32 -1.442695, %v11329_v5 }
 0x861   : > { %v6888_v41 = vpop.f32.mrb[183].mxu1  ;;  %7785 = vpow2.f32 %v6418_v47  ;;  %v7780_v28 = vpop.eup %7779  ;;  %v5719_v20 = vsub.f32 1.0, %v11458_v55  ;;  %v5750_v50 = vmul.f32 %v7933_v51, %v5718_v21  ;;  %v6421_v21 = vmul.f32 -1.442695, %v11333_v4 }
 0x862   : > { %v6889_v26 = vadd.f32 %v6888_v41, %v6887_v1  ;;  %7787 = vrcp.f32 %v5432_v42  ;;  %v5433_v25 = vadd.f32 1.0, %v7780_v28  ;;  %v5143_v1 = vadd.f32 %v6886_v61, %v11192_v39 }
 0x863   : > { %7789 = vpow2.f32 %v6419_v32  ;;  %v5751_v30 = vmul.f32 %v7934_v11, %v5719_v20 }
 0x864   : > { %7791 = vrcp.f32 %v5433_v25  ;;  %v5146_v20 = vadd.f32 %v6889_v26, %v11192_v39 }
 0x865   : > { %7793 = vpow2.f32 %v6420_v63 }
 0x868   : > { %v7782_v52 = vpop.eup %7781  ;;  %v5599_v60 = vpop.permute.xlu1 %5598 }
 0x869   : > { %5630 = vrot.lane.b32.xlu1 %v7782_v52, %s8054_s23  ;;  %v5686_v7 = vmul.f32 %v11455_v31, %v5599_v60 }
 0x86a   : > { %v5601_v40 = vpop.permute.xlu0 %5600  ;;  %v7784_v3 = vpop.eup %7783 }
 0x86b   : > { %v11466_v14 = vadd.f32 %v5750_v50, %v5686_v7  ;;  %v5687_v49 = vmul.f32 %v11458_v55, %v5601_v40  ;;  %v7786_v24 = vpop.eup %7785  ;;  %5632 = vrot.lane.b32.xlu0 %v7784_v3, %s8054_s23 }
 0x86c   : > { %v6890_v29 = vpop.f32.mrb[184].mxu1  ;;  %v5434_v48 = vadd.f32 1.0, %v7786_v24  ;;  %v11481_v47 = vpop.eup %7787 }
 0x86d   : > { %v6891_v34 = vpop.f32.mrb[185].mxu1  ;;  %5814 = vst.msk [vmem:[%s11314_s20 + $0x40] sm:$0xff] %vm528_vm0, %v11466_v14  ;;  %v11473_v43 = vadd.f32 %v5751_v30, %v5687_v49  ;;  %v7790_v42 = vpop.eup %7789  ;;  %v5720_v25 = vsub.f32 1.0, %v11481_v47 }
 0x86e   : > { %v6892_v22 = vadd.f32 %v6891_v34, %v6890_v29  ;;  %v6893_v53 = vpop.f32.mrb[186].mxu1  ;;  %7795 = vrcp.f32 %v5434_v48  ;;  %v5435_v4 = vadd.f32 1.0, %v7790_v42  ;;  %v11491_v11 = vpop.eup %7791  ;;  %v7935_v29 = vld [vmem:[%s8177_s10 + $0x50] sm:$0xff]  ;;  %v6422_v42 = vmul.f32 -1.442695, %v11340_v59  ;;  %v7936_v59 = vld [vmem:[%s8177_s10 + $0x58] sm:$0xff] }
 0x86f   : > { %v6894_v6 = vpop.f32.mrb[187].mxu1  ;;  %5815 = vst.msk [vmem:[%s11314_s20 + $0x48] sm:$0xff] %vm528_vm0, %v11473_v43  ;;  %v5752_v34 = vmul.f32 %v7935_v29, %v5720_v25  ;;  %v6423_v29 = vmul.f32 -1.442695, %v11345_v45  ;;  %v7937_v45 = vld [vmem:[%s8177_s10 + $0x60] sm:$0xff] }
 0x870   : > { %v6895_v10 = vadd.f32 %v6894_v6, %v6893_v53  ;;  %v5151_v30 = vadd.f32 %v6892_v22, %v11192_v39  ;;  %v5721_v6 = vsub.f32 1.0, %v11491_v11 }
 0x874   : > { %v6896_v41 = vpop.f32.mrb[188].mxu1  ;;  %v5303_v27 = vpop.f32.mrb[212].mxu0 }
 0x875   : > { %v11484_v28 = vadd.f32 %v5303_v27, %v5143_v1  ;;  %v6897_v32 = vpop.f32.mrb[189].mxu1  ;;  %v5305_v52 = vpop.f32.mrb[213].mxu0  ;;  %v5154_v27 = vadd.f32 %v6895_v10, %v11192_v39 }
 0x876   : > { %v6898_v60 = vadd.f32 %v6897_v32, %v6896_v41  ;;  %v6899_v5 = vpop.f32.mrb[190].mxu1  ;;  %v5306_v51 = vpop.f32.mrb[214].mxu0 }
 0x877   : > { %7797 = vtanh.f32 %v11484_v28  ;;  %v11488_v61 = vadd.f32 %v5306_v51, %v5146_v20  ;;  %v6900_v50 = vpop.f32.mrb[191].mxu1  ;;  %v5308_v7 = vpop.f32.mrb[215].mxu0 }
 0x878   : > { %v6901_v40 = vadd.f32 %v6900_v50, %v6899_v5  ;;  %7799 = vpow2.f32 %v6421_v21  ;;  %v5159_v49 = vadd.f32 %v6898_v60, %v11192_v39  ;;  %v7794_v20 = vpop.eup %7793  ;;  %v5753_v7 = vmul.f32 %v7936_v59, %v5721_v6 }
 0x879   : > { %7801 = vtanh.f32 %v11488_v61  ;;  %v11514_v50 = vpop.eup %7795 }
 0x87a   : > { %v5603_v26 = vpop.permute.xlu1 %5602  ;;  %7803 = vrcp.f32 %v5435_v4  ;;  %v5162_v32 = vadd.f32 %v6901_v40, %v11192_v39  ;;  %v5436_v40 = vadd.f32 1.0, %v7794_v20 }
 0x87b   : > { %v5688_v3 = vmul.f32 %v11481_v47, %v5603_v26 }
 0x87c   : > { %v5311_v53 = vpop.f32.mrb[216].mxu0  ;;  %v5319_v24 = vpop.f32.mrb[192].mxu1 }
 0x87d   : > { %v11499_v63 = vadd.f32 %v5311_v53, %v5151_v30  ;;  %v11501_v48 = vadd.f32 %v5319_v24, %v5159_v49  ;;  %v11503_v1 = vadd.f32 %v5752_v34, %v5688_v3  ;;  %v5313_v22 = vpop.f32.mrb[217].mxu0  ;;  %v5321_v41 = vpop.f32.mrb[193].mxu1  ;;  %v5722_v34 = vsub.f32 1.0, %v11514_v50 }
 0x87e   : > { %v5314_v21 = vpop.f32.mrb[218].mxu0  ;;  %v5322_v52 = vpop.f32.mrb[194].mxu1 }
 0x87f   : > { %7805 = vtanh.f32 %v11499_v63  ;;  %5816 = vst.msk [vmem:[%s11314_s20 + $0x50] sm:$0xff] %vm528_vm0, %v11503_v1  ;;  %v11512_v60 = vadd.f32 %v5314_v21, %v5154_v27  ;;  %v5605_v5 = vpop.permute.xlu0 %5604  ;;  %v5316_v51 = vpop.f32.mrb[219].mxu0  ;;  %v11516_v10 = vadd.f32 %v5322_v52, %v5162_v32  ;;  %v5754_v6 = vmul.f32 %v7937_v45, %v5722_v34  ;;  %v7939_v34 = vld [vmem:[%s8177_s10 + $0x70] sm:$0xff] }
 0x880   : > { %v5689_v39 = vmul.f32 %v11491_v11, %v5605_v5  ;;  %v5324_v25 = vpop.f32.mrb[195].mxu1  ;;  %7807 = vpow2.f32 %v6422_v42  ;;  %v6424_v32 = vmul.f32 -1.442695, %v11356_v58  ;;  %v7938_v5 = vld [vmem:[%s8177_s10 + $0x68] sm:$0xff] }
 0x881   : > { %v7798_v4 = vpop.eup %7797  ;;  %7809 = vtanh.f32 %v11512_v60 }
 0x882   : > { %v11520_v26 = vadd.f32 %v5753_v7, %v5689_v39  ;;  %5634 = vrot.lane.b32.xlu1 %v7798_v4, %s8054_s23  ;;  %v7800_v30 = vpop.eup %7799  ;;  %7811 = vrcp.f32 %v5436_v40  ;;  %v6425_v40 = vmul.f32 -1.442695, %v11362_v46 }
 0x883   : > { %v7802_v49 = vpop.eup %7801  ;;  %v5437_v53 = vadd.f32 1.0, %v7800_v30  ;;  %7813 = vtanh.f32 %v11501_v48 }
 0x884   : > { %5817 = vst.msk [vmem:[%s11314_s20 + $0x58] sm:$0xff] %vm528_vm0, %v11520_v26  ;;  %5636 = vrot.lane.b32.xlu0 %v7802_v49, %s8054_s23  ;;  %v11530_v3 = vpop.eup %7803  ;;  %7815 = vpow2.f32 %v6423_v29 }
 0x885   : > { %v5723_v42 = vsub.f32 1.0, %v11530_v3  ;;  %7817 = vrcp.f32 %v5437_v53 }
 0x886   : > { %7819 = vtanh.f32 %v11516_v10 }
 0x887   : > { %v5607_v24 = vpop.permute.xlu1 %5606  ;;  %v5755_v51 = vmul.f32 %v7938_v5, %v5723_v42  ;;  %7821 = vpow2.f32 %v6424_v32 }
 0x888   : > { %v5690_v22 = vmul.f32 %v11514_v50, %v5607_v24 }
 0x889   : > { %v7806_v41 = vpop.eup %7805  ;;  %v5609_v52 = vpop.permute.xlu0 %5608 }
 0x88a   : > { %v11535_v27 = vadd.f32 %v5754_v6, %v5690_v22  ;;  %5638 = vrot.lane.b32.xlu1 %v7806_v41, %s8054_s23  ;;  %v7808_v21 = vpop.eup %7807  ;;  %v5691_v59 = vmul.f32 %v11530_v3, %v5609_v52  ;;  %v6426_v6 = vmul.f32 -1.442695, %v11382_v16  ;;  %v7940_v41 = vld [vmem:[%s8177_s10 + $0x78] sm:$0xff] }
 0x88b   : > { %v7810_v20 = vpop.eup %7809  ;;  %v5438_v7 = vadd.f32 1.0, %v7808_v21 }
 0x88c   : > { %5818 = vst.msk [vmem:[%s11314_s20 + $0x60] sm:$0xff] %vm528_vm0, %v11535_v27  ;;  %5640 = vrot.lane.b32.xlu0 %v7810_v20, %s8054_s23  ;;  %v11549_v39 = vpop.eup %7811  ;;  %v11551_v25 = vadd.f32 %v5755_v51, %v5691_v59 }
 0x88d   : > { %v7814_v4 = vpop.eup %7813  ;;  %7823 = vrcp.f32 %v5438_v7 }
 0x88e   : > { %5870 = vrot.lane.b32.xlu1 %v11307_v44, %s12181_s21  ;;  %v7816_v58 = vpop.eup %7815  ;;  %5819 = vst.msk [vmem:[%s11314_s20 + $0x68] sm:$0xff] %vm528_vm0, %v11551_v25  ;;  %v5724_v44 = vsub.f32 1.0, %v11549_v39  ;;  %7825 = vpow2.f32 %v6425_v40  ;;  %v7942_v40 = vld [vmem:[%s8177_s10 + $0x88] sm:$0xff] }
 0x88f   : > { %v11561_v30 = vpop.eup %7817  ;;  %v5439_v49 = vadd.f32 1.0, %v7816_v58 }
 0x890   : > { %5872 = vrot.lane.b32.xlu0 %v11319_v37, %s12181_s21  ;;  %v7820_v29 = vpop.eup %7819  ;;  %v5756_v53 = vmul.f32 %v7939_v34, %v5724_v44  ;;  %v5725_v37 = vsub.f32 1.0, %v11561_v30 }
 0x891   : > { %7827 = vrcp.f32 %v5439_v49  ;;  %v7822_v22 = vpop.eup %7821 }
 0x892   : > { %5642 = vrot.lane.b32.xlu1 %v7814_v4, %s8054_s23  ;;  %v5757_v42 = vmul.f32 %v7940_v41, %v5725_v37  ;;  %v5440_v52 = vadd.f32 1.0, %v7822_v22  ;;  %7829 = vpow2.f32 %v6426_v6  ;;  %v6430_v6 = vmul.f32 -1.442695, %v11438_v33  ;;  %v7944_v41 = vld [vmem:[%s8177_s10 + $0x98] sm:$0xff] }
 0x893   : > { %v6431_v33 = vmul.f32 -1.442695, %v11448_v12 }
 0x894   : > { %5644 = vrot.lane.b32.xlu0 %v7820_v29, %s8054_s23  ;;  %7831 = vrcp.f32 %v5440_v52  ;;  %s11800_s23 = scalar_lea.vmem [#allocation2], %s6303_s24  ;;  %s7961_s24 = sshll.u32 %s8061_s25, 4  ;;  %s7962_s24 = int_to_ptr.vmem [resolvable:$false] %s7961_s24 }
 0x895   : > { %p7964_p0 = scmp.lt.s32.totalorder %s11814_s13, %s7962_s24 }
 0x896   : > { %5874 = vrot.lane.b32.xlu1 %v11368_v36, %s12181_s21  ;;  %v5611_v46 = vpop.permute.xlu1 %5610 }
 0x897   : > { %v5692_v24 = vmul.f32 %v11549_v39, %v5611_v46  ;;  %v11578_v32 = vpop.eup %7823 }
 0x898   : > { %5876 = vrot.lane.b32.xlu0 %v11376_v17, %s12181_s21  ;;  %v5613_v36 = vpop.permute.xlu0 %5612  ;;  %v7826_v17 = vpop.eup %7825  ;;  %v5726_v20 = vsub.f32 1.0, %v11578_v32 }
 0x899   : > { %v5788_v45 = vadd.f32 %v5756_v53, %v5692_v24  ;;  %v5693_v21 = vmul.f32 %v11561_v30, %v5613_v36  ;;  %v5441_v51 = vadd.f32 1.0, %v7826_v17 }
 0x89a   : > { %5878 = vrot.lane.b32.xlu1 %v11401_v2, %s12181_s21  ;;  %v6427_v2 = vmul.f32 -1.442695, %v11389_v56 }
 0x89b   : > { %5820 = vst.msk [vmem:[%s11314_s20 + $0x70] sm:$0xff] %vm528_vm0, %v5788_v45  ;;  %v5789_v16 = vadd.f32 %v5757_v42, %v5693_v21  ;;  %v11590_v5 = vpop.eup %7827 }
 0x89c   : > { %5880 = vrot.lane.b32.xlu0 %v11408_v18, %s12181_s21  ;;  %7833 = vpow2.f32 %v6427_v2  ;;  %v5727_v4 = vsub.f32 1.0, %v11590_v5 }
 0x89d   : > { %5821 = vst.msk [vmem:[%s11314_s20 + $0x78] sm:$0xff] %vm528_vm0, %v5789_v16  ;;  %7835 = vrcp.f32 %v5441_v51 }
 0x89e   : > { %5882 = vrot.lane.b32.xlu1 %v11434_v15, %s12181_s21  ;;  %v7941_v15 = vld [vmem:[%s8177_s10 + $0x80] sm:$0xff]  ;;  %v5759_v44 = vmul.f32 %v7942_v40, %v5727_v4 }
 0x89f   : > { %v5758_v56 = vmul.f32 %v7941_v15, %v5726_v20 }
 0x8a0   : > { %5884 = vrot.lane.b32.xlu0 %v11445_v23, %s12181_s21  ;;  %v6428_v23 = vmul.f32 -1.442695, %v11415_v8  ;;  %v6429_v8 = vmul.f32 -1.442695, %v11421_v19  ;;  %v7943_v19 = vld [vmem:[%s8177_s10 + $0x90] sm:$0xff] }
 0x8a2   : > { %5886 = vrot.lane.b32.xlu1 %v11466_v14, %s12181_s21  ;;  %v7830_v14 = vpop.eup %7829  ;;  %7837 = vpow2.f32 %v6428_v23 }
 0x8a3   : > { %v5615_v18 = vpop.permute.xlu1 %5614  ;;  %v11610_v29 = vpop.eup %7831 }
 0x8a4   : > { %v5694_v59 = vmul.f32 %v11578_v32, %v5615_v18  ;;  %5888 = vrot.lane.b32.xlu0 %v11473_v43, %s12181_s21 }
 0x8a6   : > { %v5790_v7 = vadd.f32 %v5758_v56, %v5694_v59  ;;  %5890 = vrot.lane.b32.xlu1 %v11503_v1, %s12181_s21  ;;  %v5617_v58 = vpop.permute.xlu0 %5616  ;;  %v5442_v1 = vadd.f32 1.0, %v7830_v14  ;;  %v7834_v46 = vpop.eup %7833  ;;  %v7945_v56 = vld [vmem:[%s8177_s10 + $0xa0] sm:$0xff] }
 0x8a7   : > { %v5695_v49 = vmul.f32 %v11590_v5, %v5617_v58  ;;  %v5443_v34 = vadd.f32 1.0, %v7834_v46  ;;  %v7946_v58 = vld [vmem:[%s8177_s10 + $0xa8] sm:$0xff] }
 0x8a8   : > { %5822 = vst.msk [vmem:[%s11314_s20 + $0x80] sm:$0xff] %vm528_vm0, %v5790_v7  ;;  %5892 = vrot.lane.b32.xlu0 %v11520_v26, %s12181_s21  ;;  %7839 = vrcp.f32 %v5442_v1  ;;  %v11619_v26 = vpop.eup %7835 }
 0x8a9   : > { %v5791_v43 = vadd.f32 %v5759_v44, %v5695_v49  ;;  %7841 = vpow2.f32 %v6429_v8 }
 0x8aa   : > { %5894 = vrot.lane.b32.xlu1 %v11535_v27, %s12181_s21  ;;  %v5728_v27 = vsub.f32 1.0, %v11610_v29  ;;  %7843 = vrcp.f32 %v5443_v34 }
 0x8ab   : > { %5823 = vst.msk [vmem:[%s11314_s20 + $0x88] sm:$0xff] %vm528_vm0, %v5791_v43  ;;  %7845 = vpow2.f32 %v6430_v6 }
 0x8ac   : > { %5896 = vrot.lane.b32.xlu0 %v11551_v25, %s12181_s21  ;;  %v5760_v24 = vmul.f32 %v7943_v19, %v5728_v27  ;;  %v7838_v22 = vpop.eup %7837  ;;  %v6432_v19 = vmul.f32 -1.442695, %v11484_v28 }
 0x8ae   : > { %5898 = vrot.lane.b32.xlu1 %v5788_v45, %s12181_s21  ;;  %v5729_v45 = vsub.f32 1.0, %v11619_v26 }
 0x8b0   : > { %5900 = vrot.lane.b32.xlu0 %v5789_v16, %s12181_s21  ;;  %v5761_v42 = vmul.f32 %v7944_v41, %v5729_v45  ;;  %v5444_v16 = vadd.f32 1.0, %v7838_v22  ;;  %v6433_v22 = vmul.f32 -1.442695, %v11488_v61  ;;  %v7948_v41 = vld [vmem:[%s8177_s10 + $0xb8] sm:$0xff] }
 0x8b2   : > { %5902 = vrot.lane.b32.xlu1 %v5790_v7, %s12181_s21  ;;  %v5619_v53 = vpop.permute.xlu1 %5618  ;;  %v11633_v52 = vpop.eup %7839  ;;  %7847 = vrcp.f32 %v5444_v16 }
 0x8b3   : > { %v5696_v37 = vmul.f32 %v11610_v29, %v5619_v53  ;;  %v7842_v2 = vpop.eup %7841  ;;  %v5730_v20 = vsub.f32 1.0, %v11633_v52  ;;  %7849 = vpow2.f32 %v6431_v33 }
 0x8b4   : > { %5904 = vrot.lane.b32.xlu0 %v5791_v43, %s12181_s21  ;;  %v11640_v51 = vpop.eup %7843  ;;  %v5445_v18 = vadd.f32 1.0, %v7842_v2 }
 0x8b5   : > { %v5792_v25 = vadd.f32 %v5760_v24, %v5696_v37  ;;  %v5762_v59 = vmul.f32 %v7945_v56, %v5730_v20  ;;  %v5731_v4 = vsub.f32 1.0, %v11640_v51  ;;  %v7846_v14 = vpop.eup %7845  ;;  %v7947_v24 = vld [vmem:[%s8177_s10 + $0xb0] sm:$0xff]  ;;  %v6435_v20 = vmul.f32 -1.442695, %v11512_v60  ;;  %v7950_v60 = vld [vmem:[%s8177_s10 + $0xc8] sm:$0xff] }
 0x8b6   : > { %v5621_v36 = vpop.permute.xlu0 %5620  ;;  %7851 = vrcp.f32 %v5445_v18  ;;  %v5446_v49 = vadd.f32 1.0, %v7846_v14  ;;  %v7949_v18 = vld [vmem:[%s8177_s10 + $0xc0] sm:$0xff] }
 0x8b7   : > { %5824 = vst.msk [vmem:[%s11314_s20 + $0x90] sm:$0xff] %vm528_vm0, %v5792_v25  ;;  %5906 = vrot.lane.b32.xlu1 %v5792_v25, %s12181_s21  ;;  %v5697_v21 = vmul.f32 %v11619_v26, %v5621_v36  ;;  %v5763_v40 = vmul.f32 %v7946_v58, %v5731_v4 }
 0x8b8   : > { %7853 = vrcp.f32 %v5446_v49  ;;  %v6437_v49 = vmul.f32 -1.442695, %v11516_v10 }
 0x8b9   : > { %v5793_v17 = vadd.f32 %v5761_v42, %v5697_v21 }
 0x8bb   : > { %5825 = vst.msk [vmem:[%s11314_s20 + $0x98] sm:$0xff] %vm528_vm0, %v5793_v17  ;;  %5908 = vrot.lane.b32.xlu0 %v5793_v17, %s12181_s21  ;;  %v6434_v17 = vmul.f32 -1.442695, %v11499_v63 }
 0x8bc   : > { %v11650_v1 = vpop.eup %7847 }
 0x8bd   : > { %v7850_v46 = vpop.eup %7849  ;;  %v5732_v8 = vsub.f32 1.0, %v11650_v1 }
 0x8be   : > { %v5447_v34 = vadd.f32 1.0, %v7850_v46 }
 0x8bf   : > { %v5623_v15 = vpop.permute.xlu1 %5622  ;;  %v5764_v37 = vmul.f32 %v7947_v24, %v5732_v8 }
 0x8c0   : > { %v5698_v7 = vmul.f32 %v11633_v52, %v5623_v15  ;;  %v11656_v27 = vpop.eup %7851  ;;  %7855 = vrcp.f32 %v5447_v34 }
 0x8c1   : > { %v5733_v25 = vsub.f32 1.0, %v11656_v27  ;;  %7857 = vpow2.f32 %v6432_v19 }
 0x8c2   : > { %v5794_v12 = vadd.f32 %v5762_v59, %v5698_v7  ;;  %v5625_v23 = vpop.permute.xlu0 %5624  ;;  %v11668_v21 = vpop.eup %7853  ;;  %7859 = vpow2.f32 %v6433_v22 }
 0x8c3   : > { %v5699_v44 = vmul.f32 %v11640_v51, %v5625_v23  ;;  %v5765_v28 = vmul.f32 %v7948_v41, %v5733_v25  ;;  %v5734_v61 = vsub.f32 1.0, %v11668_v21  ;;  %7861 = vpow2.f32 %v6434_v17 }
 0x8c4   : > { %5826 = vst.msk [vmem:[%s11314_s20 + $0xa0] sm:$0xff] %vm528_vm0, %v5794_v12  ;;  %5910 = vrot.lane.b32.xlu1 %v5794_v12, %s12181_s21  ;;  %v6436_v12 = vmul.f32 -1.442695, %v11501_v48  ;;  %7863 = vpow2.f32 %v6435_v20 }
 0x8c5   : > { %v5795_v43 = vadd.f32 %v5763_v40, %v5699_v44  ;;  %v5766_v15 = vmul.f32 %v7949_v18, %v5734_v61  ;;  %v7952_v61 = vld [vmem:[%s8177_s10 + $0xd8] sm:$0xff] }
 0x8c6   : > { %7865 = vpow2.f32 %v6436_v12 }
 0x8c7   : > { %5827 = vst.msk [vmem:[%s11314_s20 + $0xa8] sm:$0xff] %vm528_vm0, %v5795_v43  ;;  %5912 = vrot.lane.b32.xlu0 %v5795_v43, %s12181_s21 }
 0x8ca   : > { %v11675_v2 = vpop.eup %7855 }
 0x8cb   : > { %v7858_v59 = vpop.eup %7857  ;;  %v5735_v7 = vsub.f32 1.0, %v11675_v2 }
 0x8cc   : > { %v7860_v4 = vpop.eup %7859  ;;  %v5448_v14 = vadd.f32 1.0, %v7858_v59 }
 0x8cd   : > { %v5767_v58 = vmul.f32 %v7950_v60, %v5735_v7  ;;  %v5449_v44 = vadd.f32 1.0, %v7860_v4  ;;  %v7862_v48 = vpop.eup %7861 }
 0x8ce   : > { %v5627_v53 = vpop.permute.xlu1 %5626  ;;  %7867 = vrcp.f32 %v5448_v14  ;;  %v5450_v46 = vadd.f32 1.0, %v7862_v48  ;;  %v7864_v8 = vpop.eup %7863 }
 0x8cf   : > { %v5700_v45 = vmul.f32 %v11650_v1, %v5627_v53  ;;  %7869 = vrcp.f32 %v5449_v44  ;;  %v5451_v53 = vadd.f32 1.0, %v7864_v8  ;;  %v7954_v44 = vld [vmem:[%s8177_s10 + $0xe8] sm:$0xff] }
 0x8d0   : > { %v5629_v36 = vpop.permute.xlu0 %5628  ;;  %7871 = vpow2.f32 %v6437_v49  ;;  %v7866_v34 = vpop.eup %7865 }
 0x8d1   : > { %v5796_v6 = vadd.f32 %v5764_v37, %v5700_v45  ;;  %v5701_v42 = vmul.f32 %v11656_v27, %v5629_v36  ;;  %7873 = vrcp.f32 %v5450_v46  ;;  %v5452_v24 = vadd.f32 1.0, %v7866_v34  ;;  %v7951_v36 = vld [vmem:[%s8177_s10 + $0xd0] sm:$0xff] }
 0x8d2   : > { %7875 = vrcp.f32 %v5451_v53 }
 0x8d3   : > { %5828 = vst.msk [vmem:[%s11314_s20 + $0xb0] sm:$0xff] %vm528_vm0, %v5796_v6  ;;  %5914 = vrot.lane.b32.xlu1 %v5796_v6, %s12181_s21  ;;  %v5797_v16 = vadd.f32 %v5765_v28, %v5701_v42  ;;  %7877 = vrcp.f32 %v5452_v24  ;;  %v7955_v24 = vld [vmem:[%s8177_s10 + $0xf0] sm:$0xff] }
 0x8d5   : > { %5829 = vst.msk [vmem:[%s11314_s20 + $0xb8] sm:$0xff] %vm528_vm0, %v5797_v16  ;;  %5916 = vrot.lane.b32.xlu0 %v5797_v16, %s12181_s21 }
 0x8d8   : > { %v11691_v19 = vpop.eup %7867 }
 0x8d9   : > { %v11693_v37 = vpop.eup %7869  ;;  %v5736_v10 = vsub.f32 1.0, %v11691_v19 }
 0x8da   : > { %v7872_v45 = vpop.eup %7871  ;;  %v5737_v6 = vsub.f32 1.0, %v11693_v37 }
 0x8db   : > { %v5631_v33 = vpop.permute.xlu1 %5630  ;;  %v5453_v22 = vadd.f32 1.0, %v7872_v45  ;;  %v5768_v41 = vmul.f32 %v7951_v36, %v5736_v10  ;;  %v11699_v42 = vpop.eup %7873 }
 0x8dc   : > { %v5702_v56 = vmul.f32 %v11668_v21, %v5631_v33  ;;  %v5769_v33 = vmul.f32 %v7952_v61, %v5737_v6  ;;  %v5738_v18 = vsub.f32 1.0, %v11699_v42 }
 0x8dd   : > { %v5633_v23 = vpop.permute.xlu0 %5632  ;;  %7879 = vrcp.f32 %v5453_v22 }
 0x8de   : > { %v5798_v63 = vadd.f32 %v5766_v15, %v5702_v56  ;;  %v5703_v40 = vmul.f32 %v11675_v2, %v5633_v23  ;;  %v11707_v56 = vpop.eup %7875 }
 0x8df   : > { %v11714_v4 = vpop.eup %7877  ;;  %v5739_v14 = vsub.f32 1.0, %v11707_v56 }
 0x8e0   : > { %5830 = vst.msk [vmem:[%s11314_s20 + $0xc0] sm:$0xff] %vm528_vm0, %v5798_v63  ;;  %5918 = vrot.lane.b32.xlu1 %v5798_v63, %s12181_s21  ;;  %v5799_v43 = vadd.f32 %v5767_v58, %v5703_v40  ;;  %v7953_v63 = vld [vmem:[%s8177_s10 + $0xe0] sm:$0xff]  ;;  %v5740_v40 = vsub.f32 1.0, %v11714_v4 }
 0x8e1   : > { %v5770_v7 = vmul.f32 %v7953_v63, %v5738_v18  ;;  %v5771_v49 = vmul.f32 %v7954_v44, %v5739_v14 }
 0x8e2   : > { %5831 = vst.msk [vmem:[%s11314_s20 + $0xc8] sm:$0xff] %vm528_vm0, %v5799_v43  ;;  %5920 = vrot.lane.b32.xlu0 %v5799_v43, %s12181_s21  ;;  %v5772_v10 = vmul.f32 %v7955_v24, %v5740_v40 }
 0x8e7   : > { %v11723_v48 = vpop.eup %7879 }
 0x8f4   : > { %v5635_v25 = vpop.permute.xlu1 %5634 }
 0x8f5   : > { %v5704_v28 = vmul.f32 %v11691_v19, %v5635_v25  ;;  %v5741_v25 = vsub.f32 1.0, %v11723_v48 }
 0x8f6   : > { %v5637_v17 = vpop.permute.xlu0 %5636 }
 0x8f7   : > { %v5800_v16 = vadd.f32 %v5768_v41, %v5704_v28  ;;  %v5705_v20 = vmul.f32 %v11693_v37, %v5637_v17  ;;  %v7956_v41 = vld [vmem:[%s8177_s10 + $0xf8] sm:$0xff]  ;;  %s12180_s10 = sshll.u32 %s8131_s9, 12 }
 0x8f8   : > { %v5773_v28 = vmul.f32 %v7956_v41, %v5741_v25  ;;  %s11810_s22 = scalar_lea.hbm %s11971_s8, %s12180_s10 }
 0x8f9   : > { %5832 = vst.msk [vmem:[%s11314_s20 + $0xd0] sm:$0xff] %vm528_vm0, %v5800_v16  ;;  %5922 = vrot.lane.b32.xlu1 %v5800_v16, %s12181_s21  ;;  %v5801_v15 = vadd.f32 %v5769_v33, %v5705_v20 }
 0x8fb   : > { %5833 = vst.msk [vmem:[%s11314_s20 + $0xd8] sm:$0xff] %vm528_vm0, %v5801_v15  ;;  %5924 = vrot.lane.b32.xlu0 %v5801_v15, %s12181_s21 }
 0x8fc   : > { %v5639_v59 = vpop.permute.xlu1 %5638 }
 0x8fd   : > { %v5706_v12 = vmul.f32 %v11699_v42, %v5639_v59 }
 0x8fe   : > { %v5641_v58 = vpop.permute.xlu0 %5640 }
 0x8ff   : > { %v5802_v23 = vadd.f32 %v5770_v7, %v5706_v12  ;;  %v5707_v43 = vmul.f32 %v11707_v56, %v5641_v58 }
 0x900   : > { %v5871_v60 = vpop.permute.xlu1 %5870 }
 0x901   : > { %5834 = vst.msk [vmem:[%s11314_s20 + $0xe0] sm:$0xff] %vm528_vm0, %v5802_v23  ;;  %5926 = vrot.lane.b32.xlu1 %v5802_v23, %s12181_s21  ;;  %v5966_v46 = vmul.f32 %v11287_v35, %v5871_v60  ;;  %v5803_v8 = vadd.f32 %v5771_v49, %v5707_v43 }
 0x902   : > { %v5873_v53 = vpop.permute.xlu0 %5872 }
 0x903   : > { %5835 = vst.msk [vmem:[%s11314_s20 + $0xe8] sm:$0xff] %vm528_vm0, %v5803_v8  ;;  %5928 = vrot.lane.b32.xlu0 %v5803_v8, %s12181_s21  ;;  %v5967_v35 = vmul.f32 %v11289_v62, %v5873_v53 }
 0x904   : > { %v5643_v34 = vpop.permute.xlu1 %5642 }
 0x905   : > { %v5708_v45 = vmul.f32 %v11714_v4, %v5643_v34  ;;  %6030 = vrot.lane.b32.xlu1 %v5966_v46, %s12181_s21 }
 0x906   : > { %v5645_v36 = vpop.permute.xlu0 %5644 }
 0x907   : > { %v5804_v6 = vadd.f32 %v5772_v10, %v5708_v45  ;;  %v5709_v16 = vmul.f32 %v11723_v48, %v5645_v36  ;;  %6032 = vrot.lane.b32.xlu0 %v5967_v35, %s12181_s21 }
 0x908   : > { %v5875_v22 = vpop.permute.xlu1 %5874 }
 0x909   : > { %5836 = vst.msk [vmem:[%s11314_s20 + $0xf0] sm:$0xff] %vm528_vm0, %v5804_v6  ;;  %5930 = vrot.lane.b32.xlu1 %v5804_v6, %s12181_s21  ;;  %v5968_v17 = vmul.f32 %v11349_v0, %v5875_v22  ;;  %v5805_v61 = vadd.f32 %v5773_v28, %v5709_v16 }
 0x90a   : > { %v5877_v20 = vpop.permute.xlu0 %5876 }
 0x90b   : > { %5837 = vst.msk [vmem:[%s11314_s20 + $0xf8] sm:$0xff] %vm528_vm0, %v5805_v61  ;;  %5932 = vrot.lane.b32.xlu0 %v5805_v61, %s12181_s21  ;;  %v5969_v18 = vmul.f32 %v11354_v38, %v5877_v20  ;;  %s7963_s20 = scalar_lea.vmem %s7962_s24, 8192 }
 0x90c   : > { %v5879_v33 = vpop.permute.xlu1 %5878  ;;  %p7965_p1 = scmp.lt.s32.totalorder %s7963_s20, %s7957_s12 }
 0x90d   : > { %6034 = vrot.lane.b32.xlu1 %v5968_v17, %s12181_s21  ;;  %v5970_v62 = vmul.f32 %v11386_v57, %v5879_v33 }
 0x90e   : > { %v5881_v59 = vpop.permute.xlu0 %5880  ;;  %p7966_p2 = por %p7965_p1, %p7964_p0 }
 0x90f   : > { %6036 = vrot.lane.b32.xlu0 %v5969_v18, %s12181_s21  ;;  %v5971_v63 = vmul.f32 %v11391_v54, %v5881_v59 }
 0x910   : > { %v5883_v15 = vpop.permute.xlu1 %5882  ;;  %p7967_p3 = pnand %p7966_p2, %p7960_p13 }
 0x911   : > { %6038 = vrot.lane.b32.xlu1 %v5970_v62, %s12181_s21  ;;  %v5972_v0 = vmul.f32 %v11418_v9, %v5883_v15 }
 0x912   : > { %v5885_v12 = vpop.permute.xlu0 %5884 }
 0x913   : > { %6040 = vrot.lane.b32.xlu0 %v5971_v63, %s12181_s21  ;;  %v5973_v38 = vmul.f32 %v11423_v13, %v5885_v12 }
 0x914   : > { %v5887_v7 = vpop.permute.xlu1 %5886 }
 0x915   : > { %6042 = vrot.lane.b32.xlu1 %v5972_v0, %s12181_s21  ;;  %v5974_v57 = vmul.f32 %v11455_v31, %v5887_v7 }
 0x916   : > { %v5889_v23 = vpop.permute.xlu0 %5888 }
 0x917   : > { %6044 = vrot.lane.b32.xlu0 %v5973_v38, %s12181_s21  ;;  %v5975_v54 = vmul.f32 %v11458_v55, %v5889_v23 }
 0x918   : > { %v5891_v14 = vpop.permute.xlu1 %5890 }
 0x919   : > { %6046 = vrot.lane.b32.xlu1 %v5974_v57, %s12181_s21  ;;  %v5976_v9 = vmul.f32 %v11481_v47, %v5891_v14 }
 0x91a   : > { %v5893_v58 = vpop.permute.xlu0 %5892 }
 0x91b   : > { %6048 = vrot.lane.b32.xlu0 %v5975_v54, %s12181_s21  ;;  %v5977_v13 = vmul.f32 %v11491_v11, %v5893_v58 }
 0x91c   : > { %v5895_v60 = vpop.permute.xlu1 %5894 }
 0x91d   : > { %6050 = vrot.lane.b32.xlu1 %v5976_v9, %s12181_s21  ;;  %v5978_v31 = vmul.f32 %v11514_v50, %v5895_v60 }
 0x91e   : > { %v5897_v44 = vpop.permute.xlu0 %5896 }
 0x91f   : > { %6052 = vrot.lane.b32.xlu0 %v5977_v13, %s12181_s21  ;;  %v5979_v55 = vmul.f32 %v11530_v3, %v5897_v44 }
 0x920   : > { %v5899_v40 = vpop.permute.xlu1 %5898 }
 0x921   : > { %6054 = vrot.lane.b32.xlu1 %v5978_v31, %s12181_s21  ;;  %v5980_v47 = vmul.f32 %v11549_v39, %v5899_v40 }
 0x922   : > { %v5901_v43 = vpop.permute.xlu0 %5900 }
 0x923   : > { %6056 = vrot.lane.b32.xlu0 %v5979_v55, %s12181_s21  ;;  %v5981_v11 = vmul.f32 %v11561_v30, %v5901_v43 }
 0x924   : > { %v5903_v49 = vpop.permute.xlu1 %5902 }
 0x925   : > { %6058 = vrot.lane.b32.xlu1 %v5980_v47, %s12181_s21  ;;  %v5982_v50 = vmul.f32 %v11578_v32, %v5903_v49 }
 0x926   : > { %v5905_v46 = vpop.permute.xlu0 %5904 }
 0x927   : > { %6060 = vrot.lane.b32.xlu0 %v5981_v11, %s12181_s21  ;;  %v5983_v3 = vmul.f32 %v11590_v5, %v5905_v46 }
 0x929   : > { %6062 = vrot.lane.b32.xlu1 %v5982_v50, %s12181_s21  ;;  %v5907_v8 = vpop.permute.xlu1 %5906 }
 0x92a   : > { %v5984_v39 = vmul.f32 %v11610_v29, %v5907_v8 }
 0x92b   : > { %6064 = vrot.lane.b32.xlu0 %v5983_v3, %s12181_s21 }
 0x92d   : > { %6066 = vrot.lane.b32.xlu1 %v5984_v39, %s12181_s21  ;;  %v5909_v34 = vpop.permute.xlu0 %5908 }
 0x92e   : > { %v5985_v53 = vmul.f32 %v11619_v26, %v5909_v34 }
 0x930   : > { %6068 = vrot.lane.b32.xlu0 %v5985_v53, %s12181_s21 }
 0x936   : > { %v5911_v30 = vpop.permute.xlu1 %5910 }
 0x937   : > { %v5986_v32 = vmul.f32 %v11633_v52, %v5911_v30 }
 0x939   : > { %6070 = vrot.lane.b32.xlu1 %v5986_v32, %s12181_s21  ;;  %v5913_v24 = vpop.permute.xlu0 %5912 }
 0x93a   : > { %v5987_v10 = vmul.f32 %v11640_v51, %v5913_v24 }
 0x93c   : > { %6072 = vrot.lane.b32.xlu0 %v5987_v10, %s12181_s21 }
 0x945   : > { %v5915_v5 = vpop.permute.xlu1 %5914 }
 0x946   : > { %v5988_v29 = vmul.f32 %v11650_v1, %v5915_v5 }
 0x947   : > { %v5917_v45 = vpop.permute.xlu0 %5916 }
 0x948   : > { %6074 = vrot.lane.b32.xlu1 %v5988_v29, %s12181_s21  ;;  %v5989_v26 = vmul.f32 %v11656_v27, %v5917_v45 }
 0x94a   : > { %6076 = vrot.lane.b32.xlu0 %v5989_v26, %s12181_s21 }
 0x952   : > { %v5919_v25 = vpop.permute.xlu1 %5918 }
 0x953   : > { %v5990_v52 = vmul.f32 %v11668_v21, %v5919_v25 }
 0x954   : > { %v5921_v51 = vpop.permute.xlu0 %5920 }
 0x955   : > { %6078 = vrot.lane.b32.xlu1 %v5990_v52, %s12181_s21  ;;  %v5991_v6 = vmul.f32 %v11675_v2, %v5921_v51 }
 0x957   : > { %6080 = vrot.lane.b32.xlu0 %v5991_v6, %s12181_s21 }
 0x96b   : > { %v5923_v1 = vpop.permute.xlu1 %5922 }
 0x96c   : > { %v5992_v35 = vmul.f32 %v11691_v19, %v5923_v1 }
 0x96d   : > { %v5925_v27 = vpop.permute.xlu0 %5924 }
 0x96e   : > { %6082 = vrot.lane.b32.xlu1 %v5992_v35, %s12181_s21  ;;  %v5993_v22 = vmul.f32 %v11693_v37, %v5925_v27 }
 0x970   : > { %6084 = vrot.lane.b32.xlu0 %v5993_v22, %s12181_s21 }
 0x973   : > { %v5927_v21 = vpop.permute.xlu1 %5926 }
 0x974   : > { %v5994_v36 = vmul.f32 %v11699_v42, %v5927_v21 }
 0x975   : > { %v5929_v41 = vpop.permute.xlu0 %5928 }
 0x976   : > { %6086 = vrot.lane.b32.xlu1 %v5994_v36, %s12181_s21  ;;  %v5995_v19 = vmul.f32 %v11707_v56, %v5929_v41 }
 0x977   : > { %v6031_v2 = vpop.permute.xlu1 %6030 }
 0x978   : > { %6126 = vst.msk [vmem:[%s11800_s23] sm:$0xff] %vm528_vm0, %v6031_v2  ;;  %6088 = vrot.lane.b32.xlu0 %v5995_v19, %s12181_s21 }
 0x979   : > { %v6033_v42 = vpop.permute.xlu0 %6032 }
 0x97b   : > { %v5931_v37 = vpop.permute.xlu1 %5930 }
 0x97c   : > { %v5996_v28 = vmul.f32 %v11714_v4, %v5931_v37 }
 0x97d   : > { %7970 = shalt.err (!%p7967_p3)
}
 0x97e   : > { %s7971_s18 = scalar_lea.hbm %s11810_s22, 4096  ;;  %s7975_s25 = scalar_lea.hbm %s11971_s8, 8192 }
 0x97f   : > { %p7972_p4 = scmp.ne.s32.totalorder %s11810_s22, %s7971_s18  ;;  %p7976_p9 = scmp.lt.u32.totalorder %s11810_s22, %s11971_s8 }
 0x980   : > { %p7977_p10 = scmp.lt.u32.totalorder %s7975_s25, %s7971_s18  ;;  %p7979_p12 = scmp.lt.u32.totalorder %s7971_s18, %s11810_s22 }
 0x981   : > { %p7973_p7 = pnand %p7972_p4, %p8148_p5 }
 0x982   : > { %p7978_p11 = por %p7977_p10, %p7976_p9 }
 0x983   : > { %p7974_p8 = pneg %p7973_p7 }
 0x984   : > { %p7980_p13 = por %p7979_p12, %p7978_p11 }
 0x986   : > { %p7981_p0 = pnand %p7980_p13, %p7974_p8 }
 0x988   : > { %7984 = shalt.err (!%p7981_p0)
}
 0x989   : > { %s8062_s12 = smov 128   ;;  %s8063_s10 = smov 8   ;;  %6127 = vst.msk [vmem:[%s11800_s23 + $0x8] sm:$0xff] %vm528_vm0, %v6033_v42  ;;  %v6035_v56 = vpop.permute.xlu1 %6034  ;;  %v5933_v4 = vpop.permute.xlu0 %5932 }
 0x98a   : > { %6981 = dma.vmem_to_hbm [thread:$0]  (%p8148_p5), %s11814_s13, 4096, %s11810_s22, %s6164_s17, %s8062_s12, %s8062_s12, %s8063_s10   ;;  %v5997_v16 = vmul.f32 %v11723_v48, %v5933_v4 }
 0x98b   : > { %s12653_s21 = smov 64   ;;  %6128 = vst.msk [vmem:[%s11800_s23 + $0x10] sm:$0xff] %vm528_vm0, %v6035_v56  ;;  %s6177_s22 = sshll.u32 %s11800_s23, 4  ;;  %s11915_s22 = int_to_ptr.vmem [resolvable:$true] %s6177_s22 }
 0x98c   : > { %6090 = vrot.lane.b32.xlu1 %v5996_v28, %s12653_s21  ;;  %6092 = vrot.lane.b32.xlu0 %v5997_v16, %s12653_s21  ;;  %s12654_s13 = sshll.u32 %s8131_s9, 12  ;;  %s6159_s19 = scalar_lea.sflag [#allocation3], %s11292_s26 }
 0x98d   : > { %v6039_v17 = vpop.permute.xlu1 %6038  ;;  %v6037_v61 = vpop.permute.xlu0 %6036  ;;  %s11913_s18 = scalar_lea.hbm %s11970_s7, %s12654_s13  ;;  %s7985_s25 = scalar_lea.vmem %s11915_s22, 4096 }
 0x98e   : > { %6130 = vst.msk [vmem:[%s11800_s23 + $0x20] sm:$0xff] %vm528_vm0, %v6039_v17  ;;  %6129 = vst.msk [vmem:[%s11800_s23 + $0x18] sm:$0xff] %vm528_vm0, %v6037_v61  ;;  %p7986_p1 = scmp.ne.s32.totalorder %s11915_s22, %s7985_s25  ;;  %s8064_s9 = smov [#allocation2]  }
 0x98f   : > { %s7989_s24 = sshll.u32 %s8064_s9, 4  ;;  %s7990_s24 = int_to_ptr.vmem [resolvable:$false] %s7989_s24 }
 0x990   : > { %p7987_p2 = pnand %p7986_p1, %p8148_p5  ;;  %s7991_s21 = scalar_lea.vmem %s7990_s24, 8192 }
 0x991   : > { %v6043_v33 = vpop.permute.xlu1 %6042  ;;  %v6041_v20 = vpop.permute.xlu0 %6040  ;;  %p7992_p4 = scmp.lt.s32.totalorder %s11915_s22, %s7990_s24  ;;  %p7993_p7 = scmp.lt.s32.totalorder %s7991_s21, %s7985_s25 }
 0x992   : > { %6132 = vst.msk [vmem:[%s11800_s23 + $0x30] sm:$0xff] %vm528_vm0, %v6043_v33  ;;  %6131 = vst.msk [vmem:[%s11800_s23 + $0x28] sm:$0xff] %vm528_vm0, %v6041_v20  ;;  %p7988_p3 = pneg %p7987_p2 }
 0x993   : > { %p7994_p8 = por %p7993_p7, %p7992_p4 }
 0x995   : > { %v6047_v48 = vpop.permute.xlu1 %6046  ;;  %v6045_v62 = vpop.permute.xlu0 %6044  ;;  %p7995_p9 = pnand %p7994_p8, %p7988_p3 }
 0x996   : > { %6134 = vst.msk [vmem:[%s11800_s23 + $0x40] sm:$0xff] %vm528_vm0, %v6047_v48  ;;  %6133 = vst.msk [vmem:[%s11800_s23 + $0x38] sm:$0xff] %vm528_vm0, %v6045_v62 }
 0x999   : > { %v6051_v18 = vpop.permute.xlu1 %6050  ;;  %v6049_v15 = vpop.permute.xlu0 %6048 }
 0x99a   : > { %6136 = vst.msk [vmem:[%s11800_s23 + $0x50] sm:$0xff] %vm528_vm0, %v6051_v18  ;;  %6135 = vst.msk [vmem:[%s11800_s23 + $0x48] sm:$0xff] %vm528_vm0, %v6049_v15 }
 0x99d   : > { %v6055_v59 = vpop.permute.xlu1 %6054  ;;  %v6053_v0 = vpop.permute.xlu0 %6052 }
 0x99e   : > { %6138 = vst.msk [vmem:[%s11800_s23 + $0x60] sm:$0xff] %vm528_vm0, %v6055_v59  ;;  %6137 = vst.msk [vmem:[%s11800_s23 + $0x58] sm:$0xff] %vm528_vm0, %v6053_v0 }
 0x9a1   : > { %v6059_v63 = vpop.permute.xlu1 %6058  ;;  %v6057_v7 = vpop.permute.xlu0 %6056 }
 0x9a2   : > { %6140 = vst.msk [vmem:[%s11800_s23 + $0x70] sm:$0xff] %vm528_vm0, %v6059_v63  ;;  %6139 = vst.msk [vmem:[%s11800_s23 + $0x68] sm:$0xff] %vm528_vm0, %v6057_v7 }
 0x9a5   : > { %v6063_v12 = vpop.permute.xlu1 %6062  ;;  %v6061_v57 = vpop.permute.xlu0 %6060 }
 0x9a6   : > { %6142 = vst.msk [vmem:[%s11800_s23 + $0x80] sm:$0xff] %vm528_vm0, %v6063_v12  ;;  %6141 = vst.msk [vmem:[%s11800_s23 + $0x78] sm:$0xff] %vm528_vm0, %v6061_v57 }
 0x9a9   : > { %v6067_v38 = vpop.permute.xlu1 %6066  ;;  %v6065_v14 = vpop.permute.xlu0 %6064 }
 0x9aa   : > { %6144 = vst.msk [vmem:[%s11800_s23 + $0x90] sm:$0xff] %vm528_vm0, %v6067_v38  ;;  %6143 = vst.msk [vmem:[%s11800_s23 + $0x88] sm:$0xff] %vm528_vm0, %v6065_v14 }
 0x9ad   : > { %v6069_v23 = vpop.permute.xlu0 %6068  ;;  %v6071_v9 = vpop.permute.xlu1 %6070 }
 0x9ae   : > { %6145 = vst.msk [vmem:[%s11800_s23 + $0x98] sm:$0xff] %vm528_vm0, %v6069_v23  ;;  %6146 = vst.msk [vmem:[%s11800_s23 + $0xa0] sm:$0xff] %vm528_vm0, %v6071_v9 }
 0x9b1   : > { %v6073_v54 = vpop.permute.xlu0 %6072 }
 0x9b2   : > { %6147 = vst.msk [vmem:[%s11800_s23 + $0xa8] sm:$0xff] %vm528_vm0, %v6073_v54 }
 0x9ba   : > { %v6075_v60 = vpop.permute.xlu1 %6074 }
 0x9bb   : > { %6148 = vst.msk [vmem:[%s11800_s23 + $0xb0] sm:$0xff] %vm528_vm0, %v6075_v60 }
 0x9bc   : > { %v6077_v58 = vpop.permute.xlu0 %6076 }
 0x9bd   : > { %6149 = vst.msk [vmem:[%s11800_s23 + $0xb8] sm:$0xff] %vm528_vm0, %v6077_v58 }
 0x9c7   : > { %v6079_v31 = vpop.permute.xlu1 %6078 }
 0x9c8   : > { %6150 = vst.msk [vmem:[%s11800_s23 + $0xc0] sm:$0xff] %vm528_vm0, %v6079_v31 }
 0x9c9   : > { %v6081_v13 = vpop.permute.xlu0 %6080 }
 0x9ca   : > { %6151 = vst.msk [vmem:[%s11800_s23 + $0xc8] sm:$0xff] %vm528_vm0, %v6081_v13 }
 0x9e0   : > { %v6083_v40 = vpop.permute.xlu1 %6082 }
 0x9e1   : > { %6152 = vst.msk [vmem:[%s11800_s23 + $0xd0] sm:$0xff] %vm528_vm0, %v6083_v40 }
 0x9e2   : > { %v6085_v44 = vpop.permute.xlu0 %6084 }
 0x9e3   : > { %6153 = vst.msk [vmem:[%s11800_s23 + $0xd8] sm:$0xff] %vm528_vm0, %v6085_v44 }
 0x9e8   : > { %v6087_v47 = vpop.permute.xlu1 %6086 }
 0x9e9   : > { %6154 = vst.msk [vmem:[%s11800_s23 + $0xe0] sm:$0xff] %vm528_vm0, %v6087_v47 }
 0x9ea   : > { %v6089_v55 = vpop.permute.xlu0 %6088 }
 0x9eb   : > { %6155 = vst.msk [vmem:[%s11800_s23 + $0xe8] sm:$0xff] %vm528_vm0, %v6089_v55 }
 0x9fe   : > { %v6091_v49 = vpop.permute.xlu1 %6090  ;;  %v6093_v43 = vpop.permute.xlu0 %6092 }
 0x9ff   : > { %6156 = vst.msk [vmem:[%s11800_s23 + $0xf0] sm:$0xff] %vm528_vm0, %v6091_v49  ;;  %6157 = vst.msk [vmem:[%s11800_s23 + $0xf8] sm:$0xff] %vm528_vm0, %v6093_v43 }
 0xa00   : > { %7998 = shalt.err (!%p7995_p9)
}
 0xa01   : > { %s7999_s23 = scalar_lea.hbm %s11913_s18, 4096  ;;  %s8003_s20 = scalar_lea.hbm %s11970_s7, 8192 }
 0xa02   : > { %p8000_p10 = scmp.ne.s32.totalorder %s11913_s18, %s7999_s23  ;;  %p8004_p13 = scmp.lt.u32.totalorder %s11913_s18, %s11970_s7 }
 0xa03   : > { %p8005_p0 = scmp.lt.u32.totalorder %s8003_s20, %s7999_s23  ;;  %p8007_p2 = scmp.lt.u32.totalorder %s7999_s23, %s11913_s18 }
 0xa04   : > { %p8001_p11 = pnand %p8000_p10, %p8148_p5 }
 0xa05   : > { %p8006_p1 = por %p8005_p0, %p8004_p13 }
 0xa06   : > { %p8002_p12 = pneg %p8001_p11 }
 0xa07   : > { %p8008_p3 = por %p8007_p2, %p8006_p1 }
 0xa09   : > { %p8009_p4 = pnand %p8008_p3, %p8002_p12 }
 0xa0b   : > { %8012 = shalt.err (!%p8009_p4)
}
 0xa0c   : > { %6980 = dma.vmem_to_hbm [thread:$0]  (%p8148_p5), %s11915_s22, 4096, %s11913_s18, %s6159_s19, %s8062_s12, %s8062_s12, %s8063_s10  }
 0xa0d PF: > { %p6991_p7 = scmp.ge.s32.totalorder %s8051_s30, 2  ;;  %s6208_s25 = sand.u32 1, %s8039_s27  }
 0xa0e   : > { %s6209_s21 = scalar_lea.sflag [#allocation3], %s6208_s25 }
 0xa0f   : > { %p6985_p8 = pnand %p6991_p7, %p8152_p6 }
 0xa11   : > { %8030 = dma.done.wait (!%p6985_p8), %s6209_s21, 4096  }
 0xa12   : > { %8032 = vsyncadd (!%p6985_p8), %s6209_s21, 4294963200  ;;  %s6218_s15 = scalar_lea.sflag [#allocation5], %s6208_s25 }
 0xa13   : > { %8034 = dma.done.wait (!%p6985_p8), %s6218_s15, 4096  }
 0xa14   : > { %8036 = vsyncadd (!%p6985_p8), %s6218_s15, 4294963200  ;;  %p22_p5 = scmp.ge.s32.totalorder %s8135_s11, 4   ;;  %s12655_s27 = smov %s8043_s28 }
 0xa15   : > { %s12656_s28 = smov %s8047_s29  ;;  %s12657_s29 = smov %s8146_s14 }
 0xa16   : > { %s12658_s30 = smov %s8135_s11  ;;  %24 = sbr.rel (!%p22_p5) target bundleno = 5 (0x5), region = 103 }
 0xa1d   :  { %6223 = vsyncpa [#allocation3], 1 }
 0xa1e   :  { %6225 = vsyncpa [#allocation3 + $0x1], 1 }
 0xa1f   :  { %6226 = vsyncpa [#allocation5], 1 }
 0xa20   :  { %6228 = vsyncpa [#allocation5 + $0x1], 1 }

</bundles_post_ra>
